<compile_context>
chip_gen: v6e
topology: v6e:2x2x1
jax: 0.10.0
libtpu: 0.0.40
codegen_flags: <defaults>
</compile_context>

<pallas_src>
import jax
import jax.numpy as jnp
from jax.experimental import pallas as pl
from jax.experimental.pallas import tpu as pltpu

INPUT_DIM = 768
N_FINGERS = 5
K_TOTAL = INPUT_DIM * N_FINGERS          # 3840
HIDDEN = 512
OUTPUT_DIM = 256
LN_EPS = 1e-5


def _encoder_kernel(x_ref, w1_ref, vecs_ref, w2_ref, o_ref):
    # fc1: f32 activations x bf16 weights (upcast in-register), f32 accumulate.
    h = jnp.dot(x_ref[...], w1_ref[...].astype(jnp.float32),
                preferred_element_type=jnp.float32)

    vecs = vecs_ref[...]                  # (4, HIDDEN) f32
    b1 = vecs[0:1, :]
    gamma = vecs[1:2, :]
    beta = vecs[2:3, :]
    b2 = vecs[3:4, :OUTPUT_DIM]

    # bias + ReLU
    h = jnp.maximum(h + b1, 0.0)
    # LayerNorm over last dim (biased variance, like torch.nn.LayerNorm);
    # rsqrt goes to the EUP slot which has plenty of slack here.
    mean = jnp.mean(h, axis=-1, keepdims=True)
    var = jnp.mean((h - mean) * (h - mean), axis=-1, keepdims=True)
    hn = (h - mean) * jax.lax.rsqrt(var + LN_EPS)
    hn = hn * gamma + beta

    # fc2 (bf16 weights upcast, f32 accumulate), lane-dense 256-wide store.
    out = jnp.dot(hn, w2_ref[...].astype(jnp.float32),
                  preferred_element_type=jnp.float32)
    o_ref[...] = (out + b2).astype(o_ref.dtype)


def prepare_params(w1, b1, gamma, beta, w2, b2):
    """One-time parameter preprocessing (keep OUT of the per-call hot path)."""
    w1_bf = jnp.asarray(w1, jnp.bfloat16)        # halves the W1 HBM stream
    w2_bf = jnp.asarray(w2, jnp.bfloat16)
    b2_pad = jnp.pad(jnp.asarray(b2, jnp.float32), (0, HIDDEN - OUTPUT_DIM))
    vecs = jnp.stack([jnp.asarray(b1, jnp.float32),
                      jnp.asarray(gamma, jnp.float32),
                      jnp.asarray(beta, jnp.float32),
                      b2_pad], axis=0)           # (4, HIDDEN): b1/gamma/beta/b2
    return w1_bf, vecs, w2_bf


@jax.jit
def text_embedding_encoder(finger_embeddings, w1_bf, vecs, w2_bf):
    """finger_embeddings: (B, 5, 768) float32 -> (B, 256) float32."""
    B = finger_embeddings.shape[0]
    x = finger_embeddings.reshape(B, K_TOTAL).astype(jnp.float32)

    # Pad batch to a multiple of 8 (f32 sublane granularity); slice back at end.
    Bp = ((B + 7) // 8) * 8
    if Bp != B:
        x = jnp.pad(x, ((0, Bp - B), (0, 0)))

    cost = pl.CostEstimate(
        flops=2 * Bp * K_TOTAL * HIDDEN + 2 * Bp * HIDDEN * OUTPUT_DIM,
        transcendentals=Bp,
        bytes_accessed=(K_TOTAL * HIDDEN + HIDDEN * OUTPUT_DIM) * 2
                       + (Bp * K_TOTAL + 4 * HIDDEN + Bp * OUTPUT_DIM) * 4,
    )

    out = pl.pallas_call(
        _encoder_kernel,
        out_shape=jax.ShapeDtypeStruct((Bp, OUTPUT_DIM), jnp.float32),
        grid_spec=pltpu.PrefetchScalarGridSpec(
            num_scalar_prefetch=0,
            grid=(1,),                                           # single step
            in_specs=[
                pl.BlockSpec((Bp, K_TOTAL), lambda i: (0, 0)),       # x
                pl.BlockSpec((K_TOTAL, HIDDEN), lambda i: (0, 0)),   # W1 (bf16)
                pl.BlockSpec((4, HIDDEN), lambda i: (0, 0)),         # b1/g/b/b2
                pl.BlockSpec((HIDDEN, OUTPUT_DIM), lambda i: (0, 0)),  # W2 (bf16)
            ],
            out_specs=pl.BlockSpec((Bp, OUTPUT_DIM), lambda i: (0, 0)),
        ),
        compiler_params=pltpu.CompilerParams(
            dimension_semantics=("arbitrary",),
            vmem_limit_bytes=16 * 1024 * 1024),   # ~9 MB footprint, fits all gens
        cost_estimate=cost,
    )(x, w1_bf, vecs, w2_bf)
    return out[:B]


def _reference(finger_embeddings, w1, b1, gamma, beta, w2, b2):
    x = finger_embeddings.reshape(finger_embeddings.shape[0], -1)
    h = jnp.maximum(x @ w1 + b1, 0.0)
    mean = jnp.mean(h, axis=-1, keepdims=True)
    var = jnp.mean((h - mean) ** 2, axis=-1, keepdims=True)
    hn = (h - mean) / jnp.sqrt(var + LN_EPS) * gamma + beta
    return hn @ w2 + b2


def _init_params(key):
    """Deterministic, torch-Linear-like init (uniform +/- 1/sqrt(fan_in))."""
    k1, k2, k3, k4 = jax.random.split(key, 4)
    fan1 = INPUT_DIM * N_FINGERS
    lim1 = 1.0 / jnp.sqrt(fan1)
    lim2 = 1.0 / jnp.sqrt(HIDDEN)
    w1 = jax.random.uniform(k1, (fan1, HIDDEN), jnp.float32, -lim1, lim1)
    b1 = jax.random.uniform(k2, (HIDDEN,), jnp.float32, -lim1, lim1)
    w2 = jax.random.uniform(k3, (HIDDEN, OUTPUT_DIM), jnp.float32, -lim2, lim2)
    b2 = jax.random.uniform(k4, (OUTPUT_DIM,), jnp.float32, -lim2, lim2)
    gamma = jnp.ones((HIDDEN,), jnp.float32)   # LayerNorm weight init
    beta = jnp.zeros((HIDDEN,), jnp.float32)   # LayerNorm bias init
    return w1, b1, gamma, beta, w2, b2


if __name__ == "__main__":
    key = jax.random.PRNGKey(0)
    k_in, k_par = jax.random.split(key)
    B = 2
    finger_embeddings = jax.random.normal(k_in, (B, N_FINGERS, INPUT_DIM),
                                          jnp.float32)
    params = _init_params(k_par)

    # One-time parameter prep (bf16 weights + packed small vectors).
    w1_bf, vecs, w2_bf = prepare_params(*params)

    out = text_embedding_encoder(finger_embeddings, w1_bf, vecs, w2_bf)
    out = jax.block_until_ready(out)

    ref = _reference(finger_embeddings, *params)
    assert out.shape == (B, OUTPUT_DIM), out.shape
    # Only the weights are bf16 (activations and accumulation are f32), so the
    # error vs the f32 reference sits around ~1e-2 worst case.
    max_err = float(jnp.max(jnp.abs(out - ref)))
    assert jnp.allclose(out, ref, atol=2e-2, rtol=2e-2), max_err

    print("KERNEL_OK")
</pallas_src>

<mosaic_0001>
module attributes {stable_mosaic.version = 11 : i64} {
  func.func @_encoder_kernel(%arg0: i32, %arg1: memref<8x3840xf32, #tpu.memory_space<vmem>>, %arg2: memref<3840x512xbf16, #tpu.memory_space<vmem>>, %arg3: memref<4x512xf32, #tpu.memory_space<vmem>>, %arg4: memref<512x256xbf16, #tpu.memory_space<vmem>>, %arg5: memref<8x256xf32, #tpu.memory_space<vmem>>) attributes {dimension_semantics = [#tpu.dimension_semantics<arbitrary>], iteration_bounds = array<i64: 1>, scalar_prefetch = 0 : i64, scratch_operands = 0 : i64, tpu.core_type = #tpu.core_type<tc>, window_params = [{pipeline_mode = #tpu.pipeline_mode<synchronous>, transform_indices = @transform_0, window_bounds = array<i64: 8, 3840>}, {pipeline_mode = #tpu.pipeline_mode<synchronous>, transform_indices = @transform_1, window_bounds = array<i64: 3840, 512>}, {pipeline_mode = #tpu.pipeline_mode<synchronous>, transform_indices = @transform_2, window_bounds = array<i64: 4, 512>}, {pipeline_mode = #tpu.pipeline_mode<synchronous>, transform_indices = @transform_3, window_bounds = array<i64: 512, 256>}, {pipeline_mode = #tpu.pipeline_mode<synchronous>, transform_indices = @transform_4, window_bounds = array<i64: 8, 256>}]} {
    %c0 = arith.constant 0 : index
    %c0_0 = arith.constant 0 : index
    %0 = vector.load %arg1[%c0, %c0_0] : memref<8x3840xf32, #tpu.memory_space<vmem>>, vector<8x3840xf32>
    %c0_1 = arith.constant 0 : index
    %c0_2 = arith.constant 0 : index
    %1 = vector.load %arg2[%c0_1, %c0_2] : memref<3840x512xbf16, #tpu.memory_space<vmem>>, vector<3840x512xbf16>
    %2 = arith.extf %1 : vector<3840x512xbf16> to vector<3840x512xf32>
    %cst = arith.constant dense<0.000000e+00> : vector<8x512xf32>
    %3 = tpu.matmul %0, %2, %cst {dimension_numbers = #tpu.dot_dimension_numbers<[1], [0], [0], [1], [0, 0, 1, 1], [], []>} : vector<8x3840xf32>, vector<3840x512xf32>, vector<8x512xf32> -> vector<8x512xf32>
    %c0_3 = arith.constant 0 : index
    %c0_4 = arith.constant 0 : index
    %4 = vector.load %arg3[%c0_3, %c0_4] : memref<4x512xf32, #tpu.memory_space<vmem>>, vector<4x512xf32>
    %5 = vector.extract_strided_slice %4 {offsets = [0, 0], sizes = [1, 512], strides = [1, 1]} : vector<4x512xf32> to vector<1x512xf32>
    %6 = vector.extract_strided_slice %4 {offsets = [1, 0], sizes = [1, 512], strides = [1, 1]} : vector<4x512xf32> to vector<1x512xf32>
    %7 = vector.extract_strided_slice %4 {offsets = [2, 0], sizes = [1, 512], strides = [1, 1]} : vector<4x512xf32> to vector<1x512xf32>
    %8 = vector.extract_strided_slice %4 {offsets = [3, 0], sizes = [1, 256], strides = [1, 1]} : vector<4x512xf32> to vector<1x256xf32>
    %9 = vector.broadcast %5 : vector<1x512xf32> to vector<8x512xf32>
    %10 = arith.addf %3, %9 : vector<8x512xf32>
    %cst_5 = arith.constant 0.000000e+00 : f32
    %11 = vector.broadcast %cst_5 : f32 to vector<8x512xf32>
    %12 = arith.maximumf %10, %11 : vector<8x512xf32>
    %cst_6 = arith.constant dense<0.000000e+00> : vector<8xf32>
    %13 = vector.multi_reduction <add>, %12, %cst_6 [1] : vector<8x512xf32> to vector<8xf32>
    %14 = vector.shape_cast %13 : vector<8xf32> to vector<8x1xf32>
    %cst_7 = arith.constant 5.120000e+02 : f32
    %15 = vector.broadcast %cst_7 : f32 to vector<8x1xf32>
    %16 = arith.divf %14, %15 : vector<8x1xf32>
    %17 = vector.broadcast %16 : vector<8x1xf32> to vector<8x512xf32>
    %18 = arith.subf %12, %17 : vector<8x512xf32>
    %19 = vector.broadcast %16 : vector<8x1xf32> to vector<8x512xf32>
    %20 = arith.subf %12, %19 : vector<8x512xf32>
    %21 = arith.mulf %18, %20 : vector<8x512xf32>
    %cst_8 = arith.constant dense<0.000000e+00> : vector<8xf32>
    %22 = vector.multi_reduction <add>, %21, %cst_8 [1] : vector<8x512xf32> to vector<8xf32>
    %23 = vector.shape_cast %22 : vector<8xf32> to vector<8x1xf32>
    %cst_9 = arith.constant 5.120000e+02 : f32
    %24 = vector.broadcast %cst_9 : f32 to vector<8x1xf32>
    %25 = arith.divf %23, %24 : vector<8x1xf32>
    %26 = vector.broadcast %16 : vector<8x1xf32> to vector<8x512xf32>
    %27 = arith.subf %12, %26 : vector<8x512xf32>
    %cst_10 = arith.constant 9.99999974E-6 : f32
    %28 = vector.broadcast %cst_10 : f32 to vector<8x1xf32>
    %29 = arith.addf %25, %28 : vector<8x1xf32>
    %30 = math.rsqrt %29 : vector<8x1xf32>
    %31 = vector.broadcast %30 : vector<8x1xf32> to vector<8x512xf32>
    %32 = arith.mulf %27, %31 : vector<8x512xf32>
    %33 = vector.broadcast %6 : vector<1x512xf32> to vector<8x512xf32>
    %34 = arith.mulf %32, %33 : vector<8x512xf32>
    %35 = vector.broadcast %7 : vector<1x512xf32> to vector<8x512xf32>
    %36 = arith.addf %34, %35 : vector<8x512xf32>
    %c0_11 = arith.constant 0 : index
    %c0_12 = arith.constant 0 : index
    %37 = vector.load %arg4[%c0_11, %c0_12] : memref<512x256xbf16, #tpu.memory_space<vmem>>, vector<512x256xbf16>
    %38 = arith.extf %37 : vector<512x256xbf16> to vector<512x256xf32>
    %cst_13 = arith.constant dense<0.000000e+00> : vector<8x256xf32>
    %39 = tpu.matmul %36, %38, %cst_13 {dimension_numbers = #tpu.dot_dimension_numbers<[1], [0], [0], [1], [0, 0, 1, 1], [], []>} : vector<8x512xf32>, vector<512x256xf32>, vector<8x256xf32> -> vector<8x256xf32>
    %40 = vector.broadcast %8 : vector<1x256xf32> to vector<8x256xf32>
    %41 = arith.addf %39, %40 : vector<8x256xf32>
    %c0_14 = arith.constant 0 : index
    %c0_15 = arith.constant 0 : index
    %42 = vector.load %arg5[%c0_14, %c0_15] : memref<8x256xf32, #tpu.memory_space<vmem>>, vector<8x256xf32>
    tpu.vector_store %arg5[%c0_14, %c0_15], %41 {strides = array<i32>} : memref<8x256xf32, #tpu.memory_space<vmem>>, vector<8x256xf32>,
    return
  }
  func.func @transform_0(%arg0: i32) -> (i32, i32) {
    %c0_i32 = arith.constant 0 : i32
    %c0_i32_0 = arith.constant 0 : i32
    %c0_i32_1 = arith.constant 0 : i32
    return %c0_i32, %c0_i32_0 : i32, i32
  }
  func.func @transform_1(%arg0: i32) -> (i32, i32) {
    %c0_i32 = arith.constant 0 : i32
    %c0_i32_0 = arith.constant 0 : i32
    %c0_i32_1 = arith.constant 0 : i32
    return %c0_i32, %c0_i32_0 : i32, i32
  }
  func.func @transform_2(%arg0: i32) -> (i32, i32) {
    %c0_i32 = arith.constant 0 : i32
    %c0_i32_0 = arith.constant 0 : i32
    %c0_i32_1 = arith.constant 0 : i32
    return %c0_i32, %c0_i32_0 : i32, i32
  }
  func.func @transform_3(%arg0: i32) -> (i32, i32) {
    %c0_i32 = arith.constant 0 : i32
    %c0_i32_0 = arith.constant 0 : i32
    %c0_i32_1 = arith.constant 0 : i32
    return %c0_i32, %c0_i32_0 : i32, i32
  }
  func.func @transform_4(%arg0: i32) -> (i32, i32) {
    %c0_i32 = arith.constant 0 : i32
    %c0_i32_0 = arith.constant 0 : i32
    %c0_i32_1 = arith.constant 0 : i32
    return %c0_i32, %c0_i32_0 : i32, i32
  }
}

</mosaic_0001>

<bundles_post_ra>
// kernel: text_embedding_encoder.1
= control target key start
LH: loop header
LB: loop body
LE: loop exit
PB: predicated region body
PF: predicated region fallthrough
CT: control target
= control target key end

     0   :  { %9 = vsyncpa [#allocation3], 0  ;;  %s6067_s0 = inlined_call_operand.vmem [shape: f32[8,3840], index: 0, kind: input, shape index: {}]   ;;  %s6068_s1 = inlined_call_operand.hbm [shape: bf16[3840,512], index: 1, kind: input, shape index: {}]   ;;  %s6069_s2 = inlined_call_operand.hbm [shape: f32[4,512], index: 2, kind: input, shape index: {}]   ;;  %s6070_s3 = inlined_call_operand.hbm [shape: bf16[512,256], index: 3, kind: input, shape index: {}]   ;;  %s6071_s4 = inlined_call_operand.vmem [shape: f32[8,256], index: 4, kind: output, shape index: {}]  }
   0x1   :  { %10 = vsyncpa [#allocation5], 0  ;;  %s5710_s15 = smov [#allocation4]   ;;  %s5711_s17 = smov [#allocation2]  }
   0x2   :  { %s31_s16 = sshll.u32 %s5710_s15, 4  ;;  %s18_s18 = sshll.u32 %s5711_s17, 4  ;;  %s32_s16 = int_to_ptr.vmem [resolvable:$true] %s31_s16  ;;  %s19_s18 = int_to_ptr.vmem [resolvable:$true] %s18_s18 }
   0x3   :  { %s5654_s19 = scalar_lea.vmem %s32_s16, 256  ;;  %p5659_p1 = scmp.lt.s32.totalorder %s32_s16, %s32_s16 }
   0x4   :  { %p5655_p0 = scmp.ne.s32.totalorder %s32_s16, %s5654_s19  ;;  %p5660_p2 = scmp.lt.s32.totalorder %s5654_s19, %s5654_s19 }
   0x6   :  { %p5661_p3 = por %p5660_p2, %p5659_p1 }
   0x8   :  { %p5662_p4 = pnand %p5661_p3, %p5655_p0 }
   0xa   :  { %5665 = shalt.err (!%p5662_p4)
}
   0xb   :  { %34 = dma.hbm_to_vmem [thread:$0]  %s6069_s2, 256, %s32_s16, [#allocation5]  }
   0xc   :  { %s5674_s22 = scalar_lea.vmem %s19_s18, 122880  ;;  %p5679_p6 = scmp.lt.s32.totalorder %s19_s18, %s19_s18 }
   0xd   :  { %p5675_p5 = scmp.ne.s32.totalorder %s19_s18, %s5674_s22  ;;  %p5680_p7 = scmp.lt.s32.totalorder %s5674_s22, %s5674_s22 }
   0xf   :  { %p5681_p8 = por %p5680_p7, %p5679_p6 }
  0x11   :  { %p5682_p9 = pnand %p5681_p8, %p5675_p5 }
  0x13   :  { %5685 = shalt.err (!%p5682_p9)
}
  0x14   :  { %s5712_s23 = smov 256   ;;  %s5713_s24 = smov 16  }
  0x15   :  { %24 = dma.hbm_to_vmem [thread:$0]  %s6068_s1, 122880, %s19_s18, [#allocation3], %s5712_s23, %s5712_s23, %s5713_s24  }
  0x16   :  { %s5714_s27 = smov [#allocation6]  }
  0x17   :  { %s40_s28 = sshll.u32 %s5714_s27, 4  ;;  %s41_s28 = int_to_ptr.vmem [resolvable:$true] %s40_s28 }
  0x18   :  { %s5694_s29 = scalar_lea.vmem %s41_s28, 8192  ;;  %p5699_p11 = scmp.lt.s32.totalorder %s41_s28, %s41_s28 }
  0x19   :  { %p5695_p10 = scmp.ne.s32.totalorder %s41_s28, %s5694_s29  ;;  %p5700_p12 = scmp.lt.s32.totalorder %s5694_s29, %s5694_s29 }
  0x1b   :  { %p5701_p13 = por %p5700_p12, %p5699_p11 }
  0x1d   :  { %p5702_p0 = pnand %p5701_p13, %p5695_p10 }
  0x1f   :  { %5705 = shalt.err (!%p5702_p0)
}
  0x20   :  { %s5715_s2 = smov 128   ;;  %s5716_s30 = smov 8  }
  0x21   :  { %46 = dma.hbm_to_vmem [thread:$0]  %s6070_s3, 8192, %s41_s28, [#allocation5], %s5715_s2, %s5715_s2, %s5716_s30  }
  0x22   :  { %5706 = dma.done.wait [#allocation3], 122880  }
  0x23   :  { %5707 = vsyncadd [#allocation3], 4294844416 }
  0x24   :  { %5708 = dma.done.wait [#allocation5], 8448  }
  0x25   :  { %5709 = vsyncadd [#allocation5], 4294958848  ;;  %v116_v0 = vld [vmem:[#allocation2 + $0xf0] sm:$0xff]  ;;  %v114_v2 = vld [vmem:[#allocation2 + $0xe0] sm:$0xff] }
  0x26   :  { %v180_v1 = vld [vmem:[#allocation2 + $0x2f0] sm:$0xff]  ;;  %v1107_v3 = vunpack.c.h.bf16 %v116_v0  ;;  %v1106_v5 = vunpack.c.l.bf16 %v116_v0  ;;  %v178_v7 = vld [vmem:[#allocation2 + $0x2e0] sm:$0xff]  ;;  %v1103_v10 = vunpack.c.h.bf16 %v114_v2  ;;  %v1102_v12 = vunpack.c.l.bf16 %v114_v2 }
  0x27   :  { %v1235_v4 = vunpack.c.h.bf16 %v180_v1  ;;  %v1234_v6 = vunpack.c.l.bf16 %v180_v1  ;;  %v112_v8 = vld [vmem:[#allocation2 + $0xd0] sm:$0xff]  ;;  %v1231_v11 = vunpack.c.h.bf16 %v178_v7  ;;  %v1230_v13 = vunpack.c.l.bf16 %v178_v7  ;;  %v110_v14 = vld [vmem:[#allocation2 + $0xc0] sm:$0xff] }
  0x28   :  { %v176_v9 = vld [vmem:[#allocation2 + $0x2d0] sm:$0xff]  ;;  %v174_v15 = vld [vmem:[#allocation2 + $0x2c0] sm:$0xff]  ;;  %3006 = vmatprep.subr.mxu0 %v1107_v3  ;;  %v1099_v16 = vunpack.c.h.bf16 %v112_v8  ;;  %v1098_v18 = vunpack.c.l.bf16 %v112_v8  ;;  %v1095_v22 = vunpack.c.h.bf16 %v110_v14  ;;  %v1094_v24 = vunpack.c.l.bf16 %v110_v14 }
  0x29   :  { %3077 = vmatprep.subr.mxu1 %v1235_v4  ;;  %v1227_v17 = vunpack.c.h.bf16 %v176_v9  ;;  %3007 = vmatpush1.msra.mxu0 %v1106_v5  ;;  %v1226_v19 = vunpack.c.l.bf16 %v176_v9  ;;  %v108_v20 = vld [vmem:[#allocation2 + $0xb0] sm:$0xff]  ;;  %v1223_v23 = vunpack.c.h.bf16 %v174_v15  ;;  %v1222_v25 = vunpack.c.l.bf16 %v174_v15  ;;  %v106_v26 = vld [vmem:[#allocation2 + $0xa0] sm:$0xff] }
  0x2a   :  { %3078 = vmatpush1.msra.mxu1 %v1234_v6  ;;  %v172_v21 = vld [vmem:[#allocation2 + $0x2b0] sm:$0xff]  ;;  %3008 = vmatprep.subr.mxu0 %v1103_v10  ;;  %v170_v27 = vld [vmem:[#allocation2 + $0x2a0] sm:$0xff]  ;;  %v1091_v28 = vunpack.c.h.bf16 %v108_v20  ;;  %v1090_v30 = vunpack.c.l.bf16 %v108_v20  ;;  %v1087_v34 = vunpack.c.h.bf16 %v106_v26  ;;  %v1086_v36 = vunpack.c.l.bf16 %v106_v26 }
  0x2b   :  { %3079 = vmatprep.subr.mxu1 %v1231_v11  ;;  %3009 = vmatpush1.msra.mxu0 %v1102_v12  ;;  %v1219_v29 = vunpack.c.h.bf16 %v172_v21  ;;  %v1218_v31 = vunpack.c.l.bf16 %v172_v21  ;;  %v104_v32 = vld [vmem:[#allocation2 + $0x90] sm:$0xff]  ;;  %v1215_v35 = vunpack.c.h.bf16 %v170_v27  ;;  %v1214_v37 = vunpack.c.l.bf16 %v170_v27  ;;  %v102_v38 = vld [vmem:[#allocation2 + $0x80] sm:$0xff] }
  0x2c   :  { %3080 = vmatpush1.msra.mxu1 %v1230_v13  ;;  %3010 = vmatprep.subr.mxu0 %v1099_v16  ;;  %v168_v33 = vld [vmem:[#allocation2 + $0x290] sm:$0xff]  ;;  %v166_v39 = vld [vmem:[#allocation2 + $0x280] sm:$0xff]  ;;  %v1083_v40 = vunpack.c.h.bf16 %v104_v32  ;;  %v1082_v42 = vunpack.c.l.bf16 %v104_v32  ;;  %v1079_v46 = vunpack.c.h.bf16 %v102_v38  ;;  %v1078_v48 = vunpack.c.l.bf16 %v102_v38 }
  0x2d   :  { %3081 = vmatprep.subr.mxu1 %v1227_v17  ;;  %3011 = vmatpush1.msra.mxu0 %v1098_v18  ;;  %v1211_v41 = vunpack.c.h.bf16 %v168_v33  ;;  %v1210_v43 = vunpack.c.l.bf16 %v168_v33  ;;  %v100_v44 = vld [vmem:[#allocation2 + $0x70] sm:$0xff]  ;;  %v1207_v47 = vunpack.c.h.bf16 %v166_v39  ;;  %v1206_v49 = vunpack.c.l.bf16 %v166_v39  ;;  %v98_v50 = vld [vmem:[#allocation2 + $0x60] sm:$0xff] }
  0x2e   :  { %3082 = vmatpush1.msra.mxu1 %v1226_v19  ;;  %3012 = vmatprep.subr.mxu0 %v1095_v22  ;;  %v164_v45 = vld [vmem:[#allocation2 + $0x270] sm:$0xff]  ;;  %v162_v51 = vld [vmem:[#allocation2 + $0x260] sm:$0xff]  ;;  %v1075_v52 = vunpack.c.h.bf16 %v100_v44  ;;  %v1074_v54 = vunpack.c.l.bf16 %v100_v44  ;;  %v1071_v58 = vunpack.c.h.bf16 %v98_v50  ;;  %v1070_v60 = vunpack.c.l.bf16 %v98_v50 }
  0x2f   :  { %3083 = vmatprep.subr.mxu1 %v1223_v23  ;;  %3013 = vmatpush1.msra.mxu0 %v1094_v24  ;;  %v1203_v53 = vunpack.c.h.bf16 %v164_v45  ;;  %v1202_v55 = vunpack.c.l.bf16 %v164_v45  ;;  %v96_v56 = vld [vmem:[#allocation2 + $0x50] sm:$0xff]  ;;  %v1199_v59 = vunpack.c.h.bf16 %v162_v51  ;;  %v1198_v61 = vunpack.c.l.bf16 %v162_v51  ;;  %v94_v62 = vld [vmem:[#allocation2 + $0x40] sm:$0xff] }
  0x30   :  { %3084 = vmatpush1.msra.mxu1 %v1222_v25  ;;  %3014 = vmatprep.subr.mxu0 %v1091_v28  ;;  %v160_v57 = vld [vmem:[#allocation2 + $0x250] sm:$0xff]  ;;  %v158_v63 = vld [vmem:[#allocation2 + $0x240] sm:$0xff]  ;;  %v1067_v0 = vunpack.c.h.bf16 %v96_v56  ;;  %v1066_v2 = vunpack.c.l.bf16 %v96_v56  ;;  %v1063_v6 = vunpack.c.h.bf16 %v94_v62  ;;  %v1062_v8 = vunpack.c.l.bf16 %v94_v62 }
  0x31   :  { %3085 = vmatprep.subr.mxu1 %v1219_v29  ;;  %3015 = vmatpush1.msra.mxu0 %v1090_v30  ;;  %v1195_v1 = vunpack.c.h.bf16 %v160_v57  ;;  %v1194_v3 = vunpack.c.l.bf16 %v160_v57  ;;  %v92_v4 = vld [vmem:[#allocation2 + $0x30] sm:$0xff]  ;;  %v1191_v7 = vunpack.c.h.bf16 %v158_v63  ;;  %v1190_v9 = vunpack.c.l.bf16 %v158_v63  ;;  %v90_v10 = vld [vmem:[#allocation2 + $0x20] sm:$0xff] }
  0x32   :  { %3086 = vmatpush1.msra.mxu1 %v1218_v31  ;;  %3016 = vmatprep.subr.mxu0 %v1087_v34  ;;  %v156_v5 = vld [vmem:[#allocation2 + $0x230] sm:$0xff]  ;;  %v154_v11 = vld [vmem:[#allocation2 + $0x220] sm:$0xff]  ;;  %v1059_v12 = vunpack.c.h.bf16 %v92_v4  ;;  %v1058_v14 = vunpack.c.l.bf16 %v92_v4  ;;  %v1055_v18 = vunpack.c.h.bf16 %v90_v10  ;;  %v1054_v20 = vunpack.c.l.bf16 %v90_v10 }
  0x33   :  { %3087 = vmatprep.subr.mxu1 %v1215_v35  ;;  %3017 = vmatpush1.msra.mxu0 %v1086_v36  ;;  %v1187_v13 = vunpack.c.h.bf16 %v156_v5  ;;  %v1186_v15 = vunpack.c.l.bf16 %v156_v5  ;;  %v88_v16 = vld [vmem:[#allocation2 + $0x10] sm:$0xff]  ;;  %v1183_v19 = vunpack.c.h.bf16 %v154_v11  ;;  %v1182_v21 = vunpack.c.l.bf16 %v154_v11  ;;  %v86_v22 = vld [vmem:[#allocation2] sm:$0xff] }
  0x34   :  { %3088 = vmatpush1.msra.mxu1 %v1214_v37  ;;  %3018 = vmatprep.subr.mxu0 %v1083_v40  ;;  %v152_v17 = vld [vmem:[#allocation2 + $0x210] sm:$0xff]  ;;  %v150_v23 = vld [vmem:[#allocation2 + $0x200] sm:$0xff]  ;;  %v1051_v24 = vunpack.c.h.bf16 %v88_v16  ;;  %v1050_v26 = vunpack.c.l.bf16 %v88_v16  ;;  %v1047_v30 = vunpack.c.h.bf16 %v86_v22  ;;  %v1046_v32 = vunpack.c.l.bf16 %v86_v22 }
  0x35   :  { %3089 = vmatprep.subr.mxu1 %v1211_v41  ;;  %3019 = vmatpush1.msra.mxu0 %v1082_v42  ;;  %v1179_v25 = vunpack.c.h.bf16 %v152_v17  ;;  %v1178_v27 = vunpack.c.l.bf16 %v152_v17  ;;  %v148_v28 = vld [vmem:[#allocation2 + $0x1f0] sm:$0xff]  ;;  %v1175_v31 = vunpack.c.h.bf16 %v150_v23  ;;  %v1174_v33 = vunpack.c.l.bf16 %v150_v23  ;;  %v146_v34 = vld [vmem:[#allocation2 + $0x1e0] sm:$0xff] }
  0x36   :  { %3090 = vmatpush1.msra.mxu1 %v1210_v43  ;;  %3020 = vmatprep.subr.mxu0 %v1079_v46  ;;  %v212_v29 = vld [vmem:[#allocation2 + $0x3f0] sm:$0xff]  ;;  %v210_v35 = vld [vmem:[#allocation2 + $0x3e0] sm:$0xff]  ;;  %v1171_v36 = vunpack.c.h.bf16 %v148_v28  ;;  %v1170_v38 = vunpack.c.l.bf16 %v148_v28  ;;  %v1167_v42 = vunpack.c.h.bf16 %v146_v34  ;;  %v1166_v44 = vunpack.c.l.bf16 %v146_v34 }
  0x37   :  { %3091 = vmatprep.subr.mxu1 %v1207_v47  ;;  %3021 = vmatpush1.msra.mxu0 %v1078_v48  ;;  %v1299_v37 = vunpack.c.h.bf16 %v212_v29  ;;  %v1298_v39 = vunpack.c.l.bf16 %v212_v29  ;;  %v144_v40 = vld [vmem:[#allocation2 + $0x1d0] sm:$0xff]  ;;  %v1295_v43 = vunpack.c.h.bf16 %v210_v35  ;;  %v1294_v45 = vunpack.c.l.bf16 %v210_v35  ;;  %v142_v46 = vld [vmem:[#allocation2 + $0x1c0] sm:$0xff] }
  0x38   :  { %3092 = vmatpush1.msra.mxu1 %v1206_v49  ;;  %3022 = vmatprep.subr.mxu0 %v1075_v52  ;;  %v208_v41 = vld [vmem:[#allocation2 + $0x3d0] sm:$0xff]  ;;  %v206_v47 = vld [vmem:[#allocation2 + $0x3c0] sm:$0xff]  ;;  %v1163_v48 = vunpack.c.h.bf16 %v144_v40  ;;  %v1162_v50 = vunpack.c.l.bf16 %v144_v40  ;;  %v1158_v56 = vunpack.c.l.bf16 %v142_v46 }
  0x39   :  { %3093 = vmatprep.subr.mxu1 %v1203_v53  ;;  %3023 = vmatpush1.msra.mxu0 %v1074_v54  ;;  %v1291_v49 = vunpack.c.h.bf16 %v208_v41  ;;  %v1290_v51 = vunpack.c.l.bf16 %v208_v41  ;;  %v140_v52 = vld [vmem:[#allocation2 + $0x1b0] sm:$0xff]  ;;  %v1159_v54 = vunpack.c.h.bf16 %v142_v46  ;;  %v1286_v57 = vunpack.c.l.bf16 %v206_v47 }
  0x3a   :  { %3094 = vmatpush1.msra.mxu1 %v1202_v55  ;;  %3024 = vmatprep.subr.mxu0 %v1071_v58  ;;  %v204_v53 = vld [vmem:[#allocation2 + $0x3b0] sm:$0xff]  ;;  %v1287_v55 = vunpack.c.h.bf16 %v206_v47  ;;  %v138_v58 = vld [vmem:[#allocation2 + $0x1a0] sm:$0xff]  ;;  %v1154_v62 = vunpack.c.l.bf16 %v140_v52 }
  0x3b   :  { %3095 = vmatprep.subr.mxu1 %v1199_v59  ;;  %3025 = vmatpush1.msra.mxu0 %v1070_v60  ;;  %v202_v59 = vld [vmem:[#allocation2 + $0x3a0] sm:$0xff]  ;;  %v1155_v60 = vunpack.c.h.bf16 %v140_v52  ;;  %v1282_v63 = vunpack.c.l.bf16 %v204_v53  ;;  %v1150_v4 = vunpack.c.l.bf16 %v138_v58 }
  0x3c   :  { %3096 = vmatpush1.msra.mxu1 %v1198_v61  ;;  %3026 = vmatprep.subr.mxu0 %v1067_v0  ;;  %v1283_v61 = vunpack.c.h.bf16 %v204_v53  ;;  %v136_v0 = vld [vmem:[#allocation2 + $0x190] sm:$0xff]  ;;  %v1278_v5 = vunpack.c.l.bf16 %v202_v59 }
  0x3d   :  { %3097 = vmatprep.subr.mxu1 %v1195_v1  ;;  %3027 = vmatpush1.msra.mxu0 %v1066_v2  ;;  %v200_v1 = vld [vmem:[#allocation2 + $0x390] sm:$0xff]  ;;  %v1151_v2 = vunpack.c.h.bf16 %v138_v58  ;;  %v1146_v10 = vunpack.c.l.bf16 %v136_v0 }
  0x3e   :  { %3098 = vmatpush1.msra.mxu1 %v1194_v3  ;;  %3028 = vmatprep.subr.mxu0 %v1063_v6  ;;  %v1279_v3 = vunpack.c.h.bf16 %v202_v59  ;;  %v134_v6 = vld [vmem:[#allocation2 + $0x180] sm:$0xff]  ;;  %v1274_v11 = vunpack.c.l.bf16 %v200_v1 }
  0x3f   :  { %3099 = vmatprep.subr.mxu1 %v1191_v7  ;;  %3029 = vmatpush1.msra.mxu0 %v1062_v8  ;;  %v198_v7 = vld [vmem:[#allocation2 + $0x380] sm:$0xff]  ;;  %v1147_v8 = vunpack.c.h.bf16 %v136_v0  ;;  %v1142_v16 = vunpack.c.l.bf16 %v134_v6  ;;  %v308_v0 = vld [vmem:[#allocation2 + $0x6f0] sm:$0xff] }
  0x40   :  { %3100 = vmatpush1.msra.mxu1 %v1190_v9  ;;  %3030 = vmatprep.subr.mxu0 %v1059_v12  ;;  %v1275_v9 = vunpack.c.h.bf16 %v200_v1  ;;  %v132_v12 = vld [vmem:[#allocation2 + $0x170] sm:$0xff]  ;;  %v1270_v17 = vunpack.c.l.bf16 %v198_v7  ;;  %v57_v1 = vld [vmem:[%s6067_s0 + $0x8] sm:$0xff] }
  0x41   :  { %3101 = vmatprep.subr.mxu1 %v1187_v13  ;;  %3031 = vmatpush1.msra.mxu0 %v1058_v14  ;;  %v196_v13 = vld [vmem:[#allocation2 + $0x370] sm:$0xff]  ;;  %v1143_v14 = vunpack.c.h.bf16 %v134_v6  ;;  %v1138_v22 = vunpack.c.l.bf16 %v132_v12  ;;  %v306_v6 = vld [vmem:[#allocation2 + $0x6e0] sm:$0xff] }
  0x42   :  { %3102 = vmatpush1.msra.mxu1 %v1186_v15  ;;  %3032 = vmatprep.subr.mxu0 %v1055_v18  ;;  %v1271_v15 = vunpack.c.h.bf16 %v198_v7  ;;  %v130_v18 = vld [vmem:[#allocation2 + $0x160] sm:$0xff]  ;;  %v1266_v23 = vunpack.c.l.bf16 %v196_v13  ;;  %v59_v7 = vld [vmem:[%s6067_s0 + $0x18] sm:$0xff] }
  0x43   :  { %3103 = vmatprep.subr.mxu1 %v1183_v19  ;;  %3033 = vmatpush1.msra.mxu0 %v1054_v20  ;;  %v194_v19 = vld [vmem:[#allocation2 + $0x360] sm:$0xff]  ;;  %v1139_v20 = vunpack.c.h.bf16 %v132_v12  ;;  %v1134_v28 = vunpack.c.l.bf16 %v130_v18  ;;  %v240_v12 = vld [vmem:[#allocation2 + $0x4d0] sm:$0xff] }
  0x44   :  { %3104 = vmatpush1.msra.mxu1 %v1182_v21  ;;  %3034 = vmatprep.subr.mxu0 %v1051_v24  ;;  %v1267_v21 = vunpack.c.h.bf16 %v196_v13  ;;  %v128_v24 = vld [vmem:[#allocation2 + $0x150] sm:$0xff]  ;;  %v1262_v29 = vunpack.c.l.bf16 %v194_v19 }
  0x45   :  { %3105 = vmatprep.subr.mxu1 %v1179_v25  ;;  %3035 = vmatpush1.msra.mxu0 %v1050_v26  ;;  %v192_v25 = vld [vmem:[#allocation2 + $0x350] sm:$0xff]  ;;  %v1135_v26 = vunpack.c.h.bf16 %v130_v18  ;;  %v1130_v34 = vunpack.c.l.bf16 %v128_v24  ;;  %v238_v18 = vld [vmem:[#allocation2 + $0x4c0] sm:$0xff] }
  0x46   :  { %3106 = vmatpush1.msra.mxu1 %v1178_v27  ;;  %3036 = vmatprep.subr.mxu0 %v1047_v30  ;;  %v1263_v27 = vunpack.c.h.bf16 %v194_v19  ;;  %v126_v30 = vld [vmem:[#allocation2 + $0x140] sm:$0xff]  ;;  %v1258_v35 = vunpack.c.l.bf16 %v192_v25  ;;  %v304_v13 = vld [vmem:[#allocation2 + $0x6d0] sm:$0xff] }
  0x47   :  { %3107 = vmatprep.subr.mxu1 %v1175_v31  ;;  %3037 = vmatpush1.msra.mxu0 %v1046_v32  ;;  %v190_v31 = vld [vmem:[#allocation2 + $0x340] sm:$0xff]  ;;  %v1131_v32 = vunpack.c.h.bf16 %v128_v24  ;;  %v1126_v40 = vunpack.c.l.bf16 %v126_v30  ;;  %v236_v24 = vld [vmem:[#allocation2 + $0x4b0] sm:$0xff] }
  0x48   :  { %3108 = vmatpush1.msra.mxu1 %v1174_v33  ;;  %3038 = vmatprep.subr.mxu0 %v1171_v36  ;;  %v1259_v33 = vunpack.c.h.bf16 %v192_v25  ;;  %v124_v36 = vld [vmem:[#allocation2 + $0x130] sm:$0xff]  ;;  %v1254_v41 = vunpack.c.l.bf16 %v190_v31  ;;  %v302_v19 = vld [vmem:[#allocation2 + $0x6c0] sm:$0xff] }
  0x49   :  { %3109 = vmatprep.subr.mxu1 %v1299_v37  ;;  %3039 = vmatpush2.msra.mxu0 %v1170_v38  ;;  %v188_v37 = vld [vmem:[#allocation2 + $0x330] sm:$0xff]  ;;  %v1127_v38 = vunpack.c.h.bf16 %v126_v30  ;;  %v1122_v46 = vunpack.c.l.bf16 %v124_v36  ;;  %v234_v30 = vld [vmem:[#allocation2 + $0x4a0] sm:$0xff] }
  0x4a   :  { %3110 = vmatpush2.msra.mxu1 %v1298_v39  ;;  %3040 = vmatprep.subr.mxu0 %v1167_v42  ;;  %v1255_v39 = vunpack.c.h.bf16 %v190_v31  ;;  %v122_v42 = vld [vmem:[#allocation2 + $0x120] sm:$0xff]  ;;  %v1250_v47 = vunpack.c.l.bf16 %v188_v37  ;;  %v300_v25 = vld [vmem:[#allocation2 + $0x6b0] sm:$0xff] }
  0x4b   :  { %3111 = vmatprep.subr.mxu1 %v1295_v43  ;;  %3041 = vmatpush2.msra.mxu0 %v1166_v44  ;;  %v186_v43 = vld [vmem:[#allocation2 + $0x320] sm:$0xff]  ;;  %v1123_v44 = vunpack.c.h.bf16 %v124_v36  ;;  %v1118_v52 = vunpack.c.l.bf16 %v122_v42  ;;  %v232_v36 = vld [vmem:[#allocation2 + $0x490] sm:$0xff] }
  0x4c   :  { %3112 = vmatpush2.msra.mxu1 %v1294_v45  ;;  %3042 = vmatprep.subr.mxu0 %v1163_v48  ;;  %v1251_v45 = vunpack.c.h.bf16 %v188_v37  ;;  %v120_v48 = vld [vmem:[#allocation2 + $0x110] sm:$0xff]  ;;  %v1246_v53 = vunpack.c.l.bf16 %v186_v43  ;;  %v298_v31 = vld [vmem:[#allocation2 + $0x6a0] sm:$0xff] }
  0x4d   :  { %3113 = vmatprep.subr.mxu1 %v1291_v49  ;;  %3043 = vmatpush2.msra.mxu0 %v1162_v50  ;;  %v184_v49 = vld [vmem:[#allocation2 + $0x310] sm:$0xff]  ;;  %v1119_v50 = vunpack.c.h.bf16 %v122_v42  ;;  %v1114_v58 = vunpack.c.l.bf16 %v120_v48  ;;  %v230_v42 = vld [vmem:[#allocation2 + $0x480] sm:$0xff] }
  0x4e   :  { %3114 = vmatpush2.msra.mxu1 %v1290_v51  ;;  %3044 = vmatprep.subr.mxu0 %v1159_v54  ;;  %v1247_v51 = vunpack.c.h.bf16 %v186_v43  ;;  %v118_v54 = vld [vmem:[#allocation2 + $0x100] sm:$0xff]  ;;  %v1242_v59 = vunpack.c.l.bf16 %v184_v49  ;;  %v296_v37 = vld [vmem:[#allocation2 + $0x690] sm:$0xff] }
  0x4f   :  { %3115 = vmatprep.subr.mxu1 %v1287_v55  ;;  %3045 = vmatpush2.msra.mxu0 %v1158_v56  ;;  %v182_v55 = vld [vmem:[#allocation2 + $0x300] sm:$0xff]  ;;  %v1115_v56 = vunpack.c.h.bf16 %v120_v48  ;;  %v228_v48 = vld [vmem:[#allocation2 + $0x470] sm:$0xff] }
  0x50   :  { %3116 = vmatpush2.msra.mxu1 %v1286_v57  ;;  %3046 = vmatprep.subr.mxu0 %v1155_v60  ;;  %v1243_v57 = vunpack.c.h.bf16 %v184_v49  ;;  %v1111_v60 = vunpack.c.h.bf16 %v118_v54  ;;  %v294_v43 = vld [vmem:[#allocation2 + $0x680] sm:$0xff]  ;;  %v292_v49 = vld [vmem:[#allocation2 + $0x670] sm:$0xff] }
  0x51   :  { %3117 = vmatprep.subr.mxu1 %v1283_v61  ;;  %3047 = vmatpush2.msra.mxu0 %v1154_v62  ;;  %v1239_v61 = vunpack.c.h.bf16 %v182_v55  ;;  %v244_v62 = vld [vmem:[#allocation2 + $0x4f0] sm:$0xff] }
  0x52   :  { %3118 = vmatpush2.msra.mxu1 %v1282_v63  ;;  %3048 = vmatprep.subr.mxu0 %v1151_v2  ;;  %v1110_v63 = vunpack.c.l.bf16 %v118_v54  ;;  %v1238_v2 = vunpack.c.l.bf16 %v182_v55  ;;  %v226_v54 = vld [vmem:[#allocation2 + $0x460] sm:$0xff] }
  0x53   :  { %3119 = vmatprep.subr.mxu1 %v1279_v3  ;;  %3049 = vmatpush2.msra.mxu0 %v1150_v4  ;;  %v56_v3 = vld [vmem:[%s6067_s0] sm:$0xff]  ;;  %v1363_v4 = vunpack.c.h.bf16 %v244_v62 }
  0x54   :  { %3120 = vmatpush2.msra.mxu1 %v1278_v5  ;;  %3050 = vmatprep.subr.mxu0 %v1147_v8  ;;  %v242_v5 = vld [vmem:[#allocation2 + $0x4e0] sm:$0xff]  ;;  %v1491_v8 = vunpack.c.h.bf16 %v308_v0 }
  0x55   :  { %3121 = vmatprep.subr.mxu1 %v1275_v9  ;;  %3051 = vmatpush2.msra.mxu0 %v1146_v10  ;;  %v1362_v9 = vunpack.c.l.bf16 %v244_v62  ;;  %v1490_v10 = vunpack.c.l.bf16 %v308_v0  ;;  %v290_v55 = vld [vmem:[#allocation2 + $0x660] sm:$0xff]  ;;  %v1327_v62 = vunpack.c.h.bf16 %v226_v54  ;;  %v1326_v0 = vunpack.c.l.bf16 %v226_v54 }
  0x56   :  { %3122 = vmatpush2.msra.mxu1 %v1274_v11  ;;  %3052 = vmatprep.subr.mxu0 %v1143_v14  ;;  %v58_v11 = vld [vmem:[%s6067_s0 + $0x10] sm:$0xff]  ;;  %v1359_v14 = vunpack.c.h.bf16 %v242_v5 }
  0x57   :  { %3123 = vmatprep.subr.mxu1 %v1271_v15  ;;  %3053 = vmatpush2.msra.mxu0 %v1142_v16  ;;  %v1487_v15 = vunpack.c.h.bf16 %v306_v6  ;;  %v1358_v16 = vunpack.c.l.bf16 %v242_v5 }
  0x58   :  { %3124 = vmatpush2.msra.mxu1 %v1270_v17  ;;  %3054 = vmatprep.subr.mxu0 %v1139_v20  ;;  %v1486_v17 = vunpack.c.l.bf16 %v306_v6  ;;  %v1355_v20 = vunpack.c.h.bf16 %v240_v12 }
  0x59   :  { %3125 = vmatprep.subr.mxu1 %v1267_v21  ;;  %3055 = vmatpush2.msra.mxu0 %v1138_v22  ;;  %v1483_v21 = vunpack.c.h.bf16 %v304_v13  ;;  %v1354_v22 = vunpack.c.l.bf16 %v240_v12 }
  0x5a   :  { %3126 = vmatpush2.msra.mxu1 %v1266_v23  ;;  %3056 = vmatprep.subr.mxu0 %v1135_v26  ;;  %v1482_v23 = vunpack.c.l.bf16 %v304_v13  ;;  %v1351_v26 = vunpack.c.h.bf16 %v238_v18 }
  0x5b   :  { %3127 = vmatprep.subr.mxu1 %v1263_v27  ;;  %3057 = vmatpush2.msra.mxu0 %v1134_v28  ;;  %v1479_v27 = vunpack.c.h.bf16 %v302_v19  ;;  %v1350_v28 = vunpack.c.l.bf16 %v238_v18 }
  0x5c   :  { %3128 = vmatpush2.msra.mxu1 %v1262_v29  ;;  %3058 = vmatprep.subr.mxu0 %v1131_v32  ;;  %v1478_v29 = vunpack.c.l.bf16 %v302_v19  ;;  %v1347_v32 = vunpack.c.h.bf16 %v236_v24 }
  0x5d   :  { %3129 = vmatprep.subr.mxu1 %v1259_v33  ;;  %3059 = vmatpush2.msra.mxu0 %v1130_v34  ;;  %v1475_v33 = vunpack.c.h.bf16 %v300_v25  ;;  %v1346_v34 = vunpack.c.l.bf16 %v236_v24 }
  0x5e   :  { %3130 = vmatpush2.msra.mxu1 %v1258_v35  ;;  %3060 = vmatprep.subr.mxu0 %v1127_v38  ;;  %v1474_v35 = vunpack.c.l.bf16 %v300_v25  ;;  %v1343_v38 = vunpack.c.h.bf16 %v234_v30 }
  0x5f   :  { %3131 = vmatprep.subr.mxu1 %v1255_v39  ;;  %3061 = vmatpush2.msra.mxu0 %v1126_v40  ;;  %v1471_v39 = vunpack.c.h.bf16 %v298_v31  ;;  %v1342_v40 = vunpack.c.l.bf16 %v234_v30 }
  0x60   :  { %3132 = vmatpush2.msra.mxu1 %v1254_v41  ;;  %3062 = vmatprep.subr.mxu0 %v1123_v44  ;;  %v1470_v41 = vunpack.c.l.bf16 %v298_v31  ;;  %v1339_v44 = vunpack.c.h.bf16 %v232_v36 }
  0x61   :  { %3133 = vmatprep.subr.mxu1 %v1251_v45  ;;  %3063 = vmatpush2.msra.mxu0 %v1122_v46  ;;  %v1467_v45 = vunpack.c.h.bf16 %v296_v37  ;;  %v1338_v46 = vunpack.c.l.bf16 %v232_v36 }
  0x62   :  { %3134 = vmatpush2.msra.mxu1 %v1250_v47  ;;  %3064 = vmatprep.subr.mxu0 %v1119_v50  ;;  %v1466_v47 = vunpack.c.l.bf16 %v296_v37  ;;  %v1335_v50 = vunpack.c.h.bf16 %v230_v42 }
  0x63   :  { %3135 = vmatprep.subr.mxu1 %v1247_v51  ;;  %3065 = vmatpush2.msra.mxu0 %v1118_v52  ;;  %v1463_v51 = vunpack.c.h.bf16 %v294_v43  ;;  %v1334_v52 = vunpack.c.l.bf16 %v230_v42 }
  0x64   :  { %3136 = vmatpush2.msra.mxu1 %v1246_v53  ;;  %3066 = vmatprep.subr.mxu0 %v1115_v56  ;;  %v1462_v53 = vunpack.c.l.bf16 %v294_v43  ;;  %v1331_v56 = vunpack.c.h.bf16 %v228_v48 }
  0x65   :  { %3137 = vmatprep.subr.mxu1 %v1243_v57  ;;  %3067 = vmatpush2.msra.mxu0 %v1114_v58  ;;  %v1459_v57 = vunpack.c.h.bf16 %v292_v49  ;;  %v1330_v58 = vunpack.c.l.bf16 %v228_v48 }
  0x66   :  { %3138 = vmatpush2.msra.mxu1 %v1242_v59  ;;  %3068 = vmatprep.subr.mxu0 %v1111_v60  ;;  %v1458_v59 = vunpack.c.l.bf16 %v292_v49  ;;  %v224_v60 = vld [vmem:[#allocation2 + $0x450] sm:$0xff] }
  0x67   :  { %3139 = vmatprep.subr.mxu1 %v1239_v61  ;;  %3069 = vmatpush2.msra.mxu0 %v1110_v63  ;;  %v288_v61 = vld [vmem:[#allocation2 + $0x650] sm:$0xff]  ;;  %v1455_v63 = vunpack.c.h.bf16 %v290_v55  ;;  %v1322_v6 = vunpack.c.l.bf16 %v224_v60 }
  0x68   :  { %3070 = vmatprep.mubr.f32.mxu0 %v57_v1  ;;  %3140 = vmatpush2.msra.mxu1 %v1238_v2  ;;  %v1454_v1 = vunpack.c.l.bf16 %v290_v55  ;;  %v222_v2 = vld [vmem:[#allocation2 + $0x440] sm:$0xff]  ;;  %v1451_v5 = vunpack.c.h.bf16 %v288_v61 }
  0x69   :  { %3071 = vmatmul.mubr.f32.vlgmr.msra.gmra.mxu0 %v56_v3  ;;  %3141 = vmatprep.mubr.f32.mxu1 %v59_v7  ;;  %v286_v3 = vld [vmem:[#allocation2 + $0x640] sm:$0xff]  ;;  %v1450_v7 = vunpack.c.l.bf16 %v288_v61  ;;  %v1318_v12 = vunpack.c.l.bf16 %v222_v2 }
  0x6a   :  { %3148 = vmatprep.subr.mxu0 %v1363_v4  ;;  %3219 = vmatprep.subr.mxu1 %v1491_v8  ;;  %v1323_v4 = vunpack.c.h.bf16 %v224_v60  ;;  %v220_v8 = vld [vmem:[#allocation2 + $0x430] sm:$0xff]  ;;  %v1446_v13 = vunpack.c.l.bf16 %v286_v3 }
  0x6b   :  { %3142 = vmatmul.mubr.f32.vlgmr.msra.gmra.mxu1 %v58_v11  ;;  %3149 = vmatpush1.msra.mxu0 %v1362_v9  ;;  %v284_v9 = vld [vmem:[#allocation2 + $0x630] sm:$0xff]  ;;  %v1447_v11 = vunpack.c.h.bf16 %v286_v3  ;;  %v1314_v18 = vunpack.c.l.bf16 %v220_v8 }
  0x6c   :  { %3220 = vmatpush1.msra.mxu1 %v1490_v10  ;;  %3150 = vmatprep.subr.mxu0 %v1359_v14  ;;  %v1319_v10 = vunpack.c.h.bf16 %v222_v2  ;;  %v218_v14 = vld [vmem:[#allocation2 + $0x420] sm:$0xff]  ;;  %v1442_v19 = vunpack.c.l.bf16 %v284_v9 }
  0x6d   :  { %3221 = vmatprep.subr.mxu1 %v1487_v15  ;;  %3151 = vmatpush1.msra.mxu0 %v1358_v16  ;;  %v282_v15 = vld [vmem:[#allocation2 + $0x620] sm:$0xff]  ;;  %v1315_v16 = vunpack.c.h.bf16 %v220_v8  ;;  %v1310_v24 = vunpack.c.l.bf16 %v218_v14 }
  0x6e   :  { %3222 = vmatpush1.msra.mxu1 %v1486_v17  ;;  %3152 = vmatprep.subr.mxu0 %v1355_v20  ;;  %v1443_v17 = vunpack.c.h.bf16 %v284_v9  ;;  %v216_v20 = vld [vmem:[#allocation2 + $0x410] sm:$0xff]  ;;  %v1438_v25 = vunpack.c.l.bf16 %v282_v15 }
  0x6f   :  { %3223 = vmatprep.subr.mxu1 %v1483_v21  ;;  %3153 = vmatpush1.msra.mxu0 %v1354_v22  ;;  %v280_v21 = vld [vmem:[#allocation2 + $0x610] sm:$0xff]  ;;  %v1311_v22 = vunpack.c.h.bf16 %v218_v14  ;;  %v1306_v30 = vunpack.c.l.bf16 %v216_v20 }
  0x70   :  { %3224 = vmatpush1.msra.mxu1 %v1482_v23  ;;  %3154 = vmatprep.subr.mxu0 %v1351_v26  ;;  %v1439_v23 = vunpack.c.h.bf16 %v282_v15  ;;  %v214_v26 = vld [vmem:[#allocation2 + $0x400] sm:$0xff]  ;;  %v1434_v31 = vunpack.c.l.bf16 %v280_v21 }
  0x71   :  { %3225 = vmatprep.subr.mxu1 %v1479_v27  ;;  %3155 = vmatpush1.msra.mxu0 %v1350_v28  ;;  %v278_v27 = vld [vmem:[#allocation2 + $0x600] sm:$0xff]  ;;  %v1307_v28 = vunpack.c.h.bf16 %v216_v20  ;;  %v1302_v36 = vunpack.c.l.bf16 %v214_v26 }
  0x72   :  { %3226 = vmatpush1.msra.mxu1 %v1478_v29  ;;  %3156 = vmatprep.subr.mxu0 %v1347_v32  ;;  %v1435_v29 = vunpack.c.h.bf16 %v280_v21  ;;  %v276_v32 = vld [vmem:[#allocation2 + $0x5f0] sm:$0xff]  ;;  %v1430_v37 = vunpack.c.l.bf16 %v278_v27 }
  0x73   :  { %3227 = vmatprep.subr.mxu1 %v1475_v33  ;;  %3157 = vmatpush1.msra.mxu0 %v1346_v34  ;;  %v340_v33 = vld [vmem:[#allocation2 + $0x7f0] sm:$0xff]  ;;  %v1303_v34 = vunpack.c.h.bf16 %v214_v26  ;;  %v1426_v42 = vunpack.c.l.bf16 %v276_v32 }
  0x74   :  { %3228 = vmatpush1.msra.mxu1 %v1474_v35  ;;  %3158 = vmatprep.subr.mxu0 %v1343_v38  ;;  %v1431_v35 = vunpack.c.h.bf16 %v278_v27  ;;  %v274_v38 = vld [vmem:[#allocation2 + $0x5e0] sm:$0xff]  ;;  %v1554_v43 = vunpack.c.l.bf16 %v340_v33 }
  0x75   :  { %3229 = vmatprep.subr.mxu1 %v1471_v39  ;;  %3159 = vmatpush1.msra.mxu0 %v1342_v40  ;;  %v338_v39 = vld [vmem:[#allocation2 + $0x7e0] sm:$0xff]  ;;  %v1427_v40 = vunpack.c.h.bf16 %v276_v32  ;;  %v1422_v48 = vunpack.c.l.bf16 %v274_v38 }
  0x76   :  { %3230 = vmatpush1.msra.mxu1 %v1470_v41  ;;  %3160 = vmatprep.subr.mxu0 %v1339_v44  ;;  %v1555_v41 = vunpack.c.h.bf16 %v340_v33  ;;  %v272_v44 = vld [vmem:[#allocation2 + $0x5d0] sm:$0xff]  ;;  %v1550_v49 = vunpack.c.l.bf16 %v338_v39 }
  0x77   :  { %3231 = vmatprep.subr.mxu1 %v1467_v45  ;;  %3161 = vmatpush1.msra.mxu0 %v1338_v46  ;;  %v336_v45 = vld [vmem:[#allocation2 + $0x7d0] sm:$0xff]  ;;  %v1423_v46 = vunpack.c.h.bf16 %v274_v38  ;;  %v1418_v54 = vunpack.c.l.bf16 %v272_v44 }
  0x78   :  { %3232 = vmatpush1.msra.mxu1 %v1466_v47  ;;  %3162 = vmatprep.subr.mxu0 %v1335_v50  ;;  %v1551_v47 = vunpack.c.h.bf16 %v338_v39  ;;  %v270_v50 = vld [vmem:[#allocation2 + $0x5c0] sm:$0xff]  ;;  %v1546_v55 = vunpack.c.l.bf16 %v336_v45 }
  0x79   :  { %3233 = vmatprep.subr.mxu1 %v1463_v51  ;;  %3163 = vmatpush1.msra.mxu0 %v1334_v52  ;;  %v334_v51 = vld [vmem:[#allocation2 + $0x7c0] sm:$0xff]  ;;  %v1419_v52 = vunpack.c.h.bf16 %v272_v44  ;;  %v1414_v60 = vunpack.c.l.bf16 %v270_v50 }
  0x7a   :  { %3234 = vmatpush1.msra.mxu1 %v1462_v53  ;;  %3164 = vmatprep.subr.mxu0 %v1331_v56  ;;  %v1547_v53 = vunpack.c.h.bf16 %v336_v45  ;;  %v268_v56 = vld [vmem:[#allocation2 + $0x5b0] sm:$0xff]  ;;  %v1542_v61 = vunpack.c.l.bf16 %v334_v51 }
  0x7b   :  { %3235 = vmatprep.subr.mxu1 %v1459_v57  ;;  %3165 = vmatpush1.msra.mxu0 %v1330_v58  ;;  %v332_v57 = vld [vmem:[#allocation2 + $0x7b0] sm:$0xff]  ;;  %v1415_v58 = vunpack.c.h.bf16 %v270_v50  ;;  %v1410_v2 = vunpack.c.l.bf16 %v268_v56 }
  0x7c   :  { %3236 = vmatpush1.msra.mxu1 %v1458_v59  ;;  %3166 = vmatprep.subr.mxu0 %v1327_v62  ;;  %v1543_v59 = vunpack.c.h.bf16 %v334_v51  ;;  %v266_v62 = vld [vmem:[#allocation2 + $0x5a0] sm:$0xff]  ;;  %v1538_v3 = vunpack.c.l.bf16 %v332_v57 }
  0x7d   :  { %3237 = vmatprep.subr.mxu1 %v1455_v63  ;;  %3167 = vmatpush1.msra.mxu0 %v1326_v0  ;;  %v330_v63 = vld [vmem:[#allocation2 + $0x7a0] sm:$0xff]  ;;  %v1411_v0 = vunpack.c.h.bf16 %v268_v56  ;;  %v1406_v8 = vunpack.c.l.bf16 %v266_v62 }
  0x7e   :  { %3238 = vmatpush1.msra.mxu1 %v1454_v1  ;;  %3168 = vmatprep.subr.mxu0 %v1323_v4  ;;  %v1539_v1 = vunpack.c.h.bf16 %v332_v57  ;;  %v264_v4 = vld [vmem:[#allocation2 + $0x590] sm:$0xff]  ;;  %v1534_v9 = vunpack.c.l.bf16 %v330_v63 }
  0x7f   :  { %3239 = vmatprep.subr.mxu1 %v1451_v5  ;;  %3169 = vmatpush1.msra.mxu0 %v1322_v6  ;;  %v328_v5 = vld [vmem:[#allocation2 + $0x790] sm:$0xff]  ;;  %v1407_v6 = vunpack.c.h.bf16 %v266_v62  ;;  %v1402_v14 = vunpack.c.l.bf16 %v264_v4 }
  0x80   :  { %3240 = vmatpush1.msra.mxu1 %v1450_v7  ;;  %3170 = vmatprep.subr.mxu0 %v1319_v10  ;;  %v1535_v7 = vunpack.c.h.bf16 %v330_v63  ;;  %v262_v10 = vld [vmem:[#allocation2 + $0x580] sm:$0xff]  ;;  %v1530_v15 = vunpack.c.l.bf16 %v328_v5 }
  0x81   :  { %3241 = vmatprep.subr.mxu1 %v1447_v11  ;;  %3171 = vmatpush1.msra.mxu0 %v1318_v12  ;;  %v326_v11 = vld [vmem:[#allocation2 + $0x780] sm:$0xff]  ;;  %v1403_v12 = vunpack.c.h.bf16 %v264_v4  ;;  %v1398_v20 = vunpack.c.l.bf16 %v262_v10  ;;  %v436_v4 = vld [vmem:[#allocation2 + $0xaf0] sm:$0xff] }
  0x82   :  { %3242 = vmatpush1.msra.mxu1 %v1446_v13  ;;  %3172 = vmatprep.subr.mxu0 %v1315_v16  ;;  %v1531_v13 = vunpack.c.h.bf16 %v328_v5  ;;  %v260_v16 = vld [vmem:[#allocation2 + $0x570] sm:$0xff]  ;;  %v1526_v21 = vunpack.c.l.bf16 %v326_v11 }
  0x83   :  { %3243 = vmatprep.subr.mxu1 %v1443_v17  ;;  %3173 = vmatpush1.msra.mxu0 %v1314_v18  ;;  %v324_v17 = vld [vmem:[#allocation2 + $0x770] sm:$0xff]  ;;  %v1399_v18 = vunpack.c.h.bf16 %v262_v10  ;;  %v1394_v26 = vunpack.c.l.bf16 %v260_v16  ;;  %v434_v10 = vld [vmem:[#allocation2 + $0xae0] sm:$0xff] }
  0x84   :  { %3244 = vmatpush1.msra.mxu1 %v1442_v19  ;;  %3174 = vmatprep.subr.mxu0 %v1311_v22  ;;  %v1527_v19 = vunpack.c.h.bf16 %v326_v11  ;;  %v258_v22 = vld [vmem:[#allocation2 + $0x560] sm:$0xff]  ;;  %v1522_v27 = vunpack.c.l.bf16 %v324_v17  ;;  %v63_v11 = vld [vmem:[%s6067_s0 + $0x38] sm:$0xff] }
  0x85   :  { %3245 = vmatprep.subr.mxu1 %v1439_v23  ;;  %3175 = vmatpush1.msra.mxu0 %v1310_v24  ;;  %v322_v23 = vld [vmem:[#allocation2 + $0x760] sm:$0xff]  ;;  %v1395_v24 = vunpack.c.h.bf16 %v260_v16  ;;  %v1390_v32 = vunpack.c.l.bf16 %v258_v22  ;;  %v368_v16 = vld [vmem:[#allocation2 + $0x8d0] sm:$0xff] }
  0x86   :  { %3246 = vmatpush1.msra.mxu1 %v1438_v25  ;;  %3176 = vmatprep.subr.mxu0 %v1307_v28  ;;  %v1523_v25 = vunpack.c.h.bf16 %v324_v17  ;;  %v256_v28 = vld [vmem:[#allocation2 + $0x550] sm:$0xff]  ;;  %v1518_v33 = vunpack.c.l.bf16 %v322_v23 }
  0x87   :  { %3247 = vmatprep.subr.mxu1 %v1435_v29  ;;  %3177 = vmatpush1.msra.mxu0 %v1306_v30  ;;  %v320_v29 = vld [vmem:[#allocation2 + $0x750] sm:$0xff]  ;;  %v1391_v30 = vunpack.c.h.bf16 %v258_v22  ;;  %v1386_v38 = vunpack.c.l.bf16 %v256_v28  ;;  %v366_v22 = vld [vmem:[#allocation2 + $0x8c0] sm:$0xff] }
  0x88   :  { %3248 = vmatpush1.msra.mxu1 %v1434_v31  ;;  %3178 = vmatprep.subr.mxu0 %v1303_v34  ;;  %v1519_v31 = vunpack.c.h.bf16 %v322_v23  ;;  %v254_v34 = vld [vmem:[#allocation2 + $0x540] sm:$0xff]  ;;  %v1514_v39 = vunpack.c.l.bf16 %v320_v29  ;;  %v432_v17 = vld [vmem:[#allocation2 + $0xad0] sm:$0xff] }
  0x89   :  { %3249 = vmatprep.subr.mxu1 %v1431_v35  ;;  %3179 = vmatpush1.msra.mxu0 %v1302_v36  ;;  %v318_v35 = vld [vmem:[#allocation2 + $0x740] sm:$0xff]  ;;  %v1387_v36 = vunpack.c.h.bf16 %v256_v28  ;;  %v1382_v44 = vunpack.c.l.bf16 %v254_v34  ;;  %v364_v28 = vld [vmem:[#allocation2 + $0x8b0] sm:$0xff] }
  0x8a   :  { %3250 = vmatpush1.msra.mxu1 %v1430_v37  ;;  %3180 = vmatprep.subr.mxu0 %v1427_v40  ;;  %v1515_v37 = vunpack.c.h.bf16 %v320_v29  ;;  %v252_v40 = vld [vmem:[#allocation2 + $0x530] sm:$0xff]  ;;  %v1510_v45 = vunpack.c.l.bf16 %v318_v35  ;;  %v430_v23 = vld [vmem:[#allocation2 + $0xac0] sm:$0xff] }
  0x8b   :  { %3251 = vmatprep.subr.mxu1 %v1555_v41  ;;  %3181 = vmatpush2.msra.mxu0 %v1426_v42  ;;  %v316_v41 = vld [vmem:[#allocation2 + $0x730] sm:$0xff]  ;;  %v1383_v42 = vunpack.c.h.bf16 %v254_v34  ;;  %v1378_v50 = vunpack.c.l.bf16 %v252_v40  ;;  %v362_v34 = vld [vmem:[#allocation2 + $0x8a0] sm:$0xff] }
  0x8c   :  { %3252 = vmatpush2.msra.mxu1 %v1554_v43  ;;  %3182 = vmatprep.subr.mxu0 %v1423_v46  ;;  %v1511_v43 = vunpack.c.h.bf16 %v318_v35  ;;  %v250_v46 = vld [vmem:[#allocation2 + $0x520] sm:$0xff]  ;;  %v1506_v51 = vunpack.c.l.bf16 %v316_v41  ;;  %v428_v29 = vld [vmem:[#allocation2 + $0xab0] sm:$0xff] }
  0x8d   :  { %3253 = vmatprep.subr.mxu1 %v1551_v47  ;;  %3183 = vmatpush2.msra.mxu0 %v1422_v48  ;;  %v314_v47 = vld [vmem:[#allocation2 + $0x720] sm:$0xff]  ;;  %v1379_v48 = vunpack.c.h.bf16 %v252_v40  ;;  %v1374_v56 = vunpack.c.l.bf16 %v250_v46  ;;  %v360_v40 = vld [vmem:[#allocation2 + $0x890] sm:$0xff] }
  0x8e   :  { %3254 = vmatpush2.msra.mxu1 %v1550_v49  ;;  %3184 = vmatprep.subr.mxu0 %v1419_v52  ;;  %v1507_v49 = vunpack.c.h.bf16 %v316_v41  ;;  %v248_v52 = vld [vmem:[#allocation2 + $0x510] sm:$0xff]  ;;  %v1502_v57 = vunpack.c.l.bf16 %v314_v47  ;;  %v426_v35 = vld [vmem:[#allocation2 + $0xaa0] sm:$0xff] }
  0x8f   :  { %3255 = vmatprep.subr.mxu1 %v1547_v53  ;;  %3185 = vmatpush2.msra.mxu0 %v1418_v54  ;;  %v312_v53 = vld [vmem:[#allocation2 + $0x710] sm:$0xff]  ;;  %v1375_v54 = vunpack.c.h.bf16 %v250_v46  ;;  %v1370_v62 = vunpack.c.l.bf16 %v248_v52  ;;  %v358_v46 = vld [vmem:[#allocation2 + $0x880] sm:$0xff] }
  0x90   :  { %3256 = vmatpush2.msra.mxu1 %v1546_v55  ;;  %3186 = vmatprep.subr.mxu0 %v1415_v58  ;;  %v1503_v55 = vunpack.c.h.bf16 %v314_v47  ;;  %v246_v58 = vld [vmem:[#allocation2 + $0x500] sm:$0xff]  ;;  %v1498_v63 = vunpack.c.l.bf16 %v312_v53  ;;  %v424_v41 = vld [vmem:[#allocation2 + $0xa90] sm:$0xff] }
  0x91   :  { %3257 = vmatprep.subr.mxu1 %v1543_v59  ;;  %3187 = vmatpush2.msra.mxu0 %v1414_v60  ;;  %v310_v59 = vld [vmem:[#allocation2 + $0x700] sm:$0xff]  ;;  %v1371_v60 = vunpack.c.h.bf16 %v248_v52  ;;  %v356_v52 = vld [vmem:[#allocation2 + $0x870] sm:$0xff] }
  0x92   :  { %3258 = vmatpush2.msra.mxu1 %v1542_v61  ;;  %3188 = vmatprep.subr.mxu0 %v1411_v0  ;;  %v1499_v61 = vunpack.c.h.bf16 %v312_v53  ;;  %v1367_v0 = vunpack.c.h.bf16 %v246_v58  ;;  %v1494_v5 = vunpack.c.l.bf16 %v310_v59  ;;  %v422_v47 = vld [vmem:[#allocation2 + $0xa80] sm:$0xff]  ;;  %v420_v53 = vld [vmem:[#allocation2 + $0xa70] sm:$0xff] }
  0x93   :  { %3259 = vmatprep.subr.mxu1 %v1539_v1  ;;  %3189 = vmatpush2.msra.mxu0 %v1410_v2  ;;  %v1495_v1 = vunpack.c.h.bf16 %v310_v59  ;;  %v372_v2 = vld [vmem:[#allocation2 + $0x8f0] sm:$0xff]  ;;  %v418_v59 = vld [vmem:[#allocation2 + $0xa60] sm:$0xff] }
  0x94   :  { %3260 = vmatpush2.msra.mxu1 %v1538_v3  ;;  %3190 = vmatprep.subr.mxu0 %v1407_v6  ;;  %v1366_v3 = vunpack.c.l.bf16 %v246_v58  ;;  %v61_v6 = vld [vmem:[%s6067_s0 + $0x28] sm:$0xff]  ;;  %v354_v58 = vld [vmem:[#allocation2 + $0x860] sm:$0xff] }
  0x95   :  { %3261 = vmatprep.subr.mxu1 %v1535_v7  ;;  %3191 = vmatpush2.msra.mxu0 %v1406_v8  ;;  %v60_v7 = vld [vmem:[%s6067_s0 + $0x20] sm:$0xff]  ;;  %v1619_v8 = vunpack.c.h.bf16 %v372_v2 }
  0x96   :  { %3262 = vmatpush2.msra.mxu1 %v1534_v9  ;;  %3192 = vmatprep.subr.mxu0 %v1403_v12  ;;  %v370_v9 = vld [vmem:[#allocation2 + $0x8e0] sm:$0xff]  ;;  %v1747_v12 = vunpack.c.h.bf16 %v436_v4 }
  0x97   :  { %3263 = vmatprep.subr.mxu1 %v1531_v13  ;;  %3193 = vmatpush2.msra.mxu0 %v1402_v14  ;;  %v1618_v13 = vunpack.c.l.bf16 %v372_v2  ;;  %v1746_v14 = vunpack.c.l.bf16 %v436_v4  ;;  %v1583_v2 = vunpack.c.h.bf16 %v354_v58  ;;  %v1582_v4 = vunpack.c.l.bf16 %v354_v58 }
  0x98   :  { %3264 = vmatpush2.msra.mxu1 %v1530_v15  ;;  %3194 = vmatprep.subr.mxu0 %v1399_v18  ;;  %v62_v15 = vld [vmem:[%s6067_s0 + $0x30] sm:$0xff]  ;;  %v1615_v18 = vunpack.c.h.bf16 %v370_v9 }
  0x99   :  { %3265 = vmatprep.subr.mxu1 %v1527_v19  ;;  %3195 = vmatpush2.msra.mxu0 %v1398_v20  ;;  %v1743_v19 = vunpack.c.h.bf16 %v434_v10  ;;  %v1614_v20 = vunpack.c.l.bf16 %v370_v9 }
  0x9a   :  { %3266 = vmatpush2.msra.mxu1 %v1526_v21  ;;  %3196 = vmatprep.subr.mxu0 %v1395_v24  ;;  %v1742_v21 = vunpack.c.l.bf16 %v434_v10  ;;  %v1611_v24 = vunpack.c.h.bf16 %v368_v16 }
  0x9b   :  { %3267 = vmatprep.subr.mxu1 %v1523_v25  ;;  %3197 = vmatpush2.msra.mxu0 %v1394_v26  ;;  %v1739_v25 = vunpack.c.h.bf16 %v432_v17  ;;  %v1610_v26 = vunpack.c.l.bf16 %v368_v16 }
  0x9c   :  { %3268 = vmatpush2.msra.mxu1 %v1522_v27  ;;  %3198 = vmatprep.subr.mxu0 %v1391_v30  ;;  %v1738_v27 = vunpack.c.l.bf16 %v432_v17  ;;  %v1607_v30 = vunpack.c.h.bf16 %v366_v22 }
  0x9d   :  { %3269 = vmatprep.subr.mxu1 %v1519_v31  ;;  %3199 = vmatpush2.msra.mxu0 %v1390_v32  ;;  %v1735_v31 = vunpack.c.h.bf16 %v430_v23  ;;  %v1606_v32 = vunpack.c.l.bf16 %v366_v22 }
  0x9e   :  { %3270 = vmatpush2.msra.mxu1 %v1518_v33  ;;  %3200 = vmatprep.subr.mxu0 %v1387_v36  ;;  %v1734_v33 = vunpack.c.l.bf16 %v430_v23  ;;  %v1603_v36 = vunpack.c.h.bf16 %v364_v28 }
  0x9f   :  { %3271 = vmatprep.subr.mxu1 %v1515_v37  ;;  %3201 = vmatpush2.msra.mxu0 %v1386_v38  ;;  %v1731_v37 = vunpack.c.h.bf16 %v428_v29  ;;  %v1602_v38 = vunpack.c.l.bf16 %v364_v28 }
  0xa0   :  { %3272 = vmatpush2.msra.mxu1 %v1514_v39  ;;  %3202 = vmatprep.subr.mxu0 %v1383_v42  ;;  %v1730_v39 = vunpack.c.l.bf16 %v428_v29  ;;  %v1599_v42 = vunpack.c.h.bf16 %v362_v34 }
  0xa1   :  { %3273 = vmatprep.subr.mxu1 %v1511_v43  ;;  %3203 = vmatpush2.msra.mxu0 %v1382_v44  ;;  %v1727_v43 = vunpack.c.h.bf16 %v426_v35  ;;  %v1598_v44 = vunpack.c.l.bf16 %v362_v34 }
  0xa2   :  { %3274 = vmatpush2.msra.mxu1 %v1510_v45  ;;  %3204 = vmatprep.subr.mxu0 %v1379_v48  ;;  %v1726_v45 = vunpack.c.l.bf16 %v426_v35  ;;  %v1595_v48 = vunpack.c.h.bf16 %v360_v40 }
  0xa3   :  { %3275 = vmatprep.subr.mxu1 %v1507_v49  ;;  %3205 = vmatpush2.msra.mxu0 %v1378_v50  ;;  %v1723_v49 = vunpack.c.h.bf16 %v424_v41  ;;  %v1594_v50 = vunpack.c.l.bf16 %v360_v40 }
  0xa4   :  { %3276 = vmatpush2.msra.mxu1 %v1506_v51  ;;  %3206 = vmatprep.subr.mxu0 %v1375_v54  ;;  %v1722_v51 = vunpack.c.l.bf16 %v424_v41  ;;  %v1591_v54 = vunpack.c.h.bf16 %v358_v46 }
  0xa5   :  { %3277 = vmatprep.subr.mxu1 %v1503_v55  ;;  %3207 = vmatpush2.msra.mxu0 %v1374_v56  ;;  %v1719_v55 = vunpack.c.h.bf16 %v422_v47  ;;  %v1590_v56 = vunpack.c.l.bf16 %v358_v46 }
  0xa6   :  { %3278 = vmatpush2.msra.mxu1 %v1502_v57  ;;  %3208 = vmatprep.subr.mxu0 %v1371_v60  ;;  %v1718_v57 = vunpack.c.l.bf16 %v422_v47  ;;  %v1587_v60 = vunpack.c.h.bf16 %v356_v52 }
  0xa7   :  { %3279 = vmatprep.subr.mxu1 %v1499_v61  ;;  %3209 = vmatpush2.msra.mxu0 %v1370_v62  ;;  %v1715_v61 = vunpack.c.h.bf16 %v420_v53  ;;  %v1586_v62 = vunpack.c.l.bf16 %v356_v52 }
  0xa8   :  { %3280 = vmatpush2.msra.mxu1 %v1498_v63  ;;  %3210 = vmatprep.subr.mxu0 %v1367_v0  ;;  %v1714_v63 = vunpack.c.l.bf16 %v420_v53  ;;  %v352_v0 = vld [vmem:[#allocation2 + $0x850] sm:$0xff] }
  0xa9   :  { %3281 = vmatprep.subr.mxu1 %v1495_v1  ;;  %3211 = vmatpush2.msra.mxu0 %v1366_v3  ;;  %v416_v1 = vld [vmem:[#allocation2 + $0xa50] sm:$0xff]  ;;  %v1711_v3 = vunpack.c.h.bf16 %v418_v59  ;;  %v1578_v10 = vunpack.c.l.bf16 %v352_v0 }
  0xaa   :  { %3212 = vmatprep.mubr.f32.mxu0 %v61_v6  ;;  %3282 = vmatpush2.msra.mxu1 %v1494_v5  ;;  %v1710_v5 = vunpack.c.l.bf16 %v418_v59  ;;  %v350_v6 = vld [vmem:[#allocation2 + $0x840] sm:$0xff]  ;;  %v1707_v9 = vunpack.c.h.bf16 %v416_v1 }
  0xab   :  { %3213 = vmatmul.mubr.f32.vlgmr.msra.gmra.mxu0 %v60_v7  ;;  %3283 = vmatprep.mubr.f32.mxu1 %v63_v11  ;;  %v414_v7 = vld [vmem:[#allocation2 + $0xa40] sm:$0xff]  ;;  %v1706_v11 = vunpack.c.l.bf16 %v416_v1  ;;  %v1574_v16 = vunpack.c.l.bf16 %v350_v6 }
  0xac   :  { %3290 = vmatprep.subr.mxu0 %v1619_v8  ;;  %3361 = vmatprep.subr.mxu1 %v1747_v12  ;;  %v1579_v8 = vunpack.c.h.bf16 %v352_v0  ;;  %v348_v12 = vld [vmem:[#allocation2 + $0x830] sm:$0xff]  ;;  %v1702_v17 = vunpack.c.l.bf16 %v414_v7 }
  0xad   :  { %3284 = vmatmul.mubr.f32.vlgmr.msra.gmra.mxu1 %v62_v15  ;;  %3291 = vmatpush1.msra.mxu0 %v1618_v13  ;;  %v412_v13 = vld [vmem:[#allocation2 + $0xa30] sm:$0xff]  ;;  %v1703_v15 = vunpack.c.h.bf16 %v414_v7  ;;  %v1570_v22 = vunpack.c.l.bf16 %v348_v12 }
  0xae   :  { %3362 = vmatpush1.msra.mxu1 %v1746_v14  ;;  %3292 = vmatprep.subr.mxu0 %v1615_v18  ;;  %v1575_v14 = vunpack.c.h.bf16 %v350_v6  ;;  %v346_v18 = vld [vmem:[#allocation2 + $0x820] sm:$0xff]  ;;  %v1698_v23 = vunpack.c.l.bf16 %v412_v13 }
  0xaf   :  { %3363 = vmatprep.subr.mxu1 %v1743_v19  ;;  %3293 = vmatpush1.msra.mxu0 %v1614_v20  ;;  %v410_v19 = vld [vmem:[#allocation2 + $0xa20] sm:$0xff]  ;;  %v1571_v20 = vunpack.c.h.bf16 %v348_v12  ;;  %v1566_v28 = vunpack.c.l.bf16 %v346_v18 }
  0xb0   :  { %3364 = vmatpush1.msra.mxu1 %v1742_v21  ;;  %3294 = vmatprep.subr.mxu0 %v1611_v24  ;;  %v1699_v21 = vunpack.c.h.bf16 %v412_v13  ;;  %v344_v24 = vld [vmem:[#allocation2 + $0x810] sm:$0xff]  ;;  %v1694_v29 = vunpack.c.l.bf16 %v410_v19 }
  0xb1   :  { %3365 = vmatprep.subr.mxu1 %v1739_v25  ;;  %3295 = vmatpush1.msra.mxu0 %v1610_v26  ;;  %v408_v25 = vld [vmem:[#allocation2 + $0xa10] sm:$0xff]  ;;  %v1567_v26 = vunpack.c.h.bf16 %v346_v18  ;;  %v1562_v34 = vunpack.c.l.bf16 %v344_v24 }
  0xb2   :  { %3366 = vmatpush1.msra.mxu1 %v1738_v27  ;;  %3296 = vmatprep.subr.mxu0 %v1607_v30  ;;  %v1695_v27 = vunpack.c.h.bf16 %v410_v19  ;;  %v342_v30 = vld [vmem:[#allocation2 + $0x800] sm:$0xff]  ;;  %v1690_v35 = vunpack.c.l.bf16 %v408_v25 }
  0xb3   :  { %3367 = vmatprep.subr.mxu1 %v1735_v31  ;;  %3297 = vmatpush1.msra.mxu0 %v1606_v32  ;;  %v406_v31 = vld [vmem:[#allocation2 + $0xa00] sm:$0xff]  ;;  %v1563_v32 = vunpack.c.h.bf16 %v344_v24  ;;  %v1558_v40 = vunpack.c.l.bf16 %v342_v30 }
  0xb4   :  { %3368 = vmatpush1.msra.mxu1 %v1734_v33  ;;  %3298 = vmatprep.subr.mxu0 %v1603_v36  ;;  %v1691_v33 = vunpack.c.h.bf16 %v408_v25  ;;  %v404_v36 = vld [vmem:[#allocation2 + $0x9f0] sm:$0xff]  ;;  %v1686_v41 = vunpack.c.l.bf16 %v406_v31 }
  0xb5   :  { %3369 = vmatprep.subr.mxu1 %v1731_v37  ;;  %3299 = vmatpush1.msra.mxu0 %v1602_v38  ;;  %v468_v37 = vld [vmem:[#allocation2 + $0xbf0] sm:$0xff]  ;;  %v1559_v38 = vunpack.c.h.bf16 %v342_v30  ;;  %v1682_v46 = vunpack.c.l.bf16 %v404_v36 }
  0xb6   :  { %3370 = vmatpush1.msra.mxu1 %v1730_v39  ;;  %3300 = vmatprep.subr.mxu0 %v1599_v42  ;;  %v1687_v39 = vunpack.c.h.bf16 %v406_v31  ;;  %v402_v42 = vld [vmem:[#allocation2 + $0x9e0] sm:$0xff]  ;;  %v1810_v47 = vunpack.c.l.bf16 %v468_v37 }
  0xb7   :  { %3371 = vmatprep.subr.mxu1 %v1727_v43  ;;  %3301 = vmatpush1.msra.mxu0 %v1598_v44  ;;  %v466_v43 = vld [vmem:[#allocation2 + $0xbe0] sm:$0xff]  ;;  %v1683_v44 = vunpack.c.h.bf16 %v404_v36  ;;  %v1678_v52 = vunpack.c.l.bf16 %v402_v42 }
  0xb8   :  { %3372 = vmatpush1.msra.mxu1 %v1726_v45  ;;  %3302 = vmatprep.subr.mxu0 %v1595_v48  ;;  %v1811_v45 = vunpack.c.h.bf16 %v468_v37  ;;  %v400_v48 = vld [vmem:[#allocation2 + $0x9d0] sm:$0xff]  ;;  %v1806_v53 = vunpack.c.l.bf16 %v466_v43 }
  0xb9   :  { %3373 = vmatprep.subr.mxu1 %v1723_v49  ;;  %3303 = vmatpush1.msra.mxu0 %v1594_v50  ;;  %v464_v49 = vld [vmem:[#allocation2 + $0xbd0] sm:$0xff]  ;;  %v1679_v50 = vunpack.c.h.bf16 %v402_v42  ;;  %v1674_v58 = vunpack.c.l.bf16 %v400_v48 }
  0xba   :  { %3374 = vmatpush1.msra.mxu1 %v1722_v51  ;;  %3304 = vmatprep.subr.mxu0 %v1591_v54  ;;  %v1807_v51 = vunpack.c.h.bf16 %v466_v43  ;;  %v398_v54 = vld [vmem:[#allocation2 + $0x9c0] sm:$0xff]  ;;  %v1802_v59 = vunpack.c.l.bf16 %v464_v49 }
  0xbb   :  { %3375 = vmatprep.subr.mxu1 %v1719_v55  ;;  %3305 = vmatpush1.msra.mxu0 %v1590_v56  ;;  %v462_v55 = vld [vmem:[#allocation2 + $0xbc0] sm:$0xff]  ;;  %v1675_v56 = vunpack.c.h.bf16 %v400_v48  ;;  %v1670_v0 = vunpack.c.l.bf16 %v398_v54 }
  0xbc   :  { %3376 = vmatpush1.msra.mxu1 %v1718_v57  ;;  %3306 = vmatprep.subr.mxu0 %v1587_v60  ;;  %v1803_v57 = vunpack.c.h.bf16 %v464_v49  ;;  %v396_v60 = vld [vmem:[#allocation2 + $0x9b0] sm:$0xff]  ;;  %v1798_v1 = vunpack.c.l.bf16 %v462_v55 }
  0xbd   :  { %3377 = vmatprep.subr.mxu1 %v1715_v61  ;;  %3307 = vmatpush1.msra.mxu0 %v1586_v62  ;;  %v460_v61 = vld [vmem:[#allocation2 + $0xbb0] sm:$0xff]  ;;  %v1671_v62 = vunpack.c.h.bf16 %v398_v54  ;;  %v1666_v6 = vunpack.c.l.bf16 %v396_v60 }
  0xbe   :  { %3378 = vmatpush1.msra.mxu1 %v1714_v63  ;;  %3308 = vmatprep.subr.mxu0 %v1583_v2  ;;  %v1799_v63 = vunpack.c.h.bf16 %v462_v55  ;;  %v394_v2 = vld [vmem:[#allocation2 + $0x9a0] sm:$0xff]  ;;  %v1794_v7 = vunpack.c.l.bf16 %v460_v61 }
  0xbf   :  { %3379 = vmatprep.subr.mxu1 %v1711_v3  ;;  %3309 = vmatpush1.msra.mxu0 %v1582_v4  ;;  %v458_v3 = vld [vmem:[#allocation2 + $0xba0] sm:$0xff]  ;;  %v1667_v4 = vunpack.c.h.bf16 %v396_v60  ;;  %v1662_v12 = vunpack.c.l.bf16 %v394_v2 }
  0xc0   :  { %3380 = vmatpush1.msra.mxu1 %v1710_v5  ;;  %3310 = vmatprep.subr.mxu0 %v1579_v8  ;;  %v1795_v5 = vunpack.c.h.bf16 %v460_v61  ;;  %v392_v8 = vld [vmem:[#allocation2 + $0x990] sm:$0xff]  ;;  %v1790_v13 = vunpack.c.l.bf16 %v458_v3 }
  0xc1   :  { %3381 = vmatprep.subr.mxu1 %v1707_v9  ;;  %3311 = vmatpush1.msra.mxu0 %v1578_v10  ;;  %v456_v9 = vld [vmem:[#allocation2 + $0xb90] sm:$0xff]  ;;  %v1663_v10 = vunpack.c.h.bf16 %v394_v2  ;;  %v1658_v18 = vunpack.c.l.bf16 %v392_v8 }
  0xc2   :  { %3382 = vmatpush1.msra.mxu1 %v1706_v11  ;;  %3312 = vmatprep.subr.mxu0 %v1575_v14  ;;  %v1791_v11 = vunpack.c.h.bf16 %v458_v3  ;;  %v390_v14 = vld [vmem:[#allocation2 + $0x980] sm:$0xff]  ;;  %v1786_v19 = vunpack.c.l.bf16 %v456_v9 }
  0xc3   :  { %3383 = vmatprep.subr.mxu1 %v1703_v15  ;;  %3313 = vmatpush1.msra.mxu0 %v1574_v16  ;;  %v454_v15 = vld [vmem:[#allocation2 + $0xb80] sm:$0xff]  ;;  %v1659_v16 = vunpack.c.h.bf16 %v392_v8  ;;  %v1654_v24 = vunpack.c.l.bf16 %v390_v14  ;;  %v564_v8 = vld [vmem:[#allocation2 + $0xef0] sm:$0xff] }
  0xc4   :  { %3384 = vmatpush1.msra.mxu1 %v1702_v17  ;;  %3314 = vmatprep.subr.mxu0 %v1571_v20  ;;  %v1787_v17 = vunpack.c.h.bf16 %v456_v9  ;;  %v388_v20 = vld [vmem:[#allocation2 + $0x970] sm:$0xff]  ;;  %v1782_v25 = vunpack.c.l.bf16 %v454_v15 }
  0xc5   :  { %3385 = vmatprep.subr.mxu1 %v1699_v21  ;;  %3315 = vmatpush1.msra.mxu0 %v1570_v22  ;;  %v452_v21 = vld [vmem:[#allocation2 + $0xb70] sm:$0xff]  ;;  %v1655_v22 = vunpack.c.h.bf16 %v390_v14  ;;  %v1650_v30 = vunpack.c.l.bf16 %v388_v20  ;;  %v562_v14 = vld [vmem:[#allocation2 + $0xee0] sm:$0xff] }
  0xc6   :  { %3386 = vmatpush1.msra.mxu1 %v1698_v23  ;;  %3316 = vmatprep.subr.mxu0 %v1567_v26  ;;  %v1783_v23 = vunpack.c.h.bf16 %v454_v15  ;;  %v386_v26 = vld [vmem:[#allocation2 + $0x960] sm:$0xff]  ;;  %v1778_v31 = vunpack.c.l.bf16 %v452_v21  ;;  %v67_v15 = vld [vmem:[%s6067_s0 + $0x58] sm:$0xff] }
  0xc7   :  { %3387 = vmatprep.subr.mxu1 %v1695_v27  ;;  %3317 = vmatpush1.msra.mxu0 %v1566_v28  ;;  %v450_v27 = vld [vmem:[#allocation2 + $0xb60] sm:$0xff]  ;;  %v1651_v28 = vunpack.c.h.bf16 %v388_v20  ;;  %v1646_v36 = vunpack.c.l.bf16 %v386_v26  ;;  %v496_v20 = vld [vmem:[#allocation2 + $0xcd0] sm:$0xff] }
  0xc8   :  { %3388 = vmatpush1.msra.mxu1 %v1694_v29  ;;  %3318 = vmatprep.subr.mxu0 %v1563_v32  ;;  %v1779_v29 = vunpack.c.h.bf16 %v452_v21  ;;  %v384_v32 = vld [vmem:[#allocation2 + $0x950] sm:$0xff]  ;;  %v1774_v37 = vunpack.c.l.bf16 %v450_v27 }
  0xc9   :  { %3389 = vmatprep.subr.mxu1 %v1691_v33  ;;  %3319 = vmatpush1.msra.mxu0 %v1562_v34  ;;  %v448_v33 = vld [vmem:[#allocation2 + $0xb50] sm:$0xff]  ;;  %v1647_v34 = vunpack.c.h.bf16 %v386_v26  ;;  %v1642_v42 = vunpack.c.l.bf16 %v384_v32  ;;  %v494_v26 = vld [vmem:[#allocation2 + $0xcc0] sm:$0xff] }
  0xca   :  { %3390 = vmatpush1.msra.mxu1 %v1690_v35  ;;  %3320 = vmatprep.subr.mxu0 %v1559_v38  ;;  %v1775_v35 = vunpack.c.h.bf16 %v450_v27  ;;  %v382_v38 = vld [vmem:[#allocation2 + $0x940] sm:$0xff]  ;;  %v1770_v43 = vunpack.c.l.bf16 %v448_v33  ;;  %v560_v21 = vld [vmem:[#allocation2 + $0xed0] sm:$0xff] }
  0xcb   :  { %3391 = vmatprep.subr.mxu1 %v1687_v39  ;;  %3321 = vmatpush1.msra.mxu0 %v1558_v40  ;;  %v446_v39 = vld [vmem:[#allocation2 + $0xb40] sm:$0xff]  ;;  %v1643_v40 = vunpack.c.h.bf16 %v384_v32  ;;  %v1638_v48 = vunpack.c.l.bf16 %v382_v38  ;;  %v492_v32 = vld [vmem:[#allocation2 + $0xcb0] sm:$0xff] }
  0xcc   :  { %3392 = vmatpush1.msra.mxu1 %v1686_v41  ;;  %3322 = vmatprep.subr.mxu0 %v1683_v44  ;;  %v1771_v41 = vunpack.c.h.bf16 %v448_v33  ;;  %v380_v44 = vld [vmem:[#allocation2 + $0x930] sm:$0xff]  ;;  %v1766_v49 = vunpack.c.l.bf16 %v446_v39  ;;  %v558_v27 = vld [vmem:[#allocation2 + $0xec0] sm:$0xff] }
  0xcd   :  { %3393 = vmatprep.subr.mxu1 %v1811_v45  ;;  %3323 = vmatpush2.msra.mxu0 %v1682_v46  ;;  %v444_v45 = vld [vmem:[#allocation2 + $0xb30] sm:$0xff]  ;;  %v1639_v46 = vunpack.c.h.bf16 %v382_v38  ;;  %v1634_v54 = vunpack.c.l.bf16 %v380_v44  ;;  %v490_v38 = vld [vmem:[#allocation2 + $0xca0] sm:$0xff] }
  0xce   :  { %3394 = vmatpush2.msra.mxu1 %v1810_v47  ;;  %3324 = vmatprep.subr.mxu0 %v1679_v50  ;;  %v1767_v47 = vunpack.c.h.bf16 %v446_v39  ;;  %v378_v50 = vld [vmem:[#allocation2 + $0x920] sm:$0xff]  ;;  %v1762_v55 = vunpack.c.l.bf16 %v444_v45  ;;  %v556_v33 = vld [vmem:[#allocation2 + $0xeb0] sm:$0xff] }
  0xcf   :  { %3395 = vmatprep.subr.mxu1 %v1807_v51  ;;  %3325 = vmatpush2.msra.mxu0 %v1678_v52  ;;  %v442_v51 = vld [vmem:[#allocation2 + $0xb20] sm:$0xff]  ;;  %v1635_v52 = vunpack.c.h.bf16 %v380_v44  ;;  %v1630_v60 = vunpack.c.l.bf16 %v378_v50  ;;  %v488_v44 = vld [vmem:[#allocation2 + $0xc90] sm:$0xff] }
  0xd0   :  { %3396 = vmatpush2.msra.mxu1 %v1806_v53  ;;  %3326 = vmatprep.subr.mxu0 %v1675_v56  ;;  %v1763_v53 = vunpack.c.h.bf16 %v444_v45  ;;  %v376_v56 = vld [vmem:[#allocation2 + $0x910] sm:$0xff]  ;;  %v1758_v61 = vunpack.c.l.bf16 %v442_v51  ;;  %v554_v39 = vld [vmem:[#allocation2 + $0xea0] sm:$0xff] }
  0xd1   :  { %3397 = vmatprep.subr.mxu1 %v1803_v57  ;;  %3327 = vmatpush2.msra.mxu0 %v1674_v58  ;;  %v440_v57 = vld [vmem:[#allocation2 + $0xb10] sm:$0xff]  ;;  %v1631_v58 = vunpack.c.h.bf16 %v378_v50  ;;  %v1626_v2 = vunpack.c.l.bf16 %v376_v56  ;;  %v486_v50 = vld [vmem:[#allocation2 + $0xc80] sm:$0xff] }
  0xd2   :  { %3398 = vmatpush2.msra.mxu1 %v1802_v59  ;;  %3328 = vmatprep.subr.mxu0 %v1671_v62  ;;  %v1759_v59 = vunpack.c.h.bf16 %v442_v51  ;;  %v374_v62 = vld [vmem:[#allocation2 + $0x900] sm:$0xff]  ;;  %v1754_v3 = vunpack.c.l.bf16 %v440_v57  ;;  %v552_v45 = vld [vmem:[#allocation2 + $0xe90] sm:$0xff] }
  0xd3   :  { %3399 = vmatprep.subr.mxu1 %v1799_v63  ;;  %3329 = vmatpush2.msra.mxu0 %v1670_v0  ;;  %v438_v63 = vld [vmem:[#allocation2 + $0xb00] sm:$0xff]  ;;  %v1627_v0 = vunpack.c.h.bf16 %v376_v56  ;;  %v484_v56 = vld [vmem:[#allocation2 + $0xc70] sm:$0xff] }
  0xd4   :  { %3400 = vmatpush2.msra.mxu1 %v1798_v1  ;;  %3330 = vmatprep.subr.mxu0 %v1667_v4  ;;  %v1755_v1 = vunpack.c.h.bf16 %v440_v57  ;;  %v1623_v4 = vunpack.c.h.bf16 %v374_v62  ;;  %v1750_v9 = vunpack.c.l.bf16 %v438_v63  ;;  %v550_v51 = vld [vmem:[#allocation2 + $0xe80] sm:$0xff]  ;;  %v548_v57 = vld [vmem:[#allocation2 + $0xe70] sm:$0xff] }
  0xd5   :  { %3401 = vmatprep.subr.mxu1 %v1795_v5  ;;  %3331 = vmatpush2.msra.mxu0 %v1666_v6  ;;  %v1751_v5 = vunpack.c.h.bf16 %v438_v63  ;;  %v500_v6 = vld [vmem:[#allocation2 + $0xcf0] sm:$0xff]  ;;  %v546_v63 = vld [vmem:[#allocation2 + $0xe60] sm:$0xff] }
  0xd6   :  { %3402 = vmatpush2.msra.mxu1 %v1794_v7  ;;  %3332 = vmatprep.subr.mxu0 %v1663_v10  ;;  %v1622_v7 = vunpack.c.l.bf16 %v374_v62  ;;  %v65_v10 = vld [vmem:[%s6067_s0 + $0x48] sm:$0xff]  ;;  %v482_v62 = vld [vmem:[#allocation2 + $0xc60] sm:$0xff] }
  0xd7   :  { %3403 = vmatprep.subr.mxu1 %v1791_v11  ;;  %3333 = vmatpush2.msra.mxu0 %v1662_v12  ;;  %v64_v11 = vld [vmem:[%s6067_s0 + $0x40] sm:$0xff]  ;;  %v1875_v12 = vunpack.c.h.bf16 %v500_v6 }
  0xd8   :  { %3404 = vmatpush2.msra.mxu1 %v1790_v13  ;;  %3334 = vmatprep.subr.mxu0 %v1659_v16  ;;  %v498_v13 = vld [vmem:[#allocation2 + $0xce0] sm:$0xff]  ;;  %v2003_v16 = vunpack.c.h.bf16 %v564_v8 }
  0xd9   :  { %3405 = vmatprep.subr.mxu1 %v1787_v17  ;;  %3335 = vmatpush2.msra.mxu0 %v1658_v18  ;;  %v1874_v17 = vunpack.c.l.bf16 %v500_v6  ;;  %v2002_v18 = vunpack.c.l.bf16 %v564_v8  ;;  %v1839_v6 = vunpack.c.h.bf16 %v482_v62  ;;  %v1838_v8 = vunpack.c.l.bf16 %v482_v62 }
  0xda   :  { %3406 = vmatpush2.msra.mxu1 %v1786_v19  ;;  %3336 = vmatprep.subr.mxu0 %v1655_v22  ;;  %v66_v19 = vld [vmem:[%s6067_s0 + $0x50] sm:$0xff]  ;;  %v1871_v22 = vunpack.c.h.bf16 %v498_v13 }
  0xdb   :  { %3407 = vmatprep.subr.mxu1 %v1783_v23  ;;  %3337 = vmatpush2.msra.mxu0 %v1654_v24  ;;  %v1999_v23 = vunpack.c.h.bf16 %v562_v14  ;;  %v1870_v24 = vunpack.c.l.bf16 %v498_v13 }
  0xdc   :  { %3408 = vmatpush2.msra.mxu1 %v1782_v25  ;;  %3338 = vmatprep.subr.mxu0 %v1651_v28  ;;  %v1998_v25 = vunpack.c.l.bf16 %v562_v14  ;;  %v1867_v28 = vunpack.c.h.bf16 %v496_v20 }
  0xdd   :  { %3409 = vmatprep.subr.mxu1 %v1779_v29  ;;  %3339 = vmatpush2.msra.mxu0 %v1650_v30  ;;  %v1995_v29 = vunpack.c.h.bf16 %v560_v21  ;;  %v1866_v30 = vunpack.c.l.bf16 %v496_v20 }
  0xde   :  { %3410 = vmatpush2.msra.mxu1 %v1778_v31  ;;  %3340 = vmatprep.subr.mxu0 %v1647_v34  ;;  %v1994_v31 = vunpack.c.l.bf16 %v560_v21  ;;  %v1863_v34 = vunpack.c.h.bf16 %v494_v26 }
  0xdf   :  { %3411 = vmatprep.subr.mxu1 %v1775_v35  ;;  %3341 = vmatpush2.msra.mxu0 %v1646_v36  ;;  %v1991_v35 = vunpack.c.h.bf16 %v558_v27  ;;  %v1862_v36 = vunpack.c.l.bf16 %v494_v26 }
  0xe0   :  { %3412 = vmatpush2.msra.mxu1 %v1774_v37  ;;  %3342 = vmatprep.subr.mxu0 %v1643_v40  ;;  %v1990_v37 = vunpack.c.l.bf16 %v558_v27  ;;  %v1859_v40 = vunpack.c.h.bf16 %v492_v32 }
  0xe1   :  { %3413 = vmatprep.subr.mxu1 %v1771_v41  ;;  %3343 = vmatpush2.msra.mxu0 %v1642_v42  ;;  %v1987_v41 = vunpack.c.h.bf16 %v556_v33  ;;  %v1858_v42 = vunpack.c.l.bf16 %v492_v32 }
  0xe2   :  { %3414 = vmatpush2.msra.mxu1 %v1770_v43  ;;  %3344 = vmatprep.subr.mxu0 %v1639_v46  ;;  %v1986_v43 = vunpack.c.l.bf16 %v556_v33  ;;  %v1855_v46 = vunpack.c.h.bf16 %v490_v38 }
  0xe3   :  { %3415 = vmatprep.subr.mxu1 %v1767_v47  ;;  %3345 = vmatpush2.msra.mxu0 %v1638_v48  ;;  %v1983_v47 = vunpack.c.h.bf16 %v554_v39  ;;  %v1854_v48 = vunpack.c.l.bf16 %v490_v38 }
  0xe4   :  { %3416 = vmatpush2.msra.mxu1 %v1766_v49  ;;  %3346 = vmatprep.subr.mxu0 %v1635_v52  ;;  %v1982_v49 = vunpack.c.l.bf16 %v554_v39  ;;  %v1851_v52 = vunpack.c.h.bf16 %v488_v44 }
  0xe5   :  { %3417 = vmatprep.subr.mxu1 %v1763_v53  ;;  %3347 = vmatpush2.msra.mxu0 %v1634_v54  ;;  %v1979_v53 = vunpack.c.h.bf16 %v552_v45  ;;  %v1850_v54 = vunpack.c.l.bf16 %v488_v44 }
  0xe6   :  { %3418 = vmatpush2.msra.mxu1 %v1762_v55  ;;  %3348 = vmatprep.subr.mxu0 %v1631_v58  ;;  %v1978_v55 = vunpack.c.l.bf16 %v552_v45  ;;  %v1847_v58 = vunpack.c.h.bf16 %v486_v50 }
  0xe7   :  { %3419 = vmatprep.subr.mxu1 %v1759_v59  ;;  %3349 = vmatpush2.msra.mxu0 %v1630_v60  ;;  %v1975_v59 = vunpack.c.h.bf16 %v550_v51  ;;  %v1846_v60 = vunpack.c.l.bf16 %v486_v50 }
  0xe8   :  { %3420 = vmatpush2.msra.mxu1 %v1758_v61  ;;  %3350 = vmatprep.subr.mxu0 %v1627_v0  ;;  %v1974_v61 = vunpack.c.l.bf16 %v550_v51  ;;  %v1843_v0 = vunpack.c.h.bf16 %v484_v56 }
  0xe9   :  { %3421 = vmatprep.subr.mxu1 %v1755_v1  ;;  %3351 = vmatpush2.msra.mxu0 %v1626_v2  ;;  %v1971_v1 = vunpack.c.h.bf16 %v548_v57  ;;  %v1842_v2 = vunpack.c.l.bf16 %v484_v56 }
  0xea   :  { %3422 = vmatpush2.msra.mxu1 %v1754_v3  ;;  %3352 = vmatprep.subr.mxu0 %v1623_v4  ;;  %v1970_v3 = vunpack.c.l.bf16 %v548_v57  ;;  %v480_v4 = vld [vmem:[#allocation2 + $0xc50] sm:$0xff] }
  0xeb   :  { %3423 = vmatprep.subr.mxu1 %v1751_v5  ;;  %3353 = vmatpush2.msra.mxu0 %v1622_v7  ;;  %v544_v5 = vld [vmem:[#allocation2 + $0xe50] sm:$0xff]  ;;  %v1967_v7 = vunpack.c.h.bf16 %v546_v63  ;;  %v1834_v14 = vunpack.c.l.bf16 %v480_v4 }
  0xec   :  { %3354 = vmatprep.mubr.f32.mxu0 %v65_v10  ;;  %3424 = vmatpush2.msra.mxu1 %v1750_v9  ;;  %v1966_v9 = vunpack.c.l.bf16 %v546_v63  ;;  %v478_v10 = vld [vmem:[#allocation2 + $0xc40] sm:$0xff]  ;;  %v1963_v13 = vunpack.c.h.bf16 %v544_v5 }
  0xed   :  { %3355 = vmatmul.mubr.f32.vlgmr.msra.gmra.mxu0 %v64_v11  ;;  %3425 = vmatprep.mubr.f32.mxu1 %v67_v15  ;;  %v542_v11 = vld [vmem:[#allocation2 + $0xe40] sm:$0xff]  ;;  %v1962_v15 = vunpack.c.l.bf16 %v544_v5  ;;  %v1830_v20 = vunpack.c.l.bf16 %v478_v10 }
  0xee   :  { %3432 = vmatprep.subr.mxu0 %v1875_v12  ;;  %3503 = vmatprep.subr.mxu1 %v2003_v16  ;;  %v1835_v12 = vunpack.c.h.bf16 %v480_v4  ;;  %v476_v16 = vld [vmem:[#allocation2 + $0xc30] sm:$0xff]  ;;  %v1958_v21 = vunpack.c.l.bf16 %v542_v11 }
  0xef   :  { %3426 = vmatmul.mubr.f32.vlgmr.msra.gmra.mxu1 %v66_v19  ;;  %3433 = vmatpush1.msra.mxu0 %v1874_v17  ;;  %v540_v17 = vld [vmem:[#allocation2 + $0xe30] sm:$0xff]  ;;  %v1959_v19 = vunpack.c.h.bf16 %v542_v11  ;;  %v1826_v26 = vunpack.c.l.bf16 %v476_v16 }
  0xf0   :  { %3504 = vmatpush1.msra.mxu1 %v2002_v18  ;;  %3434 = vmatprep.subr.mxu0 %v1871_v22  ;;  %v1831_v18 = vunpack.c.h.bf16 %v478_v10  ;;  %v474_v22 = vld [vmem:[#allocation2 + $0xc20] sm:$0xff]  ;;  %v1954_v27 = vunpack.c.l.bf16 %v540_v17 }
  0xf1   :  { %3505 = vmatprep.subr.mxu1 %v1999_v23  ;;  %3435 = vmatpush1.msra.mxu0 %v1870_v24  ;;  %v538_v23 = vld [vmem:[#allocation2 + $0xe20] sm:$0xff]  ;;  %v1827_v24 = vunpack.c.h.bf16 %v476_v16  ;;  %v1822_v32 = vunpack.c.l.bf16 %v474_v22 }
  0xf2   :  { %3506 = vmatpush1.msra.mxu1 %v1998_v25  ;;  %3436 = vmatprep.subr.mxu0 %v1867_v28  ;;  %v1955_v25 = vunpack.c.h.bf16 %v540_v17  ;;  %v472_v28 = vld [vmem:[#allocation2 + $0xc10] sm:$0xff]  ;;  %v1950_v33 = vunpack.c.l.bf16 %v538_v23 }
  0xf3   :  { %3507 = vmatprep.subr.mxu1 %v1995_v29  ;;  %3437 = vmatpush1.msra.mxu0 %v1866_v30  ;;  %v536_v29 = vld [vmem:[#allocation2 + $0xe10] sm:$0xff]  ;;  %v1823_v30 = vunpack.c.h.bf16 %v474_v22  ;;  %v1818_v38 = vunpack.c.l.bf16 %v472_v28 }
  0xf4   :  { %3508 = vmatpush1.msra.mxu1 %v1994_v31  ;;  %3438 = vmatprep.subr.mxu0 %v1863_v34  ;;  %v1951_v31 = vunpack.c.h.bf16 %v538_v23  ;;  %v470_v34 = vld [vmem:[#allocation2 + $0xc00] sm:$0xff]  ;;  %v1946_v39 = vunpack.c.l.bf16 %v536_v29 }
  0xf5   :  { %3509 = vmatprep.subr.mxu1 %v1991_v35  ;;  %3439 = vmatpush1.msra.mxu0 %v1862_v36  ;;  %v534_v35 = vld [vmem:[#allocation2 + $0xe00] sm:$0xff]  ;;  %v1819_v36 = vunpack.c.h.bf16 %v472_v28  ;;  %v1814_v44 = vunpack.c.l.bf16 %v470_v34 }
  0xf6   :  { %3510 = vmatpush1.msra.mxu1 %v1990_v37  ;;  %3440 = vmatprep.subr.mxu0 %v1859_v40  ;;  %v1947_v37 = vunpack.c.h.bf16 %v536_v29  ;;  %v532_v40 = vld [vmem:[#allocation2 + $0xdf0] sm:$0xff]  ;;  %v1942_v45 = vunpack.c.l.bf16 %v534_v35 }
  0xf7   :  { %3511 = vmatprep.subr.mxu1 %v1987_v41  ;;  %3441 = vmatpush1.msra.mxu0 %v1858_v42  ;;  %v596_v41 = vld [vmem:[#allocation2 + $0xff0] sm:$0xff]  ;;  %v1815_v42 = vunpack.c.h.bf16 %v470_v34  ;;  %v1938_v50 = vunpack.c.l.bf16 %v532_v40 }
  0xf8   :  { %3512 = vmatpush1.msra.mxu1 %v1986_v43  ;;  %3442 = vmatprep.subr.mxu0 %v1855_v46  ;;  %v1943_v43 = vunpack.c.h.bf16 %v534_v35  ;;  %v530_v46 = vld [vmem:[#allocation2 + $0xde0] sm:$0xff]  ;;  %v2066_v51 = vunpack.c.l.bf16 %v596_v41 }
  0xf9   :  { %3513 = vmatprep.subr.mxu1 %v1983_v47  ;;  %3443 = vmatpush1.msra.mxu0 %v1854_v48  ;;  %v594_v47 = vld [vmem:[#allocation2 + $0xfe0] sm:$0xff]  ;;  %v1939_v48 = vunpack.c.h.bf16 %v532_v40  ;;  %v1934_v56 = vunpack.c.l.bf16 %v530_v46 }
  0xfa   :  { %3514 = vmatpush1.msra.mxu1 %v1982_v49  ;;  %3444 = vmatprep.subr.mxu0 %v1851_v52  ;;  %v2067_v49 = vunpack.c.h.bf16 %v596_v41  ;;  %v528_v52 = vld [vmem:[#allocation2 + $0xdd0] sm:$0xff]  ;;  %v2062_v57 = vunpack.c.l.bf16 %v594_v47 }
  0xfb   :  { %3515 = vmatprep.subr.mxu1 %v1979_v53  ;;  %3445 = vmatpush1.msra.mxu0 %v1850_v54  ;;  %v592_v53 = vld [vmem:[#allocation2 + $0xfd0] sm:$0xff]  ;;  %v1935_v54 = vunpack.c.h.bf16 %v530_v46  ;;  %v1930_v62 = vunpack.c.l.bf16 %v528_v52 }
  0xfc   :  { %3516 = vmatpush1.msra.mxu1 %v1978_v55  ;;  %3446 = vmatprep.subr.mxu0 %v1847_v58  ;;  %v2063_v55 = vunpack.c.h.bf16 %v594_v47  ;;  %v526_v58 = vld [vmem:[#allocation2 + $0xdc0] sm:$0xff]  ;;  %v2058_v63 = vunpack.c.l.bf16 %v592_v53 }
  0xfd   :  { %3517 = vmatprep.subr.mxu1 %v1975_v59  ;;  %3447 = vmatpush1.msra.mxu0 %v1846_v60  ;;  %v590_v59 = vld [vmem:[#allocation2 + $0xfc0] sm:$0xff]  ;;  %v1931_v60 = vunpack.c.h.bf16 %v528_v52  ;;  %v1926_v4 = vunpack.c.l.bf16 %v526_v58 }
  0xfe   :  { %3518 = vmatpush1.msra.mxu1 %v1974_v61  ;;  %3448 = vmatprep.subr.mxu0 %v1843_v0  ;;  %v2059_v61 = vunpack.c.h.bf16 %v592_v53  ;;  %v524_v0 = vld [vmem:[#allocation2 + $0xdb0] sm:$0xff]  ;;  %v2054_v5 = vunpack.c.l.bf16 %v590_v59 }
  0xff   :  { %3519 = vmatprep.subr.mxu1 %v1971_v1  ;;  %3449 = vmatpush1.msra.mxu0 %v1842_v2  ;;  %v588_v1 = vld [vmem:[#allocation2 + $0xfb0] sm:$0xff]  ;;  %v1927_v2 = vunpack.c.h.bf16 %v526_v58  ;;  %v1922_v10 = vunpack.c.l.bf16 %v524_v0 }
 0x100   :  { %3520 = vmatpush1.msra.mxu1 %v1970_v3  ;;  %3450 = vmatprep.subr.mxu0 %v1839_v6  ;;  %v2055_v3 = vunpack.c.h.bf16 %v590_v59  ;;  %v522_v6 = vld [vmem:[#allocation2 + $0xda0] sm:$0xff]  ;;  %v2050_v11 = vunpack.c.l.bf16 %v588_v1 }
 0x101   :  { %3521 = vmatprep.subr.mxu1 %v1967_v7  ;;  %3451 = vmatpush1.msra.mxu0 %v1838_v8  ;;  %v586_v7 = vld [vmem:[#allocation2 + $0xfa0] sm:$0xff]  ;;  %v1923_v8 = vunpack.c.h.bf16 %v524_v0  ;;  %v1918_v16 = vunpack.c.l.bf16 %v522_v6 }
 0x102   :  { %3522 = vmatpush1.msra.mxu1 %v1966_v9  ;;  %3452 = vmatprep.subr.mxu0 %v1835_v12  ;;  %v2051_v9 = vunpack.c.h.bf16 %v588_v1  ;;  %v520_v12 = vld [vmem:[#allocation2 + $0xd90] sm:$0xff]  ;;  %v2046_v17 = vunpack.c.l.bf16 %v586_v7 }
 0x103   :  { %3523 = vmatprep.subr.mxu1 %v1963_v13  ;;  %3453 = vmatpush1.msra.mxu0 %v1834_v14  ;;  %v584_v13 = vld [vmem:[#allocation2 + $0xf90] sm:$0xff]  ;;  %v1919_v14 = vunpack.c.h.bf16 %v522_v6  ;;  %v1914_v22 = vunpack.c.l.bf16 %v520_v12 }
 0x104   :  { %3524 = vmatpush1.msra.mxu1 %v1962_v15  ;;  %3454 = vmatprep.subr.mxu0 %v1831_v18  ;;  %v2047_v15 = vunpack.c.h.bf16 %v586_v7  ;;  %v518_v18 = vld [vmem:[#allocation2 + $0xd80] sm:$0xff]  ;;  %v2042_v23 = vunpack.c.l.bf16 %v584_v13 }
 0x105   :  { %3525 = vmatprep.subr.mxu1 %v1959_v19  ;;  %3455 = vmatpush1.msra.mxu0 %v1830_v20  ;;  %v582_v19 = vld [vmem:[#allocation2 + $0xf80] sm:$0xff]  ;;  %v1915_v20 = vunpack.c.h.bf16 %v520_v12  ;;  %v1910_v28 = vunpack.c.l.bf16 %v518_v18  ;;  %v692_v12 = vld [vmem:[#allocation2 + $0x12f0] sm:$0xff] }
 0x106   :  { %3526 = vmatpush1.msra.mxu1 %v1958_v21  ;;  %3456 = vmatprep.subr.mxu0 %v1827_v24  ;;  %v2043_v21 = vunpack.c.h.bf16 %v584_v13  ;;  %v516_v24 = vld [vmem:[#allocation2 + $0xd70] sm:$0xff]  ;;  %v2038_v29 = vunpack.c.l.bf16 %v582_v19 }
 0x107   :  { %3527 = vmatprep.subr.mxu1 %v1955_v25  ;;  %3457 = vmatpush1.msra.mxu0 %v1826_v26  ;;  %v580_v25 = vld [vmem:[#allocation2 + $0xf70] sm:$0xff]  ;;  %v1911_v26 = vunpack.c.h.bf16 %v518_v18  ;;  %v1906_v34 = vunpack.c.l.bf16 %v516_v24  ;;  %v690_v18 = vld [vmem:[#allocation2 + $0x12e0] sm:$0xff] }
 0x108   :  { %3528 = vmatpush1.msra.mxu1 %v1954_v27  ;;  %3458 = vmatprep.subr.mxu0 %v1823_v30  ;;  %v2039_v27 = vunpack.c.h.bf16 %v582_v19  ;;  %v514_v30 = vld [vmem:[#allocation2 + $0xd60] sm:$0xff]  ;;  %v2034_v35 = vunpack.c.l.bf16 %v580_v25  ;;  %v71_v19 = vld [vmem:[%s6067_s0 + $0x78] sm:$0xff] }
 0x109   :  { %3529 = vmatprep.subr.mxu1 %v1951_v31  ;;  %3459 = vmatpush1.msra.mxu0 %v1822_v32  ;;  %v578_v31 = vld [vmem:[#allocation2 + $0xf60] sm:$0xff]  ;;  %v1907_v32 = vunpack.c.h.bf16 %v516_v24  ;;  %v1902_v40 = vunpack.c.l.bf16 %v514_v30  ;;  %v624_v24 = vld [vmem:[#allocation2 + $0x10d0] sm:$0xff] }
 0x10a   :  { %3530 = vmatpush1.msra.mxu1 %v1950_v33  ;;  %3460 = vmatprep.subr.mxu0 %v1819_v36  ;;  %v2035_v33 = vunpack.c.h.bf16 %v580_v25  ;;  %v512_v36 = vld [vmem:[#allocation2 + $0xd50] sm:$0xff]  ;;  %v2030_v41 = vunpack.c.l.bf16 %v578_v31 }
 0x10b   :  { %3531 = vmatprep.subr.mxu1 %v1947_v37  ;;  %3461 = vmatpush1.msra.mxu0 %v1818_v38  ;;  %v576_v37 = vld [vmem:[#allocation2 + $0xf50] sm:$0xff]  ;;  %v1903_v38 = vunpack.c.h.bf16 %v514_v30  ;;  %v1898_v46 = vunpack.c.l.bf16 %v512_v36  ;;  %v622_v30 = vld [vmem:[#allocation2 + $0x10c0] sm:$0xff] }
 0x10c   :  { %3532 = vmatpush1.msra.mxu1 %v1946_v39  ;;  %3462 = vmatprep.subr.mxu0 %v1815_v42  ;;  %v2031_v39 = vunpack.c.h.bf16 %v578_v31  ;;  %v510_v42 = vld [vmem:[#allocation2 + $0xd40] sm:$0xff]  ;;  %v2026_v47 = vunpack.c.l.bf16 %v576_v37  ;;  %v688_v25 = vld [vmem:[#allocation2 + $0x12d0] sm:$0xff] }
 0x10d   :  { %3533 = vmatprep.subr.mxu1 %v1943_v43  ;;  %3463 = vmatpush1.msra.mxu0 %v1814_v44  ;;  %v574_v43 = vld [vmem:[#allocation2 + $0xf40] sm:$0xff]  ;;  %v1899_v44 = vunpack.c.h.bf16 %v512_v36  ;;  %v1894_v52 = vunpack.c.l.bf16 %v510_v42  ;;  %v620_v36 = vld [vmem:[#allocation2 + $0x10b0] sm:$0xff] }
 0x10e   :  { %3534 = vmatpush1.msra.mxu1 %v1942_v45  ;;  %3464 = vmatprep.subr.mxu0 %v1939_v48  ;;  %v2027_v45 = vunpack.c.h.bf16 %v576_v37  ;;  %v508_v48 = vld [vmem:[#allocation2 + $0xd30] sm:$0xff]  ;;  %v2022_v53 = vunpack.c.l.bf16 %v574_v43  ;;  %v686_v31 = vld [vmem:[#allocation2 + $0x12c0] sm:$0xff] }
 0x10f   :  { %3535 = vmatprep.subr.mxu1 %v2067_v49  ;;  %3465 = vmatpush2.msra.mxu0 %v1938_v50  ;;  %v572_v49 = vld [vmem:[#allocation2 + $0xf30] sm:$0xff]  ;;  %v1895_v50 = vunpack.c.h.bf16 %v510_v42  ;;  %v1890_v58 = vunpack.c.l.bf16 %v508_v48  ;;  %v618_v42 = vld [vmem:[#allocation2 + $0x10a0] sm:$0xff] }
 0x110   :  { %3536 = vmatpush2.msra.mxu1 %v2066_v51  ;;  %3466 = vmatprep.subr.mxu0 %v1935_v54  ;;  %v2023_v51 = vunpack.c.h.bf16 %v574_v43  ;;  %v506_v54 = vld [vmem:[#allocation2 + $0xd20] sm:$0xff]  ;;  %v2018_v59 = vunpack.c.l.bf16 %v572_v49  ;;  %v684_v37 = vld [vmem:[#allocation2 + $0x12b0] sm:$0xff] }
 0x111   :  { %3537 = vmatprep.subr.mxu1 %v2063_v55  ;;  %3467 = vmatpush2.msra.mxu0 %v1934_v56  ;;  %v570_v55 = vld [vmem:[#allocation2 + $0xf20] sm:$0xff]  ;;  %v1891_v56 = vunpack.c.h.bf16 %v508_v48  ;;  %v1886_v0 = vunpack.c.l.bf16 %v506_v54  ;;  %v616_v48 = vld [vmem:[#allocation2 + $0x1090] sm:$0xff] }
 0x112   :  { %3538 = vmatpush2.msra.mxu1 %v2062_v57  ;;  %3468 = vmatprep.subr.mxu0 %v1931_v60  ;;  %v2019_v57 = vunpack.c.h.bf16 %v572_v49  ;;  %v504_v60 = vld [vmem:[#allocation2 + $0xd10] sm:$0xff]  ;;  %v2014_v1 = vunpack.c.l.bf16 %v570_v55  ;;  %v682_v43 = vld [vmem:[#allocation2 + $0x12a0] sm:$0xff] }
 0x113   :  { %3539 = vmatprep.subr.mxu1 %v2059_v61  ;;  %3469 = vmatpush2.msra.mxu0 %v1930_v62  ;;  %v568_v61 = vld [vmem:[#allocation2 + $0xf10] sm:$0xff]  ;;  %v1887_v62 = vunpack.c.h.bf16 %v506_v54  ;;  %v1882_v6 = vunpack.c.l.bf16 %v504_v60  ;;  %v614_v54 = vld [vmem:[#allocation2 + $0x1080] sm:$0xff] }
 0x114   :  { %3540 = vmatpush2.msra.mxu1 %v2058_v63  ;;  %3470 = vmatprep.subr.mxu0 %v1927_v2  ;;  %v2015_v63 = vunpack.c.h.bf16 %v570_v55  ;;  %v502_v2 = vld [vmem:[#allocation2 + $0xd00] sm:$0xff]  ;;  %v2010_v7 = vunpack.c.l.bf16 %v568_v61  ;;  %v680_v49 = vld [vmem:[#allocation2 + $0x1290] sm:$0xff] }
 0x115   :  { %3541 = vmatprep.subr.mxu1 %v2055_v3  ;;  %3471 = vmatpush2.msra.mxu0 %v1926_v4  ;;  %v566_v3 = vld [vmem:[#allocation2 + $0xf00] sm:$0xff]  ;;  %v1883_v4 = vunpack.c.h.bf16 %v504_v60  ;;  %v612_v60 = vld [vmem:[#allocation2 + $0x1070] sm:$0xff] }
 0x116   :  { %3542 = vmatpush2.msra.mxu1 %v2054_v5  ;;  %3472 = vmatprep.subr.mxu0 %v1923_v8  ;;  %v2011_v5 = vunpack.c.h.bf16 %v568_v61  ;;  %v1879_v8 = vunpack.c.h.bf16 %v502_v2  ;;  %v2006_v13 = vunpack.c.l.bf16 %v566_v3  ;;  %v678_v55 = vld [vmem:[#allocation2 + $0x1280] sm:$0xff]  ;;  %v676_v61 = vld [vmem:[#allocation2 + $0x1270] sm:$0xff] }
 0x117   :  { %3543 = vmatprep.subr.mxu1 %v2051_v9  ;;  %3473 = vmatpush2.msra.mxu0 %v1922_v10  ;;  %v2007_v9 = vunpack.c.h.bf16 %v566_v3  ;;  %v628_v10 = vld [vmem:[#allocation2 + $0x10f0] sm:$0xff]  ;;  %v674_v3 = vld [vmem:[#allocation2 + $0x1260] sm:$0xff] }
 0x118   :  { %3544 = vmatpush2.msra.mxu1 %v2050_v11  ;;  %3474 = vmatprep.subr.mxu0 %v1919_v14  ;;  %v1878_v11 = vunpack.c.l.bf16 %v502_v2  ;;  %v69_v14 = vld [vmem:[%s6067_s0 + $0x68] sm:$0xff]  ;;  %v610_v2 = vld [vmem:[#allocation2 + $0x1060] sm:$0xff] }
 0x119   :  { %3545 = vmatprep.subr.mxu1 %v2047_v15  ;;  %3475 = vmatpush2.msra.mxu0 %v1918_v16  ;;  %v68_v15 = vld [vmem:[%s6067_s0 + $0x60] sm:$0xff]  ;;  %v2131_v16 = vunpack.c.h.bf16 %v628_v10 }
 0x11a   :  { %3546 = vmatpush2.msra.mxu1 %v2046_v17  ;;  %3476 = vmatprep.subr.mxu0 %v1915_v20  ;;  %v626_v17 = vld [vmem:[#allocation2 + $0x10e0] sm:$0xff]  ;;  %v2259_v20 = vunpack.c.h.bf16 %v692_v12 }
 0x11b   :  { %3547 = vmatprep.subr.mxu1 %v2043_v21  ;;  %3477 = vmatpush2.msra.mxu0 %v1914_v22  ;;  %v2130_v21 = vunpack.c.l.bf16 %v628_v10  ;;  %v2258_v22 = vunpack.c.l.bf16 %v692_v12  ;;  %v2095_v10 = vunpack.c.h.bf16 %v610_v2  ;;  %v2094_v12 = vunpack.c.l.bf16 %v610_v2 }
 0x11c   :  { %3548 = vmatpush2.msra.mxu1 %v2042_v23  ;;  %3478 = vmatprep.subr.mxu0 %v1911_v26  ;;  %v70_v23 = vld [vmem:[%s6067_s0 + $0x70] sm:$0xff]  ;;  %v2127_v26 = vunpack.c.h.bf16 %v626_v17 }
 0x11d   :  { %3549 = vmatprep.subr.mxu1 %v2039_v27  ;;  %3479 = vmatpush2.msra.mxu0 %v1910_v28  ;;  %v2255_v27 = vunpack.c.h.bf16 %v690_v18  ;;  %v2126_v28 = vunpack.c.l.bf16 %v626_v17 }
 0x11e   :  { %3550 = vmatpush2.msra.mxu1 %v2038_v29  ;;  %3480 = vmatprep.subr.mxu0 %v1907_v32  ;;  %v2254_v29 = vunpack.c.l.bf16 %v690_v18  ;;  %v2123_v32 = vunpack.c.h.bf16 %v624_v24 }
 0x11f   :  { %3551 = vmatprep.subr.mxu1 %v2035_v33  ;;  %3481 = vmatpush2.msra.mxu0 %v1906_v34  ;;  %v2251_v33 = vunpack.c.h.bf16 %v688_v25  ;;  %v2122_v34 = vunpack.c.l.bf16 %v624_v24 }
 0x120   :  { %3552 = vmatpush2.msra.mxu1 %v2034_v35  ;;  %3482 = vmatprep.subr.mxu0 %v1903_v38  ;;  %v2250_v35 = vunpack.c.l.bf16 %v688_v25  ;;  %v2119_v38 = vunpack.c.h.bf16 %v622_v30 }
 0x121   :  { %3553 = vmatprep.subr.mxu1 %v2031_v39  ;;  %3483 = vmatpush2.msra.mxu0 %v1902_v40  ;;  %v2247_v39 = vunpack.c.h.bf16 %v686_v31  ;;  %v2118_v40 = vunpack.c.l.bf16 %v622_v30 }
 0x122   :  { %3554 = vmatpush2.msra.mxu1 %v2030_v41  ;;  %3484 = vmatprep.subr.mxu0 %v1899_v44  ;;  %v2246_v41 = vunpack.c.l.bf16 %v686_v31  ;;  %v2115_v44 = vunpack.c.h.bf16 %v620_v36 }
 0x123   :  { %3555 = vmatprep.subr.mxu1 %v2027_v45  ;;  %3485 = vmatpush2.msra.mxu0 %v1898_v46  ;;  %v2243_v45 = vunpack.c.h.bf16 %v684_v37  ;;  %v2114_v46 = vunpack.c.l.bf16 %v620_v36 }
 0x124   :  { %3556 = vmatpush2.msra.mxu1 %v2026_v47  ;;  %3486 = vmatprep.subr.mxu0 %v1895_v50  ;;  %v2242_v47 = vunpack.c.l.bf16 %v684_v37  ;;  %v2111_v50 = vunpack.c.h.bf16 %v618_v42 }
 0x125   :  { %3557 = vmatprep.subr.mxu1 %v2023_v51  ;;  %3487 = vmatpush2.msra.mxu0 %v1894_v52  ;;  %v2239_v51 = vunpack.c.h.bf16 %v682_v43  ;;  %v2110_v52 = vunpack.c.l.bf16 %v618_v42 }
 0x126   :  { %3558 = vmatpush2.msra.mxu1 %v2022_v53  ;;  %3488 = vmatprep.subr.mxu0 %v1891_v56  ;;  %v2238_v53 = vunpack.c.l.bf16 %v682_v43  ;;  %v2107_v56 = vunpack.c.h.bf16 %v616_v48 }
 0x127   :  { %3559 = vmatprep.subr.mxu1 %v2019_v57  ;;  %3489 = vmatpush2.msra.mxu0 %v1890_v58  ;;  %v2235_v57 = vunpack.c.h.bf16 %v680_v49  ;;  %v2106_v58 = vunpack.c.l.bf16 %v616_v48 }
 0x128   :  { %3560 = vmatpush2.msra.mxu1 %v2018_v59  ;;  %3490 = vmatprep.subr.mxu0 %v1887_v62  ;;  %v2234_v59 = vunpack.c.l.bf16 %v680_v49  ;;  %v2103_v62 = vunpack.c.h.bf16 %v614_v54 }
 0x129   :  { %3561 = vmatprep.subr.mxu1 %v2015_v63  ;;  %3491 = vmatpush2.msra.mxu0 %v1886_v0  ;;  %v2231_v63 = vunpack.c.h.bf16 %v678_v55  ;;  %v2102_v0 = vunpack.c.l.bf16 %v614_v54 }
 0x12a   :  { %3562 = vmatpush2.msra.mxu1 %v2014_v1  ;;  %3492 = vmatprep.subr.mxu0 %v1883_v4  ;;  %v2230_v1 = vunpack.c.l.bf16 %v678_v55  ;;  %v2099_v4 = vunpack.c.h.bf16 %v612_v60 }
 0x12b   :  { %3563 = vmatprep.subr.mxu1 %v2011_v5  ;;  %3493 = vmatpush2.msra.mxu0 %v1882_v6  ;;  %v2227_v5 = vunpack.c.h.bf16 %v676_v61  ;;  %v2098_v6 = vunpack.c.l.bf16 %v612_v60 }
 0x12c   :  { %3564 = vmatpush2.msra.mxu1 %v2010_v7  ;;  %3494 = vmatprep.subr.mxu0 %v1879_v8  ;;  %v2226_v7 = vunpack.c.l.bf16 %v676_v61  ;;  %v608_v8 = vld [vmem:[#allocation2 + $0x1050] sm:$0xff] }
 0x12d   :  { %3565 = vmatprep.subr.mxu1 %v2007_v9  ;;  %3495 = vmatpush2.msra.mxu0 %v1878_v11  ;;  %v672_v9 = vld [vmem:[#allocation2 + $0x1250] sm:$0xff]  ;;  %v2223_v11 = vunpack.c.h.bf16 %v674_v3  ;;  %v2090_v18 = vunpack.c.l.bf16 %v608_v8 }
 0x12e   :  { %3496 = vmatprep.mubr.f32.mxu0 %v69_v14  ;;  %3566 = vmatpush2.msra.mxu1 %v2006_v13  ;;  %v2222_v13 = vunpack.c.l.bf16 %v674_v3  ;;  %v606_v14 = vld [vmem:[#allocation2 + $0x1040] sm:$0xff]  ;;  %v2219_v17 = vunpack.c.h.bf16 %v672_v9 }
 0x12f   :  { %3497 = vmatmul.mubr.f32.vlgmr.msra.gmra.mxu0 %v68_v15  ;;  %3567 = vmatprep.mubr.f32.mxu1 %v71_v19  ;;  %v670_v15 = vld [vmem:[#allocation2 + $0x1240] sm:$0xff]  ;;  %v2218_v19 = vunpack.c.l.bf16 %v672_v9  ;;  %v2086_v24 = vunpack.c.l.bf16 %v606_v14 }
 0x130   :  { %3574 = vmatprep.subr.mxu0 %v2131_v16  ;;  %3645 = vmatprep.subr.mxu1 %v2259_v20  ;;  %v2091_v16 = vunpack.c.h.bf16 %v608_v8  ;;  %v604_v20 = vld [vmem:[#allocation2 + $0x1030] sm:$0xff]  ;;  %v2214_v25 = vunpack.c.l.bf16 %v670_v15 }
 0x131   :  { %3568 = vmatmul.mubr.f32.vlgmr.msra.gmra.mxu1 %v70_v23  ;;  %3575 = vmatpush1.msra.mxu0 %v2130_v21  ;;  %v668_v21 = vld [vmem:[#allocation2 + $0x1230] sm:$0xff]  ;;  %v2215_v23 = vunpack.c.h.bf16 %v670_v15  ;;  %v2082_v30 = vunpack.c.l.bf16 %v604_v20 }
 0x132   :  { %3646 = vmatpush1.msra.mxu1 %v2258_v22  ;;  %3576 = vmatprep.subr.mxu0 %v2127_v26  ;;  %v2087_v22 = vunpack.c.h.bf16 %v606_v14  ;;  %v602_v26 = vld [vmem:[#allocation2 + $0x1020] sm:$0xff]  ;;  %v2210_v31 = vunpack.c.l.bf16 %v668_v21 }
 0x133   :  { %3647 = vmatprep.subr.mxu1 %v2255_v27  ;;  %3577 = vmatpush1.msra.mxu0 %v2126_v28  ;;  %v666_v27 = vld [vmem:[#allocation2 + $0x1220] sm:$0xff]  ;;  %v2083_v28 = vunpack.c.h.bf16 %v604_v20  ;;  %v2078_v36 = vunpack.c.l.bf16 %v602_v26 }
 0x134   :  { %3648 = vmatpush1.msra.mxu1 %v2254_v29  ;;  %3578 = vmatprep.subr.mxu0 %v2123_v32  ;;  %v2211_v29 = vunpack.c.h.bf16 %v668_v21  ;;  %v600_v32 = vld [vmem:[#allocation2 + $0x1010] sm:$0xff]  ;;  %v2206_v37 = vunpack.c.l.bf16 %v666_v27 }
 0x135   :  { %3649 = vmatprep.subr.mxu1 %v2251_v33  ;;  %3579 = vmatpush1.msra.mxu0 %v2122_v34  ;;  %v664_v33 = vld [vmem:[#allocation2 + $0x1210] sm:$0xff]  ;;  %v2079_v34 = vunpack.c.h.bf16 %v602_v26  ;;  %v2074_v42 = vunpack.c.l.bf16 %v600_v32 }
 0x136   :  { %3650 = vmatpush1.msra.mxu1 %v2250_v35  ;;  %3580 = vmatprep.subr.mxu0 %v2119_v38  ;;  %v2207_v35 = vunpack.c.h.bf16 %v666_v27  ;;  %v598_v38 = vld [vmem:[#allocation2 + $0x1000] sm:$0xff]  ;;  %v2202_v43 = vunpack.c.l.bf16 %v664_v33 }
 0x137   :  { %3651 = vmatprep.subr.mxu1 %v2247_v39  ;;  %3581 = vmatpush1.msra.mxu0 %v2118_v40  ;;  %v662_v39 = vld [vmem:[#allocation2 + $0x1200] sm:$0xff]  ;;  %v2075_v40 = vunpack.c.h.bf16 %v600_v32  ;;  %v2070_v48 = vunpack.c.l.bf16 %v598_v38 }
 0x138   :  { %3652 = vmatpush1.msra.mxu1 %v2246_v41  ;;  %3582 = vmatprep.subr.mxu0 %v2115_v44  ;;  %v2203_v41 = vunpack.c.h.bf16 %v664_v33  ;;  %v660_v44 = vld [vmem:[#allocation2 + $0x11f0] sm:$0xff]  ;;  %v2198_v49 = vunpack.c.l.bf16 %v662_v39 }
 0x139   :  { %3653 = vmatprep.subr.mxu1 %v2243_v45  ;;  %3583 = vmatpush1.msra.mxu0 %v2114_v46  ;;  %v724_v45 = vld [vmem:[#allocation2 + $0x13f0] sm:$0xff]  ;;  %v2071_v46 = vunpack.c.h.bf16 %v598_v38  ;;  %v2194_v54 = vunpack.c.l.bf16 %v660_v44 }
 0x13a   :  { %3654 = vmatpush1.msra.mxu1 %v2242_v47  ;;  %3584 = vmatprep.subr.mxu0 %v2111_v50  ;;  %v2199_v47 = vunpack.c.h.bf16 %v662_v39  ;;  %v658_v50 = vld [vmem:[#allocation2 + $0x11e0] sm:$0xff]  ;;  %v2322_v55 = vunpack.c.l.bf16 %v724_v45 }
 0x13b   :  { %3655 = vmatprep.subr.mxu1 %v2239_v51  ;;  %3585 = vmatpush1.msra.mxu0 %v2110_v52  ;;  %v722_v51 = vld [vmem:[#allocation2 + $0x13e0] sm:$0xff]  ;;  %v2195_v52 = vunpack.c.h.bf16 %v660_v44  ;;  %v2190_v60 = vunpack.c.l.bf16 %v658_v50 }
 0x13c   :  { %3656 = vmatpush1.msra.mxu1 %v2238_v53  ;;  %3586 = vmatprep.subr.mxu0 %v2107_v56  ;;  %v2323_v53 = vunpack.c.h.bf16 %v724_v45  ;;  %v656_v56 = vld [vmem:[#allocation2 + $0x11d0] sm:$0xff]  ;;  %v2318_v61 = vunpack.c.l.bf16 %v722_v51 }
 0x13d   :  { %3657 = vmatprep.subr.mxu1 %v2235_v57  ;;  %3587 = vmatpush1.msra.mxu0 %v2106_v58  ;;  %v720_v57 = vld [vmem:[#allocation2 + $0x13d0] sm:$0xff]  ;;  %v2191_v58 = vunpack.c.h.bf16 %v658_v50  ;;  %v2186_v2 = vunpack.c.l.bf16 %v656_v56 }
 0x13e   :  { %3658 = vmatpush1.msra.mxu1 %v2234_v59  ;;  %3588 = vmatprep.subr.mxu0 %v2103_v62  ;;  %v2319_v59 = vunpack.c.h.bf16 %v722_v51  ;;  %v654_v62 = vld [vmem:[#allocation2 + $0x11c0] sm:$0xff]  ;;  %v2314_v3 = vunpack.c.l.bf16 %v720_v57 }
 0x13f   :  { %3659 = vmatprep.subr.mxu1 %v2231_v63  ;;  %3589 = vmatpush1.msra.mxu0 %v2102_v0  ;;  %v718_v63 = vld [vmem:[#allocation2 + $0x13c0] sm:$0xff]  ;;  %v2187_v0 = vunpack.c.h.bf16 %v656_v56  ;;  %v2182_v8 = vunpack.c.l.bf16 %v654_v62 }
 0x140   :  { %3660 = vmatpush1.msra.mxu1 %v2230_v1  ;;  %3590 = vmatprep.subr.mxu0 %v2099_v4  ;;  %v2315_v1 = vunpack.c.h.bf16 %v720_v57  ;;  %v652_v4 = vld [vmem:[#allocation2 + $0x11b0] sm:$0xff]  ;;  %v2310_v9 = vunpack.c.l.bf16 %v718_v63 }
 0x141   :  { %3661 = vmatprep.subr.mxu1 %v2227_v5  ;;  %3591 = vmatpush1.msra.mxu0 %v2098_v6  ;;  %v716_v5 = vld [vmem:[#allocation2 + $0x13b0] sm:$0xff]  ;;  %v2183_v6 = vunpack.c.h.bf16 %v654_v62  ;;  %v2178_v14 = vunpack.c.l.bf16 %v652_v4 }
 0x142   :  { %3662 = vmatpush1.msra.mxu1 %v2226_v7  ;;  %3592 = vmatprep.subr.mxu0 %v2095_v10  ;;  %v2311_v7 = vunpack.c.h.bf16 %v718_v63  ;;  %v650_v10 = vld [vmem:[#allocation2 + $0x11a0] sm:$0xff]  ;;  %v2306_v15 = vunpack.c.l.bf16 %v716_v5 }
 0x143   :  { %3663 = vmatprep.subr.mxu1 %v2223_v11  ;;  %3593 = vmatpush1.msra.mxu0 %v2094_v12  ;;  %v714_v11 = vld [vmem:[#allocation2 + $0x13a0] sm:$0xff]  ;;  %v2179_v12 = vunpack.c.h.bf16 %v652_v4  ;;  %v2174_v20 = vunpack.c.l.bf16 %v650_v10 }
 0x144   :  { %3664 = vmatpush1.msra.mxu1 %v2222_v13  ;;  %3594 = vmatprep.subr.mxu0 %v2091_v16  ;;  %v2307_v13 = vunpack.c.h.bf16 %v716_v5  ;;  %v648_v16 = vld [vmem:[#allocation2 + $0x1190] sm:$0xff]  ;;  %v2302_v21 = vunpack.c.l.bf16 %v714_v11 }
 0x145   :  { %3665 = vmatprep.subr.mxu1 %v2219_v17  ;;  %3595 = vmatpush1.msra.mxu0 %v2090_v18  ;;  %v712_v17 = vld [vmem:[#allocation2 + $0x1390] sm:$0xff]  ;;  %v2175_v18 = vunpack.c.h.bf16 %v650_v10  ;;  %v2170_v26 = vunpack.c.l.bf16 %v648_v16 }
 0x146   :  { %3666 = vmatpush1.msra.mxu1 %v2218_v19  ;;  %3596 = vmatprep.subr.mxu0 %v2087_v22  ;;  %v2303_v19 = vunpack.c.h.bf16 %v714_v11  ;;  %v646_v22 = vld [vmem:[#allocation2 + $0x1180] sm:$0xff]  ;;  %v2298_v27 = vunpack.c.l.bf16 %v712_v17 }
 0x147   :  { %3667 = vmatprep.subr.mxu1 %v2215_v23  ;;  %3597 = vmatpush1.msra.mxu0 %v2086_v24  ;;  %v710_v23 = vld [vmem:[#allocation2 + $0x1380] sm:$0xff]  ;;  %v2171_v24 = vunpack.c.h.bf16 %v648_v16  ;;  %v2166_v32 = vunpack.c.l.bf16 %v646_v22  ;;  %v820_v16 = vld [vmem:[#allocation2 + $0x16f0] sm:$0xff] }
 0x148   :  { %3668 = vmatpush1.msra.mxu1 %v2214_v25  ;;  %3598 = vmatprep.subr.mxu0 %v2083_v28  ;;  %v2299_v25 = vunpack.c.h.bf16 %v712_v17  ;;  %v644_v28 = vld [vmem:[#allocation2 + $0x1170] sm:$0xff]  ;;  %v2294_v33 = vunpack.c.l.bf16 %v710_v23 }
 0x149   :  { %3669 = vmatprep.subr.mxu1 %v2211_v29  ;;  %3599 = vmatpush1.msra.mxu0 %v2082_v30  ;;  %v708_v29 = vld [vmem:[#allocation2 + $0x1370] sm:$0xff]  ;;  %v2167_v30 = vunpack.c.h.bf16 %v646_v22  ;;  %v2162_v38 = vunpack.c.l.bf16 %v644_v28  ;;  %v818_v22 = vld [vmem:[#allocation2 + $0x16e0] sm:$0xff] }
 0x14a   :  { %3670 = vmatpush1.msra.mxu1 %v2210_v31  ;;  %3600 = vmatprep.subr.mxu0 %v2079_v34  ;;  %v2295_v31 = vunpack.c.h.bf16 %v710_v23  ;;  %v642_v34 = vld [vmem:[#allocation2 + $0x1160] sm:$0xff]  ;;  %v2290_v39 = vunpack.c.l.bf16 %v708_v29  ;;  %v75_v23 = vld [vmem:[%s6067_s0 + $0x98] sm:$0xff] }
 0x14b   :  { %3671 = vmatprep.subr.mxu1 %v2207_v35  ;;  %3601 = vmatpush1.msra.mxu0 %v2078_v36  ;;  %v706_v35 = vld [vmem:[#allocation2 + $0x1360] sm:$0xff]  ;;  %v2163_v36 = vunpack.c.h.bf16 %v644_v28  ;;  %v2158_v44 = vunpack.c.l.bf16 %v642_v34  ;;  %v752_v28 = vld [vmem:[#allocation2 + $0x14d0] sm:$0xff] }
 0x14c   :  { %3672 = vmatpush1.msra.mxu1 %v2206_v37  ;;  %3602 = vmatprep.subr.mxu0 %v2075_v40  ;;  %v2291_v37 = vunpack.c.h.bf16 %v708_v29  ;;  %v640_v40 = vld [vmem:[#allocation2 + $0x1150] sm:$0xff]  ;;  %v2286_v45 = vunpack.c.l.bf16 %v706_v35 }
 0x14d   :  { %3673 = vmatprep.subr.mxu1 %v2203_v41  ;;  %3603 = vmatpush1.msra.mxu0 %v2074_v42  ;;  %v704_v41 = vld [vmem:[#allocation2 + $0x1350] sm:$0xff]  ;;  %v2159_v42 = vunpack.c.h.bf16 %v642_v34  ;;  %v2154_v50 = vunpack.c.l.bf16 %v640_v40  ;;  %v750_v34 = vld [vmem:[#allocation2 + $0x14c0] sm:$0xff] }
 0x14e   :  { %3674 = vmatpush1.msra.mxu1 %v2202_v43  ;;  %3604 = vmatprep.subr.mxu0 %v2071_v46  ;;  %v2287_v43 = vunpack.c.h.bf16 %v706_v35  ;;  %v638_v46 = vld [vmem:[#allocation2 + $0x1140] sm:$0xff]  ;;  %v2282_v51 = vunpack.c.l.bf16 %v704_v41  ;;  %v816_v29 = vld [vmem:[#allocation2 + $0x16d0] sm:$0xff] }
 0x14f   :  { %3675 = vmatprep.subr.mxu1 %v2199_v47  ;;  %3605 = vmatpush1.msra.mxu0 %v2070_v48  ;;  %v702_v47 = vld [vmem:[#allocation2 + $0x1340] sm:$0xff]  ;;  %v2155_v48 = vunpack.c.h.bf16 %v640_v40  ;;  %v2150_v56 = vunpack.c.l.bf16 %v638_v46  ;;  %v748_v40 = vld [vmem:[#allocation2 + $0x14b0] sm:$0xff] }
 0x150   :  { %3676 = vmatpush1.msra.mxu1 %v2198_v49  ;;  %3606 = vmatprep.subr.mxu0 %v2195_v52  ;;  %v2283_v49 = vunpack.c.h.bf16 %v704_v41  ;;  %v636_v52 = vld [vmem:[#allocation2 + $0x1130] sm:$0xff]  ;;  %v2278_v57 = vunpack.c.l.bf16 %v702_v47  ;;  %v814_v35 = vld [vmem:[#allocation2 + $0x16c0] sm:$0xff] }
 0x151   :  { %3677 = vmatprep.subr.mxu1 %v2323_v53  ;;  %3607 = vmatpush2.msra.mxu0 %v2194_v54  ;;  %v700_v53 = vld [vmem:[#allocation2 + $0x1330] sm:$0xff]  ;;  %v2151_v54 = vunpack.c.h.bf16 %v638_v46  ;;  %v2146_v62 = vunpack.c.l.bf16 %v636_v52  ;;  %v746_v46 = vld [vmem:[#allocation2 + $0x14a0] sm:$0xff] }
 0x152   :  { %3678 = vmatpush2.msra.mxu1 %v2322_v55  ;;  %3608 = vmatprep.subr.mxu0 %v2191_v58  ;;  %v2279_v55 = vunpack.c.h.bf16 %v702_v47  ;;  %v634_v58 = vld [vmem:[#allocation2 + $0x1120] sm:$0xff]  ;;  %v2274_v63 = vunpack.c.l.bf16 %v700_v53  ;;  %v812_v41 = vld [vmem:[#allocation2 + $0x16b0] sm:$0xff] }
 0x153   :  { %3679 = vmatprep.subr.mxu1 %v2319_v59  ;;  %3609 = vmatpush2.msra.mxu0 %v2190_v60  ;;  %v698_v59 = vld [vmem:[#allocation2 + $0x1320] sm:$0xff]  ;;  %v2147_v60 = vunpack.c.h.bf16 %v636_v52  ;;  %v2142_v4 = vunpack.c.l.bf16 %v634_v58  ;;  %v744_v52 = vld [vmem:[#allocation2 + $0x1490] sm:$0xff] }
 0x154   :  { %3680 = vmatpush2.msra.mxu1 %v2318_v61  ;;  %3610 = vmatprep.subr.mxu0 %v2187_v0  ;;  %v2275_v61 = vunpack.c.h.bf16 %v700_v53  ;;  %v632_v0 = vld [vmem:[#allocation2 + $0x1110] sm:$0xff]  ;;  %v2270_v5 = vunpack.c.l.bf16 %v698_v59  ;;  %v810_v47 = vld [vmem:[#allocation2 + $0x16a0] sm:$0xff] }
 0x155   :  { %3681 = vmatprep.subr.mxu1 %v2315_v1  ;;  %3611 = vmatpush2.msra.mxu0 %v2186_v2  ;;  %v696_v1 = vld [vmem:[#allocation2 + $0x1310] sm:$0xff]  ;;  %v2143_v2 = vunpack.c.h.bf16 %v634_v58  ;;  %v2138_v10 = vunpack.c.l.bf16 %v632_v0  ;;  %v742_v58 = vld [vmem:[#allocation2 + $0x1480] sm:$0xff] }
 0x156   :  { %3682 = vmatpush2.msra.mxu1 %v2314_v3  ;;  %3612 = vmatprep.subr.mxu0 %v2183_v6  ;;  %v2271_v3 = vunpack.c.h.bf16 %v698_v59  ;;  %v630_v6 = vld [vmem:[#allocation2 + $0x1100] sm:$0xff]  ;;  %v2266_v11 = vunpack.c.l.bf16 %v696_v1  ;;  %v808_v53 = vld [vmem:[#allocation2 + $0x1690] sm:$0xff] }
 0x157   :  { %3683 = vmatprep.subr.mxu1 %v2311_v7  ;;  %3613 = vmatpush2.msra.mxu0 %v2182_v8  ;;  %v694_v7 = vld [vmem:[#allocation2 + $0x1300] sm:$0xff]  ;;  %v2139_v8 = vunpack.c.h.bf16 %v632_v0  ;;  %v740_v0 = vld [vmem:[#allocation2 + $0x1470] sm:$0xff] }
 0x158   :  { %3684 = vmatpush2.msra.mxu1 %v2310_v9  ;;  %3614 = vmatprep.subr.mxu0 %v2179_v12  ;;  %v2267_v9 = vunpack.c.h.bf16 %v696_v1  ;;  %v2135_v12 = vunpack.c.h.bf16 %v630_v6  ;;  %v2262_v17 = vunpack.c.l.bf16 %v694_v7  ;;  %v806_v59 = vld [vmem:[#allocation2 + $0x1680] sm:$0xff]  ;;  %v804_v1 = vld [vmem:[#allocation2 + $0x1670] sm:$0xff] }
 0x159   :  { %3685 = vmatprep.subr.mxu1 %v2307_v13  ;;  %3615 = vmatpush2.msra.mxu0 %v2178_v14  ;;  %v2263_v13 = vunpack.c.h.bf16 %v694_v7  ;;  %v756_v14 = vld [vmem:[#allocation2 + $0x14f0] sm:$0xff]  ;;  %v802_v7 = vld [vmem:[#allocation2 + $0x1660] sm:$0xff] }
 0x15a   :  { %3686 = vmatpush2.msra.mxu1 %v2306_v15  ;;  %3616 = vmatprep.subr.mxu0 %v2175_v18  ;;  %v2134_v15 = vunpack.c.l.bf16 %v630_v6  ;;  %v73_v18 = vld [vmem:[%s6067_s0 + $0x88] sm:$0xff]  ;;  %v738_v6 = vld [vmem:[#allocation2 + $0x1460] sm:$0xff] }
 0x15b   :  { %3687 = vmatprep.subr.mxu1 %v2303_v19  ;;  %3617 = vmatpush2.msra.mxu0 %v2174_v20  ;;  %v72_v19 = vld [vmem:[%s6067_s0 + $0x80] sm:$0xff]  ;;  %v2387_v20 = vunpack.c.h.bf16 %v756_v14 }
 0x15c   :  { %3688 = vmatpush2.msra.mxu1 %v2302_v21  ;;  %3618 = vmatprep.subr.mxu0 %v2171_v24  ;;  %v754_v21 = vld [vmem:[#allocation2 + $0x14e0] sm:$0xff]  ;;  %v2515_v24 = vunpack.c.h.bf16 %v820_v16 }
 0x15d   :  { %3689 = vmatprep.subr.mxu1 %v2299_v25  ;;  %3619 = vmatpush2.msra.mxu0 %v2170_v26  ;;  %v2386_v25 = vunpack.c.l.bf16 %v756_v14  ;;  %v2514_v26 = vunpack.c.l.bf16 %v820_v16  ;;  %v2351_v14 = vunpack.c.h.bf16 %v738_v6  ;;  %v2350_v16 = vunpack.c.l.bf16 %v738_v6 }
 0x15e   :  { %3690 = vmatpush2.msra.mxu1 %v2298_v27  ;;  %3620 = vmatprep.subr.mxu0 %v2167_v30  ;;  %v74_v27 = vld [vmem:[%s6067_s0 + $0x90] sm:$0xff]  ;;  %v2383_v30 = vunpack.c.h.bf16 %v754_v21 }
 0x15f   :  { %3691 = vmatprep.subr.mxu1 %v2295_v31  ;;  %3621 = vmatpush2.msra.mxu0 %v2166_v32  ;;  %v2511_v31 = vunpack.c.h.bf16 %v818_v22  ;;  %v2382_v32 = vunpack.c.l.bf16 %v754_v21 }
 0x160   :  { %3692 = vmatpush2.msra.mxu1 %v2294_v33  ;;  %3622 = vmatprep.subr.mxu0 %v2163_v36  ;;  %v2510_v33 = vunpack.c.l.bf16 %v818_v22  ;;  %v2379_v36 = vunpack.c.h.bf16 %v752_v28 }
 0x161   :  { %3693 = vmatprep.subr.mxu1 %v2291_v37  ;;  %3623 = vmatpush2.msra.mxu0 %v2162_v38  ;;  %v2507_v37 = vunpack.c.h.bf16 %v816_v29  ;;  %v2378_v38 = vunpack.c.l.bf16 %v752_v28 }
 0x162   :  { %3694 = vmatpush2.msra.mxu1 %v2290_v39  ;;  %3624 = vmatprep.subr.mxu0 %v2159_v42  ;;  %v2506_v39 = vunpack.c.l.bf16 %v816_v29  ;;  %v2375_v42 = vunpack.c.h.bf16 %v750_v34 }
 0x163   :  { %3695 = vmatprep.subr.mxu1 %v2287_v43  ;;  %3625 = vmatpush2.msra.mxu0 %v2158_v44  ;;  %v2503_v43 = vunpack.c.h.bf16 %v814_v35  ;;  %v2374_v44 = vunpack.c.l.bf16 %v750_v34 }
 0x164   :  { %3696 = vmatpush2.msra.mxu1 %v2286_v45  ;;  %3626 = vmatprep.subr.mxu0 %v2155_v48  ;;  %v2502_v45 = vunpack.c.l.bf16 %v814_v35  ;;  %v2371_v48 = vunpack.c.h.bf16 %v748_v40 }
 0x165   :  { %3697 = vmatprep.subr.mxu1 %v2283_v49  ;;  %3627 = vmatpush2.msra.mxu0 %v2154_v50  ;;  %v2499_v49 = vunpack.c.h.bf16 %v812_v41  ;;  %v2370_v50 = vunpack.c.l.bf16 %v748_v40 }
 0x166   :  { %3698 = vmatpush2.msra.mxu1 %v2282_v51  ;;  %3628 = vmatprep.subr.mxu0 %v2151_v54  ;;  %v2498_v51 = vunpack.c.l.bf16 %v812_v41  ;;  %v2367_v54 = vunpack.c.h.bf16 %v746_v46 }
 0x167   :  { %3699 = vmatprep.subr.mxu1 %v2279_v55  ;;  %3629 = vmatpush2.msra.mxu0 %v2150_v56  ;;  %v2495_v55 = vunpack.c.h.bf16 %v810_v47  ;;  %v2366_v56 = vunpack.c.l.bf16 %v746_v46 }
 0x168   :  { %3700 = vmatpush2.msra.mxu1 %v2278_v57  ;;  %3630 = vmatprep.subr.mxu0 %v2147_v60  ;;  %v2494_v57 = vunpack.c.l.bf16 %v810_v47  ;;  %v2363_v60 = vunpack.c.h.bf16 %v744_v52 }
 0x169   :  { %3701 = vmatprep.subr.mxu1 %v2275_v61  ;;  %3631 = vmatpush2.msra.mxu0 %v2146_v62  ;;  %v2491_v61 = vunpack.c.h.bf16 %v808_v53  ;;  %v2362_v62 = vunpack.c.l.bf16 %v744_v52 }
 0x16a   :  { %3702 = vmatpush2.msra.mxu1 %v2274_v63  ;;  %3632 = vmatprep.subr.mxu0 %v2143_v2  ;;  %v2490_v63 = vunpack.c.l.bf16 %v808_v53  ;;  %v2359_v2 = vunpack.c.h.bf16 %v742_v58 }
 0x16b   :  { %3703 = vmatprep.subr.mxu1 %v2271_v3  ;;  %3633 = vmatpush2.msra.mxu0 %v2142_v4  ;;  %v2487_v3 = vunpack.c.h.bf16 %v806_v59  ;;  %v2358_v4 = vunpack.c.l.bf16 %v742_v58 }
 0x16c   :  { %3704 = vmatpush2.msra.mxu1 %v2270_v5  ;;  %3634 = vmatprep.subr.mxu0 %v2139_v8  ;;  %v2486_v5 = vunpack.c.l.bf16 %v806_v59  ;;  %v2355_v8 = vunpack.c.h.bf16 %v740_v0 }
 0x16d   :  { %3705 = vmatprep.subr.mxu1 %v2267_v9  ;;  %3635 = vmatpush2.msra.mxu0 %v2138_v10  ;;  %v2483_v9 = vunpack.c.h.bf16 %v804_v1  ;;  %v2354_v10 = vunpack.c.l.bf16 %v740_v0 }
 0x16e   :  { %3706 = vmatpush2.msra.mxu1 %v2266_v11  ;;  %3636 = vmatprep.subr.mxu0 %v2135_v12  ;;  %v2482_v11 = vunpack.c.l.bf16 %v804_v1  ;;  %v736_v12 = vld [vmem:[#allocation2 + $0x1450] sm:$0xff] }
 0x16f   :  { %3707 = vmatprep.subr.mxu1 %v2263_v13  ;;  %3637 = vmatpush2.msra.mxu0 %v2134_v15  ;;  %v800_v13 = vld [vmem:[#allocation2 + $0x1650] sm:$0xff]  ;;  %v2479_v15 = vunpack.c.h.bf16 %v802_v7  ;;  %v2346_v22 = vunpack.c.l.bf16 %v736_v12 }
 0x170   :  { %3638 = vmatprep.mubr.f32.mxu0 %v73_v18  ;;  %3708 = vmatpush2.msra.mxu1 %v2262_v17  ;;  %v2478_v17 = vunpack.c.l.bf16 %v802_v7  ;;  %v734_v18 = vld [vmem:[#allocation2 + $0x1440] sm:$0xff]  ;;  %v2475_v21 = vunpack.c.h.bf16 %v800_v13 }
 0x171   :  { %3639 = vmatmul.mubr.f32.vlgmr.msra.gmra.mxu0 %v72_v19  ;;  %3709 = vmatprep.mubr.f32.mxu1 %v75_v23  ;;  %v798_v19 = vld [vmem:[#allocation2 + $0x1640] sm:$0xff]  ;;  %v2474_v23 = vunpack.c.l.bf16 %v800_v13  ;;  %v2342_v28 = vunpack.c.l.bf16 %v734_v18 }
 0x172   :  { %3716 = vmatprep.subr.mxu0 %v2387_v20  ;;  %3787 = vmatprep.subr.mxu1 %v2515_v24  ;;  %v2347_v20 = vunpack.c.h.bf16 %v736_v12  ;;  %v732_v24 = vld [vmem:[#allocation2 + $0x1430] sm:$0xff]  ;;  %v2470_v29 = vunpack.c.l.bf16 %v798_v19 }
 0x173   :  { %3710 = vmatmul.mubr.f32.vlgmr.msra.gmra.mxu1 %v74_v27  ;;  %3717 = vmatpush1.msra.mxu0 %v2386_v25  ;;  %v796_v25 = vld [vmem:[#allocation2 + $0x1630] sm:$0xff]  ;;  %v2471_v27 = vunpack.c.h.bf16 %v798_v19  ;;  %v2338_v34 = vunpack.c.l.bf16 %v732_v24 }
 0x174   :  { %3788 = vmatpush1.msra.mxu1 %v2514_v26  ;;  %3718 = vmatprep.subr.mxu0 %v2383_v30  ;;  %v2343_v26 = vunpack.c.h.bf16 %v734_v18  ;;  %v730_v30 = vld [vmem:[#allocation2 + $0x1420] sm:$0xff]  ;;  %v2466_v35 = vunpack.c.l.bf16 %v796_v25 }
 0x175   :  { %3789 = vmatprep.subr.mxu1 %v2511_v31  ;;  %3719 = vmatpush1.msra.mxu0 %v2382_v32  ;;  %v794_v31 = vld [vmem:[#allocation2 + $0x1620] sm:$0xff]  ;;  %v2339_v32 = vunpack.c.h.bf16 %v732_v24  ;;  %v2334_v40 = vunpack.c.l.bf16 %v730_v30 }
 0x176   :  { %3790 = vmatpush1.msra.mxu1 %v2510_v33  ;;  %3720 = vmatprep.subr.mxu0 %v2379_v36  ;;  %v2467_v33 = vunpack.c.h.bf16 %v796_v25  ;;  %v728_v36 = vld [vmem:[#allocation2 + $0x1410] sm:$0xff]  ;;  %v2462_v41 = vunpack.c.l.bf16 %v794_v31 }
 0x177   :  { %3791 = vmatprep.subr.mxu1 %v2507_v37  ;;  %3721 = vmatpush1.msra.mxu0 %v2378_v38  ;;  %v792_v37 = vld [vmem:[#allocation2 + $0x1610] sm:$0xff]  ;;  %v2335_v38 = vunpack.c.h.bf16 %v730_v30  ;;  %v2330_v46 = vunpack.c.l.bf16 %v728_v36 }
 0x178   :  { %3792 = vmatpush1.msra.mxu1 %v2506_v39  ;;  %3722 = vmatprep.subr.mxu0 %v2375_v42  ;;  %v2463_v39 = vunpack.c.h.bf16 %v794_v31  ;;  %v726_v42 = vld [vmem:[#allocation2 + $0x1400] sm:$0xff]  ;;  %v2458_v47 = vunpack.c.l.bf16 %v792_v37 }
 0x179   :  { %3793 = vmatprep.subr.mxu1 %v2503_v43  ;;  %3723 = vmatpush1.msra.mxu0 %v2374_v44  ;;  %v790_v43 = vld [vmem:[#allocation2 + $0x1600] sm:$0xff]  ;;  %v2331_v44 = vunpack.c.h.bf16 %v728_v36  ;;  %v2326_v52 = vunpack.c.l.bf16 %v726_v42 }
 0x17a   :  { %3794 = vmatpush1.msra.mxu1 %v2502_v45  ;;  %3724 = vmatprep.subr.mxu0 %v2371_v48  ;;  %v2459_v45 = vunpack.c.h.bf16 %v792_v37  ;;  %v788_v48 = vld [vmem:[#allocation2 + $0x15f0] sm:$0xff]  ;;  %v2454_v53 = vunpack.c.l.bf16 %v790_v43 }
 0x17b   :  { %3795 = vmatprep.subr.mxu1 %v2499_v49  ;;  %3725 = vmatpush1.msra.mxu0 %v2370_v50  ;;  %v852_v49 = vld [vmem:[#allocation2 + $0x17f0] sm:$0xff]  ;;  %v2327_v50 = vunpack.c.h.bf16 %v726_v42  ;;  %v2450_v58 = vunpack.c.l.bf16 %v788_v48 }
 0x17c   :  { %3796 = vmatpush1.msra.mxu1 %v2498_v51  ;;  %3726 = vmatprep.subr.mxu0 %v2367_v54  ;;  %v2455_v51 = vunpack.c.h.bf16 %v790_v43  ;;  %v786_v54 = vld [vmem:[#allocation2 + $0x15e0] sm:$0xff]  ;;  %v2578_v59 = vunpack.c.l.bf16 %v852_v49 }
 0x17d   :  { %3797 = vmatprep.subr.mxu1 %v2495_v55  ;;  %3727 = vmatpush1.msra.mxu0 %v2366_v56  ;;  %v850_v55 = vld [vmem:[#allocation2 + $0x17e0] sm:$0xff]  ;;  %v2451_v56 = vunpack.c.h.bf16 %v788_v48  ;;  %v2446_v0 = vunpack.c.l.bf16 %v786_v54 }
 0x17e   :  { %3798 = vmatpush1.msra.mxu1 %v2494_v57  ;;  %3728 = vmatprep.subr.mxu0 %v2363_v60  ;;  %v2579_v57 = vunpack.c.h.bf16 %v852_v49  ;;  %v784_v60 = vld [vmem:[#allocation2 + $0x15d0] sm:$0xff]  ;;  %v2574_v1 = vunpack.c.l.bf16 %v850_v55 }
 0x17f   :  { %3799 = vmatprep.subr.mxu1 %v2491_v61  ;;  %3729 = vmatpush1.msra.mxu0 %v2362_v62  ;;  %v848_v61 = vld [vmem:[#allocation2 + $0x17d0] sm:$0xff]  ;;  %v2447_v62 = vunpack.c.h.bf16 %v786_v54  ;;  %v2442_v6 = vunpack.c.l.bf16 %v784_v60 }
 0x180   :  { %3800 = vmatpush1.msra.mxu1 %v2490_v63  ;;  %3730 = vmatprep.subr.mxu0 %v2359_v2  ;;  %v2575_v63 = vunpack.c.h.bf16 %v850_v55  ;;  %v782_v2 = vld [vmem:[#allocation2 + $0x15c0] sm:$0xff]  ;;  %v2570_v7 = vunpack.c.l.bf16 %v848_v61 }
 0x181   :  { %3801 = vmatprep.subr.mxu1 %v2487_v3  ;;  %3731 = vmatpush1.msra.mxu0 %v2358_v4  ;;  %v846_v3 = vld [vmem:[#allocation2 + $0x17c0] sm:$0xff]  ;;  %v2443_v4 = vunpack.c.h.bf16 %v784_v60  ;;  %v2438_v12 = vunpack.c.l.bf16 %v782_v2 }
 0x182   :  { %3802 = vmatpush1.msra.mxu1 %v2486_v5  ;;  %3732 = vmatprep.subr.mxu0 %v2355_v8  ;;  %v2571_v5 = vunpack.c.h.bf16 %v848_v61  ;;  %v780_v8 = vld [vmem:[#allocation2 + $0x15b0] sm:$0xff]  ;;  %v2566_v13 = vunpack.c.l.bf16 %v846_v3 }
 0x183   :  { %3803 = vmatprep.subr.mxu1 %v2483_v9  ;;  %3733 = vmatpush1.msra.mxu0 %v2354_v10  ;;  %v844_v9 = vld [vmem:[#allocation2 + $0x17b0] sm:$0xff]  ;;  %v2439_v10 = vunpack.c.h.bf16 %v782_v2  ;;  %v2434_v18 = vunpack.c.l.bf16 %v780_v8 }
 0x184   :  { %3804 = vmatpush1.msra.mxu1 %v2482_v11  ;;  %3734 = vmatprep.subr.mxu0 %v2351_v14  ;;  %v2567_v11 = vunpack.c.h.bf16 %v846_v3  ;;  %v778_v14 = vld [vmem:[#allocation2 + $0x15a0] sm:$0xff]  ;;  %v2562_v19 = vunpack.c.l.bf16 %v844_v9 }
 0x185   :  { %3805 = vmatprep.subr.mxu1 %v2479_v15  ;;  %3735 = vmatpush1.msra.mxu0 %v2350_v16  ;;  %v842_v15 = vld [vmem:[#allocation2 + $0x17a0] sm:$0xff]  ;;  %v2435_v16 = vunpack.c.h.bf16 %v780_v8  ;;  %v2430_v24 = vunpack.c.l.bf16 %v778_v14 }
 0x186   :  { %3806 = vmatpush1.msra.mxu1 %v2478_v17  ;;  %3736 = vmatprep.subr.mxu0 %v2347_v20  ;;  %v2563_v17 = vunpack.c.h.bf16 %v844_v9  ;;  %v776_v20 = vld [vmem:[#allocation2 + $0x1590] sm:$0xff]  ;;  %v2558_v25 = vunpack.c.l.bf16 %v842_v15 }
 0x187   :  { %3807 = vmatprep.subr.mxu1 %v2475_v21  ;;  %3737 = vmatpush1.msra.mxu0 %v2346_v22  ;;  %v840_v21 = vld [vmem:[#allocation2 + $0x1790] sm:$0xff]  ;;  %v2431_v22 = vunpack.c.h.bf16 %v778_v14  ;;  %v2426_v30 = vunpack.c.l.bf16 %v776_v20 }
 0x188   :  { %3808 = vmatpush1.msra.mxu1 %v2474_v23  ;;  %3738 = vmatprep.subr.mxu0 %v2343_v26  ;;  %v2559_v23 = vunpack.c.h.bf16 %v842_v15  ;;  %v774_v26 = vld [vmem:[#allocation2 + $0x1580] sm:$0xff]  ;;  %v2554_v31 = vunpack.c.l.bf16 %v840_v21 }
 0x189   :  { %3809 = vmatprep.subr.mxu1 %v2471_v27  ;;  %3739 = vmatpush1.msra.mxu0 %v2342_v28  ;;  %v838_v27 = vld [vmem:[#allocation2 + $0x1780] sm:$0xff]  ;;  %v2427_v28 = vunpack.c.h.bf16 %v776_v20  ;;  %v2422_v36 = vunpack.c.l.bf16 %v774_v26  ;;  %v948_v20 = vld [vmem:[#allocation2 + $0x1af0] sm:$0xff] }
 0x18a   :  { %3810 = vmatpush1.msra.mxu1 %v2470_v29  ;;  %3740 = vmatprep.subr.mxu0 %v2339_v32  ;;  %v2555_v29 = vunpack.c.h.bf16 %v840_v21  ;;  %v772_v32 = vld [vmem:[#allocation2 + $0x1570] sm:$0xff]  ;;  %v2550_v37 = vunpack.c.l.bf16 %v838_v27 }
 0x18b   :  { %3811 = vmatprep.subr.mxu1 %v2467_v33  ;;  %3741 = vmatpush1.msra.mxu0 %v2338_v34  ;;  %v836_v33 = vld [vmem:[#allocation2 + $0x1770] sm:$0xff]  ;;  %v2423_v34 = vunpack.c.h.bf16 %v774_v26  ;;  %v2418_v42 = vunpack.c.l.bf16 %v772_v32  ;;  %v946_v26 = vld [vmem:[#allocation2 + $0x1ae0] sm:$0xff] }
 0x18c   :  { %3812 = vmatpush1.msra.mxu1 %v2466_v35  ;;  %3742 = vmatprep.subr.mxu0 %v2335_v38  ;;  %v2551_v35 = vunpack.c.h.bf16 %v838_v27  ;;  %v770_v38 = vld [vmem:[#allocation2 + $0x1560] sm:$0xff]  ;;  %v2546_v43 = vunpack.c.l.bf16 %v836_v33  ;;  %v79_v27 = vld [vmem:[%s6067_s0 + $0xb8] sm:$0xff] }
 0x18d   :  { %3813 = vmatprep.subr.mxu1 %v2463_v39  ;;  %3743 = vmatpush1.msra.mxu0 %v2334_v40  ;;  %v834_v39 = vld [vmem:[#allocation2 + $0x1760] sm:$0xff]  ;;  %v2419_v40 = vunpack.c.h.bf16 %v772_v32  ;;  %v2414_v48 = vunpack.c.l.bf16 %v770_v38  ;;  %v880_v32 = vld [vmem:[#allocation2 + $0x18d0] sm:$0xff] }
 0x18e   :  { %3814 = vmatpush1.msra.mxu1 %v2462_v41  ;;  %3744 = vmatprep.subr.mxu0 %v2331_v44  ;;  %v2547_v41 = vunpack.c.h.bf16 %v836_v33  ;;  %v768_v44 = vld [vmem:[#allocation2 + $0x1550] sm:$0xff]  ;;  %v2542_v49 = vunpack.c.l.bf16 %v834_v39 }
 0x18f   :  { %3815 = vmatprep.subr.mxu1 %v2459_v45  ;;  %3745 = vmatpush1.msra.mxu0 %v2330_v46  ;;  %v832_v45 = vld [vmem:[#allocation2 + $0x1750] sm:$0xff]  ;;  %v2415_v46 = vunpack.c.h.bf16 %v770_v38  ;;  %v2410_v54 = vunpack.c.l.bf16 %v768_v44  ;;  %v878_v38 = vld [vmem:[#allocation2 + $0x18c0] sm:$0xff] }
 0x190   :  { %3816 = vmatpush1.msra.mxu1 %v2458_v47  ;;  %3746 = vmatprep.subr.mxu0 %v2327_v50  ;;  %v2543_v47 = vunpack.c.h.bf16 %v834_v39  ;;  %v766_v50 = vld [vmem:[#allocation2 + $0x1540] sm:$0xff]  ;;  %v2538_v55 = vunpack.c.l.bf16 %v832_v45  ;;  %v944_v33 = vld [vmem:[#allocation2 + $0x1ad0] sm:$0xff] }
 0x191   :  { %3817 = vmatprep.subr.mxu1 %v2455_v51  ;;  %3747 = vmatpush1.msra.mxu0 %v2326_v52  ;;  %v830_v51 = vld [vmem:[#allocation2 + $0x1740] sm:$0xff]  ;;  %v2411_v52 = vunpack.c.h.bf16 %v768_v44  ;;  %v2406_v60 = vunpack.c.l.bf16 %v766_v50  ;;  %v876_v44 = vld [vmem:[#allocation2 + $0x18b0] sm:$0xff] }
 0x192   :  { %3818 = vmatpush1.msra.mxu1 %v2454_v53  ;;  %3748 = vmatprep.subr.mxu0 %v2451_v56  ;;  %v2539_v53 = vunpack.c.h.bf16 %v832_v45  ;;  %v764_v56 = vld [vmem:[#allocation2 + $0x1530] sm:$0xff]  ;;  %v2534_v61 = vunpack.c.l.bf16 %v830_v51  ;;  %v942_v39 = vld [vmem:[#allocation2 + $0x1ac0] sm:$0xff] }
 0x193   :  { %3819 = vmatprep.subr.mxu1 %v2579_v57  ;;  %3749 = vmatpush2.msra.mxu0 %v2450_v58  ;;  %v828_v57 = vld [vmem:[#allocation2 + $0x1730] sm:$0xff]  ;;  %v2407_v58 = vunpack.c.h.bf16 %v766_v50  ;;  %v2402_v2 = vunpack.c.l.bf16 %v764_v56  ;;  %v874_v50 = vld [vmem:[#allocation2 + $0x18a0] sm:$0xff] }
 0x194   :  { %3820 = vmatpush2.msra.mxu1 %v2578_v59  ;;  %3750 = vmatprep.subr.mxu0 %v2447_v62  ;;  %v2535_v59 = vunpack.c.h.bf16 %v830_v51  ;;  %v762_v62 = vld [vmem:[#allocation2 + $0x1520] sm:$0xff]  ;;  %v2530_v3 = vunpack.c.l.bf16 %v828_v57  ;;  %v940_v45 = vld [vmem:[#allocation2 + $0x1ab0] sm:$0xff] }
 0x195   :  { %3821 = vmatprep.subr.mxu1 %v2575_v63  ;;  %3751 = vmatpush2.msra.mxu0 %v2446_v0  ;;  %v826_v63 = vld [vmem:[#allocation2 + $0x1720] sm:$0xff]  ;;  %v2403_v0 = vunpack.c.h.bf16 %v764_v56  ;;  %v2398_v8 = vunpack.c.l.bf16 %v762_v62  ;;  %v872_v56 = vld [vmem:[#allocation2 + $0x1890] sm:$0xff] }
 0x196   :  { %3822 = vmatpush2.msra.mxu1 %v2574_v1  ;;  %3752 = vmatprep.subr.mxu0 %v2443_v4  ;;  %v2531_v1 = vunpack.c.h.bf16 %v828_v57  ;;  %v760_v4 = vld [vmem:[#allocation2 + $0x1510] sm:$0xff]  ;;  %v2526_v9 = vunpack.c.l.bf16 %v826_v63  ;;  %v938_v51 = vld [vmem:[#allocation2 + $0x1aa0] sm:$0xff] }
 0x197   :  { %3823 = vmatprep.subr.mxu1 %v2571_v5  ;;  %3753 = vmatpush2.msra.mxu0 %v2442_v6  ;;  %v824_v5 = vld [vmem:[#allocation2 + $0x1710] sm:$0xff]  ;;  %v2399_v6 = vunpack.c.h.bf16 %v762_v62  ;;  %v2394_v14 = vunpack.c.l.bf16 %v760_v4  ;;  %v870_v62 = vld [vmem:[#allocation2 + $0x1880] sm:$0xff] }
 0x198   :  { %3824 = vmatpush2.msra.mxu1 %v2570_v7  ;;  %3754 = vmatprep.subr.mxu0 %v2439_v10  ;;  %v2527_v7 = vunpack.c.h.bf16 %v826_v63  ;;  %v758_v10 = vld [vmem:[#allocation2 + $0x1500] sm:$0xff]  ;;  %v2522_v15 = vunpack.c.l.bf16 %v824_v5  ;;  %v936_v57 = vld [vmem:[#allocation2 + $0x1a90] sm:$0xff] }
 0x199   :  { %3825 = vmatprep.subr.mxu1 %v2567_v11  ;;  %3755 = vmatpush2.msra.mxu0 %v2438_v12  ;;  %v822_v11 = vld [vmem:[#allocation2 + $0x1700] sm:$0xff]  ;;  %v2395_v12 = vunpack.c.h.bf16 %v760_v4  ;;  %v868_v4 = vld [vmem:[#allocation2 + $0x1870] sm:$0xff] }
 0x19a   :  { %3826 = vmatpush2.msra.mxu1 %v2566_v13  ;;  %3756 = vmatprep.subr.mxu0 %v2435_v16  ;;  %v2523_v13 = vunpack.c.h.bf16 %v824_v5  ;;  %v2391_v16 = vunpack.c.h.bf16 %v758_v10  ;;  %v2518_v21 = vunpack.c.l.bf16 %v822_v11  ;;  %v934_v63 = vld [vmem:[#allocation2 + $0x1a80] sm:$0xff]  ;;  %v932_v5 = vld [vmem:[#allocation2 + $0x1a70] sm:$0xff] }
 0x19b   :  { %3827 = vmatprep.subr.mxu1 %v2563_v17  ;;  %3757 = vmatpush2.msra.mxu0 %v2434_v18  ;;  %v2519_v17 = vunpack.c.h.bf16 %v822_v11  ;;  %v884_v18 = vld [vmem:[#allocation2 + $0x18f0] sm:$0xff]  ;;  %v930_v11 = vld [vmem:[#allocation2 + $0x1a60] sm:$0xff] }
 0x19c   :  { %3828 = vmatpush2.msra.mxu1 %v2562_v19  ;;  %3758 = vmatprep.subr.mxu0 %v2431_v22  ;;  %v2390_v19 = vunpack.c.l.bf16 %v758_v10  ;;  %v77_v22 = vld [vmem:[%s6067_s0 + $0xa8] sm:$0xff]  ;;  %v866_v10 = vld [vmem:[#allocation2 + $0x1860] sm:$0xff] }
 0x19d   :  { %3829 = vmatprep.subr.mxu1 %v2559_v23  ;;  %3759 = vmatpush2.msra.mxu0 %v2430_v24  ;;  %v76_v23 = vld [vmem:[%s6067_s0 + $0xa0] sm:$0xff]  ;;  %v2643_v24 = vunpack.c.h.bf16 %v884_v18 }
 0x19e   :  { %3830 = vmatpush2.msra.mxu1 %v2558_v25  ;;  %3760 = vmatprep.subr.mxu0 %v2427_v28  ;;  %v882_v25 = vld [vmem:[#allocation2 + $0x18e0] sm:$0xff]  ;;  %v2771_v28 = vunpack.c.h.bf16 %v948_v20 }
 0x19f   :  { %3831 = vmatprep.subr.mxu1 %v2555_v29  ;;  %3761 = vmatpush2.msra.mxu0 %v2426_v30  ;;  %v2642_v29 = vunpack.c.l.bf16 %v884_v18  ;;  %v2770_v30 = vunpack.c.l.bf16 %v948_v20  ;;  %v2607_v18 = vunpack.c.h.bf16 %v866_v10  ;;  %v2606_v20 = vunpack.c.l.bf16 %v866_v10 }
 0x1a0   :  { %3832 = vmatpush2.msra.mxu1 %v2554_v31  ;;  %3762 = vmatprep.subr.mxu0 %v2423_v34  ;;  %v78_v31 = vld [vmem:[%s6067_s0 + $0xb0] sm:$0xff]  ;;  %v2639_v34 = vunpack.c.h.bf16 %v882_v25 }
 0x1a1   :  { %3833 = vmatprep.subr.mxu1 %v2551_v35  ;;  %3763 = vmatpush2.msra.mxu0 %v2422_v36  ;;  %v2767_v35 = vunpack.c.h.bf16 %v946_v26  ;;  %v2638_v36 = vunpack.c.l.bf16 %v882_v25 }
 0x1a2   :  { %3834 = vmatpush2.msra.mxu1 %v2550_v37  ;;  %3764 = vmatprep.subr.mxu0 %v2419_v40  ;;  %v2766_v37 = vunpack.c.l.bf16 %v946_v26  ;;  %v2635_v40 = vunpack.c.h.bf16 %v880_v32 }
 0x1a3   :  { %3835 = vmatprep.subr.mxu1 %v2547_v41  ;;  %3765 = vmatpush2.msra.mxu0 %v2418_v42  ;;  %v2763_v41 = vunpack.c.h.bf16 %v944_v33  ;;  %v2634_v42 = vunpack.c.l.bf16 %v880_v32 }
 0x1a4   :  { %3836 = vmatpush2.msra.mxu1 %v2546_v43  ;;  %3766 = vmatprep.subr.mxu0 %v2415_v46  ;;  %v2762_v43 = vunpack.c.l.bf16 %v944_v33  ;;  %v2631_v46 = vunpack.c.h.bf16 %v878_v38 }
 0x1a5   :  { %3837 = vmatprep.subr.mxu1 %v2543_v47  ;;  %3767 = vmatpush2.msra.mxu0 %v2414_v48  ;;  %v2759_v47 = vunpack.c.h.bf16 %v942_v39  ;;  %v2630_v48 = vunpack.c.l.bf16 %v878_v38 }
 0x1a6   :  { %3838 = vmatpush2.msra.mxu1 %v2542_v49  ;;  %3768 = vmatprep.subr.mxu0 %v2411_v52  ;;  %v2758_v49 = vunpack.c.l.bf16 %v942_v39  ;;  %v2627_v52 = vunpack.c.h.bf16 %v876_v44 }
 0x1a7   :  { %3839 = vmatprep.subr.mxu1 %v2539_v53  ;;  %3769 = vmatpush2.msra.mxu0 %v2410_v54  ;;  %v2755_v53 = vunpack.c.h.bf16 %v940_v45  ;;  %v2626_v54 = vunpack.c.l.bf16 %v876_v44 }
 0x1a8   :  { %3840 = vmatpush2.msra.mxu1 %v2538_v55  ;;  %3770 = vmatprep.subr.mxu0 %v2407_v58  ;;  %v2754_v55 = vunpack.c.l.bf16 %v940_v45  ;;  %v2623_v58 = vunpack.c.h.bf16 %v874_v50 }
 0x1a9   :  { %3841 = vmatprep.subr.mxu1 %v2535_v59  ;;  %3771 = vmatpush2.msra.mxu0 %v2406_v60  ;;  %v2751_v59 = vunpack.c.h.bf16 %v938_v51  ;;  %v2622_v60 = vunpack.c.l.bf16 %v874_v50 }
 0x1aa   :  { %3842 = vmatpush2.msra.mxu1 %v2534_v61  ;;  %3772 = vmatprep.subr.mxu0 %v2403_v0  ;;  %v2750_v61 = vunpack.c.l.bf16 %v938_v51  ;;  %v2619_v0 = vunpack.c.h.bf16 %v872_v56 }
 0x1ab   :  { %3843 = vmatprep.subr.mxu1 %v2531_v1  ;;  %3773 = vmatpush2.msra.mxu0 %v2402_v2  ;;  %v2747_v1 = vunpack.c.h.bf16 %v936_v57  ;;  %v2618_v2 = vunpack.c.l.bf16 %v872_v56 }
 0x1ac   :  { %3844 = vmatpush2.msra.mxu1 %v2530_v3  ;;  %3774 = vmatprep.subr.mxu0 %v2399_v6  ;;  %v2746_v3 = vunpack.c.l.bf16 %v936_v57  ;;  %v2615_v6 = vunpack.c.h.bf16 %v870_v62 }
 0x1ad   :  { %3845 = vmatprep.subr.mxu1 %v2527_v7  ;;  %3775 = vmatpush2.msra.mxu0 %v2398_v8  ;;  %v2743_v7 = vunpack.c.h.bf16 %v934_v63  ;;  %v2614_v8 = vunpack.c.l.bf16 %v870_v62 }
 0x1ae   :  { %3846 = vmatpush2.msra.mxu1 %v2526_v9  ;;  %3776 = vmatprep.subr.mxu0 %v2395_v12  ;;  %v2742_v9 = vunpack.c.l.bf16 %v934_v63  ;;  %v2611_v12 = vunpack.c.h.bf16 %v868_v4 }
 0x1af   :  { %3847 = vmatprep.subr.mxu1 %v2523_v13  ;;  %3777 = vmatpush2.msra.mxu0 %v2394_v14  ;;  %v2739_v13 = vunpack.c.h.bf16 %v932_v5  ;;  %v2610_v14 = vunpack.c.l.bf16 %v868_v4 }
 0x1b0   :  { %3848 = vmatpush2.msra.mxu1 %v2522_v15  ;;  %3778 = vmatprep.subr.mxu0 %v2391_v16  ;;  %v2738_v15 = vunpack.c.l.bf16 %v932_v5  ;;  %v864_v16 = vld [vmem:[#allocation2 + $0x1850] sm:$0xff] }
 0x1b1   :  { %3849 = vmatprep.subr.mxu1 %v2519_v17  ;;  %3779 = vmatpush2.msra.mxu0 %v2390_v19  ;;  %v928_v17 = vld [vmem:[#allocation2 + $0x1a50] sm:$0xff]  ;;  %v2735_v19 = vunpack.c.h.bf16 %v930_v11  ;;  %v2602_v26 = vunpack.c.l.bf16 %v864_v16 }
 0x1b2   :  { %3780 = vmatprep.mubr.f32.mxu0 %v77_v22  ;;  %3850 = vmatpush2.msra.mxu1 %v2518_v21  ;;  %v2734_v21 = vunpack.c.l.bf16 %v930_v11  ;;  %v862_v22 = vld [vmem:[#allocation2 + $0x1840] sm:$0xff]  ;;  %v2731_v25 = vunpack.c.h.bf16 %v928_v17 }
 0x1b3   :  { %3781 = vmatmul.mubr.f32.vlgmr.msra.gmra.mxu0 %v76_v23  ;;  %3851 = vmatprep.mubr.f32.mxu1 %v79_v27  ;;  %v926_v23 = vld [vmem:[#allocation2 + $0x1a40] sm:$0xff]  ;;  %v2730_v27 = vunpack.c.l.bf16 %v928_v17  ;;  %v2598_v32 = vunpack.c.l.bf16 %v862_v22 }
 0x1b4   :  { %3858 = vmatprep.subr.mxu0 %v2643_v24  ;;  %3929 = vmatprep.subr.mxu1 %v2771_v28  ;;  %v2603_v24 = vunpack.c.h.bf16 %v864_v16  ;;  %v860_v28 = vld [vmem:[#allocation2 + $0x1830] sm:$0xff]  ;;  %v2726_v33 = vunpack.c.l.bf16 %v926_v23 }
 0x1b5   :  { %3852 = vmatmul.mubr.f32.vlgmr.msra.gmra.mxu1 %v78_v31  ;;  %3859 = vmatpush1.msra.mxu0 %v2642_v29  ;;  %v924_v29 = vld [vmem:[#allocation2 + $0x1a30] sm:$0xff]  ;;  %v2727_v31 = vunpack.c.h.bf16 %v926_v23  ;;  %v2594_v38 = vunpack.c.l.bf16 %v860_v28 }
 0x1b6   :  { %3930 = vmatpush1.msra.mxu1 %v2770_v30  ;;  %3860 = vmatprep.subr.mxu0 %v2639_v34  ;;  %v2599_v30 = vunpack.c.h.bf16 %v862_v22  ;;  %v858_v34 = vld [vmem:[#allocation2 + $0x1820] sm:$0xff]  ;;  %v2722_v39 = vunpack.c.l.bf16 %v924_v29 }
 0x1b7   :  { %3931 = vmatprep.subr.mxu1 %v2767_v35  ;;  %3861 = vmatpush1.msra.mxu0 %v2638_v36  ;;  %v922_v35 = vld [vmem:[#allocation2 + $0x1a20] sm:$0xff]  ;;  %v2595_v36 = vunpack.c.h.bf16 %v860_v28  ;;  %v2590_v44 = vunpack.c.l.bf16 %v858_v34 }
 0x1b8   :  { %3932 = vmatpush1.msra.mxu1 %v2766_v37  ;;  %3862 = vmatprep.subr.mxu0 %v2635_v40  ;;  %v2723_v37 = vunpack.c.h.bf16 %v924_v29  ;;  %v856_v40 = vld [vmem:[#allocation2 + $0x1810] sm:$0xff]  ;;  %v2718_v45 = vunpack.c.l.bf16 %v922_v35 }
 0x1b9   :  { %3933 = vmatprep.subr.mxu1 %v2763_v41  ;;  %3863 = vmatpush1.msra.mxu0 %v2634_v42  ;;  %v920_v41 = vld [vmem:[#allocation2 + $0x1a10] sm:$0xff]  ;;  %v2591_v42 = vunpack.c.h.bf16 %v858_v34  ;;  %v2586_v50 = vunpack.c.l.bf16 %v856_v40 }
 0x1ba   :  { %3934 = vmatpush1.msra.mxu1 %v2762_v43  ;;  %3864 = vmatprep.subr.mxu0 %v2631_v46  ;;  %v2719_v43 = vunpack.c.h.bf16 %v922_v35  ;;  %v854_v46 = vld [vmem:[#allocation2 + $0x1800] sm:$0xff]  ;;  %v2714_v51 = vunpack.c.l.bf16 %v920_v41 }
 0x1bb   :  { %3935 = vmatprep.subr.mxu1 %v2759_v47  ;;  %3865 = vmatpush1.msra.mxu0 %v2630_v48  ;;  %v918_v47 = vld [vmem:[#allocation2 + $0x1a00] sm:$0xff]  ;;  %v2587_v48 = vunpack.c.h.bf16 %v856_v40  ;;  %v2582_v56 = vunpack.c.l.bf16 %v854_v46 }
 0x1bc   :  { %3936 = vmatpush1.msra.mxu1 %v2758_v49  ;;  %3866 = vmatprep.subr.mxu0 %v2627_v52  ;;  %v2715_v49 = vunpack.c.h.bf16 %v920_v41  ;;  %v916_v52 = vld [vmem:[#allocation2 + $0x19f0] sm:$0xff]  ;;  %v2710_v57 = vunpack.c.l.bf16 %v918_v47 }
 0x1bd   :  { %3937 = vmatprep.subr.mxu1 %v2755_v53  ;;  %3867 = vmatpush1.msra.mxu0 %v2626_v54  ;;  %v980_v53 = vld [vmem:[#allocation2 + $0x1bf0] sm:$0xff]  ;;  %v2583_v54 = vunpack.c.h.bf16 %v854_v46  ;;  %v2706_v62 = vunpack.c.l.bf16 %v916_v52 }
 0x1be   :  { %3938 = vmatpush1.msra.mxu1 %v2754_v55  ;;  %3868 = vmatprep.subr.mxu0 %v2623_v58  ;;  %v2711_v55 = vunpack.c.h.bf16 %v918_v47  ;;  %v914_v58 = vld [vmem:[#allocation2 + $0x19e0] sm:$0xff]  ;;  %v2834_v63 = vunpack.c.l.bf16 %v980_v53 }
 0x1bf   :  { %3939 = vmatprep.subr.mxu1 %v2751_v59  ;;  %3869 = vmatpush1.msra.mxu0 %v2622_v60  ;;  %v978_v59 = vld [vmem:[#allocation2 + $0x1be0] sm:$0xff]  ;;  %v2707_v60 = vunpack.c.h.bf16 %v916_v52  ;;  %v2702_v4 = vunpack.c.l.bf16 %v914_v58 }
 0x1c0   :  { %3940 = vmatpush1.msra.mxu1 %v2750_v61  ;;  %3870 = vmatprep.subr.mxu0 %v2619_v0  ;;  %v2835_v61 = vunpack.c.h.bf16 %v980_v53  ;;  %v912_v0 = vld [vmem:[#allocation2 + $0x19d0] sm:$0xff]  ;;  %v2830_v5 = vunpack.c.l.bf16 %v978_v59 }
 0x1c1   :  { %3941 = vmatprep.subr.mxu1 %v2747_v1  ;;  %3871 = vmatpush1.msra.mxu0 %v2618_v2  ;;  %v976_v1 = vld [vmem:[#allocation2 + $0x1bd0] sm:$0xff]  ;;  %v2703_v2 = vunpack.c.h.bf16 %v914_v58  ;;  %v2698_v10 = vunpack.c.l.bf16 %v912_v0 }
 0x1c2   :  { %3942 = vmatpush1.msra.mxu1 %v2746_v3  ;;  %3872 = vmatprep.subr.mxu0 %v2615_v6  ;;  %v2831_v3 = vunpack.c.h.bf16 %v978_v59  ;;  %v910_v6 = vld [vmem:[#allocation2 + $0x19c0] sm:$0xff]  ;;  %v2826_v11 = vunpack.c.l.bf16 %v976_v1 }
 0x1c3   :  { %3943 = vmatprep.subr.mxu1 %v2743_v7  ;;  %3873 = vmatpush1.msra.mxu0 %v2614_v8  ;;  %v974_v7 = vld [vmem:[#allocation2 + $0x1bc0] sm:$0xff]  ;;  %v2699_v8 = vunpack.c.h.bf16 %v912_v0  ;;  %v2694_v16 = vunpack.c.l.bf16 %v910_v6 }
 0x1c4   :  { %3944 = vmatpush1.msra.mxu1 %v2742_v9  ;;  %3874 = vmatprep.subr.mxu0 %v2611_v12  ;;  %v2827_v9 = vunpack.c.h.bf16 %v976_v1  ;;  %v908_v12 = vld [vmem:[#allocation2 + $0x19b0] sm:$0xff]  ;;  %v2822_v17 = vunpack.c.l.bf16 %v974_v7 }
 0x1c5   :  { %3945 = vmatprep.subr.mxu1 %v2739_v13  ;;  %3875 = vmatpush1.msra.mxu0 %v2610_v14  ;;  %v972_v13 = vld [vmem:[#allocation2 + $0x1bb0] sm:$0xff]  ;;  %v2695_v14 = vunpack.c.h.bf16 %v910_v6  ;;  %v2690_v22 = vunpack.c.l.bf16 %v908_v12 }
 0x1c6   :  { %3946 = vmatpush1.msra.mxu1 %v2738_v15  ;;  %3876 = vmatprep.subr.mxu0 %v2607_v18  ;;  %v2823_v15 = vunpack.c.h.bf16 %v974_v7  ;;  %v906_v18 = vld [vmem:[#allocation2 + $0x19a0] sm:$0xff]  ;;  %v2818_v23 = vunpack.c.l.bf16 %v972_v13 }
 0x1c7   :  { %3947 = vmatprep.subr.mxu1 %v2735_v19  ;;  %3877 = vmatpush1.msra.mxu0 %v2606_v20  ;;  %v970_v19 = vld [vmem:[#allocation2 + $0x1ba0] sm:$0xff]  ;;  %v2691_v20 = vunpack.c.h.bf16 %v908_v12  ;;  %v2686_v28 = vunpack.c.l.bf16 %v906_v18 }
 0x1c8   :  { %3948 = vmatpush1.msra.mxu1 %v2734_v21  ;;  %3878 = vmatprep.subr.mxu0 %v2603_v24  ;;  %v2819_v21 = vunpack.c.h.bf16 %v972_v13  ;;  %v904_v24 = vld [vmem:[#allocation2 + $0x1990] sm:$0xff]  ;;  %v2814_v29 = vunpack.c.l.bf16 %v970_v19 }
 0x1c9   :  { %3949 = vmatprep.subr.mxu1 %v2731_v25  ;;  %3879 = vmatpush1.msra.mxu0 %v2602_v26  ;;  %v968_v25 = vld [vmem:[#allocation2 + $0x1b90] sm:$0xff]  ;;  %v2687_v26 = vunpack.c.h.bf16 %v906_v18  ;;  %v2682_v34 = vunpack.c.l.bf16 %v904_v24 }
 0x1ca   :  { %3950 = vmatpush1.msra.mxu1 %v2730_v27  ;;  %3880 = vmatprep.subr.mxu0 %v2599_v30  ;;  %v2815_v27 = vunpack.c.h.bf16 %v970_v19  ;;  %v902_v30 = vld [vmem:[#allocation2 + $0x1980] sm:$0xff]  ;;  %v2810_v35 = vunpack.c.l.bf16 %v968_v25 }
 0x1cb   :  { %3951 = vmatprep.subr.mxu1 %v2727_v31  ;;  %3881 = vmatpush1.msra.mxu0 %v2598_v32  ;;  %v966_v31 = vld [vmem:[#allocation2 + $0x1b80] sm:$0xff]  ;;  %v2683_v32 = vunpack.c.h.bf16 %v904_v24  ;;  %v2678_v40 = vunpack.c.l.bf16 %v902_v30  ;;  %v117_v24 = vld [vmem:[#allocation2 + $0xf8] sm:$0xff] }
 0x1cc   :  { %3952 = vmatpush1.msra.mxu1 %v2726_v33  ;;  %3882 = vmatprep.subr.mxu0 %v2595_v36  ;;  %v2811_v33 = vunpack.c.h.bf16 %v968_v25  ;;  %v900_v36 = vld [vmem:[#allocation2 + $0x1970] sm:$0xff]  ;;  %v2806_v41 = vunpack.c.l.bf16 %v966_v31 }
 0x1cd   :  { %3953 = vmatprep.subr.mxu1 %v2723_v37  ;;  %3883 = vmatpush1.msra.mxu0 %v2594_v38  ;;  %v964_v37 = vld [vmem:[#allocation2 + $0x1b70] sm:$0xff]  ;;  %v2679_v38 = vunpack.c.h.bf16 %v902_v30  ;;  %v2674_v46 = vunpack.c.l.bf16 %v900_v36  ;;  %v115_v30 = vld [vmem:[#allocation2 + $0xe8] sm:$0xff] }
 0x1ce   :  { %3954 = vmatpush1.msra.mxu1 %v2722_v39  ;;  %3884 = vmatprep.subr.mxu0 %v2591_v42  ;;  %v2807_v39 = vunpack.c.h.bf16 %v966_v31  ;;  %v898_v42 = vld [vmem:[#allocation2 + $0x1960] sm:$0xff]  ;;  %v2802_v47 = vunpack.c.l.bf16 %v964_v37  ;;  %v83_v31 = vld [vmem:[%s6067_s0 + $0xd8] sm:$0xff] }
 0x1cf   :  { %3955 = vmatprep.subr.mxu1 %v2719_v43  ;;  %3885 = vmatpush1.msra.mxu0 %v2590_v44  ;;  %v962_v43 = vld [vmem:[#allocation2 + $0x1b60] sm:$0xff]  ;;  %v2675_v44 = vunpack.c.h.bf16 %v900_v36  ;;  %v2670_v52 = vunpack.c.l.bf16 %v898_v42  ;;  %v1008_v36 = vld [vmem:[#allocation2 + $0x1cd0] sm:$0xff] }
 0x1d0   :  { %3956 = vmatpush1.msra.mxu1 %v2718_v45  ;;  %3886 = vmatprep.subr.mxu0 %v2587_v48  ;;  %v2803_v45 = vunpack.c.h.bf16 %v964_v37  ;;  %v896_v48 = vld [vmem:[#allocation2 + $0x1950] sm:$0xff]  ;;  %v2798_v53 = vunpack.c.l.bf16 %v962_v43  ;;  %v113_v37 = vld [vmem:[#allocation2 + $0xd8] sm:$0xff] }
 0x1d1   :  { %3957 = vmatprep.subr.mxu1 %v2715_v49  ;;  %3887 = vmatpush1.msra.mxu0 %v2586_v50  ;;  %v960_v49 = vld [vmem:[#allocation2 + $0x1b50] sm:$0xff]  ;;  %v2671_v50 = vunpack.c.h.bf16 %v898_v42  ;;  %v2666_v58 = vunpack.c.l.bf16 %v896_v48  ;;  %v1006_v42 = vld [vmem:[#allocation2 + $0x1cc0] sm:$0xff] }
 0x1d2   :  { %3958 = vmatpush1.msra.mxu1 %v2714_v51  ;;  %3888 = vmatprep.subr.mxu0 %v2583_v54  ;;  %v2799_v51 = vunpack.c.h.bf16 %v962_v43  ;;  %v894_v54 = vld [vmem:[#allocation2 + $0x1940] sm:$0xff]  ;;  %v2794_v59 = vunpack.c.l.bf16 %v960_v49  ;;  %v111_v43 = vld [vmem:[#allocation2 + $0xc8] sm:$0xff] }
 0x1d3   :  { %3959 = vmatprep.subr.mxu1 %v2711_v55  ;;  %3889 = vmatpush1.msra.mxu0 %v2582_v56  ;;  %v958_v55 = vld [vmem:[#allocation2 + $0x1b40] sm:$0xff]  ;;  %v2667_v56 = vunpack.c.h.bf16 %v896_v48  ;;  %v2662_v0 = vunpack.c.l.bf16 %v894_v54  ;;  %v1004_v48 = vld [vmem:[#allocation2 + $0x1cb0] sm:$0xff] }
 0x1d4   :  { %3960 = vmatpush1.msra.mxu1 %v2710_v57  ;;  %3890 = vmatprep.subr.mxu0 %v2707_v60  ;;  %v2795_v57 = vunpack.c.h.bf16 %v960_v49  ;;  %v892_v60 = vld [vmem:[#allocation2 + $0x1930] sm:$0xff]  ;;  %v2790_v1 = vunpack.c.l.bf16 %v958_v55  ;;  %v109_v49 = vld [vmem:[#allocation2 + $0xb8] sm:$0xff] }
 0x1d5   :  { %3961 = vmatprep.subr.mxu1 %v2835_v61  ;;  %3891 = vmatpush2.msra.mxu0 %v2706_v62  ;;  %v956_v61 = vld [vmem:[#allocation2 + $0x1b30] sm:$0xff]  ;;  %v2663_v62 = vunpack.c.h.bf16 %v894_v54  ;;  %v2658_v6 = vunpack.c.l.bf16 %v892_v60  ;;  %v1002_v54 = vld [vmem:[#allocation2 + $0x1ca0] sm:$0xff] }
 0x1d6   :  { %3962 = vmatpush2.msra.mxu1 %v2834_v63  ;;  %3892 = vmatprep.subr.mxu0 %v2703_v2  ;;  %v2791_v63 = vunpack.c.h.bf16 %v958_v55  ;;  %v890_v2 = vld [vmem:[#allocation2 + $0x1920] sm:$0xff]  ;;  %v2786_v7 = vunpack.c.l.bf16 %v956_v61  ;;  %v107_v55 = vld [vmem:[#allocation2 + $0xa8] sm:$0xff] }
 0x1d7   :  { %3963 = vmatprep.subr.mxu1 %v2831_v3  ;;  %3893 = vmatpush2.msra.mxu0 %v2702_v4  ;;  %v954_v3 = vld [vmem:[#allocation2 + $0x1b20] sm:$0xff]  ;;  %v2659_v4 = vunpack.c.h.bf16 %v892_v60  ;;  %v2654_v12 = vunpack.c.l.bf16 %v890_v2  ;;  %v1000_v60 = vld [vmem:[#allocation2 + $0x1c90] sm:$0xff] }
 0x1d8   :  { %3964 = vmatpush2.msra.mxu1 %v2830_v5  ;;  %3894 = vmatprep.subr.mxu0 %v2699_v8  ;;  %v2787_v5 = vunpack.c.h.bf16 %v956_v61  ;;  %v888_v8 = vld [vmem:[#allocation2 + $0x1910] sm:$0xff]  ;;  %v2782_v13 = vunpack.c.l.bf16 %v954_v3  ;;  %v105_v61 = vld [vmem:[#allocation2 + $0x98] sm:$0xff] }
 0x1d9   :  { %3965 = vmatprep.subr.mxu1 %v2827_v9  ;;  %3895 = vmatpush2.msra.mxu0 %v2698_v10  ;;  %v952_v9 = vld [vmem:[#allocation2 + $0x1b10] sm:$0xff]  ;;  %v2655_v10 = vunpack.c.h.bf16 %v890_v2  ;;  %v2650_v18 = vunpack.c.l.bf16 %v888_v8  ;;  %v998_v2 = vld [vmem:[#allocation2 + $0x1c80] sm:$0xff] }
 0x1da   :  { %3966 = vmatpush2.msra.mxu1 %v2826_v11  ;;  %3896 = vmatprep.subr.mxu0 %v2695_v14  ;;  %v2783_v11 = vunpack.c.h.bf16 %v954_v3  ;;  %v886_v14 = vld [vmem:[#allocation2 + $0x1900] sm:$0xff]  ;;  %v2778_v19 = vunpack.c.l.bf16 %v952_v9  ;;  %v103_v3 = vld [vmem:[#allocation2 + $0x88] sm:$0xff] }
 0x1db   :  { %3967 = vmatprep.subr.mxu1 %v2823_v15  ;;  %3897 = vmatpush2.msra.mxu0 %v2694_v16  ;;  %v950_v15 = vld [vmem:[#allocation2 + $0x1b00] sm:$0xff]  ;;  %v2651_v16 = vunpack.c.h.bf16 %v888_v8  ;;  %v996_v8 = vld [vmem:[#allocation2 + $0x1c70] sm:$0xff] }
 0x1dc   :  { %3968 = vmatpush2.msra.mxu1 %v2822_v17  ;;  %3898 = vmatprep.subr.mxu0 %v2691_v20  ;;  %v2779_v17 = vunpack.c.h.bf16 %v952_v9  ;;  %v2647_v20 = vunpack.c.h.bf16 %v886_v14  ;;  %v2774_v25 = vunpack.c.l.bf16 %v950_v15  ;;  %v101_v9 = vld [vmem:[#allocation2 + $0x78] sm:$0xff] }
 0x1dd   :  { %3969 = vmatprep.subr.mxu1 %v2819_v21  ;;  %3899 = vmatpush2.msra.mxu0 %v2690_v22  ;;  %v2775_v21 = vunpack.c.h.bf16 %v950_v15  ;;  %v1012_v22 = vld [vmem:[#allocation2 + $0x1cf0] sm:$0xff]  ;;  %v99_v15 = vld [vmem:[#allocation2 + $0x68] sm:$0xff] }
 0x1de   :  { %3970 = vmatpush2.msra.mxu1 %v2818_v23  ;;  %3900 = vmatprep.subr.mxu0 %v2687_v26  ;;  %v2646_v23 = vunpack.c.l.bf16 %v886_v14  ;;  %v81_v26 = vld [vmem:[%s6067_s0 + $0xc8] sm:$0xff]  ;;  %v994_v14 = vld [vmem:[#allocation2 + $0x1c60] sm:$0xff] }
 0x1df   :  { %3971 = vmatprep.subr.mxu1 %v2815_v27  ;;  %3901 = vmatpush2.msra.mxu0 %v2686_v28  ;;  %v80_v27 = vld [vmem:[%s6067_s0 + $0xc0] sm:$0xff]  ;;  %v2899_v28 = vunpack.c.h.bf16 %v1012_v22 }
 0x1e0   :  { %3972 = vmatpush2.msra.mxu1 %v2814_v29  ;;  %3902 = vmatprep.subr.mxu0 %v2683_v32  ;;  %v1010_v29 = vld [vmem:[#allocation2 + $0x1ce0] sm:$0xff]  ;;  %v1109_v32 = vunpack.c.h.bf16 %v117_v24 }
 0x1e1   :  { %3973 = vmatprep.subr.mxu1 %v2811_v33  ;;  %3903 = vmatpush2.msra.mxu0 %v2682_v34  ;;  %v2898_v33 = vunpack.c.l.bf16 %v1012_v22  ;;  %v1108_v34 = vunpack.c.l.bf16 %v117_v24  ;;  %v2863_v22 = vunpack.c.h.bf16 %v994_v14  ;;  %v2862_v24 = vunpack.c.l.bf16 %v994_v14 }
 0x1e2   :  { %3974 = vmatpush2.msra.mxu1 %v2810_v35  ;;  %3904 = vmatprep.subr.mxu0 %v2679_v38  ;;  %v82_v35 = vld [vmem:[%s6067_s0 + $0xd0] sm:$0xff]  ;;  %v2895_v38 = vunpack.c.h.bf16 %v1010_v29 }
 0x1e3   :  { %3975 = vmatprep.subr.mxu1 %v2807_v39  ;;  %3905 = vmatpush2.msra.mxu0 %v2678_v40  ;;  %v1105_v39 = vunpack.c.h.bf16 %v115_v30  ;;  %v2894_v40 = vunpack.c.l.bf16 %v1010_v29 }
 0x1e4   :  { %3976 = vmatpush2.msra.mxu1 %v2806_v41  ;;  %3906 = vmatprep.subr.mxu0 %v2675_v44  ;;  %v1104_v41 = vunpack.c.l.bf16 %v115_v30  ;;  %v2891_v44 = vunpack.c.h.bf16 %v1008_v36 }
 0x1e5   :  { %3977 = vmatprep.subr.mxu1 %v2803_v45  ;;  %3907 = vmatpush2.msra.mxu0 %v2674_v46  ;;  %v1101_v45 = vunpack.c.h.bf16 %v113_v37  ;;  %v2890_v46 = vunpack.c.l.bf16 %v1008_v36 }
 0x1e6   :  { %3978 = vmatpush2.msra.mxu1 %v2802_v47  ;;  %3908 = vmatprep.subr.mxu0 %v2671_v50  ;;  %v1100_v47 = vunpack.c.l.bf16 %v113_v37  ;;  %v2887_v50 = vunpack.c.h.bf16 %v1006_v42 }
 0x1e7   :  { %3979 = vmatprep.subr.mxu1 %v2799_v51  ;;  %3909 = vmatpush2.msra.mxu0 %v2670_v52  ;;  %v1097_v51 = vunpack.c.h.bf16 %v111_v43  ;;  %v2886_v52 = vunpack.c.l.bf16 %v1006_v42 }
 0x1e8   :  { %3980 = vmatpush2.msra.mxu1 %v2798_v53  ;;  %3910 = vmatprep.subr.mxu0 %v2667_v56  ;;  %v1096_v53 = vunpack.c.l.bf16 %v111_v43  ;;  %v2883_v56 = vunpack.c.h.bf16 %v1004_v48 }
 0x1e9   :  { %3981 = vmatprep.subr.mxu1 %v2795_v57  ;;  %3911 = vmatpush2.msra.mxu0 %v2666_v58  ;;  %v1093_v57 = vunpack.c.h.bf16 %v109_v49  ;;  %v2882_v58 = vunpack.c.l.bf16 %v1004_v48 }
 0x1ea   :  { %3982 = vmatpush2.msra.mxu1 %v2794_v59  ;;  %3912 = vmatprep.subr.mxu0 %v2663_v62  ;;  %v1092_v59 = vunpack.c.l.bf16 %v109_v49  ;;  %v2879_v62 = vunpack.c.h.bf16 %v1002_v54 }
 0x1eb   :  { %3983 = vmatprep.subr.mxu1 %v2791_v63  ;;  %3913 = vmatpush2.msra.mxu0 %v2662_v0  ;;  %v1089_v63 = vunpack.c.h.bf16 %v107_v55  ;;  %v2878_v0 = vunpack.c.l.bf16 %v1002_v54 }
 0x1ec   :  { %3984 = vmatpush2.msra.mxu1 %v2790_v1  ;;  %3914 = vmatprep.subr.mxu0 %v2659_v4  ;;  %v1088_v1 = vunpack.c.l.bf16 %v107_v55  ;;  %v2875_v4 = vunpack.c.h.bf16 %v1000_v60 }
 0x1ed   :  { %3985 = vmatprep.subr.mxu1 %v2787_v5  ;;  %3915 = vmatpush2.msra.mxu0 %v2658_v6  ;;  %v1085_v5 = vunpack.c.h.bf16 %v105_v61  ;;  %v2874_v6 = vunpack.c.l.bf16 %v1000_v60 }
 0x1ee   :  { %3986 = vmatpush2.msra.mxu1 %v2786_v7  ;;  %3916 = vmatprep.subr.mxu0 %v2655_v10  ;;  %v1084_v7 = vunpack.c.l.bf16 %v105_v61  ;;  %v2871_v10 = vunpack.c.h.bf16 %v998_v2 }
 0x1ef   :  { %3987 = vmatprep.subr.mxu1 %v2783_v11  ;;  %3917 = vmatpush2.msra.mxu0 %v2654_v12  ;;  %v1081_v11 = vunpack.c.h.bf16 %v103_v3  ;;  %v2870_v12 = vunpack.c.l.bf16 %v998_v2 }
 0x1f0   :  { %3988 = vmatpush2.msra.mxu1 %v2782_v13  ;;  %3918 = vmatprep.subr.mxu0 %v2651_v16  ;;  %v1080_v13 = vunpack.c.l.bf16 %v103_v3  ;;  %v2867_v16 = vunpack.c.h.bf16 %v996_v8 }
 0x1f1   :  { %3989 = vmatprep.subr.mxu1 %v2779_v17  ;;  %3919 = vmatpush2.msra.mxu0 %v2650_v18  ;;  %v1077_v17 = vunpack.c.h.bf16 %v101_v9  ;;  %v2866_v18 = vunpack.c.l.bf16 %v996_v8 }
 0x1f2   :  { %3990 = vmatpush2.msra.mxu1 %v2778_v19  ;;  %3920 = vmatprep.subr.mxu0 %v2647_v20  ;;  %v1076_v19 = vunpack.c.l.bf16 %v101_v9  ;;  %v992_v20 = vld [vmem:[#allocation2 + $0x1c50] sm:$0xff] }
 0x1f3   :  { %3991 = vmatprep.subr.mxu1 %v2775_v21  ;;  %3921 = vmatpush2.msra.mxu0 %v2646_v23  ;;  %v97_v21 = vld [vmem:[#allocation2 + $0x58] sm:$0xff]  ;;  %v1073_v23 = vunpack.c.h.bf16 %v99_v15  ;;  %v2858_v30 = vunpack.c.l.bf16 %v992_v20 }
 0x1f4   :  { %3922 = vmatprep.mubr.f32.mxu0 %v81_v26  ;;  %3992 = vmatpush2.msra.mxu1 %v2774_v25  ;;  %v1072_v25 = vunpack.c.l.bf16 %v99_v15  ;;  %v990_v26 = vld [vmem:[#allocation2 + $0x1c40] sm:$0xff]  ;;  %v1069_v29 = vunpack.c.h.bf16 %v97_v21 }
 0x1f5   :  { %3923 = vmatmul.mubr.f32.vlgmr.msra.gmra.mxu0 %v80_v27  ;;  %3993 = vmatprep.mubr.f32.mxu1 %v83_v31  ;;  %v95_v27 = vld [vmem:[#allocation2 + $0x48] sm:$0xff]  ;;  %v1068_v31 = vunpack.c.l.bf16 %v97_v21  ;;  %v2854_v36 = vunpack.c.l.bf16 %v990_v26 }
 0x1f6   :  { %4000 = vmatprep.subr.mxu0 %v2899_v28  ;;  %4071 = vmatprep.subr.mxu1 %v1109_v32  ;;  %v2859_v28 = vunpack.c.h.bf16 %v992_v20  ;;  %v988_v32 = vld [vmem:[#allocation2 + $0x1c30] sm:$0xff]  ;;  %v1064_v37 = vunpack.c.l.bf16 %v95_v27 }
 0x1f7   :  { %3994 = vmatmul.mubr.f32.vlgmr.msra.gmra.mxu1 %v82_v35  ;;  %4001 = vmatpush1.msra.mxu0 %v2898_v33  ;;  %v93_v33 = vld [vmem:[#allocation2 + $0x38] sm:$0xff]  ;;  %v1065_v35 = vunpack.c.h.bf16 %v95_v27  ;;  %v2850_v42 = vunpack.c.l.bf16 %v988_v32 }
 0x1f8   :  { %4072 = vmatpush1.msra.mxu1 %v1108_v34  ;;  %4002 = vmatprep.subr.mxu0 %v2895_v38  ;;  %v2855_v34 = vunpack.c.h.bf16 %v990_v26  ;;  %v986_v38 = vld [vmem:[#allocation2 + $0x1c20] sm:$0xff]  ;;  %v1060_v43 = vunpack.c.l.bf16 %v93_v33 }
 0x1f9   :  { %4073 = vmatprep.subr.mxu1 %v1105_v39  ;;  %4003 = vmatpush1.msra.mxu0 %v2894_v40  ;;  %v91_v39 = vld [vmem:[#allocation2 + $0x28] sm:$0xff]  ;;  %v2851_v40 = vunpack.c.h.bf16 %v988_v32  ;;  %v2846_v48 = vunpack.c.l.bf16 %v986_v38 }
 0x1fa   :  { %4074 = vmatpush1.msra.mxu1 %v1104_v41  ;;  %4004 = vmatprep.subr.mxu0 %v2891_v44  ;;  %v1061_v41 = vunpack.c.h.bf16 %v93_v33  ;;  %v984_v44 = vld [vmem:[#allocation2 + $0x1c10] sm:$0xff]  ;;  %v1056_v49 = vunpack.c.l.bf16 %v91_v39 }
 0x1fb   :  { %4075 = vmatprep.subr.mxu1 %v1101_v45  ;;  %4005 = vmatpush1.msra.mxu0 %v2890_v46  ;;  %v89_v45 = vld [vmem:[#allocation2 + $0x18] sm:$0xff]  ;;  %v2847_v46 = vunpack.c.h.bf16 %v986_v38  ;;  %v2842_v54 = vunpack.c.l.bf16 %v984_v44 }
 0x1fc   :  { %4076 = vmatpush1.msra.mxu1 %v1100_v47  ;;  %4006 = vmatprep.subr.mxu0 %v2887_v50  ;;  %v1057_v47 = vunpack.c.h.bf16 %v91_v39  ;;  %v982_v50 = vld [vmem:[#allocation2 + $0x1c00] sm:$0xff]  ;;  %v1052_v55 = vunpack.c.l.bf16 %v89_v45 }
 0x1fd   :  { %4077 = vmatprep.subr.mxu1 %v1097_v51  ;;  %4007 = vmatpush1.msra.mxu0 %v2886_v52  ;;  %v87_v51 = vld [vmem:[#allocation2 + $0x8] sm:$0xff]  ;;  %v2843_v52 = vunpack.c.h.bf16 %v984_v44  ;;  %v2838_v60 = vunpack.c.l.bf16 %v982_v50 }
 0x1fe   :  { %4078 = vmatpush1.msra.mxu1 %v1096_v53  ;;  %4008 = vmatprep.subr.mxu0 %v2883_v56  ;;  %v1053_v53 = vunpack.c.h.bf16 %v89_v45  ;;  %v1044_v56 = vld [vmem:[#allocation2 + $0x1df0] sm:$0xff]  ;;  %v1048_v61 = vunpack.c.l.bf16 %v87_v51 }
 0x1ff   :  { %4079 = vmatprep.subr.mxu1 %v1093_v57  ;;  %4009 = vmatpush1.msra.mxu0 %v2882_v58  ;;  %v149_v57 = vld [vmem:[#allocation2 + $0x1f8] sm:$0xff]  ;;  %v2839_v58 = vunpack.c.h.bf16 %v982_v50  ;;  %v2962_v2 = vunpack.c.l.bf16 %v1044_v56 }
 0x200   :  { %4080 = vmatpush1.msra.mxu1 %v1092_v59  ;;  %4010 = vmatprep.subr.mxu0 %v2879_v62  ;;  %v1049_v59 = vunpack.c.h.bf16 %v87_v51  ;;  %v1042_v62 = vld [vmem:[#allocation2 + $0x1de0] sm:$0xff]  ;;  %v1172_v3 = vunpack.c.l.bf16 %v149_v57 }
 0x201   :  { %4081 = vmatprep.subr.mxu1 %v1089_v63  ;;  %4011 = vmatpush1.msra.mxu0 %v2878_v0  ;;  %v147_v63 = vld [vmem:[#allocation2 + $0x1e8] sm:$0xff]  ;;  %v2963_v0 = vunpack.c.h.bf16 %v1044_v56  ;;  %v2958_v8 = vunpack.c.l.bf16 %v1042_v62 }
 0x202   :  { %4082 = vmatpush1.msra.mxu1 %v1088_v1  ;;  %4012 = vmatprep.subr.mxu0 %v2875_v4  ;;  %v1173_v1 = vunpack.c.h.bf16 %v149_v57  ;;  %v1040_v4 = vld [vmem:[#allocation2 + $0x1dd0] sm:$0xff]  ;;  %v1168_v9 = vunpack.c.l.bf16 %v147_v63 }
 0x203   :  { %4083 = vmatprep.subr.mxu1 %v1085_v5  ;;  %4013 = vmatpush1.msra.mxu0 %v2874_v6  ;;  %v145_v5 = vld [vmem:[#allocation2 + $0x1d8] sm:$0xff]  ;;  %v2959_v6 = vunpack.c.h.bf16 %v1042_v62  ;;  %v2954_v14 = vunpack.c.l.bf16 %v1040_v4 }
 0x204   :  { %4084 = vmatpush1.msra.mxu1 %v1084_v7  ;;  %4014 = vmatprep.subr.mxu0 %v2871_v10  ;;  %v1169_v7 = vunpack.c.h.bf16 %v147_v63  ;;  %v1038_v10 = vld [vmem:[#allocation2 + $0x1dc0] sm:$0xff]  ;;  %v1164_v15 = vunpack.c.l.bf16 %v145_v5 }
 0x205   :  { %4085 = vmatprep.subr.mxu1 %v1081_v11  ;;  %4015 = vmatpush1.msra.mxu0 %v2870_v12  ;;  %v143_v11 = vld [vmem:[#allocation2 + $0x1c8] sm:$0xff]  ;;  %v2955_v12 = vunpack.c.h.bf16 %v1040_v4  ;;  %v2950_v20 = vunpack.c.l.bf16 %v1038_v10 }
 0x206   :  { %4086 = vmatpush1.msra.mxu1 %v1080_v13  ;;  %4016 = vmatprep.subr.mxu0 %v2867_v16  ;;  %v1165_v13 = vunpack.c.h.bf16 %v145_v5  ;;  %v1036_v16 = vld [vmem:[#allocation2 + $0x1db0] sm:$0xff]  ;;  %v1160_v21 = vunpack.c.l.bf16 %v143_v11 }
 0x207   :  { %4087 = vmatprep.subr.mxu1 %v1077_v17  ;;  %4017 = vmatpush1.msra.mxu0 %v2866_v18  ;;  %v141_v17 = vld [vmem:[#allocation2 + $0x1b8] sm:$0xff]  ;;  %v2951_v18 = vunpack.c.h.bf16 %v1038_v10  ;;  %v2946_v26 = vunpack.c.l.bf16 %v1036_v16 }
 0x208   :  { %4088 = vmatpush1.msra.mxu1 %v1076_v19  ;;  %4018 = vmatprep.subr.mxu0 %v2863_v22  ;;  %v1161_v19 = vunpack.c.h.bf16 %v143_v11  ;;  %v1034_v22 = vld [vmem:[#allocation2 + $0x1da0] sm:$0xff]  ;;  %v1156_v27 = vunpack.c.l.bf16 %v141_v17 }
 0x209   :  { %4089 = vmatprep.subr.mxu1 %v1073_v23  ;;  %4019 = vmatpush1.msra.mxu0 %v2862_v24  ;;  %v139_v23 = vld [vmem:[#allocation2 + $0x1a8] sm:$0xff]  ;;  %v2947_v24 = vunpack.c.h.bf16 %v1036_v16  ;;  %v2942_v32 = vunpack.c.l.bf16 %v1034_v22 }
 0x20a   :  { %4090 = vmatpush1.msra.mxu1 %v1072_v25  ;;  %4020 = vmatprep.subr.mxu0 %v2859_v28  ;;  %v1157_v25 = vunpack.c.h.bf16 %v141_v17  ;;  %v1032_v28 = vld [vmem:[#allocation2 + $0x1d90] sm:$0xff]  ;;  %v1152_v33 = vunpack.c.l.bf16 %v139_v23 }
 0x20b   :  { %4091 = vmatprep.subr.mxu1 %v1069_v29  ;;  %4021 = vmatpush1.msra.mxu0 %v2858_v30  ;;  %v137_v29 = vld [vmem:[#allocation2 + $0x198] sm:$0xff]  ;;  %v2943_v30 = vunpack.c.h.bf16 %v1034_v22  ;;  %v2938_v38 = vunpack.c.l.bf16 %v1032_v28 }
 0x20c   :  { %4092 = vmatpush1.msra.mxu1 %v1068_v31  ;;  %4022 = vmatprep.subr.mxu0 %v2855_v34  ;;  %v1153_v31 = vunpack.c.h.bf16 %v139_v23  ;;  %v1030_v34 = vld [vmem:[#allocation2 + $0x1d80] sm:$0xff]  ;;  %v1148_v39 = vunpack.c.l.bf16 %v137_v29 }
 0x20d   :  { %4093 = vmatprep.subr.mxu1 %v1065_v35  ;;  %4023 = vmatpush1.msra.mxu0 %v2854_v36  ;;  %v135_v35 = vld [vmem:[#allocation2 + $0x188] sm:$0xff]  ;;  %v2939_v36 = vunpack.c.h.bf16 %v1032_v28  ;;  %v2934_v44 = vunpack.c.l.bf16 %v1030_v34  ;;  %v245_v28 = vld [vmem:[#allocation2 + $0x4f8] sm:$0xff] }
 0x20e   :  { %4094 = vmatpush1.msra.mxu1 %v1064_v37  ;;  %4024 = vmatprep.subr.mxu0 %v2851_v40  ;;  %v1149_v37 = vunpack.c.h.bf16 %v137_v29  ;;  %v1028_v40 = vld [vmem:[#allocation2 + $0x1d70] sm:$0xff]  ;;  %v1144_v45 = vunpack.c.l.bf16 %v135_v35 }
 0x20f   :  { %4095 = vmatprep.subr.mxu1 %v1061_v41  ;;  %4025 = vmatpush1.msra.mxu0 %v2850_v42  ;;  %v133_v41 = vld [vmem:[#allocation2 + $0x178] sm:$0xff]  ;;  %v2935_v42 = vunpack.c.h.bf16 %v1030_v34  ;;  %v2930_v50 = vunpack.c.l.bf16 %v1028_v40  ;;  %v243_v34 = vld [vmem:[#allocation2 + $0x4e8] sm:$0xff] }
 0x210   :  { %4096 = vmatpush1.msra.mxu1 %v1060_v43  ;;  %4026 = vmatprep.subr.mxu0 %v2847_v46  ;;  %v1145_v43 = vunpack.c.h.bf16 %v135_v35  ;;  %v1026_v46 = vld [vmem:[#allocation2 + $0x1d60] sm:$0xff]  ;;  %v1140_v51 = vunpack.c.l.bf16 %v133_v41  ;;  %v1365_v35 = vunpack.c.h.bf16 %v245_v28 }
 0x211   :  { %4097 = vmatprep.subr.mxu1 %v1057_v47  ;;  %4027 = vmatpush1.msra.mxu0 %v2846_v48  ;;  %v131_v47 = vld [vmem:[#allocation2 + $0x168] sm:$0xff]  ;;  %v2931_v48 = vunpack.c.h.bf16 %v1028_v40  ;;  %v2926_v56 = vunpack.c.l.bf16 %v1026_v46 }
 0x212   :  { %4098 = vmatpush1.msra.mxu1 %v1056_v49  ;;  %4028 = vmatprep.subr.mxu0 %v2843_v52  ;;  %v1141_v49 = vunpack.c.h.bf16 %v133_v41  ;;  %v1024_v52 = vld [vmem:[#allocation2 + $0x1d50] sm:$0xff]  ;;  %v1136_v57 = vunpack.c.l.bf16 %v131_v47  ;;  %v1361_v41 = vunpack.c.h.bf16 %v243_v34 }
 0x213   :  { %4099 = vmatprep.subr.mxu1 %v1053_v53  ;;  %4029 = vmatpush1.msra.mxu0 %v2842_v54  ;;  %v129_v53 = vld [vmem:[#allocation2 + $0x158] sm:$0xff]  ;;  %v2927_v54 = vunpack.c.h.bf16 %v1026_v46  ;;  %v2922_v62 = vunpack.c.l.bf16 %v1024_v52  ;;  %v239_v46 = vld [vmem:[#allocation2 + $0x4c8] sm:$0xff] }
 0x214   :  { %4100 = vmatpush1.msra.mxu1 %v1052_v55  ;;  %4030 = vmatprep.subr.mxu0 %v2839_v58  ;;  %v1137_v55 = vunpack.c.h.bf16 %v131_v47  ;;  %v1022_v58 = vld [vmem:[#allocation2 + $0x1d40] sm:$0xff]  ;;  %v1132_v63 = vunpack.c.l.bf16 %v129_v53 }
 0x215   :  { %4101 = vmatprep.subr.mxu1 %v1049_v59  ;;  %4031 = vmatpush1.msra.mxu0 %v2838_v60  ;;  %v127_v59 = vld [vmem:[#allocation2 + $0x148] sm:$0xff]  ;;  %v2923_v60 = vunpack.c.h.bf16 %v1024_v52  ;;  %v2918_v4 = vunpack.c.l.bf16 %v1022_v58  ;;  %v5617_v47 = vld [vmem:[%s6067_s0] sm:$0xff]  ;;  %v173_v52 = vld [vmem:[#allocation2 + $0x2b8] sm:$0xff] }
 0x216   :  { %4102 = vmatpush1.msra.mxu1 %v1048_v61  ;;  %4032 = vmatprep.subr.mxu0 %v2963_v0  ;;  %v1133_v61 = vunpack.c.h.bf16 %v129_v53  ;;  %v1020_v0 = vld [vmem:[#allocation2 + $0x1d30] sm:$0xff]  ;;  %v1128_v5 = vunpack.c.l.bf16 %v127_v59  ;;  %v237_v53 = vld [vmem:[#allocation2 + $0x4b8] sm:$0xff] }
 0x217   :  { %4103 = vmatprep.subr.mxu1 %v1173_v1  ;;  %4033 = vmatpush2.msra.mxu0 %v2962_v2  ;;  %v125_v1 = vld [vmem:[#allocation2 + $0x138] sm:$0xff]  ;;  %v2919_v2 = vunpack.c.h.bf16 %v1022_v58  ;;  %v2914_v10 = vunpack.c.l.bf16 %v1020_v0  ;;  %v171_v58 = vld [vmem:[#allocation2 + $0x2a8] sm:$0xff] }
 0x218   :  { %4104 = vmatpush2.msra.mxu1 %v1172_v3  ;;  %4034 = vmatprep.subr.mxu0 %v2959_v6  ;;  %v1129_v3 = vunpack.c.h.bf16 %v127_v59  ;;  %v1018_v6 = vld [vmem:[#allocation2 + $0x1d20] sm:$0xff]  ;;  %v1124_v11 = vunpack.c.l.bf16 %v125_v1  ;;  %v235_v59 = vld [vmem:[#allocation2 + $0x4a8] sm:$0xff] }
 0x219   :  { %4105 = vmatprep.subr.mxu1 %v1169_v7  ;;  %4035 = vmatpush2.msra.mxu0 %v2958_v8  ;;  %v123_v7 = vld [vmem:[#allocation2 + $0x128] sm:$0xff]  ;;  %v2915_v8 = vunpack.c.h.bf16 %v1020_v0  ;;  %v2910_v16 = vunpack.c.l.bf16 %v1018_v6  ;;  %v169_v0 = vld [vmem:[#allocation2 + $0x298] sm:$0xff] }
 0x21a   :  { %4106 = vmatpush2.msra.mxu1 %v1168_v9  ;;  %4036 = vmatprep.subr.mxu0 %v2955_v12  ;;  %v1125_v9 = vunpack.c.h.bf16 %v125_v1  ;;  %v1016_v12 = vld [vmem:[#allocation2 + $0x1d10] sm:$0xff]  ;;  %v1120_v17 = vunpack.c.l.bf16 %v123_v7  ;;  %v233_v1 = vld [vmem:[#allocation2 + $0x498] sm:$0xff] }
 0x21b   :  { %4107 = vmatprep.subr.mxu1 %v1165_v13  ;;  %4037 = vmatpush2.msra.mxu0 %v2954_v14  ;;  %v121_v13 = vld [vmem:[#allocation2 + $0x118] sm:$0xff]  ;;  %v2911_v14 = vunpack.c.h.bf16 %v1018_v6  ;;  %v2906_v22 = vunpack.c.l.bf16 %v1016_v12  ;;  %v167_v6 = vld [vmem:[#allocation2 + $0x288] sm:$0xff] }
 0x21c   :  { %4108 = vmatpush2.msra.mxu1 %v1164_v15  ;;  %4038 = vmatprep.subr.mxu0 %v2951_v18  ;;  %v1121_v15 = vunpack.c.h.bf16 %v123_v7  ;;  %v1014_v18 = vld [vmem:[#allocation2 + $0x1d00] sm:$0xff]  ;;  %v1116_v23 = vunpack.c.l.bf16 %v121_v13  ;;  %v231_v7 = vld [vmem:[#allocation2 + $0x488] sm:$0xff] }
 0x21d   :  { %4109 = vmatprep.subr.mxu1 %v1161_v19  ;;  %4039 = vmatpush2.msra.mxu0 %v2950_v20  ;;  %v119_v19 = vld [vmem:[#allocation2 + $0x108] sm:$0xff]  ;;  %v2907_v20 = vunpack.c.h.bf16 %v1016_v12  ;;  %v165_v12 = vld [vmem:[#allocation2 + $0x278] sm:$0xff] }
 0x21e   :  { %4110 = vmatpush2.msra.mxu1 %v1160_v21  ;;  %4040 = vmatprep.subr.mxu0 %v2947_v24  ;;  %v1117_v21 = vunpack.c.h.bf16 %v121_v13  ;;  %v2903_v24 = vunpack.c.h.bf16 %v1014_v18  ;;  %v1112_v29 = vunpack.c.l.bf16 %v119_v19  ;;  %v229_v13 = vld [vmem:[#allocation2 + $0x478] sm:$0xff] }
 0x21f   :  { %4111 = vmatprep.subr.mxu1 %v1157_v25  ;;  %4041 = vmatpush2.msra.mxu0 %v2946_v26  ;;  %v1113_v25 = vunpack.c.h.bf16 %v119_v19  ;;  %v181_v26 = vld [vmem:[#allocation2 + $0x2f8] sm:$0xff]  ;;  %v227_v19 = vld [vmem:[#allocation2 + $0x468] sm:$0xff] }
 0x220   :  { %4112 = vmatpush2.msra.mxu1 %v1156_v27  ;;  %4042 = vmatprep.subr.mxu0 %v2943_v30  ;;  %v2902_v27 = vunpack.c.l.bf16 %v1014_v18  ;;  %v85_v30 = vld [vmem:[%s6067_s0 + $0xe8] sm:$0xff] }
 0x221   :  { %4113 = vmatprep.subr.mxu1 %v1153_v31  ;;  %4043 = vmatpush2.msra.mxu0 %v2942_v32  ;;  %v84_v31 = vld [vmem:[%s6067_s0 + $0xe0] sm:$0xff]  ;;  %v1237_v32 = vunpack.c.h.bf16 %v181_v26  ;;  %v163_v18 = vld [vmem:[#allocation2 + $0x268] sm:$0xff] }
 0x222   :  { %4114 = vmatpush2.msra.mxu1 %v1152_v33  ;;  %4044 = vmatprep.subr.mxu0 %v2939_v36  ;;  %v179_v33 = vld [vmem:[#allocation2 + $0x2e8] sm:$0xff]  ;;  %v1236_v36 = vunpack.c.l.bf16 %v181_v26  ;;  %v1201_v26 = vunpack.c.h.bf16 %v163_v18 }
 0x223   :  { %4115 = vmatprep.subr.mxu1 %v1149_v37  ;;  %4045 = vmatpush2.msra.mxu0 %v2938_v38  ;;  %v1364_v37 = vunpack.c.l.bf16 %v245_v28  ;;  %v177_v38 = vld [vmem:[#allocation2 + $0x2d8] sm:$0xff]  ;;  %v1233_v40 = vunpack.c.h.bf16 %v179_v33  ;;  %v1200_v28 = vunpack.c.l.bf16 %v163_v18 }
 0x224   :  { %4116 = vmatpush2.msra.mxu1 %v1148_v39  ;;  %4046 = vmatprep.subr.mxu0 %v2935_v42  ;;  %v241_v39 = vld [vmem:[#allocation2 + $0x4d8] sm:$0xff]  ;;  %v5616_v42 = vld [vmem:[%s6067_s0 + $0x8] sm:$0xff] }
 0x225   :  { %4117 = vmatprep.subr.mxu1 %v1145_v43  ;;  %4047 = vmatpush2.msra.mxu0 %v2934_v44  ;;  %v1232_v43 = vunpack.c.l.bf16 %v179_v33  ;;  %v1360_v44 = vunpack.c.l.bf16 %v243_v34 }
 0x226   :  { %4118 = vmatpush2.msra.mxu1 %v1144_v45  ;;  %4048 = vmatprep.subr.mxu0 %v2931_v48  ;;  %v175_v45 = vld [vmem:[#allocation2 + $0x2c8] sm:$0xff]  ;;  %v1229_v48 = vunpack.c.h.bf16 %v177_v38 }
 0x227   :  { %4119 = vmatprep.subr.mxu1 %v1141_v49  ;;  %4049 = vmatpush2.msra.mxu0 %v2930_v50  ;;  %v1357_v49 = vunpack.c.h.bf16 %v241_v39  ;;  %v1228_v50 = vunpack.c.l.bf16 %v177_v38 }
 0x228   :  { %4120 = vmatpush2.msra.mxu1 %v1140_v51  ;;  %4050 = vmatprep.subr.mxu0 %v2927_v54  ;;  %v1356_v51 = vunpack.c.l.bf16 %v241_v39  ;;  %v1225_v54 = vunpack.c.h.bf16 %v175_v45 }
 0x229   :  { %4121 = vmatprep.subr.mxu1 %v1137_v55  ;;  %4051 = vmatpush2.msra.mxu0 %v2926_v56  ;;  %v1353_v55 = vunpack.c.h.bf16 %v239_v46  ;;  %v1224_v56 = vunpack.c.l.bf16 %v175_v45 }
 0x22a   :  { %4122 = vmatpush2.msra.mxu1 %v1136_v57  ;;  %4052 = vmatprep.subr.mxu0 %v2923_v60  ;;  %v1352_v57 = vunpack.c.l.bf16 %v239_v46  ;;  %v1221_v60 = vunpack.c.h.bf16 %v173_v52 }
 0x22b   :  { %4123 = vmatprep.subr.mxu1 %v1133_v61  ;;  %4053 = vmatpush2.msra.mxu0 %v2922_v62  ;;  %v1349_v61 = vunpack.c.h.bf16 %v237_v53  ;;  %v1220_v62 = vunpack.c.l.bf16 %v173_v52 }
 0x22c   :  { %4124 = vmatpush2.msra.mxu1 %v1132_v63  ;;  %4054 = vmatprep.subr.mxu0 %v2919_v2  ;;  %v1348_v63 = vunpack.c.l.bf16 %v237_v53  ;;  %v1217_v2 = vunpack.c.h.bf16 %v171_v58 }
 0x22d   :  { %4125 = vmatprep.subr.mxu1 %v1129_v3  ;;  %4055 = vmatpush2.msra.mxu0 %v2918_v4  ;;  %v1345_v3 = vunpack.c.h.bf16 %v235_v59  ;;  %v1216_v4 = vunpack.c.l.bf16 %v171_v58 }
 0x22e   :  { %4126 = vmatpush2.msra.mxu1 %v1128_v5  ;;  %4056 = vmatprep.subr.mxu0 %v2915_v8  ;;  %v1344_v5 = vunpack.c.l.bf16 %v235_v59  ;;  %v1213_v8 = vunpack.c.h.bf16 %v169_v0 }
 0x22f   :  { %4127 = vmatprep.subr.mxu1 %v1125_v9  ;;  %4057 = vmatpush2.msra.mxu0 %v2914_v10  ;;  %v1341_v9 = vunpack.c.h.bf16 %v233_v1  ;;  %v1212_v10 = vunpack.c.l.bf16 %v169_v0 }
 0x230   :  { %4128 = vmatpush2.msra.mxu1 %v1124_v11  ;;  %4058 = vmatprep.subr.mxu0 %v2911_v14  ;;  %v1340_v11 = vunpack.c.l.bf16 %v233_v1  ;;  %v1209_v14 = vunpack.c.h.bf16 %v167_v6 }
 0x231   :  { %4129 = vmatprep.subr.mxu1 %v1121_v15  ;;  %4059 = vmatpush2.msra.mxu0 %v2910_v16  ;;  %v1337_v15 = vunpack.c.h.bf16 %v231_v7  ;;  %v1208_v16 = vunpack.c.l.bf16 %v167_v6 }
 0x232   :  { %4130 = vmatpush2.msra.mxu1 %v1120_v17  ;;  %4060 = vmatprep.subr.mxu0 %v2907_v20  ;;  %v1336_v17 = vunpack.c.l.bf16 %v231_v7  ;;  %v1205_v20 = vunpack.c.h.bf16 %v165_v12 }
 0x233   :  { %4131 = vmatprep.subr.mxu1 %v1117_v21  ;;  %4061 = vmatpush2.msra.mxu0 %v2906_v22  ;;  %v1333_v21 = vunpack.c.h.bf16 %v229_v13  ;;  %v1204_v22 = vunpack.c.l.bf16 %v165_v12 }
 0x234   :  { %4132 = vmatpush2.msra.mxu1 %v1116_v23  ;;  %4062 = vmatprep.subr.mxu0 %v2903_v24  ;;  %v1332_v23 = vunpack.c.l.bf16 %v229_v13  ;;  %v161_v24 = vld [vmem:[#allocation2 + $0x258] sm:$0xff] }
 0x235   :  { %4133 = vmatprep.subr.mxu1 %v1113_v25  ;;  %4063 = vmatpush2.msra.mxu0 %v2902_v27  ;;  %v225_v25 = vld [vmem:[#allocation2 + $0x458] sm:$0xff]  ;;  %v1329_v27 = vunpack.c.h.bf16 %v227_v19  ;;  %v1196_v34 = vunpack.c.l.bf16 %v161_v24 }
 0x236   :  { %4064 = vmatprep.mubr.f32.mxu0 %v85_v30  ;;  %4134 = vmatpush2.msra.mxu1 %v1112_v29  ;;  %v1328_v29 = vunpack.c.l.bf16 %v227_v19  ;;  %v159_v30 = vld [vmem:[#allocation2 + $0x248] sm:$0xff]  ;;  %v1325_v33 = vunpack.c.h.bf16 %v225_v25 }
 0x237   :  { %4065 = vmatmul.mubr.f32.vlgmr.msra.gmra.mxu0 %v84_v31  ;;  %4135 = vmatprep.mubr.f32.mxu1 %v5616_v42  ;;  %v223_v31 = vld [vmem:[#allocation2 + $0x448] sm:$0xff]  ;;  %v1193_v38 = vunpack.c.h.bf16 %v159_v30 }
 0x238   :  { %4142 = vmatprep.subr.mxu0 %v1237_v32  ;;  %4213 = vmatprep.subr.mxu1 %v1365_v35  ;;  %v1197_v32 = vunpack.c.h.bf16 %v161_v24  ;;  %v1324_v35 = vunpack.c.l.bf16 %v225_v25  ;;  %v1321_v39 = vunpack.c.h.bf16 %v223_v31  ;;  %v155_v42 = vld [vmem:[#allocation2 + $0x228] sm:$0xff] }
 0x239   :  { %4136 = vmatmul.mubr.f32.vlgmr.msra.gmra.mxu1 %v5617_v47  ;;  %4143 = vmatpush1.msra.mxu0 %v1236_v36  ;;  %v157_v36 = vld [vmem:[#allocation2 + $0x238] sm:$0xff]  ;;  %v1184_v52 = vunpack.c.l.bf16 %v155_v42 }
 0x23a   :  { %4214 = vmatpush1.msra.mxu1 %v1364_v37  ;;  %4144 = vmatprep.subr.mxu0 %v1233_v40  ;;  %v221_v37 = vld [vmem:[#allocation2 + $0x438] sm:$0xff]  ;;  %v1192_v40 = vunpack.c.l.bf16 %v159_v30  ;;  %v1188_v46 = vunpack.c.l.bf16 %v157_v36 }
 0x23b   :  { %4215 = vmatprep.subr.mxu1 %v1361_v41  ;;  %4145 = vmatpush1.msra.mxu0 %v1232_v43  ;;  %v1320_v41 = vunpack.c.l.bf16 %v223_v31  ;;  %v219_v43 = vld [vmem:[#allocation2 + $0x428] sm:$0xff]  ;;  %v1317_v45 = vunpack.c.h.bf16 %v221_v37  ;;  %v1316_v47 = vunpack.c.l.bf16 %v221_v37 }
 0x23c   :  { %4216 = vmatpush1.msra.mxu1 %v1360_v44  ;;  %4146 = vmatprep.subr.mxu0 %v1229_v48  ;;  %v1189_v44 = vunpack.c.h.bf16 %v157_v36  ;;  %v153_v48 = vld [vmem:[#allocation2 + $0x218] sm:$0xff]  ;;  %v1312_v53 = vunpack.c.l.bf16 %v219_v43 }
 0x23d   :  { %4217 = vmatprep.subr.mxu1 %v1357_v49  ;;  %4147 = vmatpush1.msra.mxu0 %v1228_v50  ;;  %v217_v49 = vld [vmem:[#allocation2 + $0x418] sm:$0xff]  ;;  %v1185_v50 = vunpack.c.h.bf16 %v155_v42  ;;  %v1180_v58 = vunpack.c.l.bf16 %v153_v48 }
 0x23e   :  { %4218 = vmatpush1.msra.mxu1 %v1356_v51  ;;  %4148 = vmatprep.subr.mxu0 %v1225_v54  ;;  %v1313_v51 = vunpack.c.h.bf16 %v219_v43  ;;  %v151_v54 = vld [vmem:[#allocation2 + $0x208] sm:$0xff]  ;;  %v1308_v59 = vunpack.c.l.bf16 %v217_v49 }
 0x23f   :  { %4219 = vmatprep.subr.mxu1 %v1353_v55  ;;  %4149 = vmatpush1.msra.mxu0 %v1224_v56  ;;  %v215_v55 = vld [vmem:[#allocation2 + $0x408] sm:$0xff]  ;;  %v1181_v56 = vunpack.c.h.bf16 %v153_v48  ;;  %v1176_v0 = vunpack.c.l.bf16 %v151_v54 }
 0x240   :  { %4220 = vmatpush1.msra.mxu1 %v1352_v57  ;;  %4150 = vmatprep.subr.mxu0 %v1221_v60  ;;  %v1309_v57 = vunpack.c.h.bf16 %v217_v49  ;;  %v213_v60 = vld [vmem:[#allocation2 + $0x3f8] sm:$0xff]  ;;  %v1304_v1 = vunpack.c.l.bf16 %v215_v55 }
 0x241   :  { %4221 = vmatprep.subr.mxu1 %v1349_v61  ;;  %4151 = vmatpush1.msra.mxu0 %v1220_v62  ;;  %v277_v61 = vld [vmem:[#allocation2 + $0x5f8] sm:$0xff]  ;;  %v1177_v62 = vunpack.c.h.bf16 %v151_v54  ;;  %v1300_v6 = vunpack.c.l.bf16 %v213_v60 }
 0x242   :  { %4222 = vmatpush1.msra.mxu1 %v1348_v63  ;;  %4152 = vmatprep.subr.mxu0 %v1217_v2  ;;  %v1305_v63 = vunpack.c.h.bf16 %v215_v55  ;;  %v211_v2 = vld [vmem:[#allocation2 + $0x3e8] sm:$0xff]  ;;  %v1428_v7 = vunpack.c.l.bf16 %v277_v61 }
 0x243   :  { %4223 = vmatprep.subr.mxu1 %v1345_v3  ;;  %4153 = vmatpush1.msra.mxu0 %v1216_v4  ;;  %v275_v3 = vld [vmem:[#allocation2 + $0x5e8] sm:$0xff]  ;;  %v1301_v4 = vunpack.c.h.bf16 %v213_v60  ;;  %v1296_v12 = vunpack.c.l.bf16 %v211_v2 }
 0x244   :  { %4224 = vmatpush1.msra.mxu1 %v1344_v5  ;;  %4154 = vmatprep.subr.mxu0 %v1213_v8  ;;  %v1429_v5 = vunpack.c.h.bf16 %v277_v61  ;;  %v209_v8 = vld [vmem:[#allocation2 + $0x3d8] sm:$0xff]  ;;  %v1424_v13 = vunpack.c.l.bf16 %v275_v3 }
 0x245   :  { %4225 = vmatprep.subr.mxu1 %v1341_v9  ;;  %4155 = vmatpush1.msra.mxu0 %v1212_v10  ;;  %v273_v9 = vld [vmem:[#allocation2 + $0x5d8] sm:$0xff]  ;;  %v1297_v10 = vunpack.c.h.bf16 %v211_v2  ;;  %v1292_v18 = vunpack.c.l.bf16 %v209_v8 }
 0x246   :  { %4226 = vmatpush1.msra.mxu1 %v1340_v11  ;;  %4156 = vmatprep.subr.mxu0 %v1209_v14  ;;  %v1425_v11 = vunpack.c.h.bf16 %v275_v3  ;;  %v207_v14 = vld [vmem:[#allocation2 + $0x3c8] sm:$0xff]  ;;  %v1420_v19 = vunpack.c.l.bf16 %v273_v9 }
 0x247   :  { %4227 = vmatprep.subr.mxu1 %v1337_v15  ;;  %4157 = vmatpush1.msra.mxu0 %v1208_v16  ;;  %v271_v15 = vld [vmem:[#allocation2 + $0x5c8] sm:$0xff]  ;;  %v1293_v16 = vunpack.c.h.bf16 %v209_v8  ;;  %v1288_v24 = vunpack.c.l.bf16 %v207_v14 }
 0x248   :  { %4228 = vmatpush1.msra.mxu1 %v1336_v17  ;;  %4158 = vmatprep.subr.mxu0 %v1205_v20  ;;  %v1421_v17 = vunpack.c.h.bf16 %v273_v9  ;;  %v205_v20 = vld [vmem:[#allocation2 + $0x3b8] sm:$0xff]  ;;  %v1416_v25 = vunpack.c.l.bf16 %v271_v15 }
 0x249   :  { %4229 = vmatprep.subr.mxu1 %v1333_v21  ;;  %4159 = vmatpush1.msra.mxu0 %v1204_v22  ;;  %v269_v21 = vld [vmem:[#allocation2 + $0x5b8] sm:$0xff]  ;;  %v1289_v22 = vunpack.c.h.bf16 %v207_v14  ;;  %v1284_v30 = vunpack.c.l.bf16 %v205_v20 }
 0x24a   :  { %4230 = vmatpush1.msra.mxu1 %v1332_v23  ;;  %4160 = vmatprep.subr.mxu0 %v1201_v26  ;;  %v1417_v23 = vunpack.c.h.bf16 %v271_v15  ;;  %v203_v26 = vld [vmem:[#allocation2 + $0x3a8] sm:$0xff]  ;;  %v1412_v31 = vunpack.c.l.bf16 %v269_v21 }
 0x24b   :  { %4231 = vmatprep.subr.mxu1 %v1329_v27  ;;  %4161 = vmatpush1.msra.mxu0 %v1200_v28  ;;  %v267_v27 = vld [vmem:[#allocation2 + $0x5a8] sm:$0xff]  ;;  %v1285_v28 = vunpack.c.h.bf16 %v205_v20  ;;  %v1280_v36 = vunpack.c.l.bf16 %v203_v26 }
 0x24c   :  { %4232 = vmatpush1.msra.mxu1 %v1328_v29  ;;  %4162 = vmatprep.subr.mxu0 %v1197_v32  ;;  %v1413_v29 = vunpack.c.h.bf16 %v269_v21  ;;  %v201_v32 = vld [vmem:[#allocation2 + $0x398] sm:$0xff]  ;;  %v1408_v37 = vunpack.c.l.bf16 %v267_v27 }
 0x24d   :  { %4233 = vmatprep.subr.mxu1 %v1325_v33  ;;  %4163 = vmatpush1.msra.mxu0 %v1196_v34  ;;  %v265_v33 = vld [vmem:[#allocation2 + $0x598] sm:$0xff]  ;;  %v1281_v34 = vunpack.c.h.bf16 %v203_v26  ;;  %v1276_v42 = vunpack.c.l.bf16 %v201_v32 }
 0x24e   :  { %4234 = vmatpush1.msra.mxu1 %v1324_v35  ;;  %4164 = vmatprep.subr.mxu0 %v1193_v38  ;;  %v1409_v35 = vunpack.c.h.bf16 %v267_v27  ;;  %v199_v38 = vld [vmem:[#allocation2 + $0x388] sm:$0xff]  ;;  %v1404_v43 = vunpack.c.l.bf16 %v265_v33 }
 0x24f   :  { %4235 = vmatprep.subr.mxu1 %v1321_v39  ;;  %4165 = vmatpush1.msra.mxu0 %v1192_v40  ;;  %v263_v39 = vld [vmem:[#allocation2 + $0x588] sm:$0xff]  ;;  %v1277_v40 = vunpack.c.h.bf16 %v201_v32  ;;  %v1272_v48 = vunpack.c.l.bf16 %v199_v38  ;;  %v373_v32 = vld [vmem:[#allocation2 + $0x8f8] sm:$0xff] }
 0x250   :  { %4236 = vmatpush1.msra.mxu1 %v1320_v41  ;;  %4166 = vmatprep.subr.mxu0 %v1189_v44  ;;  %v1405_v41 = vunpack.c.h.bf16 %v265_v33  ;;  %v197_v44 = vld [vmem:[#allocation2 + $0x378] sm:$0xff]  ;;  %v1400_v49 = vunpack.c.l.bf16 %v263_v39 }
 0x251   :  { %4237 = vmatprep.subr.mxu1 %v1317_v45  ;;  %4167 = vmatpush1.msra.mxu0 %v1188_v46  ;;  %v261_v45 = vld [vmem:[#allocation2 + $0x578] sm:$0xff]  ;;  %v1273_v46 = vunpack.c.h.bf16 %v199_v38  ;;  %v1268_v54 = vunpack.c.l.bf16 %v197_v44 }
 0x252   :  { %4238 = vmatpush1.msra.mxu1 %v1316_v47  ;;  %4168 = vmatprep.subr.mxu0 %v1185_v50  ;;  %v1401_v47 = vunpack.c.h.bf16 %v263_v39  ;;  %v195_v50 = vld [vmem:[#allocation2 + $0x368] sm:$0xff]  ;;  %v1396_v55 = vunpack.c.l.bf16 %v261_v45  ;;  %v5618_v38 = vld [vmem:[%s6067_s0 + $0x18] sm:$0xff] }
 0x253   :  { %4239 = vmatprep.subr.mxu1 %v1313_v51  ;;  %4169 = vmatpush1.msra.mxu0 %v1184_v52  ;;  %v259_v51 = vld [vmem:[#allocation2 + $0x568] sm:$0xff]  ;;  %v1269_v52 = vunpack.c.h.bf16 %v197_v44  ;;  %v1264_v60 = vunpack.c.l.bf16 %v195_v50 }
 0x254   :  { %4240 = vmatpush1.msra.mxu1 %v1312_v53  ;;  %4170 = vmatprep.subr.mxu0 %v1181_v56  ;;  %v1397_v53 = vunpack.c.h.bf16 %v261_v45  ;;  %v193_v56 = vld [vmem:[#allocation2 + $0x358] sm:$0xff]  ;;  %v1392_v61 = vunpack.c.l.bf16 %v259_v51 }
 0x255   :  { %4241 = vmatprep.subr.mxu1 %v1309_v57  ;;  %4171 = vmatpush1.msra.mxu0 %v1180_v58  ;;  %v257_v57 = vld [vmem:[#allocation2 + $0x558] sm:$0xff]  ;;  %v1265_v58 = vunpack.c.h.bf16 %v195_v50  ;;  %v1260_v2 = vunpack.c.l.bf16 %v193_v56  ;;  %v367_v50 = vld [vmem:[#allocation2 + $0x8c8] sm:$0xff] }
 0x256   :  { %4242 = vmatpush1.msra.mxu1 %v1308_v59  ;;  %4172 = vmatprep.subr.mxu0 %v1177_v62  ;;  %v1393_v59 = vunpack.c.h.bf16 %v259_v51  ;;  %v191_v62 = vld [vmem:[#allocation2 + $0x348] sm:$0xff]  ;;  %v1388_v3 = vunpack.c.l.bf16 %v257_v57  ;;  %v5621_v51 = vld [vmem:[%s6067_s0 + $0x20] sm:$0xff] }
 0x257   :  { %4243 = vmatprep.subr.mxu1 %v1305_v63  ;;  %4173 = vmatpush1.msra.mxu0 %v1176_v0  ;;  %v255_v63 = vld [vmem:[#allocation2 + $0x548] sm:$0xff]  ;;  %v1261_v0 = vunpack.c.h.bf16 %v193_v56  ;;  %v1256_v8 = vunpack.c.l.bf16 %v191_v62  ;;  %v301_v56 = vld [vmem:[#allocation2 + $0x6b8] sm:$0xff] }
 0x258   :  { %4244 = vmatpush1.msra.mxu1 %v1304_v1  ;;  %4174 = vmatprep.subr.mxu0 %v1301_v4  ;;  %v1389_v1 = vunpack.c.h.bf16 %v257_v57  ;;  %v189_v4 = vld [vmem:[#allocation2 + $0x338] sm:$0xff]  ;;  %v1384_v9 = vunpack.c.l.bf16 %v255_v63 }
 0x259   :  { %4245 = vmatprep.subr.mxu1 %v1429_v5  ;;  %4175 = vmatpush2.msra.mxu0 %v1300_v6  ;;  %v253_v5 = vld [vmem:[#allocation2 + $0x538] sm:$0xff]  ;;  %v1257_v6 = vunpack.c.h.bf16 %v191_v62  ;;  %v1252_v14 = vunpack.c.l.bf16 %v189_v4  ;;  %v299_v62 = vld [vmem:[#allocation2 + $0x6a8] sm:$0xff] }
 0x25a   :  { %4246 = vmatpush2.msra.mxu1 %v1428_v7  ;;  %4176 = vmatprep.subr.mxu0 %v1297_v10  ;;  %v1385_v7 = vunpack.c.h.bf16 %v255_v63  ;;  %v187_v10 = vld [vmem:[#allocation2 + $0x328] sm:$0xff]  ;;  %v1380_v15 = vunpack.c.l.bf16 %v253_v5  ;;  %v365_v57 = vld [vmem:[#allocation2 + $0x8b8] sm:$0xff] }
 0x25b   :  { %4247 = vmatprep.subr.mxu1 %v1425_v11  ;;  %4177 = vmatpush2.msra.mxu0 %v1296_v12  ;;  %v251_v11 = vld [vmem:[#allocation2 + $0x528] sm:$0xff]  ;;  %v1253_v12 = vunpack.c.h.bf16 %v189_v4  ;;  %v1248_v20 = vunpack.c.l.bf16 %v187_v10  ;;  %v297_v4 = vld [vmem:[#allocation2 + $0x698] sm:$0xff] }
 0x25c   :  { %4248 = vmatpush2.msra.mxu1 %v1424_v13  ;;  %4178 = vmatprep.subr.mxu0 %v1293_v16  ;;  %v1381_v13 = vunpack.c.h.bf16 %v253_v5  ;;  %v185_v16 = vld [vmem:[#allocation2 + $0x318] sm:$0xff]  ;;  %v1376_v21 = vunpack.c.l.bf16 %v251_v11  ;;  %v363_v63 = vld [vmem:[#allocation2 + $0x8a8] sm:$0xff] }
 0x25d   :  { %4249 = vmatprep.subr.mxu1 %v1421_v17  ;;  %4179 = vmatpush2.msra.mxu0 %v1292_v18  ;;  %v249_v17 = vld [vmem:[#allocation2 + $0x518] sm:$0xff]  ;;  %v1249_v18 = vunpack.c.h.bf16 %v187_v10  ;;  %v1244_v26 = vunpack.c.l.bf16 %v185_v16  ;;  %v295_v10 = vld [vmem:[#allocation2 + $0x688] sm:$0xff] }
 0x25e   :  { %4250 = vmatpush2.msra.mxu1 %v1420_v19  ;;  %4180 = vmatprep.subr.mxu0 %v1289_v22  ;;  %v1377_v19 = vunpack.c.h.bf16 %v251_v11  ;;  %v183_v22 = vld [vmem:[#allocation2 + $0x308] sm:$0xff]  ;;  %v1372_v27 = vunpack.c.l.bf16 %v249_v17  ;;  %v361_v5 = vld [vmem:[#allocation2 + $0x898] sm:$0xff] }
 0x25f   :  { %4251 = vmatprep.subr.mxu1 %v1417_v23  ;;  %4181 = vmatpush2.msra.mxu0 %v1288_v24  ;;  %v247_v23 = vld [vmem:[#allocation2 + $0x508] sm:$0xff]  ;;  %v1245_v24 = vunpack.c.h.bf16 %v185_v16  ;;  %v293_v16 = vld [vmem:[#allocation2 + $0x678] sm:$0xff] }
 0x260   :  { %4252 = vmatpush2.msra.mxu1 %v1416_v25  ;;  %4182 = vmatprep.subr.mxu0 %v1285_v28  ;;  %v1373_v25 = vunpack.c.h.bf16 %v249_v17  ;;  %v1241_v28 = vunpack.c.h.bf16 %v183_v22  ;;  %v1368_v33 = vunpack.c.l.bf16 %v247_v23  ;;  %v359_v11 = vld [vmem:[#allocation2 + $0x888] sm:$0xff]  ;;  %v357_v17 = vld [vmem:[#allocation2 + $0x878] sm:$0xff] }
 0x261   :  { %4253 = vmatprep.subr.mxu1 %v1413_v29  ;;  %4183 = vmatpush2.msra.mxu0 %v1284_v30  ;;  %v1369_v29 = vunpack.c.h.bf16 %v247_v23  ;;  %v309_v30 = vld [vmem:[#allocation2 + $0x6f8] sm:$0xff]  ;;  %v355_v23 = vld [vmem:[#allocation2 + $0x868] sm:$0xff] }
 0x262   :  { %4254 = vmatpush2.msra.mxu1 %v1412_v31  ;;  %4184 = vmatprep.subr.mxu0 %v1281_v34  ;;  %v1240_v31 = vunpack.c.l.bf16 %v183_v22  ;;  %v1493_v34 = vunpack.c.h.bf16 %v309_v30  ;;  %v1492_v39 = vunpack.c.l.bf16 %v309_v30  ;;  %v291_v22 = vld [vmem:[#allocation2 + $0x668] sm:$0xff] }
 0x263   :  { %4255 = vmatprep.subr.mxu1 %v1409_v35  ;;  %4185 = vmatpush2.msra.mxu0 %v1280_v36  ;;  %v307_v35 = vld [vmem:[#allocation2 + $0x6e8] sm:$0xff]  ;;  %v1457_v30 = vunpack.c.h.bf16 %v291_v22 }
 0x264   :  { %4256 = vmatpush2.msra.mxu1 %v1408_v37  ;;  %4186 = vmatprep.subr.mxu0 %v1277_v40  ;;  %v371_v36 = vld [vmem:[#allocation2 + $0x8e8] sm:$0xff]  ;;  %v1621_v37 = vunpack.c.h.bf16 %v373_v32  ;;  %v1620_v40 = vunpack.c.l.bf16 %v373_v32  ;;  %v1489_v44 = vunpack.c.h.bf16 %v307_v35  ;;  %v1456_v32 = vunpack.c.l.bf16 %v291_v22 }
 0x265   :  { %4257 = vmatprep.subr.mxu1 %v1405_v41  ;;  %4187 = vmatpush2.msra.mxu0 %v1276_v42  ;;  %v305_v41 = vld [vmem:[#allocation2 + $0x6d8] sm:$0xff]  ;;  %v1617_v45 = vunpack.c.h.bf16 %v371_v36 }
 0x266   :  { %4258 = vmatpush2.msra.mxu1 %v1404_v43  ;;  %4188 = vmatprep.subr.mxu0 %v1273_v46  ;;  %v369_v42 = vld [vmem:[#allocation2 + $0x8d8] sm:$0xff]  ;;  %v5619_v43 = vld [vmem:[%s6067_s0 + $0x10] sm:$0xff]  ;;  %v5620_v46 = vld [vmem:[%s6067_s0 + $0x28] sm:$0xff] }
 0x267   :  { %4259 = vmatprep.subr.mxu1 %v1401_v47  ;;  %4189 = vmatpush2.msra.mxu0 %v1272_v48  ;;  %v1488_v47 = vunpack.c.l.bf16 %v307_v35  ;;  %v1616_v48 = vunpack.c.l.bf16 %v371_v36  ;;  %v351_v35 = vld [vmem:[#allocation2 + $0x848] sm:$0xff] }
 0x268   :  { %4260 = vmatpush2.msra.mxu1 %v1400_v49  ;;  %4190 = vmatprep.subr.mxu0 %v1269_v52  ;;  %v303_v49 = vld [vmem:[#allocation2 + $0x6c8] sm:$0xff]  ;;  %v1485_v52 = vunpack.c.h.bf16 %v305_v41 }
 0x269   :  { %4261 = vmatprep.subr.mxu1 %v1397_v53  ;;  %4191 = vmatpush2.msra.mxu0 %v1268_v54  ;;  %v1613_v53 = vunpack.c.h.bf16 %v369_v42  ;;  %v1484_v54 = vunpack.c.l.bf16 %v305_v41  ;;  %v349_v41 = vld [vmem:[#allocation2 + $0x838] sm:$0xff] }
 0x26a   :  { %4262 = vmatpush2.msra.mxu1 %v1396_v55  ;;  %4192 = vmatprep.subr.mxu0 %v1265_v58  ;;  %v1612_v55 = vunpack.c.l.bf16 %v369_v42  ;;  %v1481_v58 = vunpack.c.h.bf16 %v303_v49 }
 0x26b   :  { %4263 = vmatprep.subr.mxu1 %v1393_v59  ;;  %4193 = vmatpush2.msra.mxu0 %v1264_v60  ;;  %v1609_v59 = vunpack.c.h.bf16 %v367_v50  ;;  %v1480_v60 = vunpack.c.l.bf16 %v303_v49  ;;  %v1573_v49 = vunpack.c.h.bf16 %v349_v41 }
 0x26c   :  { %4264 = vmatpush2.msra.mxu1 %v1392_v61  ;;  %4194 = vmatprep.subr.mxu0 %v1261_v0  ;;  %v1608_v61 = vunpack.c.l.bf16 %v367_v50  ;;  %v1477_v0 = vunpack.c.h.bf16 %v301_v56 }
 0x26d   :  { %4265 = vmatprep.subr.mxu1 %v1389_v1  ;;  %4195 = vmatpush2.msra.mxu0 %v1260_v2  ;;  %v1605_v1 = vunpack.c.h.bf16 %v365_v57  ;;  %v1476_v2 = vunpack.c.l.bf16 %v301_v56 }
 0x26e   :  { %4266 = vmatpush2.msra.mxu1 %v1388_v3  ;;  %4196 = vmatprep.subr.mxu0 %v1257_v6  ;;  %v1604_v3 = vunpack.c.l.bf16 %v365_v57  ;;  %v1473_v6 = vunpack.c.h.bf16 %v299_v62 }
 0x26f   :  { %4267 = vmatprep.subr.mxu1 %v1385_v7  ;;  %4197 = vmatpush2.msra.mxu0 %v1256_v8  ;;  %v1601_v7 = vunpack.c.h.bf16 %v363_v63  ;;  %v1472_v8 = vunpack.c.l.bf16 %v299_v62 }
 0x270   :  { %4268 = vmatpush2.msra.mxu1 %v1384_v9  ;;  %4198 = vmatprep.subr.mxu0 %v1253_v12  ;;  %v1600_v9 = vunpack.c.l.bf16 %v363_v63  ;;  %v1469_v12 = vunpack.c.h.bf16 %v297_v4 }
 0x271   :  { %4269 = vmatprep.subr.mxu1 %v1381_v13  ;;  %4199 = vmatpush2.msra.mxu0 %v1252_v14  ;;  %v1597_v13 = vunpack.c.h.bf16 %v361_v5  ;;  %v1468_v14 = vunpack.c.l.bf16 %v297_v4 }
 0x272   :  { %4270 = vmatpush2.msra.mxu1 %v1380_v15  ;;  %4200 = vmatprep.subr.mxu0 %v1249_v18  ;;  %v1596_v15 = vunpack.c.l.bf16 %v361_v5  ;;  %v1465_v18 = vunpack.c.h.bf16 %v295_v10 }
 0x273   :  { %4271 = vmatprep.subr.mxu1 %v1377_v19  ;;  %4201 = vmatpush2.msra.mxu0 %v1248_v20  ;;  %v1593_v19 = vunpack.c.h.bf16 %v359_v11  ;;  %v1464_v20 = vunpack.c.l.bf16 %v295_v10 }
 0x274   :  { %4272 = vmatpush2.msra.mxu1 %v1376_v21  ;;  %4202 = vmatprep.subr.mxu0 %v1245_v24  ;;  %v1592_v21 = vunpack.c.l.bf16 %v359_v11  ;;  %v1461_v24 = vunpack.c.h.bf16 %v293_v16 }
 0x275   :  { %4273 = vmatprep.subr.mxu1 %v1373_v25  ;;  %4203 = vmatpush2.msra.mxu0 %v1244_v26  ;;  %v1589_v25 = vunpack.c.h.bf16 %v357_v17  ;;  %v1460_v26 = vunpack.c.l.bf16 %v293_v16 }
 0x276   :  { %4274 = vmatpush2.msra.mxu1 %v1372_v27  ;;  %4204 = vmatprep.subr.mxu0 %v1241_v28  ;;  %v1588_v27 = vunpack.c.l.bf16 %v357_v17  ;;  %v289_v28 = vld [vmem:[#allocation2 + $0x658] sm:$0xff] }
 0x277   :  { %4275 = vmatprep.subr.mxu1 %v1369_v29  ;;  %4205 = vmatpush2.msra.mxu0 %v1240_v31  ;;  %v353_v29 = vld [vmem:[#allocation2 + $0x858] sm:$0xff]  ;;  %v1585_v31 = vunpack.c.h.bf16 %v355_v23  ;;  %v1453_v36 = vunpack.c.h.bf16 %v289_v28 }
 0x278   :  { %4206 = vmatprep.mubr.f32.mxu0 %v5618_v38  ;;  %4276 = vmatpush2.msra.mxu1 %v1368_v33  ;;  %v1584_v33 = vunpack.c.l.bf16 %v355_v23  ;;  %v1452_v38 = vunpack.c.l.bf16 %v289_v28 }
 0x279   :  { %4207 = vmatmul.mubr.f32.vlgmr.msra.gmra.mxu0 %v5619_v43  ;;  %4277 = vmatprep.mubr.f32.mxu1 %v5620_v46  ;;  %v1577_v43 = vunpack.c.h.bf16 %v351_v35  ;;  %v283_v46 = vld [vmem:[#allocation2 + $0x628] sm:$0xff] }
 0x27a   :  { %4284 = vmatprep.subr.mxu0 %v1493_v34  ;;  %4355 = vmatprep.subr.mxu1 %v1621_v37  ;;  %v287_v34 = vld [vmem:[#allocation2 + $0x648] sm:$0xff]  ;;  %v1581_v37 = vunpack.c.h.bf16 %v353_v29  ;;  %v1440_v56 = vunpack.c.l.bf16 %v283_v46 }
 0x27b   :  { %4278 = vmatmul.mubr.f32.vlgmr.msra.gmra.mxu1 %v5621_v51  ;;  %4285 = vmatpush1.msra.mxu0 %v1492_v39  ;;  %v1580_v39 = vunpack.c.l.bf16 %v353_v29  ;;  %v1449_v42 = vunpack.c.h.bf16 %v287_v34  ;;  %v1572_v51 = vunpack.c.l.bf16 %v349_v41 }
 0x27c   :  { %4356 = vmatpush1.msra.mxu1 %v1620_v40  ;;  %4286 = vmatprep.subr.mxu0 %v1489_v44  ;;  %v285_v40 = vld [vmem:[#allocation2 + $0x638] sm:$0xff]  ;;  %v1448_v44 = vunpack.c.l.bf16 %v287_v34 }
 0x27d   :  { %4357 = vmatprep.subr.mxu1 %v1617_v45  ;;  %4287 = vmatpush1.msra.mxu0 %v1488_v47  ;;  %v1576_v45 = vunpack.c.l.bf16 %v351_v35  ;;  %v347_v47 = vld [vmem:[#allocation2 + $0x828] sm:$0xff]  ;;  %v1444_v50 = vunpack.c.l.bf16 %v285_v40 }
 0x27e   :  { %4358 = vmatpush1.msra.mxu1 %v1616_v48  ;;  %4288 = vmatprep.subr.mxu0 %v1485_v52  ;;  %v1445_v48 = vunpack.c.h.bf16 %v285_v40  ;;  %v281_v52 = vld [vmem:[#allocation2 + $0x618] sm:$0xff]  ;;  %v1568_v57 = vunpack.c.l.bf16 %v347_v47 }
 0x27f   :  { %4359 = vmatprep.subr.mxu1 %v1613_v53  ;;  %4289 = vmatpush1.msra.mxu0 %v1484_v54  ;;  %v345_v53 = vld [vmem:[#allocation2 + $0x818] sm:$0xff]  ;;  %v1441_v54 = vunpack.c.h.bf16 %v283_v46  ;;  %v1436_v62 = vunpack.c.l.bf16 %v281_v52 }
 0x280   :  { %4360 = vmatpush1.msra.mxu1 %v1612_v55  ;;  %4290 = vmatprep.subr.mxu0 %v1481_v58  ;;  %v1569_v55 = vunpack.c.h.bf16 %v347_v47  ;;  %v279_v58 = vld [vmem:[#allocation2 + $0x608] sm:$0xff]  ;;  %v1564_v63 = vunpack.c.l.bf16 %v345_v53 }
 0x281   :  { %4361 = vmatprep.subr.mxu1 %v1609_v59  ;;  %4291 = vmatpush1.msra.mxu0 %v1480_v60  ;;  %v343_v59 = vld [vmem:[#allocation2 + $0x808] sm:$0xff]  ;;  %v1437_v60 = vunpack.c.h.bf16 %v281_v52  ;;  %v1432_v4 = vunpack.c.l.bf16 %v279_v58 }
 0x282   :  { %4362 = vmatpush1.msra.mxu1 %v1608_v61  ;;  %4292 = vmatprep.subr.mxu0 %v1477_v0  ;;  %v1565_v61 = vunpack.c.h.bf16 %v345_v53  ;;  %v341_v0 = vld [vmem:[#allocation2 + $0x7f8] sm:$0xff]  ;;  %v1560_v5 = vunpack.c.l.bf16 %v343_v59 }
 0x283   :  { %4363 = vmatprep.subr.mxu1 %v1605_v1  ;;  %4293 = vmatpush1.msra.mxu0 %v1476_v2  ;;  %v405_v1 = vld [vmem:[#allocation2 + $0x9f8] sm:$0xff]  ;;  %v1433_v2 = vunpack.c.h.bf16 %v279_v58  ;;  %v1556_v10 = vunpack.c.l.bf16 %v341_v0 }
 0x284   :  { %4364 = vmatpush1.msra.mxu1 %v1604_v3  ;;  %4294 = vmatprep.subr.mxu0 %v1473_v6  ;;  %v1561_v3 = vunpack.c.h.bf16 %v343_v59  ;;  %v339_v6 = vld [vmem:[#allocation2 + $0x7e8] sm:$0xff]  ;;  %v1684_v11 = vunpack.c.l.bf16 %v405_v1 }
 0x285   :  { %4365 = vmatprep.subr.mxu1 %v1601_v7  ;;  %4295 = vmatpush1.msra.mxu0 %v1472_v8  ;;  %v403_v7 = vld [vmem:[#allocation2 + $0x9e8] sm:$0xff]  ;;  %v1557_v8 = vunpack.c.h.bf16 %v341_v0  ;;  %v1552_v16 = vunpack.c.l.bf16 %v339_v6 }
 0x286   :  { %4366 = vmatpush1.msra.mxu1 %v1600_v9  ;;  %4296 = vmatprep.subr.mxu0 %v1469_v12  ;;  %v1685_v9 = vunpack.c.h.bf16 %v405_v1  ;;  %v337_v12 = vld [vmem:[#allocation2 + $0x7d8] sm:$0xff]  ;;  %v1680_v17 = vunpack.c.l.bf16 %v403_v7 }
 0x287   :  { %4367 = vmatprep.subr.mxu1 %v1597_v13  ;;  %4297 = vmatpush1.msra.mxu0 %v1468_v14  ;;  %v401_v13 = vld [vmem:[#allocation2 + $0x9d8] sm:$0xff]  ;;  %v1553_v14 = vunpack.c.h.bf16 %v339_v6  ;;  %v1548_v22 = vunpack.c.l.bf16 %v337_v12 }
 0x288   :  { %4368 = vmatpush1.msra.mxu1 %v1596_v15  ;;  %4298 = vmatprep.subr.mxu0 %v1465_v18  ;;  %v1681_v15 = vunpack.c.h.bf16 %v403_v7  ;;  %v335_v18 = vld [vmem:[#allocation2 + $0x7c8] sm:$0xff]  ;;  %v1676_v23 = vunpack.c.l.bf16 %v401_v13 }
 0x289   :  { %4369 = vmatprep.subr.mxu1 %v1593_v19  ;;  %4299 = vmatpush1.msra.mxu0 %v1464_v20  ;;  %v399_v19 = vld [vmem:[#allocation2 + $0x9c8] sm:$0xff]  ;;  %v1549_v20 = vunpack.c.h.bf16 %v337_v12  ;;  %v1544_v28 = vunpack.c.l.bf16 %v335_v18 }
 0x28a   :  { %4370 = vmatpush1.msra.mxu1 %v1592_v21  ;;  %4300 = vmatprep.subr.mxu0 %v1461_v24  ;;  %v1677_v21 = vunpack.c.h.bf16 %v401_v13  ;;  %v333_v24 = vld [vmem:[#allocation2 + $0x7b8] sm:$0xff]  ;;  %v1672_v29 = vunpack.c.l.bf16 %v399_v19 }
 0x28b   :  { %4371 = vmatprep.subr.mxu1 %v1589_v25  ;;  %4301 = vmatpush1.msra.mxu0 %v1460_v26  ;;  %v397_v25 = vld [vmem:[#allocation2 + $0x9b8] sm:$0xff]  ;;  %v1545_v26 = vunpack.c.h.bf16 %v335_v18  ;;  %v1540_v34 = vunpack.c.l.bf16 %v333_v24 }
 0x28c   :  { %4372 = vmatpush1.msra.mxu1 %v1588_v27  ;;  %4302 = vmatprep.subr.mxu0 %v1457_v30  ;;  %v1673_v27 = vunpack.c.h.bf16 %v399_v19  ;;  %v331_v30 = vld [vmem:[#allocation2 + $0x7a8] sm:$0xff]  ;;  %v1668_v35 = vunpack.c.l.bf16 %v397_v25 }
 0x28d   :  { %4373 = vmatprep.subr.mxu1 %v1585_v31  ;;  %4303 = vmatpush1.msra.mxu0 %v1456_v32  ;;  %v395_v31 = vld [vmem:[#allocation2 + $0x9a8] sm:$0xff]  ;;  %v1541_v32 = vunpack.c.h.bf16 %v333_v24  ;;  %v1536_v40 = vunpack.c.l.bf16 %v331_v30 }
 0x28e   :  { %4374 = vmatpush1.msra.mxu1 %v1584_v33  ;;  %4304 = vmatprep.subr.mxu0 %v1453_v36  ;;  %v1669_v33 = vunpack.c.h.bf16 %v397_v25  ;;  %v329_v36 = vld [vmem:[#allocation2 + $0x798] sm:$0xff]  ;;  %v1664_v41 = vunpack.c.l.bf16 %v395_v31 }
 0x28f   :  { %4375 = vmatprep.subr.mxu1 %v1581_v37  ;;  %4305 = vmatpush1.msra.mxu0 %v1452_v38  ;;  %v393_v37 = vld [vmem:[#allocation2 + $0x998] sm:$0xff]  ;;  %v1537_v38 = vunpack.c.h.bf16 %v331_v30  ;;  %v1532_v46 = vunpack.c.l.bf16 %v329_v36 }
 0x290   :  { %4376 = vmatpush1.msra.mxu1 %v1580_v39  ;;  %4306 = vmatprep.subr.mxu0 %v1449_v42  ;;  %v1665_v39 = vunpack.c.h.bf16 %v395_v31  ;;  %v327_v42 = vld [vmem:[#allocation2 + $0x788] sm:$0xff]  ;;  %v1660_v47 = vunpack.c.l.bf16 %v393_v37 }
 0x291   :  { %4377 = vmatprep.subr.mxu1 %v1577_v43  ;;  %4307 = vmatpush1.msra.mxu0 %v1448_v44  ;;  %v391_v43 = vld [vmem:[#allocation2 + $0x988] sm:$0xff]  ;;  %v1533_v44 = vunpack.c.h.bf16 %v329_v36  ;;  %v1528_v52 = vunpack.c.l.bf16 %v327_v42  ;;  %v501_v36 = vld [vmem:[#allocation2 + $0xcf8] sm:$0xff] }
 0x292   :  { %4378 = vmatpush1.msra.mxu1 %v1576_v45  ;;  %4308 = vmatprep.subr.mxu0 %v1445_v48  ;;  %v1661_v45 = vunpack.c.h.bf16 %v393_v37  ;;  %v325_v48 = vld [vmem:[#allocation2 + $0x778] sm:$0xff]  ;;  %v1656_v53 = vunpack.c.l.bf16 %v391_v43 }
 0x293   :  { %4379 = vmatprep.subr.mxu1 %v1573_v49  ;;  %4309 = vmatpush1.msra.mxu0 %v1444_v50  ;;  %v389_v49 = vld [vmem:[#allocation2 + $0x978] sm:$0xff]  ;;  %v1529_v50 = vunpack.c.h.bf16 %v327_v42  ;;  %v1524_v58 = vunpack.c.l.bf16 %v325_v48 }
 0x294   :  { %4380 = vmatpush1.msra.mxu1 %v1572_v51  ;;  %4310 = vmatprep.subr.mxu0 %v1441_v54  ;;  %v1657_v51 = vunpack.c.h.bf16 %v391_v43  ;;  %v323_v54 = vld [vmem:[#allocation2 + $0x768] sm:$0xff]  ;;  %v1652_v59 = vunpack.c.l.bf16 %v389_v49  ;;  %v5622_v42 = vld [vmem:[%s6067_s0 + $0x38] sm:$0xff] }
 0x295   :  { %4381 = vmatprep.subr.mxu1 %v1569_v55  ;;  %4311 = vmatpush1.msra.mxu0 %v1440_v56  ;;  %v387_v55 = vld [vmem:[#allocation2 + $0x968] sm:$0xff]  ;;  %v1525_v56 = vunpack.c.h.bf16 %v325_v48  ;;  %v1520_v0 = vunpack.c.l.bf16 %v323_v54 }
 0x296   :  { %4382 = vmatpush1.msra.mxu1 %v1568_v57  ;;  %4312 = vmatprep.subr.mxu0 %v1437_v60  ;;  %v1653_v57 = vunpack.c.h.bf16 %v389_v49  ;;  %v321_v60 = vld [vmem:[#allocation2 + $0x758] sm:$0xff]  ;;  %v1648_v1 = vunpack.c.l.bf16 %v387_v55 }
 0x297   :  { %4383 = vmatprep.subr.mxu1 %v1565_v61  ;;  %4313 = vmatpush1.msra.mxu0 %v1436_v62  ;;  %v385_v61 = vld [vmem:[#allocation2 + $0x958] sm:$0xff]  ;;  %v1521_v62 = vunpack.c.h.bf16 %v323_v54  ;;  %v1516_v6 = vunpack.c.l.bf16 %v321_v60  ;;  %v495_v54 = vld [vmem:[#allocation2 + $0xcc8] sm:$0xff] }
 0x298   :  { %4384 = vmatpush1.msra.mxu1 %v1564_v63  ;;  %4314 = vmatprep.subr.mxu0 %v1433_v2  ;;  %v1649_v63 = vunpack.c.h.bf16 %v387_v55  ;;  %v319_v2 = vld [vmem:[#allocation2 + $0x748] sm:$0xff]  ;;  %v1644_v7 = vunpack.c.l.bf16 %v385_v61  ;;  %v5625_v55 = vld [vmem:[%s6067_s0 + $0x40] sm:$0xff] }
 0x299   :  { %4385 = vmatprep.subr.mxu1 %v1561_v3  ;;  %4315 = vmatpush1.msra.mxu0 %v1432_v4  ;;  %v383_v3 = vld [vmem:[#allocation2 + $0x948] sm:$0xff]  ;;  %v1517_v4 = vunpack.c.h.bf16 %v321_v60  ;;  %v1512_v12 = vunpack.c.l.bf16 %v319_v2  ;;  %v429_v60 = vld [vmem:[#allocation2 + $0xab8] sm:$0xff] }
 0x29a   :  { %4386 = vmatpush1.msra.mxu1 %v1560_v5  ;;  %4316 = vmatprep.subr.mxu0 %v1557_v8  ;;  %v1645_v5 = vunpack.c.h.bf16 %v385_v61  ;;  %v317_v8 = vld [vmem:[#allocation2 + $0x738] sm:$0xff]  ;;  %v1640_v13 = vunpack.c.l.bf16 %v383_v3 }
 0x29b   :  { %4387 = vmatprep.subr.mxu1 %v1685_v9  ;;  %4317 = vmatpush2.msra.mxu0 %v1556_v10  ;;  %v381_v9 = vld [vmem:[#allocation2 + $0x938] sm:$0xff]  ;;  %v1513_v10 = vunpack.c.h.bf16 %v319_v2  ;;  %v1508_v18 = vunpack.c.l.bf16 %v317_v8  ;;  %v427_v2 = vld [vmem:[#allocation2 + $0xaa8] sm:$0xff] }
 0x29c   :  { %4388 = vmatpush2.msra.mxu1 %v1684_v11  ;;  %4318 = vmatprep.subr.mxu0 %v1553_v14  ;;  %v1641_v11 = vunpack.c.h.bf16 %v383_v3  ;;  %v315_v14 = vld [vmem:[#allocation2 + $0x728] sm:$0xff]  ;;  %v1636_v19 = vunpack.c.l.bf16 %v381_v9  ;;  %v493_v61 = vld [vmem:[#allocation2 + $0xcb8] sm:$0xff] }
 0x29d   :  { %4389 = vmatprep.subr.mxu1 %v1681_v15  ;;  %4319 = vmatpush2.msra.mxu0 %v1552_v16  ;;  %v379_v15 = vld [vmem:[#allocation2 + $0x928] sm:$0xff]  ;;  %v1509_v16 = vunpack.c.h.bf16 %v317_v8  ;;  %v1504_v24 = vunpack.c.l.bf16 %v315_v14  ;;  %v425_v8 = vld [vmem:[#allocation2 + $0xa98] sm:$0xff] }
 0x29e   :  { %4390 = vmatpush2.msra.mxu1 %v1680_v17  ;;  %4320 = vmatprep.subr.mxu0 %v1549_v20  ;;  %v1637_v17 = vunpack.c.h.bf16 %v381_v9  ;;  %v313_v20 = vld [vmem:[#allocation2 + $0x718] sm:$0xff]  ;;  %v1632_v25 = vunpack.c.l.bf16 %v379_v15  ;;  %v491_v3 = vld [vmem:[#allocation2 + $0xca8] sm:$0xff] }
 0x29f   :  { %4391 = vmatprep.subr.mxu1 %v1677_v21  ;;  %4321 = vmatpush2.msra.mxu0 %v1548_v22  ;;  %v377_v21 = vld [vmem:[#allocation2 + $0x918] sm:$0xff]  ;;  %v1505_v22 = vunpack.c.h.bf16 %v315_v14  ;;  %v1500_v30 = vunpack.c.l.bf16 %v313_v20  ;;  %v423_v14 = vld [vmem:[#allocation2 + $0xa88] sm:$0xff] }
 0x2a0   :  { %4392 = vmatpush2.msra.mxu1 %v1676_v23  ;;  %4322 = vmatprep.subr.mxu0 %v1545_v26  ;;  %v1633_v23 = vunpack.c.h.bf16 %v379_v15  ;;  %v311_v26 = vld [vmem:[#allocation2 + $0x708] sm:$0xff]  ;;  %v1628_v31 = vunpack.c.l.bf16 %v377_v21  ;;  %v489_v9 = vld [vmem:[#allocation2 + $0xc98] sm:$0xff] }
 0x2a1   :  { %4393 = vmatprep.subr.mxu1 %v1673_v27  ;;  %4323 = vmatpush2.msra.mxu0 %v1544_v28  ;;  %v375_v27 = vld [vmem:[#allocation2 + $0x908] sm:$0xff]  ;;  %v1501_v28 = vunpack.c.h.bf16 %v313_v20  ;;  %v421_v20 = vld [vmem:[#allocation2 + $0xa78] sm:$0xff] }
 0x2a2   :  { %4394 = vmatpush2.msra.mxu1 %v1672_v29  ;;  %4324 = vmatprep.subr.mxu0 %v1541_v32  ;;  %v1629_v29 = vunpack.c.h.bf16 %v377_v21  ;;  %v1497_v32 = vunpack.c.h.bf16 %v311_v26  ;;  %v1624_v37 = vunpack.c.l.bf16 %v375_v27  ;;  %v487_v15 = vld [vmem:[#allocation2 + $0xc88] sm:$0xff]  ;;  %v485_v21 = vld [vmem:[#allocation2 + $0xc78] sm:$0xff] }
 0x2a3   :  { %4395 = vmatprep.subr.mxu1 %v1669_v33  ;;  %4325 = vmatpush2.msra.mxu0 %v1540_v34  ;;  %v1625_v33 = vunpack.c.h.bf16 %v375_v27  ;;  %v437_v34 = vld [vmem:[#allocation2 + $0xaf8] sm:$0xff]  ;;  %v483_v27 = vld [vmem:[#allocation2 + $0xc68] sm:$0xff] }
 0x2a4   :  { %4396 = vmatpush2.msra.mxu1 %v1668_v35  ;;  %4326 = vmatprep.subr.mxu0 %v1537_v38  ;;  %v1496_v35 = vunpack.c.l.bf16 %v311_v26  ;;  %v1749_v38 = vunpack.c.h.bf16 %v437_v34  ;;  %v1748_v43 = vunpack.c.l.bf16 %v437_v34  ;;  %v419_v26 = vld [vmem:[#allocation2 + $0xa68] sm:$0xff] }
 0x2a5   :  { %4397 = vmatprep.subr.mxu1 %v1665_v39  ;;  %4327 = vmatpush2.msra.mxu0 %v1536_v40  ;;  %v435_v39 = vld [vmem:[#allocation2 + $0xae8] sm:$0xff]  ;;  %v1713_v34 = vunpack.c.h.bf16 %v419_v26 }
 0x2a6   :  { %4398 = vmatpush2.msra.mxu1 %v1664_v41  ;;  %4328 = vmatprep.subr.mxu0 %v1533_v44  ;;  %v499_v40 = vld [vmem:[#allocation2 + $0xce8] sm:$0xff]  ;;  %v1877_v41 = vunpack.c.h.bf16 %v501_v36  ;;  %v1876_v44 = vunpack.c.l.bf16 %v501_v36  ;;  %v1745_v48 = vunpack.c.h.bf16 %v435_v39  ;;  %v1712_v36 = vunpack.c.l.bf16 %v419_v26 }
 0x2a7   :  { %4399 = vmatprep.subr.mxu1 %v1661_v45  ;;  %4329 = vmatpush2.msra.mxu0 %v1532_v46  ;;  %v433_v45 = vld [vmem:[#allocation2 + $0xad8] sm:$0xff]  ;;  %v1873_v49 = vunpack.c.h.bf16 %v499_v40 }
 0x2a8   :  { %4400 = vmatpush2.msra.mxu1 %v1660_v47  ;;  %4330 = vmatprep.subr.mxu0 %v1529_v50  ;;  %v497_v46 = vld [vmem:[#allocation2 + $0xcd8] sm:$0xff]  ;;  %v5623_v47 = vld [vmem:[%s6067_s0 + $0x30] sm:$0xff]  ;;  %v5624_v50 = vld [vmem:[%s6067_s0 + $0x48] sm:$0xff] }
 0x2a9   :  { %4401 = vmatprep.subr.mxu1 %v1657_v51  ;;  %4331 = vmatpush2.msra.mxu0 %v1528_v52  ;;  %v1744_v51 = vunpack.c.l.bf16 %v435_v39  ;;  %v1872_v52 = vunpack.c.l.bf16 %v499_v40  ;;  %v479_v39 = vld [vmem:[#allocation2 + $0xc48] sm:$0xff] }
 0x2aa   :  { %4402 = vmatpush2.msra.mxu1 %v1656_v53  ;;  %4332 = vmatprep.subr.mxu0 %v1525_v56  ;;  %v431_v53 = vld [vmem:[#allocation2 + $0xac8] sm:$0xff]  ;;  %v1741_v56 = vunpack.c.h.bf16 %v433_v45 }
 0x2ab   :  { %4403 = vmatprep.subr.mxu1 %v1653_v57  ;;  %4333 = vmatpush2.msra.mxu0 %v1524_v58  ;;  %v1869_v57 = vunpack.c.h.bf16 %v497_v46  ;;  %v1740_v58 = vunpack.c.l.bf16 %v433_v45  ;;  %v477_v45 = vld [vmem:[#allocation2 + $0xc38] sm:$0xff] }
 0x2ac   :  { %4404 = vmatpush2.msra.mxu1 %v1652_v59  ;;  %4334 = vmatprep.subr.mxu0 %v1521_v62  ;;  %v1868_v59 = vunpack.c.l.bf16 %v497_v46  ;;  %v1737_v62 = vunpack.c.h.bf16 %v431_v53 }
 0x2ad   :  { %4405 = vmatprep.subr.mxu1 %v1649_v63  ;;  %4335 = vmatpush2.msra.mxu0 %v1520_v0  ;;  %v1865_v63 = vunpack.c.h.bf16 %v495_v54  ;;  %v1736_v0 = vunpack.c.l.bf16 %v431_v53  ;;  %v1829_v53 = vunpack.c.h.bf16 %v477_v45 }
 0x2ae   :  { %4406 = vmatpush2.msra.mxu1 %v1648_v1  ;;  %4336 = vmatprep.subr.mxu0 %v1517_v4  ;;  %v1864_v1 = vunpack.c.l.bf16 %v495_v54  ;;  %v1733_v4 = vunpack.c.h.bf16 %v429_v60 }
 0x2af   :  { %4407 = vmatprep.subr.mxu1 %v1645_v5  ;;  %4337 = vmatpush2.msra.mxu0 %v1516_v6  ;;  %v1861_v5 = vunpack.c.h.bf16 %v493_v61  ;;  %v1732_v6 = vunpack.c.l.bf16 %v429_v60 }
 0x2b0   :  { %4408 = vmatpush2.msra.mxu1 %v1644_v7  ;;  %4338 = vmatprep.subr.mxu0 %v1513_v10  ;;  %v1860_v7 = vunpack.c.l.bf16 %v493_v61  ;;  %v1729_v10 = vunpack.c.h.bf16 %v427_v2 }
 0x2b1   :  { %4409 = vmatprep.subr.mxu1 %v1641_v11  ;;  %4339 = vmatpush2.msra.mxu0 %v1512_v12  ;;  %v1857_v11 = vunpack.c.h.bf16 %v491_v3  ;;  %v1728_v12 = vunpack.c.l.bf16 %v427_v2 }
 0x2b2   :  { %4410 = vmatpush2.msra.mxu1 %v1640_v13  ;;  %4340 = vmatprep.subr.mxu0 %v1509_v16  ;;  %v1856_v13 = vunpack.c.l.bf16 %v491_v3  ;;  %v1725_v16 = vunpack.c.h.bf16 %v425_v8 }
 0x2b3   :  { %4411 = vmatprep.subr.mxu1 %v1637_v17  ;;  %4341 = vmatpush2.msra.mxu0 %v1508_v18  ;;  %v1853_v17 = vunpack.c.h.bf16 %v489_v9  ;;  %v1724_v18 = vunpack.c.l.bf16 %v425_v8 }
 0x2b4   :  { %4412 = vmatpush2.msra.mxu1 %v1636_v19  ;;  %4342 = vmatprep.subr.mxu0 %v1505_v22  ;;  %v1852_v19 = vunpack.c.l.bf16 %v489_v9  ;;  %v1721_v22 = vunpack.c.h.bf16 %v423_v14 }
 0x2b5   :  { %4413 = vmatprep.subr.mxu1 %v1633_v23  ;;  %4343 = vmatpush2.msra.mxu0 %v1504_v24  ;;  %v1849_v23 = vunpack.c.h.bf16 %v487_v15  ;;  %v1720_v24 = vunpack.c.l.bf16 %v423_v14 }
 0x2b6   :  { %4414 = vmatpush2.msra.mxu1 %v1632_v25  ;;  %4344 = vmatprep.subr.mxu0 %v1501_v28  ;;  %v1848_v25 = vunpack.c.l.bf16 %v487_v15  ;;  %v1717_v28 = vunpack.c.h.bf16 %v421_v20 }
 0x2b7   :  { %4415 = vmatprep.subr.mxu1 %v1629_v29  ;;  %4345 = vmatpush2.msra.mxu0 %v1500_v30  ;;  %v1845_v29 = vunpack.c.h.bf16 %v485_v21  ;;  %v1716_v30 = vunpack.c.l.bf16 %v421_v20 }
 0x2b8   :  { %4416 = vmatpush2.msra.mxu1 %v1628_v31  ;;  %4346 = vmatprep.subr.mxu0 %v1497_v32  ;;  %v1844_v31 = vunpack.c.l.bf16 %v485_v21  ;;  %v417_v32 = vld [vmem:[#allocation2 + $0xa58] sm:$0xff] }
 0x2b9   :  { %4417 = vmatprep.subr.mxu1 %v1625_v33  ;;  %4347 = vmatpush2.msra.mxu0 %v1496_v35  ;;  %v481_v33 = vld [vmem:[#allocation2 + $0xc58] sm:$0xff]  ;;  %v1841_v35 = vunpack.c.h.bf16 %v483_v27  ;;  %v1709_v40 = vunpack.c.h.bf16 %v417_v32 }
 0x2ba   :  { %4348 = vmatprep.mubr.f32.mxu0 %v5622_v42  ;;  %4418 = vmatpush2.msra.mxu1 %v1624_v37  ;;  %v1840_v37 = vunpack.c.l.bf16 %v483_v27  ;;  %v1708_v42 = vunpack.c.l.bf16 %v417_v32 }
 0x2bb   :  { %4349 = vmatmul.mubr.f32.vlgmr.msra.gmra.mxu0 %v5623_v47  ;;  %4419 = vmatprep.mubr.f32.mxu1 %v5624_v50  ;;  %v1833_v47 = vunpack.c.h.bf16 %v479_v39  ;;  %v411_v50 = vld [vmem:[#allocation2 + $0xa28] sm:$0xff] }
 0x2bc   :  { %4426 = vmatprep.subr.mxu0 %v1749_v38  ;;  %4497 = vmatprep.subr.mxu1 %v1877_v41  ;;  %v415_v38 = vld [vmem:[#allocation2 + $0xa48] sm:$0xff]  ;;  %v1837_v41 = vunpack.c.h.bf16 %v481_v33  ;;  %v1696_v60 = vunpack.c.l.bf16 %v411_v50 }
 0x2bd   :  { %4420 = vmatmul.mubr.f32.vlgmr.msra.gmra.mxu1 %v5625_v55  ;;  %4427 = vmatpush1.msra.mxu0 %v1748_v43  ;;  %v1836_v43 = vunpack.c.l.bf16 %v481_v33  ;;  %v1705_v46 = vunpack.c.h.bf16 %v415_v38  ;;  %v1828_v55 = vunpack.c.l.bf16 %v477_v45 }
 0x2be   :  { %4498 = vmatpush1.msra.mxu1 %v1876_v44  ;;  %4428 = vmatprep.subr.mxu0 %v1745_v48  ;;  %v413_v44 = vld [vmem:[#allocation2 + $0xa38] sm:$0xff]  ;;  %v1704_v48 = vunpack.c.l.bf16 %v415_v38 }
 0x2bf   :  { %4499 = vmatprep.subr.mxu1 %v1873_v49  ;;  %4429 = vmatpush1.msra.mxu0 %v1744_v51  ;;  %v1832_v49 = vunpack.c.l.bf16 %v479_v39  ;;  %v475_v51 = vld [vmem:[#allocation2 + $0xc28] sm:$0xff]  ;;  %v1700_v54 = vunpack.c.l.bf16 %v413_v44 }
 0x2c0   :  { %4500 = vmatpush1.msra.mxu1 %v1872_v52  ;;  %4430 = vmatprep.subr.mxu0 %v1741_v56  ;;  %v1701_v52 = vunpack.c.h.bf16 %v413_v44  ;;  %v409_v56 = vld [vmem:[#allocation2 + $0xa18] sm:$0xff]  ;;  %v1824_v61 = vunpack.c.l.bf16 %v475_v51 }
 0x2c1   :  { %4501 = vmatprep.subr.mxu1 %v1869_v57  ;;  %4431 = vmatpush1.msra.mxu0 %v1740_v58  ;;  %v473_v57 = vld [vmem:[#allocation2 + $0xc18] sm:$0xff]  ;;  %v1697_v58 = vunpack.c.h.bf16 %v411_v50  ;;  %v1692_v2 = vunpack.c.l.bf16 %v409_v56 }
 0x2c2   :  { %4502 = vmatpush1.msra.mxu1 %v1868_v59  ;;  %4432 = vmatprep.subr.mxu0 %v1737_v62  ;;  %v1825_v59 = vunpack.c.h.bf16 %v475_v51  ;;  %v407_v62 = vld [vmem:[#allocation2 + $0xa08] sm:$0xff]  ;;  %v1820_v3 = vunpack.c.l.bf16 %v473_v57 }
 0x2c3   :  { %4503 = vmatprep.subr.mxu1 %v1865_v63  ;;  %4433 = vmatpush1.msra.mxu0 %v1736_v0  ;;  %v471_v63 = vld [vmem:[#allocation2 + $0xc08] sm:$0xff]  ;;  %v1693_v0 = vunpack.c.h.bf16 %v409_v56  ;;  %v1688_v8 = vunpack.c.l.bf16 %v407_v62 }
 0x2c4   :  { %4504 = vmatpush1.msra.mxu1 %v1864_v1  ;;  %4434 = vmatprep.subr.mxu0 %v1733_v4  ;;  %v1821_v1 = vunpack.c.h.bf16 %v473_v57  ;;  %v469_v4 = vld [vmem:[#allocation2 + $0xbf8] sm:$0xff]  ;;  %v1816_v9 = vunpack.c.l.bf16 %v471_v63 }
 0x2c5   :  { %4505 = vmatprep.subr.mxu1 %v1861_v5  ;;  %4435 = vmatpush1.msra.mxu0 %v1732_v6  ;;  %v533_v5 = vld [vmem:[#allocation2 + $0xdf8] sm:$0xff]  ;;  %v1689_v6 = vunpack.c.h.bf16 %v407_v62  ;;  %v1812_v14 = vunpack.c.l.bf16 %v469_v4 }
 0x2c6   :  { %4506 = vmatpush1.msra.mxu1 %v1860_v7  ;;  %4436 = vmatprep.subr.mxu0 %v1729_v10  ;;  %v1817_v7 = vunpack.c.h.bf16 %v471_v63  ;;  %v467_v10 = vld [vmem:[#allocation2 + $0xbe8] sm:$0xff]  ;;  %v1940_v15 = vunpack.c.l.bf16 %v533_v5 }
 0x2c7   :  { %4507 = vmatprep.subr.mxu1 %v1857_v11  ;;  %4437 = vmatpush1.msra.mxu0 %v1728_v12  ;;  %v531_v11 = vld [vmem:[#allocation2 + $0xde8] sm:$0xff]  ;;  %v1813_v12 = vunpack.c.h.bf16 %v469_v4  ;;  %v1808_v20 = vunpack.c.l.bf16 %v467_v10 }
 0x2c8   :  { %4508 = vmatpush1.msra.mxu1 %v1856_v13  ;;  %4438 = vmatprep.subr.mxu0 %v1725_v16  ;;  %v1941_v13 = vunpack.c.h.bf16 %v533_v5  ;;  %v465_v16 = vld [vmem:[#allocation2 + $0xbd8] sm:$0xff]  ;;  %v1936_v21 = vunpack.c.l.bf16 %v531_v11 }
 0x2c9   :  { %4509 = vmatprep.subr.mxu1 %v1853_v17  ;;  %4439 = vmatpush1.msra.mxu0 %v1724_v18  ;;  %v529_v17 = vld [vmem:[#allocation2 + $0xdd8] sm:$0xff]  ;;  %v1809_v18 = vunpack.c.h.bf16 %v467_v10  ;;  %v1804_v26 = vunpack.c.l.bf16 %v465_v16 }
 0x2ca   :  { %4510 = vmatpush1.msra.mxu1 %v1852_v19  ;;  %4440 = vmatprep.subr.mxu0 %v1721_v22  ;;  %v1937_v19 = vunpack.c.h.bf16 %v531_v11  ;;  %v463_v22 = vld [vmem:[#allocation2 + $0xbc8] sm:$0xff]  ;;  %v1932_v27 = vunpack.c.l.bf16 %v529_v17 }
 0x2cb   :  { %4511 = vmatprep.subr.mxu1 %v1849_v23  ;;  %4441 = vmatpush1.msra.mxu0 %v1720_v24  ;;  %v527_v23 = vld [vmem:[#allocation2 + $0xdc8] sm:$0xff]  ;;  %v1805_v24 = vunpack.c.h.bf16 %v465_v16  ;;  %v1800_v32 = vunpack.c.l.bf16 %v463_v22 }
 0x2cc   :  { %4512 = vmatpush1.msra.mxu1 %v1848_v25  ;;  %4442 = vmatprep.subr.mxu0 %v1717_v28  ;;  %v1933_v25 = vunpack.c.h.bf16 %v529_v17  ;;  %v461_v28 = vld [vmem:[#allocation2 + $0xbb8] sm:$0xff]  ;;  %v1928_v33 = vunpack.c.l.bf16 %v527_v23 }
 0x2cd   :  { %4513 = vmatprep.subr.mxu1 %v1845_v29  ;;  %4443 = vmatpush1.msra.mxu0 %v1716_v30  ;;  %v525_v29 = vld [vmem:[#allocation2 + $0xdb8] sm:$0xff]  ;;  %v1801_v30 = vunpack.c.h.bf16 %v463_v22  ;;  %v1796_v38 = vunpack.c.l.bf16 %v461_v28 }
 0x2ce   :  { %4514 = vmatpush1.msra.mxu1 %v1844_v31  ;;  %4444 = vmatprep.subr.mxu0 %v1713_v34  ;;  %v1929_v31 = vunpack.c.h.bf16 %v527_v23  ;;  %v459_v34 = vld [vmem:[#allocation2 + $0xba8] sm:$0xff]  ;;  %v1924_v39 = vunpack.c.l.bf16 %v525_v29 }
 0x2cf   :  { %4515 = vmatprep.subr.mxu1 %v1841_v35  ;;  %4445 = vmatpush1.msra.mxu0 %v1712_v36  ;;  %v523_v35 = vld [vmem:[#allocation2 + $0xda8] sm:$0xff]  ;;  %v1797_v36 = vunpack.c.h.bf16 %v461_v28  ;;  %v1792_v44 = vunpack.c.l.bf16 %v459_v34 }
 0x2d0   :  { %4516 = vmatpush1.msra.mxu1 %v1840_v37  ;;  %4446 = vmatprep.subr.mxu0 %v1709_v40  ;;  %v1925_v37 = vunpack.c.h.bf16 %v525_v29  ;;  %v457_v40 = vld [vmem:[#allocation2 + $0xb98] sm:$0xff]  ;;  %v1920_v45 = vunpack.c.l.bf16 %v523_v35 }
 0x2d1   :  { %4517 = vmatprep.subr.mxu1 %v1837_v41  ;;  %4447 = vmatpush1.msra.mxu0 %v1708_v42  ;;  %v521_v41 = vld [vmem:[#allocation2 + $0xd98] sm:$0xff]  ;;  %v1793_v42 = vunpack.c.h.bf16 %v459_v34  ;;  %v1788_v50 = vunpack.c.l.bf16 %v457_v40 }
 0x2d2   :  { %4518 = vmatpush1.msra.mxu1 %v1836_v43  ;;  %4448 = vmatprep.subr.mxu0 %v1705_v46  ;;  %v1921_v43 = vunpack.c.h.bf16 %v523_v35  ;;  %v455_v46 = vld [vmem:[#allocation2 + $0xb88] sm:$0xff]  ;;  %v1916_v51 = vunpack.c.l.bf16 %v521_v41 }
 0x2d3   :  { %4519 = vmatprep.subr.mxu1 %v1833_v47  ;;  %4449 = vmatpush1.msra.mxu0 %v1704_v48  ;;  %v519_v47 = vld [vmem:[#allocation2 + $0xd88] sm:$0xff]  ;;  %v1789_v48 = vunpack.c.h.bf16 %v457_v40  ;;  %v1784_v56 = vunpack.c.l.bf16 %v455_v46  ;;  %v629_v40 = vld [vmem:[#allocation2 + $0x10f8] sm:$0xff] }
 0x2d4   :  { %4520 = vmatpush1.msra.mxu1 %v1832_v49  ;;  %4450 = vmatprep.subr.mxu0 %v1701_v52  ;;  %v1917_v49 = vunpack.c.h.bf16 %v521_v41  ;;  %v453_v52 = vld [vmem:[#allocation2 + $0xb78] sm:$0xff]  ;;  %v1912_v57 = vunpack.c.l.bf16 %v519_v47 }
 0x2d5   :  { %4521 = vmatprep.subr.mxu1 %v1829_v53  ;;  %4451 = vmatpush1.msra.mxu0 %v1700_v54  ;;  %v517_v53 = vld [vmem:[#allocation2 + $0xd78] sm:$0xff]  ;;  %v1785_v54 = vunpack.c.h.bf16 %v455_v46  ;;  %v1780_v62 = vunpack.c.l.bf16 %v453_v52 }
 0x2d6   :  { %4522 = vmatpush1.msra.mxu1 %v1828_v55  ;;  %4452 = vmatprep.subr.mxu0 %v1697_v58  ;;  %v1913_v55 = vunpack.c.h.bf16 %v519_v47  ;;  %v451_v58 = vld [vmem:[#allocation2 + $0xb68] sm:$0xff]  ;;  %v1908_v63 = vunpack.c.l.bf16 %v517_v53  ;;  %v5626_v46 = vld [vmem:[%s6067_s0 + $0x58] sm:$0xff] }
 0x2d7   :  { %4523 = vmatprep.subr.mxu1 %v1825_v59  ;;  %4453 = vmatpush1.msra.mxu0 %v1696_v60  ;;  %v515_v59 = vld [vmem:[#allocation2 + $0xd68] sm:$0xff]  ;;  %v1781_v60 = vunpack.c.h.bf16 %v453_v52  ;;  %v1776_v4 = vunpack.c.l.bf16 %v451_v58 }
 0x2d8   :  { %4524 = vmatpush1.msra.mxu1 %v1824_v61  ;;  %4454 = vmatprep.subr.mxu0 %v1693_v0  ;;  %v1909_v61 = vunpack.c.h.bf16 %v517_v53  ;;  %v449_v0 = vld [vmem:[#allocation2 + $0xb58] sm:$0xff]  ;;  %v1904_v5 = vunpack.c.l.bf16 %v515_v59 }
 0x2d9   :  { %4525 = vmatprep.subr.mxu1 %v1821_v1  ;;  %4455 = vmatpush1.msra.mxu0 %v1692_v2  ;;  %v513_v1 = vld [vmem:[#allocation2 + $0xd58] sm:$0xff]  ;;  %v1777_v2 = vunpack.c.h.bf16 %v451_v58  ;;  %v1772_v10 = vunpack.c.l.bf16 %v449_v0  ;;  %v623_v58 = vld [vmem:[#allocation2 + $0x10c8] sm:$0xff] }
 0x2da   :  { %4526 = vmatpush1.msra.mxu1 %v1820_v3  ;;  %4456 = vmatprep.subr.mxu0 %v1689_v6  ;;  %v1905_v3 = vunpack.c.h.bf16 %v515_v59  ;;  %v447_v6 = vld [vmem:[#allocation2 + $0xb48] sm:$0xff]  ;;  %v1900_v11 = vunpack.c.l.bf16 %v513_v1  ;;  %v5629_v59 = vld [vmem:[%s6067_s0 + $0x60] sm:$0xff] }
 0x2db   :  { %4527 = vmatprep.subr.mxu1 %v1817_v7  ;;  %4457 = vmatpush1.msra.mxu0 %v1688_v8  ;;  %v511_v7 = vld [vmem:[#allocation2 + $0xd48] sm:$0xff]  ;;  %v1773_v8 = vunpack.c.h.bf16 %v449_v0  ;;  %v1768_v16 = vunpack.c.l.bf16 %v447_v6  ;;  %v557_v0 = vld [vmem:[#allocation2 + $0xeb8] sm:$0xff] }
 0x2dc   :  { %4528 = vmatpush1.msra.mxu1 %v1816_v9  ;;  %4458 = vmatprep.subr.mxu0 %v1813_v12  ;;  %v1901_v9 = vunpack.c.h.bf16 %v513_v1  ;;  %v445_v12 = vld [vmem:[#allocation2 + $0xb38] sm:$0xff]  ;;  %v1896_v17 = vunpack.c.l.bf16 %v511_v7 }
 0x2dd   :  { %4529 = vmatprep.subr.mxu1 %v1941_v13  ;;  %4459 = vmatpush2.msra.mxu0 %v1812_v14  ;;  %v509_v13 = vld [vmem:[#allocation2 + $0xd38] sm:$0xff]  ;;  %v1769_v14 = vunpack.c.h.bf16 %v447_v6  ;;  %v1764_v22 = vunpack.c.l.bf16 %v445_v12  ;;  %v555_v6 = vld [vmem:[#allocation2 + $0xea8] sm:$0xff] }
 0x2de   :  { %4530 = vmatpush2.msra.mxu1 %v1940_v15  ;;  %4460 = vmatprep.subr.mxu0 %v1809_v18  ;;  %v1897_v15 = vunpack.c.h.bf16 %v511_v7  ;;  %v443_v18 = vld [vmem:[#allocation2 + $0xb28] sm:$0xff]  ;;  %v1892_v23 = vunpack.c.l.bf16 %v509_v13  ;;  %v621_v1 = vld [vmem:[#allocation2 + $0x10b8] sm:$0xff] }
 0x2df   :  { %4531 = vmatprep.subr.mxu1 %v1937_v19  ;;  %4461 = vmatpush2.msra.mxu0 %v1808_v20  ;;  %v507_v19 = vld [vmem:[#allocation2 + $0xd28] sm:$0xff]  ;;  %v1765_v20 = vunpack.c.h.bf16 %v445_v12  ;;  %v1760_v28 = vunpack.c.l.bf16 %v443_v18  ;;  %v553_v12 = vld [vmem:[#allocation2 + $0xe98] sm:$0xff] }
 0x2e0   :  { %4532 = vmatpush2.msra.mxu1 %v1936_v21  ;;  %4462 = vmatprep.subr.mxu0 %v1805_v24  ;;  %v1893_v21 = vunpack.c.h.bf16 %v509_v13  ;;  %v441_v24 = vld [vmem:[#allocation2 + $0xb18] sm:$0xff]  ;;  %v1888_v29 = vunpack.c.l.bf16 %v507_v19  ;;  %v619_v7 = vld [vmem:[#allocation2 + $0x10a8] sm:$0xff] }
 0x2e1   :  { %4533 = vmatprep.subr.mxu1 %v1933_v25  ;;  %4463 = vmatpush2.msra.mxu0 %v1804_v26  ;;  %v505_v25 = vld [vmem:[#allocation2 + $0xd18] sm:$0xff]  ;;  %v1761_v26 = vunpack.c.h.bf16 %v443_v18  ;;  %v1756_v34 = vunpack.c.l.bf16 %v441_v24  ;;  %v551_v18 = vld [vmem:[#allocation2 + $0xe88] sm:$0xff] }
 0x2e2   :  { %4534 = vmatpush2.msra.mxu1 %v1932_v27  ;;  %4464 = vmatprep.subr.mxu0 %v1801_v30  ;;  %v1889_v27 = vunpack.c.h.bf16 %v507_v19  ;;  %v439_v30 = vld [vmem:[#allocation2 + $0xb08] sm:$0xff]  ;;  %v1884_v35 = vunpack.c.l.bf16 %v505_v25  ;;  %v617_v13 = vld [vmem:[#allocation2 + $0x1098] sm:$0xff] }
 0x2e3   :  { %4535 = vmatprep.subr.mxu1 %v1929_v31  ;;  %4465 = vmatpush2.msra.mxu0 %v1800_v32  ;;  %v503_v31 = vld [vmem:[#allocation2 + $0xd08] sm:$0xff]  ;;  %v1757_v32 = vunpack.c.h.bf16 %v441_v24  ;;  %v549_v24 = vld [vmem:[#allocation2 + $0xe78] sm:$0xff] }
 0x2e4   :  { %4536 = vmatpush2.msra.mxu1 %v1928_v33  ;;  %4466 = vmatprep.subr.mxu0 %v1797_v36  ;;  %v1885_v33 = vunpack.c.h.bf16 %v505_v25  ;;  %v1753_v36 = vunpack.c.h.bf16 %v439_v30  ;;  %v1880_v41 = vunpack.c.l.bf16 %v503_v31  ;;  %v615_v19 = vld [vmem:[#allocation2 + $0x1088] sm:$0xff]  ;;  %v613_v25 = vld [vmem:[#allocation2 + $0x1078] sm:$0xff] }
 0x2e5   :  { %4537 = vmatprep.subr.mxu1 %v1925_v37  ;;  %4467 = vmatpush2.msra.mxu0 %v1796_v38  ;;  %v1881_v37 = vunpack.c.h.bf16 %v503_v31  ;;  %v565_v38 = vld [vmem:[#allocation2 + $0xef8] sm:$0xff]  ;;  %v611_v31 = vld [vmem:[#allocation2 + $0x1068] sm:$0xff] }
 0x2e6   :  { %4538 = vmatpush2.msra.mxu1 %v1924_v39  ;;  %4468 = vmatprep.subr.mxu0 %v1793_v42  ;;  %v1752_v39 = vunpack.c.l.bf16 %v439_v30  ;;  %v2005_v42 = vunpack.c.h.bf16 %v565_v38  ;;  %v2004_v47 = vunpack.c.l.bf16 %v565_v38  ;;  %v547_v30 = vld [vmem:[#allocation2 + $0xe68] sm:$0xff] }
 0x2e7   :  { %4539 = vmatprep.subr.mxu1 %v1921_v43  ;;  %4469 = vmatpush2.msra.mxu0 %v1792_v44  ;;  %v563_v43 = vld [vmem:[#allocation2 + $0xee8] sm:$0xff]  ;;  %v1969_v38 = vunpack.c.h.bf16 %v547_v30 }
 0x2e8   :  { %4540 = vmatpush2.msra.mxu1 %v1920_v45  ;;  %4470 = vmatprep.subr.mxu0 %v1789_v48  ;;  %v627_v44 = vld [vmem:[#allocation2 + $0x10e8] sm:$0xff]  ;;  %v2133_v45 = vunpack.c.h.bf16 %v629_v40  ;;  %v2132_v48 = vunpack.c.l.bf16 %v629_v40  ;;  %v2001_v52 = vunpack.c.h.bf16 %v563_v43  ;;  %v1968_v40 = vunpack.c.l.bf16 %v547_v30 }
 0x2e9   :  { %4541 = vmatprep.subr.mxu1 %v1917_v49  ;;  %4471 = vmatpush2.msra.mxu0 %v1788_v50  ;;  %v561_v49 = vld [vmem:[#allocation2 + $0xed8] sm:$0xff]  ;;  %v2129_v53 = vunpack.c.h.bf16 %v627_v44 }
 0x2ea   :  { %4542 = vmatpush2.msra.mxu1 %v1916_v51  ;;  %4472 = vmatprep.subr.mxu0 %v1785_v54  ;;  %v625_v50 = vld [vmem:[#allocation2 + $0x10d8] sm:$0xff]  ;;  %v5627_v51 = vld [vmem:[%s6067_s0 + $0x50] sm:$0xff]  ;;  %v5628_v54 = vld [vmem:[%s6067_s0 + $0x68] sm:$0xff] }
 0x2eb   :  { %4543 = vmatprep.subr.mxu1 %v1913_v55  ;;  %4473 = vmatpush2.msra.mxu0 %v1784_v56  ;;  %v2000_v55 = vunpack.c.l.bf16 %v563_v43  ;;  %v2128_v56 = vunpack.c.l.bf16 %v627_v44  ;;  %v607_v43 = vld [vmem:[#allocation2 + $0x1048] sm:$0xff] }
 0x2ec   :  { %4544 = vmatpush2.msra.mxu1 %v1912_v57  ;;  %4474 = vmatprep.subr.mxu0 %v1781_v60  ;;  %v559_v57 = vld [vmem:[#allocation2 + $0xec8] sm:$0xff]  ;;  %v1997_v60 = vunpack.c.h.bf16 %v561_v49 }
 0x2ed   :  { %4545 = vmatprep.subr.mxu1 %v1909_v61  ;;  %4475 = vmatpush2.msra.mxu0 %v1780_v62  ;;  %v2125_v61 = vunpack.c.h.bf16 %v625_v50  ;;  %v1996_v62 = vunpack.c.l.bf16 %v561_v49  ;;  %v605_v49 = vld [vmem:[#allocation2 + $0x1038] sm:$0xff] }
 0x2ee   :  { %4546 = vmatpush2.msra.mxu1 %v1908_v63  ;;  %4476 = vmatprep.subr.mxu0 %v1777_v2  ;;  %v2124_v63 = vunpack.c.l.bf16 %v625_v50  ;;  %v1993_v2 = vunpack.c.h.bf16 %v559_v57 }
 0x2ef   :  { %4547 = vmatprep.subr.mxu1 %v1905_v3  ;;  %4477 = vmatpush2.msra.mxu0 %v1776_v4  ;;  %v2121_v3 = vunpack.c.h.bf16 %v623_v58  ;;  %v1992_v4 = vunpack.c.l.bf16 %v559_v57  ;;  %v2085_v57 = vunpack.c.h.bf16 %v605_v49 }
 0x2f0   :  { %4548 = vmatpush2.msra.mxu1 %v1904_v5  ;;  %4478 = vmatprep.subr.mxu0 %v1773_v8  ;;  %v2120_v5 = vunpack.c.l.bf16 %v623_v58  ;;  %v1989_v8 = vunpack.c.h.bf16 %v557_v0 }
 0x2f1   :  { %4549 = vmatprep.subr.mxu1 %v1901_v9  ;;  %4479 = vmatpush2.msra.mxu0 %v1772_v10  ;;  %v2117_v9 = vunpack.c.h.bf16 %v621_v1  ;;  %v1988_v10 = vunpack.c.l.bf16 %v557_v0 }
 0x2f2   :  { %4550 = vmatpush2.msra.mxu1 %v1900_v11  ;;  %4480 = vmatprep.subr.mxu0 %v1769_v14  ;;  %v2116_v11 = vunpack.c.l.bf16 %v621_v1  ;;  %v1985_v14 = vunpack.c.h.bf16 %v555_v6 }
 0x2f3   :  { %4551 = vmatprep.subr.mxu1 %v1897_v15  ;;  %4481 = vmatpush2.msra.mxu0 %v1768_v16  ;;  %v2113_v15 = vunpack.c.h.bf16 %v619_v7  ;;  %v1984_v16 = vunpack.c.l.bf16 %v555_v6 }
 0x2f4   :  { %4552 = vmatpush2.msra.mxu1 %v1896_v17  ;;  %4482 = vmatprep.subr.mxu0 %v1765_v20  ;;  %v2112_v17 = vunpack.c.l.bf16 %v619_v7  ;;  %v1981_v20 = vunpack.c.h.bf16 %v553_v12 }
 0x2f5   :  { %4553 = vmatprep.subr.mxu1 %v1893_v21  ;;  %4483 = vmatpush2.msra.mxu0 %v1764_v22  ;;  %v2109_v21 = vunpack.c.h.bf16 %v617_v13  ;;  %v1980_v22 = vunpack.c.l.bf16 %v553_v12 }
 0x2f6   :  { %4554 = vmatpush2.msra.mxu1 %v1892_v23  ;;  %4484 = vmatprep.subr.mxu0 %v1761_v26  ;;  %v2108_v23 = vunpack.c.l.bf16 %v617_v13  ;;  %v1977_v26 = vunpack.c.h.bf16 %v551_v18 }
 0x2f7   :  { %4555 = vmatprep.subr.mxu1 %v1889_v27  ;;  %4485 = vmatpush2.msra.mxu0 %v1760_v28  ;;  %v2105_v27 = vunpack.c.h.bf16 %v615_v19  ;;  %v1976_v28 = vunpack.c.l.bf16 %v551_v18 }
 0x2f8   :  { %4556 = vmatpush2.msra.mxu1 %v1888_v29  ;;  %4486 = vmatprep.subr.mxu0 %v1757_v32  ;;  %v2104_v29 = vunpack.c.l.bf16 %v615_v19  ;;  %v1973_v32 = vunpack.c.h.bf16 %v549_v24 }
 0x2f9   :  { %4557 = vmatprep.subr.mxu1 %v1885_v33  ;;  %4487 = vmatpush2.msra.mxu0 %v1756_v34  ;;  %v2101_v33 = vunpack.c.h.bf16 %v613_v25  ;;  %v1972_v34 = vunpack.c.l.bf16 %v549_v24 }
 0x2fa   :  { %4558 = vmatpush2.msra.mxu1 %v1884_v35  ;;  %4488 = vmatprep.subr.mxu0 %v1753_v36  ;;  %v2100_v35 = vunpack.c.l.bf16 %v613_v25  ;;  %v545_v36 = vld [vmem:[#allocation2 + $0xe58] sm:$0xff] }
 0x2fb   :  { %4559 = vmatprep.subr.mxu1 %v1881_v37  ;;  %4489 = vmatpush2.msra.mxu0 %v1752_v39  ;;  %v609_v37 = vld [vmem:[#allocation2 + $0x1058] sm:$0xff]  ;;  %v2097_v39 = vunpack.c.h.bf16 %v611_v31  ;;  %v1965_v44 = vunpack.c.h.bf16 %v545_v36 }
 0x2fc   :  { %4490 = vmatprep.mubr.f32.mxu0 %v5626_v46  ;;  %4560 = vmatpush2.msra.mxu1 %v1880_v41  ;;  %v2096_v41 = vunpack.c.l.bf16 %v611_v31  ;;  %v1964_v46 = vunpack.c.l.bf16 %v545_v36 }
 0x2fd   :  { %4491 = vmatmul.mubr.f32.vlgmr.msra.gmra.mxu0 %v5627_v51  ;;  %4561 = vmatprep.mubr.f32.mxu1 %v5628_v54  ;;  %v2089_v51 = vunpack.c.h.bf16 %v607_v43  ;;  %v539_v54 = vld [vmem:[#allocation2 + $0xe28] sm:$0xff] }
 0x2fe   :  { %4568 = vmatprep.subr.mxu0 %v2005_v42  ;;  %4639 = vmatprep.subr.mxu1 %v2133_v45  ;;  %v543_v42 = vld [vmem:[#allocation2 + $0xe48] sm:$0xff]  ;;  %v2093_v45 = vunpack.c.h.bf16 %v609_v37  ;;  %v1952_v0 = vunpack.c.l.bf16 %v539_v54 }
 0x2ff   :  { %4562 = vmatmul.mubr.f32.vlgmr.msra.gmra.mxu1 %v5629_v59  ;;  %4569 = vmatpush1.msra.mxu0 %v2004_v47  ;;  %v2092_v47 = vunpack.c.l.bf16 %v609_v37  ;;  %v1961_v50 = vunpack.c.h.bf16 %v543_v42  ;;  %v2084_v59 = vunpack.c.l.bf16 %v605_v49 }
 0x300   :  { %4640 = vmatpush1.msra.mxu1 %v2132_v48  ;;  %4570 = vmatprep.subr.mxu0 %v2001_v52  ;;  %v541_v48 = vld [vmem:[#allocation2 + $0xe38] sm:$0xff]  ;;  %v1960_v52 = vunpack.c.l.bf16 %v543_v42 }
 0x301   :  { %4641 = vmatprep.subr.mxu1 %v2129_v53  ;;  %4571 = vmatpush1.msra.mxu0 %v2000_v55  ;;  %v2088_v53 = vunpack.c.l.bf16 %v607_v43  ;;  %v603_v55 = vld [vmem:[#allocation2 + $0x1028] sm:$0xff]  ;;  %v1956_v58 = vunpack.c.l.bf16 %v541_v48 }
 0x302   :  { %4642 = vmatpush1.msra.mxu1 %v2128_v56  ;;  %4572 = vmatprep.subr.mxu0 %v1997_v60  ;;  %v1957_v56 = vunpack.c.h.bf16 %v541_v48  ;;  %v537_v60 = vld [vmem:[#allocation2 + $0xe18] sm:$0xff]  ;;  %v2080_v1 = vunpack.c.l.bf16 %v603_v55 }
 0x303   :  { %4643 = vmatprep.subr.mxu1 %v2125_v61  ;;  %4573 = vmatpush1.msra.mxu0 %v1996_v62  ;;  %v601_v61 = vld [vmem:[#allocation2 + $0x1018] sm:$0xff]  ;;  %v1953_v62 = vunpack.c.h.bf16 %v539_v54  ;;  %v1948_v6 = vunpack.c.l.bf16 %v537_v60 }
 0x304   :  { %4644 = vmatpush1.msra.mxu1 %v2124_v63  ;;  %4574 = vmatprep.subr.mxu0 %v1993_v2  ;;  %v2081_v63 = vunpack.c.h.bf16 %v603_v55  ;;  %v535_v2 = vld [vmem:[#allocation2 + $0xe08] sm:$0xff]  ;;  %v2076_v7 = vunpack.c.l.bf16 %v601_v61 }
 0x305   :  { %4645 = vmatprep.subr.mxu1 %v2121_v3  ;;  %4575 = vmatpush1.msra.mxu0 %v1992_v4  ;;  %v599_v3 = vld [vmem:[#allocation2 + $0x1008] sm:$0xff]  ;;  %v1949_v4 = vunpack.c.h.bf16 %v537_v60  ;;  %v1944_v12 = vunpack.c.l.bf16 %v535_v2 }
 0x306   :  { %4646 = vmatpush1.msra.mxu1 %v2120_v5  ;;  %4576 = vmatprep.subr.mxu0 %v1989_v8  ;;  %v2077_v5 = vunpack.c.h.bf16 %v601_v61  ;;  %v597_v8 = vld [vmem:[#allocation2 + $0xff8] sm:$0xff]  ;;  %v2072_v13 = vunpack.c.l.bf16 %v599_v3 }
 0x307   :  { %4647 = vmatprep.subr.mxu1 %v2117_v9  ;;  %4577 = vmatpush1.msra.mxu0 %v1988_v10  ;;  %v661_v9 = vld [vmem:[#allocation2 + $0x11f8] sm:$0xff]  ;;  %v1945_v10 = vunpack.c.h.bf16 %v535_v2  ;;  %v2068_v18 = vunpack.c.l.bf16 %v597_v8 }
 0x308   :  { %4648 = vmatpush1.msra.mxu1 %v2116_v11  ;;  %4578 = vmatprep.subr.mxu0 %v1985_v14  ;;  %v2073_v11 = vunpack.c.h.bf16 %v599_v3  ;;  %v595_v14 = vld [vmem:[#allocation2 + $0xfe8] sm:$0xff]  ;;  %v2196_v19 = vunpack.c.l.bf16 %v661_v9 }
 0x309   :  { %4649 = vmatprep.subr.mxu1 %v2113_v15  ;;  %4579 = vmatpush1.msra.mxu0 %v1984_v16  ;;  %v659_v15 = vld [vmem:[#allocation2 + $0x11e8] sm:$0xff]  ;;  %v2069_v16 = vunpack.c.h.bf16 %v597_v8  ;;  %v2064_v24 = vunpack.c.l.bf16 %v595_v14 }
 0x30a   :  { %4650 = vmatpush1.msra.mxu1 %v2112_v17  ;;  %4580 = vmatprep.subr.mxu0 %v1981_v20  ;;  %v2197_v17 = vunpack.c.h.bf16 %v661_v9  ;;  %v593_v20 = vld [vmem:[#allocation2 + $0xfd8] sm:$0xff]  ;;  %v2192_v25 = vunpack.c.l.bf16 %v659_v15 }
 0x30b   :  { %4651 = vmatprep.subr.mxu1 %v2109_v21  ;;  %4581 = vmatpush1.msra.mxu0 %v1980_v22  ;;  %v657_v21 = vld [vmem:[#allocation2 + $0x11d8] sm:$0xff]  ;;  %v2065_v22 = vunpack.c.h.bf16 %v595_v14  ;;  %v2060_v30 = vunpack.c.l.bf16 %v593_v20 }
 0x30c   :  { %4652 = vmatpush1.msra.mxu1 %v2108_v23  ;;  %4582 = vmatprep.subr.mxu0 %v1977_v26  ;;  %v2193_v23 = vunpack.c.h.bf16 %v659_v15  ;;  %v591_v26 = vld [vmem:[#allocation2 + $0xfc8] sm:$0xff]  ;;  %v2188_v31 = vunpack.c.l.bf16 %v657_v21 }
 0x30d   :  { %4653 = vmatprep.subr.mxu1 %v2105_v27  ;;  %4583 = vmatpush1.msra.mxu0 %v1976_v28  ;;  %v655_v27 = vld [vmem:[#allocation2 + $0x11c8] sm:$0xff]  ;;  %v2061_v28 = vunpack.c.h.bf16 %v593_v20  ;;  %v2056_v36 = vunpack.c.l.bf16 %v591_v26 }
 0x30e   :  { %4654 = vmatpush1.msra.mxu1 %v2104_v29  ;;  %4584 = vmatprep.subr.mxu0 %v1973_v32  ;;  %v2189_v29 = vunpack.c.h.bf16 %v657_v21  ;;  %v589_v32 = vld [vmem:[#allocation2 + $0xfb8] sm:$0xff]  ;;  %v2184_v37 = vunpack.c.l.bf16 %v655_v27 }
 0x30f   :  { %4655 = vmatprep.subr.mxu1 %v2101_v33  ;;  %4585 = vmatpush1.msra.mxu0 %v1972_v34  ;;  %v653_v33 = vld [vmem:[#allocation2 + $0x11b8] sm:$0xff]  ;;  %v2057_v34 = vunpack.c.h.bf16 %v591_v26  ;;  %v2052_v42 = vunpack.c.l.bf16 %v589_v32 }
 0x310   :  { %4656 = vmatpush1.msra.mxu1 %v2100_v35  ;;  %4586 = vmatprep.subr.mxu0 %v1969_v38  ;;  %v2185_v35 = vunpack.c.h.bf16 %v655_v27  ;;  %v587_v38 = vld [vmem:[#allocation2 + $0xfa8] sm:$0xff]  ;;  %v2180_v43 = vunpack.c.l.bf16 %v653_v33 }
 0x311   :  { %4657 = vmatprep.subr.mxu1 %v2097_v39  ;;  %4587 = vmatpush1.msra.mxu0 %v1968_v40  ;;  %v651_v39 = vld [vmem:[#allocation2 + $0x11a8] sm:$0xff]  ;;  %v2053_v40 = vunpack.c.h.bf16 %v589_v32  ;;  %v2048_v48 = vunpack.c.l.bf16 %v587_v38 }
 0x312   :  { %4658 = vmatpush1.msra.mxu1 %v2096_v41  ;;  %4588 = vmatprep.subr.mxu0 %v1965_v44  ;;  %v2181_v41 = vunpack.c.h.bf16 %v653_v33  ;;  %v585_v44 = vld [vmem:[#allocation2 + $0xf98] sm:$0xff]  ;;  %v2176_v49 = vunpack.c.l.bf16 %v651_v39 }
 0x313   :  { %4659 = vmatprep.subr.mxu1 %v2093_v45  ;;  %4589 = vmatpush1.msra.mxu0 %v1964_v46  ;;  %v649_v45 = vld [vmem:[#allocation2 + $0x1198] sm:$0xff]  ;;  %v2049_v46 = vunpack.c.h.bf16 %v587_v38  ;;  %v2044_v54 = vunpack.c.l.bf16 %v585_v44 }
 0x314   :  { %4660 = vmatpush1.msra.mxu1 %v2092_v47  ;;  %4590 = vmatprep.subr.mxu0 %v1961_v50  ;;  %v2177_v47 = vunpack.c.h.bf16 %v651_v39  ;;  %v583_v50 = vld [vmem:[#allocation2 + $0xf88] sm:$0xff]  ;;  %v2172_v55 = vunpack.c.l.bf16 %v649_v45 }
 0x315   :  { %4661 = vmatprep.subr.mxu1 %v2089_v51  ;;  %4591 = vmatpush1.msra.mxu0 %v1960_v52  ;;  %v647_v51 = vld [vmem:[#allocation2 + $0x1188] sm:$0xff]  ;;  %v2045_v52 = vunpack.c.h.bf16 %v585_v44  ;;  %v2040_v60 = vunpack.c.l.bf16 %v583_v50  ;;  %v757_v44 = vld [vmem:[#allocation2 + $0x14f8] sm:$0xff] }
 0x316   :  { %4662 = vmatpush1.msra.mxu1 %v2088_v53  ;;  %4592 = vmatprep.subr.mxu0 %v1957_v56  ;;  %v2173_v53 = vunpack.c.h.bf16 %v649_v45  ;;  %v581_v56 = vld [vmem:[#allocation2 + $0xf78] sm:$0xff]  ;;  %v2168_v61 = vunpack.c.l.bf16 %v647_v51 }
 0x317   :  { %4663 = vmatprep.subr.mxu1 %v2085_v57  ;;  %4593 = vmatpush1.msra.mxu0 %v1956_v58  ;;  %v645_v57 = vld [vmem:[#allocation2 + $0x1178] sm:$0xff]  ;;  %v2041_v58 = vunpack.c.h.bf16 %v583_v50  ;;  %v2036_v2 = vunpack.c.l.bf16 %v581_v56 }
 0x318   :  { %4664 = vmatpush1.msra.mxu1 %v2084_v59  ;;  %4594 = vmatprep.subr.mxu0 %v1953_v62  ;;  %v2169_v59 = vunpack.c.h.bf16 %v647_v51  ;;  %v579_v62 = vld [vmem:[#allocation2 + $0xf68] sm:$0xff]  ;;  %v2164_v3 = vunpack.c.l.bf16 %v645_v57  ;;  %v5630_v50 = vld [vmem:[%s6067_s0 + $0x78] sm:$0xff] }
 0x319   :  { %4665 = vmatprep.subr.mxu1 %v2081_v63  ;;  %4595 = vmatpush1.msra.mxu0 %v1952_v0  ;;  %v643_v63 = vld [vmem:[#allocation2 + $0x1168] sm:$0xff]  ;;  %v2037_v0 = vunpack.c.h.bf16 %v581_v56  ;;  %v2032_v8 = vunpack.c.l.bf16 %v579_v62 }
 0x31a   :  { %4666 = vmatpush1.msra.mxu1 %v2080_v1  ;;  %4596 = vmatprep.subr.mxu0 %v1949_v4  ;;  %v2165_v1 = vunpack.c.h.bf16 %v645_v57  ;;  %v577_v4 = vld [vmem:[#allocation2 + $0xf58] sm:$0xff]  ;;  %v2160_v9 = vunpack.c.l.bf16 %v643_v63 }
 0x31b   :  { %4667 = vmatprep.subr.mxu1 %v2077_v5  ;;  %4597 = vmatpush1.msra.mxu0 %v1948_v6  ;;  %v641_v5 = vld [vmem:[#allocation2 + $0x1158] sm:$0xff]  ;;  %v2033_v6 = vunpack.c.h.bf16 %v579_v62  ;;  %v2028_v14 = vunpack.c.l.bf16 %v577_v4  ;;  %v751_v62 = vld [vmem:[#allocation2 + $0x14c8] sm:$0xff] }
 0x31c   :  { %4668 = vmatpush1.msra.mxu1 %v2076_v7  ;;  %4598 = vmatprep.subr.mxu0 %v1945_v10  ;;  %v2161_v7 = vunpack.c.h.bf16 %v643_v63  ;;  %v575_v10 = vld [vmem:[#allocation2 + $0xf48] sm:$0xff]  ;;  %v2156_v15 = vunpack.c.l.bf16 %v641_v5  ;;  %v5633_v63 = vld [vmem:[%s6067_s0 + $0x80] sm:$0xff] }
 0x31d   :  { %4669 = vmatprep.subr.mxu1 %v2073_v11  ;;  %4599 = vmatpush1.msra.mxu0 %v1944_v12  ;;  %v639_v11 = vld [vmem:[#allocation2 + $0x1148] sm:$0xff]  ;;  %v2029_v12 = vunpack.c.h.bf16 %v577_v4  ;;  %v2024_v20 = vunpack.c.l.bf16 %v575_v10  ;;  %v685_v4 = vld [vmem:[#allocation2 + $0x12b8] sm:$0xff] }
 0x31e   :  { %4670 = vmatpush1.msra.mxu1 %v2072_v13  ;;  %4600 = vmatprep.subr.mxu0 %v2069_v16  ;;  %v2157_v13 = vunpack.c.h.bf16 %v641_v5  ;;  %v573_v16 = vld [vmem:[#allocation2 + $0xf38] sm:$0xff]  ;;  %v2152_v21 = vunpack.c.l.bf16 %v639_v11 }
 0x31f   :  { %4671 = vmatprep.subr.mxu1 %v2197_v17  ;;  %4601 = vmatpush2.msra.mxu0 %v2068_v18  ;;  %v637_v17 = vld [vmem:[#allocation2 + $0x1138] sm:$0xff]  ;;  %v2025_v18 = vunpack.c.h.bf16 %v575_v10  ;;  %v2020_v26 = vunpack.c.l.bf16 %v573_v16  ;;  %v683_v10 = vld [vmem:[#allocation2 + $0x12a8] sm:$0xff] }
 0x320   :  { %4672 = vmatpush2.msra.mxu1 %v2196_v19  ;;  %4602 = vmatprep.subr.mxu0 %v2065_v22  ;;  %v2153_v19 = vunpack.c.h.bf16 %v639_v11  ;;  %v571_v22 = vld [vmem:[#allocation2 + $0xf28] sm:$0xff]  ;;  %v2148_v27 = vunpack.c.l.bf16 %v637_v17  ;;  %v749_v5 = vld [vmem:[#allocation2 + $0x14b8] sm:$0xff] }
 0x321   :  { %4673 = vmatprep.subr.mxu1 %v2193_v23  ;;  %4603 = vmatpush2.msra.mxu0 %v2064_v24  ;;  %v635_v23 = vld [vmem:[#allocation2 + $0x1128] sm:$0xff]  ;;  %v2021_v24 = vunpack.c.h.bf16 %v573_v16  ;;  %v2016_v32 = vunpack.c.l.bf16 %v571_v22  ;;  %v681_v16 = vld [vmem:[#allocation2 + $0x1298] sm:$0xff] }
 0x322   :  { %4674 = vmatpush2.msra.mxu1 %v2192_v25  ;;  %4604 = vmatprep.subr.mxu0 %v2061_v28  ;;  %v2149_v25 = vunpack.c.h.bf16 %v637_v17  ;;  %v569_v28 = vld [vmem:[#allocation2 + $0xf18] sm:$0xff]  ;;  %v2144_v33 = vunpack.c.l.bf16 %v635_v23  ;;  %v747_v11 = vld [vmem:[#allocation2 + $0x14a8] sm:$0xff] }
 0x323   :  { %4675 = vmatprep.subr.mxu1 %v2189_v29  ;;  %4605 = vmatpush2.msra.mxu0 %v2060_v30  ;;  %v633_v29 = vld [vmem:[#allocation2 + $0x1118] sm:$0xff]  ;;  %v2017_v30 = vunpack.c.h.bf16 %v571_v22  ;;  %v2012_v38 = vunpack.c.l.bf16 %v569_v28  ;;  %v679_v22 = vld [vmem:[#allocation2 + $0x1288] sm:$0xff] }
 0x324   :  { %4676 = vmatpush2.msra.mxu1 %v2188_v31  ;;  %4606 = vmatprep.subr.mxu0 %v2057_v34  ;;  %v2145_v31 = vunpack.c.h.bf16 %v635_v23  ;;  %v567_v34 = vld [vmem:[#allocation2 + $0xf08] sm:$0xff]  ;;  %v2140_v39 = vunpack.c.l.bf16 %v633_v29  ;;  %v745_v17 = vld [vmem:[#allocation2 + $0x1498] sm:$0xff] }
 0x325   :  { %4677 = vmatprep.subr.mxu1 %v2185_v35  ;;  %4607 = vmatpush2.msra.mxu0 %v2056_v36  ;;  %v631_v35 = vld [vmem:[#allocation2 + $0x1108] sm:$0xff]  ;;  %v2013_v36 = vunpack.c.h.bf16 %v569_v28  ;;  %v677_v28 = vld [vmem:[#allocation2 + $0x1278] sm:$0xff] }
 0x326   :  { %4678 = vmatpush2.msra.mxu1 %v2184_v37  ;;  %4608 = vmatprep.subr.mxu0 %v2053_v40  ;;  %v2141_v37 = vunpack.c.h.bf16 %v633_v29  ;;  %v2009_v40 = vunpack.c.h.bf16 %v567_v34  ;;  %v2136_v45 = vunpack.c.l.bf16 %v631_v35  ;;  %v743_v23 = vld [vmem:[#allocation2 + $0x1488] sm:$0xff]  ;;  %v741_v29 = vld [vmem:[#allocation2 + $0x1478] sm:$0xff] }
 0x327   :  { %4679 = vmatprep.subr.mxu1 %v2181_v41  ;;  %4609 = vmatpush2.msra.mxu0 %v2052_v42  ;;  %v2137_v41 = vunpack.c.h.bf16 %v631_v35  ;;  %v693_v42 = vld [vmem:[#allocation2 + $0x12f8] sm:$0xff]  ;;  %v739_v35 = vld [vmem:[#allocation2 + $0x1468] sm:$0xff] }
 0x328   :  { %4680 = vmatpush2.msra.mxu1 %v2180_v43  ;;  %4610 = vmatprep.subr.mxu0 %v2049_v46  ;;  %v2008_v43 = vunpack.c.l.bf16 %v567_v34  ;;  %v2261_v46 = vunpack.c.h.bf16 %v693_v42  ;;  %v2260_v51 = vunpack.c.l.bf16 %v693_v42  ;;  %v675_v34 = vld [vmem:[#allocation2 + $0x1268] sm:$0xff] }
 0x329   :  { %4681 = vmatprep.subr.mxu1 %v2177_v47  ;;  %4611 = vmatpush2.msra.mxu0 %v2048_v48  ;;  %v691_v47 = vld [vmem:[#allocation2 + $0x12e8] sm:$0xff]  ;;  %v2225_v42 = vunpack.c.h.bf16 %v675_v34 }
 0x32a   :  { %4682 = vmatpush2.msra.mxu1 %v2176_v49  ;;  %4612 = vmatprep.subr.mxu0 %v2045_v52  ;;  %v755_v48 = vld [vmem:[#allocation2 + $0x14e8] sm:$0xff]  ;;  %v2389_v49 = vunpack.c.h.bf16 %v757_v44  ;;  %v2388_v52 = vunpack.c.l.bf16 %v757_v44  ;;  %v2257_v56 = vunpack.c.h.bf16 %v691_v47  ;;  %v2224_v44 = vunpack.c.l.bf16 %v675_v34 }
 0x32b   :  { %4683 = vmatprep.subr.mxu1 %v2173_v53  ;;  %4613 = vmatpush2.msra.mxu0 %v2044_v54  ;;  %v689_v53 = vld [vmem:[#allocation2 + $0x12d8] sm:$0xff]  ;;  %v2385_v57 = vunpack.c.h.bf16 %v755_v48 }
 0x32c   :  { %4684 = vmatpush2.msra.mxu1 %v2172_v55  ;;  %4614 = vmatprep.subr.mxu0 %v2041_v58  ;;  %v753_v54 = vld [vmem:[#allocation2 + $0x14d8] sm:$0xff]  ;;  %v5631_v55 = vld [vmem:[%s6067_s0 + $0x70] sm:$0xff]  ;;  %v5632_v58 = vld [vmem:[%s6067_s0 + $0x88] sm:$0xff] }
 0x32d   :  { %4685 = vmatprep.subr.mxu1 %v2169_v59  ;;  %4615 = vmatpush2.msra.mxu0 %v2040_v60  ;;  %v2256_v59 = vunpack.c.l.bf16 %v691_v47  ;;  %v2384_v60 = vunpack.c.l.bf16 %v755_v48  ;;  %v735_v47 = vld [vmem:[#allocation2 + $0x1448] sm:$0xff] }
 0x32e   :  { %4686 = vmatpush2.msra.mxu1 %v2168_v61  ;;  %4616 = vmatprep.subr.mxu0 %v2037_v0  ;;  %v687_v61 = vld [vmem:[#allocation2 + $0x12c8] sm:$0xff]  ;;  %v2253_v0 = vunpack.c.h.bf16 %v689_v53 }
 0x32f   :  { %4687 = vmatprep.subr.mxu1 %v2165_v1  ;;  %4617 = vmatpush2.msra.mxu0 %v2036_v2  ;;  %v2381_v1 = vunpack.c.h.bf16 %v753_v54  ;;  %v2252_v2 = vunpack.c.l.bf16 %v689_v53  ;;  %v733_v53 = vld [vmem:[#allocation2 + $0x1438] sm:$0xff] }
 0x330   :  { %4688 = vmatpush2.msra.mxu1 %v2164_v3  ;;  %4618 = vmatprep.subr.mxu0 %v2033_v6  ;;  %v2380_v3 = vunpack.c.l.bf16 %v753_v54  ;;  %v2249_v6 = vunpack.c.h.bf16 %v687_v61 }
 0x331   :  { %4689 = vmatprep.subr.mxu1 %v2161_v7  ;;  %4619 = vmatpush2.msra.mxu0 %v2032_v8  ;;  %v2377_v7 = vunpack.c.h.bf16 %v751_v62  ;;  %v2248_v8 = vunpack.c.l.bf16 %v687_v61  ;;  %v2341_v61 = vunpack.c.h.bf16 %v733_v53 }
 0x332   :  { %4690 = vmatpush2.msra.mxu1 %v2160_v9  ;;  %4620 = vmatprep.subr.mxu0 %v2029_v12  ;;  %v2376_v9 = vunpack.c.l.bf16 %v751_v62  ;;  %v2245_v12 = vunpack.c.h.bf16 %v685_v4 }
 0x333   :  { %4691 = vmatprep.subr.mxu1 %v2157_v13  ;;  %4621 = vmatpush2.msra.mxu0 %v2028_v14  ;;  %v2373_v13 = vunpack.c.h.bf16 %v749_v5  ;;  %v2244_v14 = vunpack.c.l.bf16 %v685_v4 }
 0x334   :  { %4692 = vmatpush2.msra.mxu1 %v2156_v15  ;;  %4622 = vmatprep.subr.mxu0 %v2025_v18  ;;  %v2372_v15 = vunpack.c.l.bf16 %v749_v5  ;;  %v2241_v18 = vunpack.c.h.bf16 %v683_v10 }
 0x335   :  { %4693 = vmatprep.subr.mxu1 %v2153_v19  ;;  %4623 = vmatpush2.msra.mxu0 %v2024_v20  ;;  %v2369_v19 = vunpack.c.h.bf16 %v747_v11  ;;  %v2240_v20 = vunpack.c.l.bf16 %v683_v10 }
 0x336   :  { %4694 = vmatpush2.msra.mxu1 %v2152_v21  ;;  %4624 = vmatprep.subr.mxu0 %v2021_v24  ;;  %v2368_v21 = vunpack.c.l.bf16 %v747_v11  ;;  %v2237_v24 = vunpack.c.h.bf16 %v681_v16 }
 0x337   :  { %4695 = vmatprep.subr.mxu1 %v2149_v25  ;;  %4625 = vmatpush2.msra.mxu0 %v2020_v26  ;;  %v2365_v25 = vunpack.c.h.bf16 %v745_v17  ;;  %v2236_v26 = vunpack.c.l.bf16 %v681_v16 }
 0x338   :  { %4696 = vmatpush2.msra.mxu1 %v2148_v27  ;;  %4626 = vmatprep.subr.mxu0 %v2017_v30  ;;  %v2364_v27 = vunpack.c.l.bf16 %v745_v17  ;;  %v2233_v30 = vunpack.c.h.bf16 %v679_v22 }
 0x339   :  { %4697 = vmatprep.subr.mxu1 %v2145_v31  ;;  %4627 = vmatpush2.msra.mxu0 %v2016_v32  ;;  %v2361_v31 = vunpack.c.h.bf16 %v743_v23  ;;  %v2232_v32 = vunpack.c.l.bf16 %v679_v22 }
 0x33a   :  { %4698 = vmatpush2.msra.mxu1 %v2144_v33  ;;  %4628 = vmatprep.subr.mxu0 %v2013_v36  ;;  %v2360_v33 = vunpack.c.l.bf16 %v743_v23  ;;  %v2229_v36 = vunpack.c.h.bf16 %v677_v28 }
 0x33b   :  { %4699 = vmatprep.subr.mxu1 %v2141_v37  ;;  %4629 = vmatpush2.msra.mxu0 %v2012_v38  ;;  %v2357_v37 = vunpack.c.h.bf16 %v741_v29  ;;  %v2228_v38 = vunpack.c.l.bf16 %v677_v28 }
 0x33c   :  { %4700 = vmatpush2.msra.mxu1 %v2140_v39  ;;  %4630 = vmatprep.subr.mxu0 %v2009_v40  ;;  %v2356_v39 = vunpack.c.l.bf16 %v741_v29  ;;  %v673_v40 = vld [vmem:[#allocation2 + $0x1258] sm:$0xff] }
 0x33d   :  { %4701 = vmatprep.subr.mxu1 %v2137_v41  ;;  %4631 = vmatpush2.msra.mxu0 %v2008_v43  ;;  %v737_v41 = vld [vmem:[#allocation2 + $0x1458] sm:$0xff]  ;;  %v2353_v43 = vunpack.c.h.bf16 %v739_v35  ;;  %v2221_v48 = vunpack.c.h.bf16 %v673_v40 }
 0x33e   :  { %4632 = vmatprep.mubr.f32.mxu0 %v5630_v50  ;;  %4702 = vmatpush2.msra.mxu1 %v2136_v45  ;;  %v2352_v45 = vunpack.c.l.bf16 %v739_v35  ;;  %v2220_v50 = vunpack.c.l.bf16 %v673_v40 }
 0x33f   :  { %4633 = vmatmul.mubr.f32.vlgmr.msra.gmra.mxu0 %v5631_v55  ;;  %4703 = vmatprep.mubr.f32.mxu1 %v5632_v58  ;;  %v2345_v55 = vunpack.c.h.bf16 %v735_v47  ;;  %v667_v58 = vld [vmem:[#allocation2 + $0x1228] sm:$0xff] }
 0x340   :  { %4710 = vmatprep.subr.mxu0 %v2261_v46  ;;  %4781 = vmatprep.subr.mxu1 %v2389_v49  ;;  %v671_v46 = vld [vmem:[#allocation2 + $0x1248] sm:$0xff]  ;;  %v2349_v49 = vunpack.c.h.bf16 %v737_v41  ;;  %v2208_v4 = vunpack.c.l.bf16 %v667_v58 }
 0x341   :  { %4704 = vmatmul.mubr.f32.vlgmr.msra.gmra.mxu1 %v5633_v63  ;;  %4711 = vmatpush1.msra.mxu0 %v2260_v51  ;;  %v2348_v51 = vunpack.c.l.bf16 %v737_v41  ;;  %v2217_v54 = vunpack.c.h.bf16 %v671_v46  ;;  %v2340_v63 = vunpack.c.l.bf16 %v733_v53 }
 0x342   :  { %4782 = vmatpush1.msra.mxu1 %v2388_v52  ;;  %4712 = vmatprep.subr.mxu0 %v2257_v56  ;;  %v669_v52 = vld [vmem:[#allocation2 + $0x1238] sm:$0xff]  ;;  %v2216_v56 = vunpack.c.l.bf16 %v671_v46 }
 0x343   :  { %4783 = vmatprep.subr.mxu1 %v2385_v57  ;;  %4713 = vmatpush1.msra.mxu0 %v2256_v59  ;;  %v2344_v57 = vunpack.c.l.bf16 %v735_v47  ;;  %v731_v59 = vld [vmem:[#allocation2 + $0x1428] sm:$0xff]  ;;  %v2212_v62 = vunpack.c.l.bf16 %v669_v52 }
 0x344   :  { %4784 = vmatpush1.msra.mxu1 %v2384_v60  ;;  %4714 = vmatprep.subr.mxu0 %v2253_v0  ;;  %v2213_v60 = vunpack.c.h.bf16 %v669_v52  ;;  %v665_v0 = vld [vmem:[#allocation2 + $0x1218] sm:$0xff]  ;;  %v2336_v5 = vunpack.c.l.bf16 %v731_v59 }
 0x345   :  { %4785 = vmatprep.subr.mxu1 %v2381_v1  ;;  %4715 = vmatpush1.msra.mxu0 %v2252_v2  ;;  %v729_v1 = vld [vmem:[#allocation2 + $0x1418] sm:$0xff]  ;;  %v2209_v2 = vunpack.c.h.bf16 %v667_v58  ;;  %v2204_v10 = vunpack.c.l.bf16 %v665_v0 }
 0x346   :  { %4786 = vmatpush1.msra.mxu1 %v2380_v3  ;;  %4716 = vmatprep.subr.mxu0 %v2249_v6  ;;  %v2337_v3 = vunpack.c.h.bf16 %v731_v59  ;;  %v663_v6 = vld [vmem:[#allocation2 + $0x1208] sm:$0xff]  ;;  %v2332_v11 = vunpack.c.l.bf16 %v729_v1 }
 0x347   :  { %4787 = vmatprep.subr.mxu1 %v2377_v7  ;;  %4717 = vmatpush1.msra.mxu0 %v2248_v8  ;;  %v727_v7 = vld [vmem:[#allocation2 + $0x1408] sm:$0xff]  ;;  %v2205_v8 = vunpack.c.h.bf16 %v665_v0  ;;  %v2200_v16 = vunpack.c.l.bf16 %v663_v6 }
 0x348   :  { %4788 = vmatpush1.msra.mxu1 %v2376_v9  ;;  %4718 = vmatprep.subr.mxu0 %v2245_v12  ;;  %v2333_v9 = vunpack.c.h.bf16 %v729_v1  ;;  %v725_v12 = vld [vmem:[#allocation2 + $0x13f8] sm:$0xff]  ;;  %v2328_v17 = vunpack.c.l.bf16 %v727_v7 }
 0x349   :  { %4789 = vmatprep.subr.mxu1 %v2373_v13  ;;  %4719 = vmatpush1.msra.mxu0 %v2244_v14  ;;  %v789_v13 = vld [vmem:[#allocation2 + $0x15f8] sm:$0xff]  ;;  %v2201_v14 = vunpack.c.h.bf16 %v663_v6  ;;  %v2324_v22 = vunpack.c.l.bf16 %v725_v12 }
 0x34a   :  { %4790 = vmatpush1.msra.mxu1 %v2372_v15  ;;  %4720 = vmatprep.subr.mxu0 %v2241_v18  ;;  %v2329_v15 = vunpack.c.h.bf16 %v727_v7  ;;  %v723_v18 = vld [vmem:[#allocation2 + $0x13e8] sm:$0xff]  ;;  %v2452_v23 = vunpack.c.l.bf16 %v789_v13 }
 0x34b   :  { %4791 = vmatprep.subr.mxu1 %v2369_v19  ;;  %4721 = vmatpush1.msra.mxu0 %v2240_v20  ;;  %v787_v19 = vld [vmem:[#allocation2 + $0x15e8] sm:$0xff]  ;;  %v2325_v20 = vunpack.c.h.bf16 %v725_v12  ;;  %v2320_v28 = vunpack.c.l.bf16 %v723_v18 }
 0x34c   :  { %4792 = vmatpush1.msra.mxu1 %v2368_v21  ;;  %4722 = vmatprep.subr.mxu0 %v2237_v24  ;;  %v2453_v21 = vunpack.c.h.bf16 %v789_v13  ;;  %v721_v24 = vld [vmem:[#allocation2 + $0x13d8] sm:$0xff]  ;;  %v2448_v29 = vunpack.c.l.bf16 %v787_v19 }
 0x34d   :  { %4793 = vmatprep.subr.mxu1 %v2365_v25  ;;  %4723 = vmatpush1.msra.mxu0 %v2236_v26  ;;  %v785_v25 = vld [vmem:[#allocation2 + $0x15d8] sm:$0xff]  ;;  %v2321_v26 = vunpack.c.h.bf16 %v723_v18  ;;  %v2316_v34 = vunpack.c.l.bf16 %v721_v24 }
 0x34e   :  { %4794 = vmatpush1.msra.mxu1 %v2364_v27  ;;  %4724 = vmatprep.subr.mxu0 %v2233_v30  ;;  %v2449_v27 = vunpack.c.h.bf16 %v787_v19  ;;  %v719_v30 = vld [vmem:[#allocation2 + $0x13c8] sm:$0xff]  ;;  %v2444_v35 = vunpack.c.l.bf16 %v785_v25 }
 0x34f   :  { %4795 = vmatprep.subr.mxu1 %v2361_v31  ;;  %4725 = vmatpush1.msra.mxu0 %v2232_v32  ;;  %v783_v31 = vld [vmem:[#allocation2 + $0x15c8] sm:$0xff]  ;;  %v2317_v32 = vunpack.c.h.bf16 %v721_v24  ;;  %v2312_v40 = vunpack.c.l.bf16 %v719_v30 }
 0x350   :  { %4796 = vmatpush1.msra.mxu1 %v2360_v33  ;;  %4726 = vmatprep.subr.mxu0 %v2229_v36  ;;  %v2445_v33 = vunpack.c.h.bf16 %v785_v25  ;;  %v717_v36 = vld [vmem:[#allocation2 + $0x13b8] sm:$0xff]  ;;  %v2440_v41 = vunpack.c.l.bf16 %v783_v31 }
 0x351   :  { %4797 = vmatprep.subr.mxu1 %v2357_v37  ;;  %4727 = vmatpush1.msra.mxu0 %v2228_v38  ;;  %v781_v37 = vld [vmem:[#allocation2 + $0x15b8] sm:$0xff]  ;;  %v2313_v38 = vunpack.c.h.bf16 %v719_v30  ;;  %v2308_v46 = vunpack.c.l.bf16 %v717_v36 }
 0x352   :  { %4798 = vmatpush1.msra.mxu1 %v2356_v39  ;;  %4728 = vmatprep.subr.mxu0 %v2225_v42  ;;  %v2441_v39 = vunpack.c.h.bf16 %v783_v31  ;;  %v715_v42 = vld [vmem:[#allocation2 + $0x13a8] sm:$0xff]  ;;  %v2436_v47 = vunpack.c.l.bf16 %v781_v37 }
 0x353   :  { %4799 = vmatprep.subr.mxu1 %v2353_v43  ;;  %4729 = vmatpush1.msra.mxu0 %v2224_v44  ;;  %v779_v43 = vld [vmem:[#allocation2 + $0x15a8] sm:$0xff]  ;;  %v2309_v44 = vunpack.c.h.bf16 %v717_v36  ;;  %v2304_v52 = vunpack.c.l.bf16 %v715_v42 }
 0x354   :  { %4800 = vmatpush1.msra.mxu1 %v2352_v45  ;;  %4730 = vmatprep.subr.mxu0 %v2221_v48  ;;  %v2437_v45 = vunpack.c.h.bf16 %v781_v37  ;;  %v713_v48 = vld [vmem:[#allocation2 + $0x1398] sm:$0xff]  ;;  %v2432_v53 = vunpack.c.l.bf16 %v779_v43 }
 0x355   :  { %4801 = vmatprep.subr.mxu1 %v2349_v49  ;;  %4731 = vmatpush1.msra.mxu0 %v2220_v50  ;;  %v777_v49 = vld [vmem:[#allocation2 + $0x1598] sm:$0xff]  ;;  %v2305_v50 = vunpack.c.h.bf16 %v715_v42  ;;  %v2300_v58 = vunpack.c.l.bf16 %v713_v48 }
 0x356   :  { %4802 = vmatpush1.msra.mxu1 %v2348_v51  ;;  %4732 = vmatprep.subr.mxu0 %v2217_v54  ;;  %v2433_v51 = vunpack.c.h.bf16 %v779_v43  ;;  %v711_v54 = vld [vmem:[#allocation2 + $0x1388] sm:$0xff]  ;;  %v2428_v59 = vunpack.c.l.bf16 %v777_v49 }
 0x357   :  { %4803 = vmatprep.subr.mxu1 %v2345_v55  ;;  %4733 = vmatpush1.msra.mxu0 %v2216_v56  ;;  %v775_v55 = vld [vmem:[#allocation2 + $0x1588] sm:$0xff]  ;;  %v2301_v56 = vunpack.c.h.bf16 %v713_v48  ;;  %v2296_v0 = vunpack.c.l.bf16 %v711_v54  ;;  %v885_v48 = vld [vmem:[#allocation2 + $0x18f8] sm:$0xff] }
 0x358   :  { %4804 = vmatpush1.msra.mxu1 %v2344_v57  ;;  %4734 = vmatprep.subr.mxu0 %v2213_v60  ;;  %v2429_v57 = vunpack.c.h.bf16 %v777_v49  ;;  %v709_v60 = vld [vmem:[#allocation2 + $0x1378] sm:$0xff]  ;;  %v2424_v1 = vunpack.c.l.bf16 %v775_v55 }
 0x359   :  { %4805 = vmatprep.subr.mxu1 %v2341_v61  ;;  %4735 = vmatpush1.msra.mxu0 %v2212_v62  ;;  %v773_v61 = vld [vmem:[#allocation2 + $0x1578] sm:$0xff]  ;;  %v2297_v62 = vunpack.c.h.bf16 %v711_v54  ;;  %v2292_v6 = vunpack.c.l.bf16 %v709_v60 }
 0x35a   :  { %4806 = vmatpush1.msra.mxu1 %v2340_v63  ;;  %4736 = vmatprep.subr.mxu0 %v2209_v2  ;;  %v2425_v63 = vunpack.c.h.bf16 %v775_v55  ;;  %v707_v2 = vld [vmem:[#allocation2 + $0x1368] sm:$0xff]  ;;  %v2420_v7 = vunpack.c.l.bf16 %v773_v61  ;;  %v5634_v54 = vld [vmem:[%s6067_s0 + $0x98] sm:$0xff] }
 0x35b   :  { %4807 = vmatprep.subr.mxu1 %v2337_v3  ;;  %4737 = vmatpush1.msra.mxu0 %v2208_v4  ;;  %v771_v3 = vld [vmem:[#allocation2 + $0x1568] sm:$0xff]  ;;  %v2293_v4 = vunpack.c.h.bf16 %v709_v60  ;;  %v2288_v12 = vunpack.c.l.bf16 %v707_v2 }
 0x35c   :  { %4808 = vmatpush1.msra.mxu1 %v2336_v5  ;;  %4738 = vmatprep.subr.mxu0 %v2205_v8  ;;  %v2421_v5 = vunpack.c.h.bf16 %v773_v61  ;;  %v705_v8 = vld [vmem:[#allocation2 + $0x1358] sm:$0xff]  ;;  %v2416_v13 = vunpack.c.l.bf16 %v771_v3 }
 0x35d   :  { %4809 = vmatprep.subr.mxu1 %v2333_v9  ;;  %4739 = vmatpush1.msra.mxu0 %v2204_v10  ;;  %v769_v9 = vld [vmem:[#allocation2 + $0x1558] sm:$0xff]  ;;  %v2289_v10 = vunpack.c.h.bf16 %v707_v2  ;;  %v2284_v18 = vunpack.c.l.bf16 %v705_v8  ;;  %v879_v2 = vld [vmem:[#allocation2 + $0x18c8] sm:$0xff] }
 0x35e   :  { %4810 = vmatpush1.msra.mxu1 %v2332_v11  ;;  %4740 = vmatprep.subr.mxu0 %v2201_v14  ;;  %v2417_v11 = vunpack.c.h.bf16 %v771_v3  ;;  %v703_v14 = vld [vmem:[#allocation2 + $0x1348] sm:$0xff]  ;;  %v2412_v19 = vunpack.c.l.bf16 %v769_v9  ;;  %v5637_v3 = vld [vmem:[%s6067_s0 + $0xa0] sm:$0xff] }
 0x35f   :  { %4811 = vmatprep.subr.mxu1 %v2329_v15  ;;  %4741 = vmatpush1.msra.mxu0 %v2200_v16  ;;  %v767_v15 = vld [vmem:[#allocation2 + $0x1548] sm:$0xff]  ;;  %v2285_v16 = vunpack.c.h.bf16 %v705_v8  ;;  %v2280_v24 = vunpack.c.l.bf16 %v703_v14  ;;  %v813_v8 = vld [vmem:[#allocation2 + $0x16b8] sm:$0xff] }
 0x360   :  { %4812 = vmatpush1.msra.mxu1 %v2328_v17  ;;  %4742 = vmatprep.subr.mxu0 %v2325_v20  ;;  %v2413_v17 = vunpack.c.h.bf16 %v769_v9  ;;  %v701_v20 = vld [vmem:[#allocation2 + $0x1338] sm:$0xff]  ;;  %v2408_v25 = vunpack.c.l.bf16 %v767_v15 }
 0x361   :  { %4813 = vmatprep.subr.mxu1 %v2453_v21  ;;  %4743 = vmatpush2.msra.mxu0 %v2324_v22  ;;  %v765_v21 = vld [vmem:[#allocation2 + $0x1538] sm:$0xff]  ;;  %v2281_v22 = vunpack.c.h.bf16 %v703_v14  ;;  %v2276_v30 = vunpack.c.l.bf16 %v701_v20  ;;  %v811_v14 = vld [vmem:[#allocation2 + $0x16a8] sm:$0xff] }
 0x362   :  { %4814 = vmatpush2.msra.mxu1 %v2452_v23  ;;  %4744 = vmatprep.subr.mxu0 %v2321_v26  ;;  %v2409_v23 = vunpack.c.h.bf16 %v767_v15  ;;  %v699_v26 = vld [vmem:[#allocation2 + $0x1328] sm:$0xff]  ;;  %v2404_v31 = vunpack.c.l.bf16 %v765_v21  ;;  %v877_v9 = vld [vmem:[#allocation2 + $0x18b8] sm:$0xff] }
 0x363   :  { %4815 = vmatprep.subr.mxu1 %v2449_v27  ;;  %4745 = vmatpush2.msra.mxu0 %v2320_v28  ;;  %v763_v27 = vld [vmem:[#allocation2 + $0x1528] sm:$0xff]  ;;  %v2277_v28 = vunpack.c.h.bf16 %v701_v20  ;;  %v2272_v36 = vunpack.c.l.bf16 %v699_v26  ;;  %v809_v20 = vld [vmem:[#allocation2 + $0x1698] sm:$0xff] }
 0x364   :  { %4816 = vmatpush2.msra.mxu1 %v2448_v29  ;;  %4746 = vmatprep.subr.mxu0 %v2317_v32  ;;  %v2405_v29 = vunpack.c.h.bf16 %v765_v21  ;;  %v697_v32 = vld [vmem:[#allocation2 + $0x1318] sm:$0xff]  ;;  %v2400_v37 = vunpack.c.l.bf16 %v763_v27  ;;  %v875_v15 = vld [vmem:[#allocation2 + $0x18a8] sm:$0xff] }
 0x365   :  { %4817 = vmatprep.subr.mxu1 %v2445_v33  ;;  %4747 = vmatpush2.msra.mxu0 %v2316_v34  ;;  %v761_v33 = vld [vmem:[#allocation2 + $0x1518] sm:$0xff]  ;;  %v2273_v34 = vunpack.c.h.bf16 %v699_v26  ;;  %v2268_v42 = vunpack.c.l.bf16 %v697_v32  ;;  %v807_v26 = vld [vmem:[#allocation2 + $0x1688] sm:$0xff] }
 0x366   :  { %4818 = vmatpush2.msra.mxu1 %v2444_v35  ;;  %4748 = vmatprep.subr.mxu0 %v2313_v38  ;;  %v2401_v35 = vunpack.c.h.bf16 %v763_v27  ;;  %v695_v38 = vld [vmem:[#allocation2 + $0x1308] sm:$0xff]  ;;  %v2396_v43 = vunpack.c.l.bf16 %v761_v33  ;;  %v873_v21 = vld [vmem:[#allocation2 + $0x1898] sm:$0xff] }
 0x367   :  { %4819 = vmatprep.subr.mxu1 %v2441_v39  ;;  %4749 = vmatpush2.msra.mxu0 %v2312_v40  ;;  %v759_v39 = vld [vmem:[#allocation2 + $0x1508] sm:$0xff]  ;;  %v2269_v40 = vunpack.c.h.bf16 %v697_v32  ;;  %v805_v32 = vld [vmem:[#allocation2 + $0x1678] sm:$0xff] }
 0x368   :  { %4820 = vmatpush2.msra.mxu1 %v2440_v41  ;;  %4750 = vmatprep.subr.mxu0 %v2309_v44  ;;  %v2397_v41 = vunpack.c.h.bf16 %v761_v33  ;;  %v2265_v44 = vunpack.c.h.bf16 %v695_v38  ;;  %v2392_v49 = vunpack.c.l.bf16 %v759_v39  ;;  %v871_v27 = vld [vmem:[#allocation2 + $0x1888] sm:$0xff]  ;;  %v869_v33 = vld [vmem:[#allocation2 + $0x1878] sm:$0xff] }
 0x369   :  { %4821 = vmatprep.subr.mxu1 %v2437_v45  ;;  %4751 = vmatpush2.msra.mxu0 %v2308_v46  ;;  %v2393_v45 = vunpack.c.h.bf16 %v759_v39  ;;  %v821_v46 = vld [vmem:[#allocation2 + $0x16f8] sm:$0xff]  ;;  %v867_v39 = vld [vmem:[#allocation2 + $0x1868] sm:$0xff] }
 0x36a   :  { %4822 = vmatpush2.msra.mxu1 %v2436_v47  ;;  %4752 = vmatprep.subr.mxu0 %v2305_v50  ;;  %v2264_v47 = vunpack.c.l.bf16 %v695_v38  ;;  %v2517_v50 = vunpack.c.h.bf16 %v821_v46  ;;  %v2516_v55 = vunpack.c.l.bf16 %v821_v46  ;;  %v803_v38 = vld [vmem:[#allocation2 + $0x1668] sm:$0xff] }
 0x36b   :  { %4823 = vmatprep.subr.mxu1 %v2433_v51  ;;  %4753 = vmatpush2.msra.mxu0 %v2304_v52  ;;  %v819_v51 = vld [vmem:[#allocation2 + $0x16e8] sm:$0xff]  ;;  %v2481_v46 = vunpack.c.h.bf16 %v803_v38 }
 0x36c   :  { %4824 = vmatpush2.msra.mxu1 %v2432_v53  ;;  %4754 = vmatprep.subr.mxu0 %v2301_v56  ;;  %v883_v52 = vld [vmem:[#allocation2 + $0x18e8] sm:$0xff]  ;;  %v2645_v53 = vunpack.c.h.bf16 %v885_v48  ;;  %v2644_v56 = vunpack.c.l.bf16 %v885_v48  ;;  %v2513_v60 = vunpack.c.h.bf16 %v819_v51  ;;  %v2480_v48 = vunpack.c.l.bf16 %v803_v38 }
 0x36d   :  { %4825 = vmatprep.subr.mxu1 %v2429_v57  ;;  %4755 = vmatpush2.msra.mxu0 %v2300_v58  ;;  %v817_v57 = vld [vmem:[#allocation2 + $0x16d8] sm:$0xff]  ;;  %v2641_v61 = vunpack.c.h.bf16 %v883_v52 }
 0x36e   :  { %4826 = vmatpush2.msra.mxu1 %v2428_v59  ;;  %4756 = vmatprep.subr.mxu0 %v2297_v62  ;;  %v881_v58 = vld [vmem:[#allocation2 + $0x18d8] sm:$0xff]  ;;  %v5635_v59 = vld [vmem:[%s6067_s0 + $0x90] sm:$0xff]  ;;  %v5636_v62 = vld [vmem:[%s6067_s0 + $0xa8] sm:$0xff] }
 0x36f   :  { %4827 = vmatprep.subr.mxu1 %v2425_v63  ;;  %4757 = vmatpush2.msra.mxu0 %v2296_v0  ;;  %v2512_v63 = vunpack.c.l.bf16 %v819_v51  ;;  %v2640_v0 = vunpack.c.l.bf16 %v883_v52  ;;  %v863_v51 = vld [vmem:[#allocation2 + $0x1848] sm:$0xff] }
 0x370   :  { %4828 = vmatpush2.msra.mxu1 %v2424_v1  ;;  %4758 = vmatprep.subr.mxu0 %v2293_v4  ;;  %v815_v1 = vld [vmem:[#allocation2 + $0x16c8] sm:$0xff]  ;;  %v2509_v4 = vunpack.c.h.bf16 %v817_v57 }
 0x371   :  { %4829 = vmatprep.subr.mxu1 %v2421_v5  ;;  %4759 = vmatpush2.msra.mxu0 %v2292_v6  ;;  %v2637_v5 = vunpack.c.h.bf16 %v881_v58  ;;  %v2508_v6 = vunpack.c.l.bf16 %v817_v57  ;;  %v861_v57 = vld [vmem:[#allocation2 + $0x1838] sm:$0xff] }
 0x372   :  { %4830 = vmatpush2.msra.mxu1 %v2420_v7  ;;  %4760 = vmatprep.subr.mxu0 %v2289_v10  ;;  %v2636_v7 = vunpack.c.l.bf16 %v881_v58  ;;  %v2505_v10 = vunpack.c.h.bf16 %v815_v1 }
 0x373   :  { %4831 = vmatprep.subr.mxu1 %v2417_v11  ;;  %4761 = vmatpush2.msra.mxu0 %v2288_v12  ;;  %v2633_v11 = vunpack.c.h.bf16 %v879_v2  ;;  %v2504_v12 = vunpack.c.l.bf16 %v815_v1  ;;  %v2597_v1 = vunpack.c.h.bf16 %v861_v57 }
 0x374   :  { %4832 = vmatpush2.msra.mxu1 %v2416_v13  ;;  %4762 = vmatprep.subr.mxu0 %v2285_v16  ;;  %v2632_v13 = vunpack.c.l.bf16 %v879_v2  ;;  %v2501_v16 = vunpack.c.h.bf16 %v813_v8 }
 0x375   :  { %4833 = vmatprep.subr.mxu1 %v2413_v17  ;;  %4763 = vmatpush2.msra.mxu0 %v2284_v18  ;;  %v2629_v17 = vunpack.c.h.bf16 %v877_v9  ;;  %v2500_v18 = vunpack.c.l.bf16 %v813_v8 }
 0x376   :  { %4834 = vmatpush2.msra.mxu1 %v2412_v19  ;;  %4764 = vmatprep.subr.mxu0 %v2281_v22  ;;  %v2628_v19 = vunpack.c.l.bf16 %v877_v9  ;;  %v2497_v22 = vunpack.c.h.bf16 %v811_v14 }
 0x377   :  { %4835 = vmatprep.subr.mxu1 %v2409_v23  ;;  %4765 = vmatpush2.msra.mxu0 %v2280_v24  ;;  %v2625_v23 = vunpack.c.h.bf16 %v875_v15  ;;  %v2496_v24 = vunpack.c.l.bf16 %v811_v14 }
 0x378   :  { %4836 = vmatpush2.msra.mxu1 %v2408_v25  ;;  %4766 = vmatprep.subr.mxu0 %v2277_v28  ;;  %v2624_v25 = vunpack.c.l.bf16 %v875_v15  ;;  %v2493_v28 = vunpack.c.h.bf16 %v809_v20 }
 0x379   :  { %4837 = vmatprep.subr.mxu1 %v2405_v29  ;;  %4767 = vmatpush2.msra.mxu0 %v2276_v30  ;;  %v2621_v29 = vunpack.c.h.bf16 %v873_v21  ;;  %v2492_v30 = vunpack.c.l.bf16 %v809_v20 }
 0x37a   :  { %4838 = vmatpush2.msra.mxu1 %v2404_v31  ;;  %4768 = vmatprep.subr.mxu0 %v2273_v34  ;;  %v2620_v31 = vunpack.c.l.bf16 %v873_v21  ;;  %v2489_v34 = vunpack.c.h.bf16 %v807_v26 }
 0x37b   :  { %4839 = vmatprep.subr.mxu1 %v2401_v35  ;;  %4769 = vmatpush2.msra.mxu0 %v2272_v36  ;;  %v2617_v35 = vunpack.c.h.bf16 %v871_v27  ;;  %v2488_v36 = vunpack.c.l.bf16 %v807_v26 }
 0x37c   :  { %4840 = vmatpush2.msra.mxu1 %v2400_v37  ;;  %4770 = vmatprep.subr.mxu0 %v2269_v40  ;;  %v2616_v37 = vunpack.c.l.bf16 %v871_v27  ;;  %v2485_v40 = vunpack.c.h.bf16 %v805_v32 }
 0x37d   :  { %4841 = vmatprep.subr.mxu1 %v2397_v41  ;;  %4771 = vmatpush2.msra.mxu0 %v2268_v42  ;;  %v2613_v41 = vunpack.c.h.bf16 %v869_v33  ;;  %v2484_v42 = vunpack.c.l.bf16 %v805_v32 }
 0x37e   :  { %4842 = vmatpush2.msra.mxu1 %v2396_v43  ;;  %4772 = vmatprep.subr.mxu0 %v2265_v44  ;;  %v2612_v43 = vunpack.c.l.bf16 %v869_v33  ;;  %v801_v44 = vld [vmem:[#allocation2 + $0x1658] sm:$0xff] }
 0x37f   :  { %4843 = vmatprep.subr.mxu1 %v2393_v45  ;;  %4773 = vmatpush2.msra.mxu0 %v2264_v47  ;;  %v865_v45 = vld [vmem:[#allocation2 + $0x1858] sm:$0xff]  ;;  %v2609_v47 = vunpack.c.h.bf16 %v867_v39  ;;  %v2477_v52 = vunpack.c.h.bf16 %v801_v44 }
 0x380   :  { %4774 = vmatprep.mubr.f32.mxu0 %v5634_v54  ;;  %4844 = vmatpush2.msra.mxu1 %v2392_v49  ;;  %v2608_v49 = vunpack.c.l.bf16 %v867_v39  ;;  %v2476_v54 = vunpack.c.l.bf16 %v801_v44 }
 0x381   :  { %4775 = vmatmul.mubr.f32.vlgmr.msra.gmra.mxu0 %v5635_v59  ;;  %4845 = vmatprep.mubr.f32.mxu1 %v5636_v62  ;;  %v2601_v59 = vunpack.c.h.bf16 %v863_v51  ;;  %v795_v62 = vld [vmem:[#allocation2 + $0x1628] sm:$0xff] }
 0x382   :  { %4852 = vmatprep.subr.mxu0 %v2517_v50  ;;  %4923 = vmatprep.subr.mxu1 %v2645_v53  ;;  %v799_v50 = vld [vmem:[#allocation2 + $0x1648] sm:$0xff]  ;;  %v2605_v53 = vunpack.c.h.bf16 %v865_v45  ;;  %v2464_v8 = vunpack.c.l.bf16 %v795_v62 }
 0x383   :  { %4846 = vmatmul.mubr.f32.vlgmr.msra.gmra.mxu1 %v5637_v3  ;;  %4853 = vmatpush1.msra.mxu0 %v2516_v55  ;;  %v2604_v55 = vunpack.c.l.bf16 %v865_v45  ;;  %v2473_v58 = vunpack.c.h.bf16 %v799_v50  ;;  %v2596_v3 = vunpack.c.l.bf16 %v861_v57 }
 0x384   :  { %4924 = vmatpush1.msra.mxu1 %v2644_v56  ;;  %4854 = vmatprep.subr.mxu0 %v2513_v60  ;;  %v797_v56 = vld [vmem:[#allocation2 + $0x1638] sm:$0xff]  ;;  %v2472_v60 = vunpack.c.l.bf16 %v799_v50 }
 0x385   :  { %4925 = vmatprep.subr.mxu1 %v2641_v61  ;;  %4855 = vmatpush1.msra.mxu0 %v2512_v63  ;;  %v2600_v61 = vunpack.c.l.bf16 %v863_v51  ;;  %v859_v63 = vld [vmem:[#allocation2 + $0x1828] sm:$0xff]  ;;  %v2468_v2 = vunpack.c.l.bf16 %v797_v56 }
 0x386   :  { %4926 = vmatpush1.msra.mxu1 %v2640_v0  ;;  %4856 = vmatprep.subr.mxu0 %v2509_v4  ;;  %v2469_v0 = vunpack.c.h.bf16 %v797_v56  ;;  %v793_v4 = vld [vmem:[#allocation2 + $0x1618] sm:$0xff]  ;;  %v2592_v9 = vunpack.c.l.bf16 %v859_v63 }
 0x387   :  { %4927 = vmatprep.subr.mxu1 %v2637_v5  ;;  %4857 = vmatpush1.msra.mxu0 %v2508_v6  ;;  %v857_v5 = vld [vmem:[#allocation2 + $0x1818] sm:$0xff]  ;;  %v2465_v6 = vunpack.c.h.bf16 %v795_v62  ;;  %v2460_v14 = vunpack.c.l.bf16 %v793_v4 }
 0x388   :  { %4928 = vmatpush1.msra.mxu1 %v2636_v7  ;;  %4858 = vmatprep.subr.mxu0 %v2505_v10  ;;  %v2593_v7 = vunpack.c.h.bf16 %v859_v63  ;;  %v791_v10 = vld [vmem:[#allocation2 + $0x1608] sm:$0xff]  ;;  %v2588_v15 = vunpack.c.l.bf16 %v857_v5 }
 0x389   :  { %4929 = vmatprep.subr.mxu1 %v2633_v11  ;;  %4859 = vmatpush1.msra.mxu0 %v2504_v12  ;;  %v855_v11 = vld [vmem:[#allocation2 + $0x1808] sm:$0xff]  ;;  %v2461_v12 = vunpack.c.h.bf16 %v793_v4  ;;  %v2456_v20 = vunpack.c.l.bf16 %v791_v10 }
 0x38a   :  { %4930 = vmatpush1.msra.mxu1 %v2632_v13  ;;  %4860 = vmatprep.subr.mxu0 %v2501_v16  ;;  %v2589_v13 = vunpack.c.h.bf16 %v857_v5  ;;  %v853_v16 = vld [vmem:[#allocation2 + $0x17f8] sm:$0xff]  ;;  %v2584_v21 = vunpack.c.l.bf16 %v855_v11 }
 0x38b   :  { %4931 = vmatprep.subr.mxu1 %v2629_v17  ;;  %4861 = vmatpush1.msra.mxu0 %v2500_v18  ;;  %v917_v17 = vld [vmem:[#allocation2 + $0x19f8] sm:$0xff]  ;;  %v2457_v18 = vunpack.c.h.bf16 %v791_v10  ;;  %v2580_v26 = vunpack.c.l.bf16 %v853_v16 }
 0x38c   :  { %4932 = vmatpush1.msra.mxu1 %v2628_v19  ;;  %4862 = vmatprep.subr.mxu0 %v2497_v22  ;;  %v2585_v19 = vunpack.c.h.bf16 %v855_v11  ;;  %v851_v22 = vld [vmem:[#allocation2 + $0x17e8] sm:$0xff]  ;;  %v2708_v27 = vunpack.c.l.bf16 %v917_v17 }
 0x38d   :  { %4933 = vmatprep.subr.mxu1 %v2625_v23  ;;  %4863 = vmatpush1.msra.mxu0 %v2496_v24  ;;  %v915_v23 = vld [vmem:[#allocation2 + $0x19e8] sm:$0xff]  ;;  %v2581_v24 = vunpack.c.h.bf16 %v853_v16  ;;  %v2576_v32 = vunpack.c.l.bf16 %v851_v22 }
 0x38e   :  { %4934 = vmatpush1.msra.mxu1 %v2624_v25  ;;  %4864 = vmatprep.subr.mxu0 %v2493_v28  ;;  %v2709_v25 = vunpack.c.h.bf16 %v917_v17  ;;  %v849_v28 = vld [vmem:[#allocation2 + $0x17d8] sm:$0xff]  ;;  %v2704_v33 = vunpack.c.l.bf16 %v915_v23 }
 0x38f   :  { %4935 = vmatprep.subr.mxu1 %v2621_v29  ;;  %4865 = vmatpush1.msra.mxu0 %v2492_v30  ;;  %v913_v29 = vld [vmem:[#allocation2 + $0x19d8] sm:$0xff]  ;;  %v2577_v30 = vunpack.c.h.bf16 %v851_v22  ;;  %v2572_v38 = vunpack.c.l.bf16 %v849_v28 }
 0x390   :  { %4936 = vmatpush1.msra.mxu1 %v2620_v31  ;;  %4866 = vmatprep.subr.mxu0 %v2489_v34  ;;  %v2705_v31 = vunpack.c.h.bf16 %v915_v23  ;;  %v847_v34 = vld [vmem:[#allocation2 + $0x17c8] sm:$0xff]  ;;  %v2700_v39 = vunpack.c.l.bf16 %v913_v29 }
 0x391   :  { %4937 = vmatprep.subr.mxu1 %v2617_v35  ;;  %4867 = vmatpush1.msra.mxu0 %v2488_v36  ;;  %v911_v35 = vld [vmem:[#allocation2 + $0x19c8] sm:$0xff]  ;;  %v2573_v36 = vunpack.c.h.bf16 %v849_v28  ;;  %v2568_v44 = vunpack.c.l.bf16 %v847_v34 }
 0x392   :  { %4938 = vmatpush1.msra.mxu1 %v2616_v37  ;;  %4868 = vmatprep.subr.mxu0 %v2485_v40  ;;  %v2701_v37 = vunpack.c.h.bf16 %v913_v29  ;;  %v845_v40 = vld [vmem:[#allocation2 + $0x17b8] sm:$0xff]  ;;  %v2696_v45 = vunpack.c.l.bf16 %v911_v35 }
 0x393   :  { %4939 = vmatprep.subr.mxu1 %v2613_v41  ;;  %4869 = vmatpush1.msra.mxu0 %v2484_v42  ;;  %v909_v41 = vld [vmem:[#allocation2 + $0x19b8] sm:$0xff]  ;;  %v2569_v42 = vunpack.c.h.bf16 %v847_v34  ;;  %v2564_v50 = vunpack.c.l.bf16 %v845_v40 }
 0x394   :  { %4940 = vmatpush1.msra.mxu1 %v2612_v43  ;;  %4870 = vmatprep.subr.mxu0 %v2481_v46  ;;  %v2697_v43 = vunpack.c.h.bf16 %v911_v35  ;;  %v843_v46 = vld [vmem:[#allocation2 + $0x17a8] sm:$0xff]  ;;  %v2692_v51 = vunpack.c.l.bf16 %v909_v41 }
 0x395   :  { %4941 = vmatprep.subr.mxu1 %v2609_v47  ;;  %4871 = vmatpush1.msra.mxu0 %v2480_v48  ;;  %v907_v47 = vld [vmem:[#allocation2 + $0x19a8] sm:$0xff]  ;;  %v2565_v48 = vunpack.c.h.bf16 %v845_v40  ;;  %v2560_v56 = vunpack.c.l.bf16 %v843_v46 }
 0x396   :  { %4942 = vmatpush1.msra.mxu1 %v2608_v49  ;;  %4872 = vmatprep.subr.mxu0 %v2477_v52  ;;  %v2693_v49 = vunpack.c.h.bf16 %v909_v41  ;;  %v841_v52 = vld [vmem:[#allocation2 + $0x1798] sm:$0xff]  ;;  %v2688_v57 = vunpack.c.l.bf16 %v907_v47 }
 0x397   :  { %4943 = vmatprep.subr.mxu1 %v2605_v53  ;;  %4873 = vmatpush1.msra.mxu0 %v2476_v54  ;;  %v905_v53 = vld [vmem:[#allocation2 + $0x1998] sm:$0xff]  ;;  %v2561_v54 = vunpack.c.h.bf16 %v843_v46  ;;  %v2556_v62 = vunpack.c.l.bf16 %v841_v52 }
 0x398   :  { %4944 = vmatpush1.msra.mxu1 %v2604_v55  ;;  %4874 = vmatprep.subr.mxu0 %v2473_v58  ;;  %v2689_v55 = vunpack.c.h.bf16 %v907_v47  ;;  %v839_v58 = vld [vmem:[#allocation2 + $0x1788] sm:$0xff]  ;;  %v2684_v63 = vunpack.c.l.bf16 %v905_v53 }
 0x399   :  { %4945 = vmatprep.subr.mxu1 %v2601_v59  ;;  %4875 = vmatpush1.msra.mxu0 %v2472_v60  ;;  %v903_v59 = vld [vmem:[#allocation2 + $0x1988] sm:$0xff]  ;;  %v2557_v60 = vunpack.c.h.bf16 %v841_v52  ;;  %v2552_v4 = vunpack.c.l.bf16 %v839_v58  ;;  %v1013_v52 = vld [vmem:[#allocation2 + $0x1cf8] sm:$0xff] }
 0x39a   :  { %4946 = vmatpush1.msra.mxu1 %v2600_v61  ;;  %4876 = vmatprep.subr.mxu0 %v2469_v0  ;;  %v2685_v61 = vunpack.c.h.bf16 %v905_v53  ;;  %v837_v0 = vld [vmem:[#allocation2 + $0x1778] sm:$0xff]  ;;  %v2680_v5 = vunpack.c.l.bf16 %v903_v59 }
 0x39b   :  { %4947 = vmatprep.subr.mxu1 %v2597_v1  ;;  %4877 = vmatpush1.msra.mxu0 %v2468_v2  ;;  %v901_v1 = vld [vmem:[#allocation2 + $0x1978] sm:$0xff]  ;;  %v2553_v2 = vunpack.c.h.bf16 %v839_v58  ;;  %v2548_v10 = vunpack.c.l.bf16 %v837_v0 }
 0x39c   :  { %4948 = vmatpush1.msra.mxu1 %v2596_v3  ;;  %4878 = vmatprep.subr.mxu0 %v2465_v6  ;;  %v2681_v3 = vunpack.c.h.bf16 %v903_v59  ;;  %v835_v6 = vld [vmem:[#allocation2 + $0x1768] sm:$0xff]  ;;  %v2676_v11 = vunpack.c.l.bf16 %v901_v1  ;;  %v5638_v58 = vld [vmem:[%s6067_s0 + $0xb8] sm:$0xff] }
 0x39d   :  { %4949 = vmatprep.subr.mxu1 %v2593_v7  ;;  %4879 = vmatpush1.msra.mxu0 %v2464_v8  ;;  %v899_v7 = vld [vmem:[#allocation2 + $0x1968] sm:$0xff]  ;;  %v2549_v8 = vunpack.c.h.bf16 %v837_v0  ;;  %v2544_v16 = vunpack.c.l.bf16 %v835_v6 }
 0x39e   :  { %4950 = vmatpush1.msra.mxu1 %v2592_v9  ;;  %4880 = vmatprep.subr.mxu0 %v2461_v12  ;;  %v2677_v9 = vunpack.c.h.bf16 %v901_v1  ;;  %v833_v12 = vld [vmem:[#allocation2 + $0x1758] sm:$0xff]  ;;  %v2672_v17 = vunpack.c.l.bf16 %v899_v7 }
 0x39f   :  { %4951 = vmatprep.subr.mxu1 %v2589_v13  ;;  %4881 = vmatpush1.msra.mxu0 %v2460_v14  ;;  %v897_v13 = vld [vmem:[#allocation2 + $0x1958] sm:$0xff]  ;;  %v2545_v14 = vunpack.c.h.bf16 %v835_v6  ;;  %v2540_v22 = vunpack.c.l.bf16 %v833_v12  ;;  %v1007_v6 = vld [vmem:[#allocation2 + $0x1cc8] sm:$0xff] }
 0x3a0   :  { %4952 = vmatpush1.msra.mxu1 %v2588_v15  ;;  %4882 = vmatprep.subr.mxu0 %v2457_v18  ;;  %v2673_v15 = vunpack.c.h.bf16 %v899_v7  ;;  %v831_v18 = vld [vmem:[#allocation2 + $0x1748] sm:$0xff]  ;;  %v2668_v23 = vunpack.c.l.bf16 %v897_v13  ;;  %v5641_v7 = vld [vmem:[%s6067_s0 + $0xc0] sm:$0xff] }
 0x3a1   :  { %4953 = vmatprep.subr.mxu1 %v2585_v19  ;;  %4883 = vmatpush1.msra.mxu0 %v2456_v20  ;;  %v895_v19 = vld [vmem:[#allocation2 + $0x1948] sm:$0xff]  ;;  %v2541_v20 = vunpack.c.h.bf16 %v833_v12  ;;  %v2536_v28 = vunpack.c.l.bf16 %v831_v18  ;;  %v941_v12 = vld [vmem:[#allocation2 + $0x1ab8] sm:$0xff] }
 0x3a2   :  { %4954 = vmatpush1.msra.mxu1 %v2584_v21  ;;  %4884 = vmatprep.subr.mxu0 %v2581_v24  ;;  %v2669_v21 = vunpack.c.h.bf16 %v897_v13  ;;  %v829_v24 = vld [vmem:[#allocation2 + $0x1738] sm:$0xff]  ;;  %v2664_v29 = vunpack.c.l.bf16 %v895_v19 }
 0x3a3   :  { %4955 = vmatprep.subr.mxu1 %v2709_v25  ;;  %4885 = vmatpush2.msra.mxu0 %v2580_v26  ;;  %v893_v25 = vld [vmem:[#allocation2 + $0x1938] sm:$0xff]  ;;  %v2537_v26 = vunpack.c.h.bf16 %v831_v18  ;;  %v2532_v34 = vunpack.c.l.bf16 %v829_v24  ;;  %v939_v18 = vld [vmem:[#allocation2 + $0x1aa8] sm:$0xff] }
 0x3a4   :  { %4956 = vmatpush2.msra.mxu1 %v2708_v27  ;;  %4886 = vmatprep.subr.mxu0 %v2577_v30  ;;  %v2665_v27 = vunpack.c.h.bf16 %v895_v19  ;;  %v827_v30 = vld [vmem:[#allocation2 + $0x1728] sm:$0xff]  ;;  %v2660_v35 = vunpack.c.l.bf16 %v893_v25  ;;  %v1005_v13 = vld [vmem:[#allocation2 + $0x1cb8] sm:$0xff] }
 0x3a5   :  { %4957 = vmatprep.subr.mxu1 %v2705_v31  ;;  %4887 = vmatpush2.msra.mxu0 %v2576_v32  ;;  %v891_v31 = vld [vmem:[#allocation2 + $0x1928] sm:$0xff]  ;;  %v2533_v32 = vunpack.c.h.bf16 %v829_v24  ;;  %v2528_v40 = vunpack.c.l.bf16 %v827_v30  ;;  %v937_v24 = vld [vmem:[#allocation2 + $0x1a98] sm:$0xff] }
 0x3a6   :  { %4958 = vmatpush2.msra.mxu1 %v2704_v33  ;;  %4888 = vmatprep.subr.mxu0 %v2573_v36  ;;  %v2661_v33 = vunpack.c.h.bf16 %v893_v25  ;;  %v825_v36 = vld [vmem:[#allocation2 + $0x1718] sm:$0xff]  ;;  %v2656_v41 = vunpack.c.l.bf16 %v891_v31  ;;  %v1003_v19 = vld [vmem:[#allocation2 + $0x1ca8] sm:$0xff] }
 0x3a7   :  { %4959 = vmatprep.subr.mxu1 %v2701_v37  ;;  %4889 = vmatpush2.msra.mxu0 %v2572_v38  ;;  %v889_v37 = vld [vmem:[#allocation2 + $0x1918] sm:$0xff]  ;;  %v2529_v38 = vunpack.c.h.bf16 %v827_v30  ;;  %v2524_v46 = vunpack.c.l.bf16 %v825_v36  ;;  %v935_v30 = vld [vmem:[#allocation2 + $0x1a88] sm:$0xff] }
 0x3a8   :  { %4960 = vmatpush2.msra.mxu1 %v2700_v39  ;;  %4890 = vmatprep.subr.mxu0 %v2569_v42  ;;  %v2657_v39 = vunpack.c.h.bf16 %v891_v31  ;;  %v823_v42 = vld [vmem:[#allocation2 + $0x1708] sm:$0xff]  ;;  %v2652_v47 = vunpack.c.l.bf16 %v889_v37  ;;  %v1001_v25 = vld [vmem:[#allocation2 + $0x1c98] sm:$0xff] }
 0x3a9   :  { %4961 = vmatprep.subr.mxu1 %v2697_v43  ;;  %4891 = vmatpush2.msra.mxu0 %v2568_v44  ;;  %v887_v43 = vld [vmem:[#allocation2 + $0x1908] sm:$0xff]  ;;  %v2525_v44 = vunpack.c.h.bf16 %v825_v36  ;;  %v933_v36 = vld [vmem:[#allocation2 + $0x1a78] sm:$0xff] }
 0x3aa   :  { %4962 = vmatpush2.msra.mxu1 %v2696_v45  ;;  %4892 = vmatprep.subr.mxu0 %v2565_v48  ;;  %v2653_v45 = vunpack.c.h.bf16 %v889_v37  ;;  %v2521_v48 = vunpack.c.h.bf16 %v823_v42  ;;  %v2648_v53 = vunpack.c.l.bf16 %v887_v43  ;;  %v999_v31 = vld [vmem:[#allocation2 + $0x1c88] sm:$0xff]  ;;  %v997_v37 = vld [vmem:[#allocation2 + $0x1c78] sm:$0xff] }
 0x3ab   :  { %4963 = vmatprep.subr.mxu1 %v2693_v49  ;;  %4893 = vmatpush2.msra.mxu0 %v2564_v50  ;;  %v2649_v49 = vunpack.c.h.bf16 %v887_v43  ;;  %v949_v50 = vld [vmem:[#allocation2 + $0x1af8] sm:$0xff]  ;;  %v995_v43 = vld [vmem:[#allocation2 + $0x1c68] sm:$0xff] }
 0x3ac   :  { %4964 = vmatpush2.msra.mxu1 %v2692_v51  ;;  %4894 = vmatprep.subr.mxu0 %v2561_v54  ;;  %v2520_v51 = vunpack.c.l.bf16 %v823_v42  ;;  %v2773_v54 = vunpack.c.h.bf16 %v949_v50  ;;  %v2772_v59 = vunpack.c.l.bf16 %v949_v50  ;;  %v931_v42 = vld [vmem:[#allocation2 + $0x1a68] sm:$0xff] }
 0x3ad   :  { %4965 = vmatprep.subr.mxu1 %v2689_v55  ;;  %4895 = vmatpush2.msra.mxu0 %v2560_v56  ;;  %v947_v55 = vld [vmem:[#allocation2 + $0x1ae8] sm:$0xff]  ;;  %v2737_v50 = vunpack.c.h.bf16 %v931_v42 }
 0x3ae   :  { %4966 = vmatpush2.msra.mxu1 %v2688_v57  ;;  %4896 = vmatprep.subr.mxu0 %v2557_v60  ;;  %v1011_v56 = vld [vmem:[#allocation2 + $0x1ce8] sm:$0xff]  ;;  %v2901_v57 = vunpack.c.h.bf16 %v1013_v52  ;;  %v2900_v60 = vunpack.c.l.bf16 %v1013_v52  ;;  %v2769_v0 = vunpack.c.h.bf16 %v947_v55  ;;  %v2736_v52 = vunpack.c.l.bf16 %v931_v42 }
 0x3af   :  { %4967 = vmatprep.subr.mxu1 %v2685_v61  ;;  %4897 = vmatpush2.msra.mxu0 %v2556_v62  ;;  %v945_v61 = vld [vmem:[#allocation2 + $0x1ad8] sm:$0xff]  ;;  %v2897_v1 = vunpack.c.h.bf16 %v1011_v56 }
 0x3b0   :  { %4968 = vmatpush2.msra.mxu1 %v2684_v63  ;;  %4898 = vmatprep.subr.mxu0 %v2553_v2  ;;  %v1009_v62 = vld [vmem:[#allocation2 + $0x1cd8] sm:$0xff]  ;;  %v5639_v63 = vld [vmem:[%s6067_s0 + $0xb0] sm:$0xff]  ;;  %v5640_v2 = vld [vmem:[%s6067_s0 + $0xc8] sm:$0xff] }
 0x3b1   :  { %4969 = vmatprep.subr.mxu1 %v2681_v3  ;;  %4899 = vmatpush2.msra.mxu0 %v2552_v4  ;;  %v2768_v3 = vunpack.c.l.bf16 %v947_v55  ;;  %v2896_v4 = vunpack.c.l.bf16 %v1011_v56  ;;  %v991_v55 = vld [vmem:[#allocation2 + $0x1c48] sm:$0xff] }
 0x3b2   :  { %4970 = vmatpush2.msra.mxu1 %v2680_v5  ;;  %4900 = vmatprep.subr.mxu0 %v2549_v8  ;;  %v943_v5 = vld [vmem:[#allocation2 + $0x1ac8] sm:$0xff]  ;;  %v2765_v8 = vunpack.c.h.bf16 %v945_v61 }
 0x3b3   :  { %4971 = vmatprep.subr.mxu1 %v2677_v9  ;;  %4901 = vmatpush2.msra.mxu0 %v2548_v10  ;;  %v2893_v9 = vunpack.c.h.bf16 %v1009_v62  ;;  %v2764_v10 = vunpack.c.l.bf16 %v945_v61  ;;  %v989_v61 = vld [vmem:[#allocation2 + $0x1c38] sm:$0xff] }
 0x3b4   :  { %4972 = vmatpush2.msra.mxu1 %v2676_v11  ;;  %4902 = vmatprep.subr.mxu0 %v2545_v14  ;;  %v2892_v11 = vunpack.c.l.bf16 %v1009_v62  ;;  %v2761_v14 = vunpack.c.h.bf16 %v943_v5 }
 0x3b5   :  { %4973 = vmatprep.subr.mxu1 %v2673_v15  ;;  %4903 = vmatpush2.msra.mxu0 %v2544_v16  ;;  %v2889_v15 = vunpack.c.h.bf16 %v1007_v6  ;;  %v2760_v16 = vunpack.c.l.bf16 %v943_v5  ;;  %v2853_v5 = vunpack.c.h.bf16 %v989_v61 }
 0x3b6   :  { %4974 = vmatpush2.msra.mxu1 %v2672_v17  ;;  %4904 = vmatprep.subr.mxu0 %v2541_v20  ;;  %v2888_v17 = vunpack.c.l.bf16 %v1007_v6  ;;  %v2757_v20 = vunpack.c.h.bf16 %v941_v12 }
 0x3b7   :  { %4975 = vmatprep.subr.mxu1 %v2669_v21  ;;  %4905 = vmatpush2.msra.mxu0 %v2540_v22  ;;  %v2885_v21 = vunpack.c.h.bf16 %v1005_v13  ;;  %v2756_v22 = vunpack.c.l.bf16 %v941_v12 }
 0x3b8   :  { %4976 = vmatpush2.msra.mxu1 %v2668_v23  ;;  %4906 = vmatprep.subr.mxu0 %v2537_v26  ;;  %v2884_v23 = vunpack.c.l.bf16 %v1005_v13  ;;  %v2753_v26 = vunpack.c.h.bf16 %v939_v18 }
 0x3b9   :  { %4977 = vmatprep.subr.mxu1 %v2665_v27  ;;  %4907 = vmatpush2.msra.mxu0 %v2536_v28  ;;  %v2881_v27 = vunpack.c.h.bf16 %v1003_v19  ;;  %v2752_v28 = vunpack.c.l.bf16 %v939_v18 }
 0x3ba   :  { %4978 = vmatpush2.msra.mxu1 %v2664_v29  ;;  %4908 = vmatprep.subr.mxu0 %v2533_v32  ;;  %v2880_v29 = vunpack.c.l.bf16 %v1003_v19  ;;  %v2749_v32 = vunpack.c.h.bf16 %v937_v24 }
 0x3bb   :  { %4979 = vmatprep.subr.mxu1 %v2661_v33  ;;  %4909 = vmatpush2.msra.mxu0 %v2532_v34  ;;  %v2877_v33 = vunpack.c.h.bf16 %v1001_v25  ;;  %v2748_v34 = vunpack.c.l.bf16 %v937_v24 }
 0x3bc   :  { %4980 = vmatpush2.msra.mxu1 %v2660_v35  ;;  %4910 = vmatprep.subr.mxu0 %v2529_v38  ;;  %v2876_v35 = vunpack.c.l.bf16 %v1001_v25  ;;  %v2745_v38 = vunpack.c.h.bf16 %v935_v30 }
 0x3bd   :  { %4981 = vmatprep.subr.mxu1 %v2657_v39  ;;  %4911 = vmatpush2.msra.mxu0 %v2528_v40  ;;  %v2873_v39 = vunpack.c.h.bf16 %v999_v31  ;;  %v2744_v40 = vunpack.c.l.bf16 %v935_v30 }
 0x3be   :  { %4982 = vmatpush2.msra.mxu1 %v2656_v41  ;;  %4912 = vmatprep.subr.mxu0 %v2525_v44  ;;  %v2872_v41 = vunpack.c.l.bf16 %v999_v31  ;;  %v2741_v44 = vunpack.c.h.bf16 %v933_v36 }
 0x3bf   :  { %4983 = vmatprep.subr.mxu1 %v2653_v45  ;;  %4913 = vmatpush2.msra.mxu0 %v2524_v46  ;;  %v2869_v45 = vunpack.c.h.bf16 %v997_v37  ;;  %v2740_v46 = vunpack.c.l.bf16 %v933_v36 }
 0x3c0   :  { %4984 = vmatpush2.msra.mxu1 %v2652_v47  ;;  %4914 = vmatprep.subr.mxu0 %v2521_v48  ;;  %v2868_v47 = vunpack.c.l.bf16 %v997_v37  ;;  %v929_v48 = vld [vmem:[#allocation2 + $0x1a58] sm:$0xff] }
 0x3c1   :  { %4985 = vmatprep.subr.mxu1 %v2649_v49  ;;  %4915 = vmatpush2.msra.mxu0 %v2520_v51  ;;  %v993_v49 = vld [vmem:[#allocation2 + $0x1c58] sm:$0xff]  ;;  %v2865_v51 = vunpack.c.h.bf16 %v995_v43  ;;  %v2733_v56 = vunpack.c.h.bf16 %v929_v48 }
 0x3c2   :  { %4916 = vmatprep.mubr.f32.mxu0 %v5638_v58  ;;  %4986 = vmatpush2.msra.mxu1 %v2648_v53  ;;  %v2864_v53 = vunpack.c.l.bf16 %v995_v43  ;;  %v2732_v58 = vunpack.c.l.bf16 %v929_v48 }
 0x3c3   :  { %4917 = vmatmul.mubr.f32.vlgmr.msra.gmra.mxu0 %v5639_v63  ;;  %4987 = vmatprep.mubr.f32.mxu1 %v5640_v2  ;;  %v2857_v63 = vunpack.c.h.bf16 %v991_v55  ;;  %v923_v2 = vld [vmem:[#allocation2 + $0x1a28] sm:$0xff] }
 0x3c4   :  { %4994 = vmatprep.subr.mxu0 %v2773_v54  ;;  %5065 = vmatprep.subr.mxu1 %v2901_v57  ;;  %v927_v54 = vld [vmem:[#allocation2 + $0x1a48] sm:$0xff]  ;;  %v2861_v57 = vunpack.c.h.bf16 %v993_v49  ;;  %v2720_v12 = vunpack.c.l.bf16 %v923_v2 }
 0x3c5   :  { %4988 = vmatmul.mubr.f32.vlgmr.msra.gmra.mxu1 %v5641_v7  ;;  %4995 = vmatpush1.msra.mxu0 %v2772_v59  ;;  %v2860_v59 = vunpack.c.l.bf16 %v993_v49  ;;  %v2729_v62 = vunpack.c.h.bf16 %v927_v54  ;;  %v2852_v7 = vunpack.c.l.bf16 %v989_v61 }
 0x3c6   :  { %5066 = vmatpush1.msra.mxu1 %v2900_v60  ;;  %4996 = vmatprep.subr.mxu0 %v2769_v0  ;;  %v925_v60 = vld [vmem:[#allocation2 + $0x1a38] sm:$0xff]  ;;  %v2728_v0 = vunpack.c.l.bf16 %v927_v54 }
 0x3c7   :  { %5067 = vmatprep.subr.mxu1 %v2897_v1  ;;  %4997 = vmatpush1.msra.mxu0 %v2768_v3  ;;  %v2856_v1 = vunpack.c.l.bf16 %v991_v55  ;;  %v987_v3 = vld [vmem:[#allocation2 + $0x1c28] sm:$0xff]  ;;  %v2724_v6 = vunpack.c.l.bf16 %v925_v60 }
 0x3c8   :  { %5068 = vmatpush1.msra.mxu1 %v2896_v4  ;;  %4998 = vmatprep.subr.mxu0 %v2765_v8  ;;  %v2725_v4 = vunpack.c.h.bf16 %v925_v60  ;;  %v921_v8 = vld [vmem:[#allocation2 + $0x1a18] sm:$0xff]  ;;  %v2848_v13 = vunpack.c.l.bf16 %v987_v3 }
 0x3c9   :  { %5069 = vmatprep.subr.mxu1 %v2893_v9  ;;  %4999 = vmatpush1.msra.mxu0 %v2764_v10  ;;  %v985_v9 = vld [vmem:[#allocation2 + $0x1c18] sm:$0xff]  ;;  %v2721_v10 = vunpack.c.h.bf16 %v923_v2  ;;  %v2716_v18 = vunpack.c.l.bf16 %v921_v8 }
 0x3ca   :  { %5070 = vmatpush1.msra.mxu1 %v2892_v11  ;;  %5000 = vmatprep.subr.mxu0 %v2761_v14  ;;  %v2849_v11 = vunpack.c.h.bf16 %v987_v3  ;;  %v919_v14 = vld [vmem:[#allocation2 + $0x1a08] sm:$0xff]  ;;  %v2844_v19 = vunpack.c.l.bf16 %v985_v9 }
 0x3cb   :  { %5071 = vmatprep.subr.mxu1 %v2889_v15  ;;  %5001 = vmatpush1.msra.mxu0 %v2760_v16  ;;  %v983_v15 = vld [vmem:[#allocation2 + $0x1c08] sm:$0xff]  ;;  %v2717_v16 = vunpack.c.h.bf16 %v921_v8  ;;  %v2712_v24 = vunpack.c.l.bf16 %v919_v14 }
 0x3cc   :  { %5072 = vmatpush1.msra.mxu1 %v2888_v17  ;;  %5002 = vmatprep.subr.mxu0 %v2757_v20  ;;  %v2845_v17 = vunpack.c.h.bf16 %v985_v9  ;;  %v981_v20 = vld [vmem:[#allocation2 + $0x1bf8] sm:$0xff]  ;;  %v2840_v25 = vunpack.c.l.bf16 %v983_v15 }
 0x3cd   :  { %5073 = vmatprep.subr.mxu1 %v2885_v21  ;;  %5003 = vmatpush1.msra.mxu0 %v2756_v22  ;;  %v1045_v21 = vld [vmem:[#allocation2 + $0x1df8] sm:$0xff]  ;;  %v2713_v22 = vunpack.c.h.bf16 %v919_v14  ;;  %v2836_v30 = vunpack.c.l.bf16 %v981_v20 }
 0x3ce   :  { %5074 = vmatpush1.msra.mxu1 %v2884_v23  ;;  %5004 = vmatprep.subr.mxu0 %v2753_v26  ;;  %v2841_v23 = vunpack.c.h.bf16 %v983_v15  ;;  %v979_v26 = vld [vmem:[#allocation2 + $0x1be8] sm:$0xff]  ;;  %v2964_v31 = vunpack.c.l.bf16 %v1045_v21 }
 0x3cf   :  { %5075 = vmatprep.subr.mxu1 %v2881_v27  ;;  %5005 = vmatpush1.msra.mxu0 %v2752_v28  ;;  %v1043_v27 = vld [vmem:[#allocation2 + $0x1de8] sm:$0xff]  ;;  %v2837_v28 = vunpack.c.h.bf16 %v981_v20  ;;  %v2832_v36 = vunpack.c.l.bf16 %v979_v26 }
 0x3d0   :  { %5076 = vmatpush1.msra.mxu1 %v2880_v29  ;;  %5006 = vmatprep.subr.mxu0 %v2749_v32  ;;  %v2965_v29 = vunpack.c.h.bf16 %v1045_v21  ;;  %v977_v32 = vld [vmem:[#allocation2 + $0x1bd8] sm:$0xff]  ;;  %v2960_v37 = vunpack.c.l.bf16 %v1043_v27 }
 0x3d1   :  { %5077 = vmatprep.subr.mxu1 %v2877_v33  ;;  %5007 = vmatpush1.msra.mxu0 %v2748_v34  ;;  %v1041_v33 = vld [vmem:[#allocation2 + $0x1dd8] sm:$0xff]  ;;  %v2833_v34 = vunpack.c.h.bf16 %v979_v26  ;;  %v2828_v42 = vunpack.c.l.bf16 %v977_v32 }
 0x3d2   :  { %5078 = vmatpush1.msra.mxu1 %v2876_v35  ;;  %5008 = vmatprep.subr.mxu0 %v2745_v38  ;;  %v2961_v35 = vunpack.c.h.bf16 %v1043_v27  ;;  %v975_v38 = vld [vmem:[#allocation2 + $0x1bc8] sm:$0xff]  ;;  %v2956_v43 = vunpack.c.l.bf16 %v1041_v33 }
 0x3d3   :  { %5079 = vmatprep.subr.mxu1 %v2873_v39  ;;  %5009 = vmatpush1.msra.mxu0 %v2744_v40  ;;  %v1039_v39 = vld [vmem:[#allocation2 + $0x1dc8] sm:$0xff]  ;;  %v2829_v40 = vunpack.c.h.bf16 %v977_v32  ;;  %v2824_v48 = vunpack.c.l.bf16 %v975_v38 }
 0x3d4   :  { %5080 = vmatpush1.msra.mxu1 %v2872_v41  ;;  %5010 = vmatprep.subr.mxu0 %v2741_v44  ;;  %v2957_v41 = vunpack.c.h.bf16 %v1041_v33  ;;  %v973_v44 = vld [vmem:[#allocation2 + $0x1bb8] sm:$0xff]  ;;  %v2952_v49 = vunpack.c.l.bf16 %v1039_v39 }
 0x3d5   :  { %5081 = vmatprep.subr.mxu1 %v2869_v45  ;;  %5011 = vmatpush1.msra.mxu0 %v2740_v46  ;;  %v1037_v45 = vld [vmem:[#allocation2 + $0x1db8] sm:$0xff]  ;;  %v2825_v46 = vunpack.c.h.bf16 %v975_v38  ;;  %v2820_v54 = vunpack.c.l.bf16 %v973_v44 }
 0x3d6   :  { %5082 = vmatpush1.msra.mxu1 %v2868_v47  ;;  %5012 = vmatprep.subr.mxu0 %v2737_v50  ;;  %v2953_v47 = vunpack.c.h.bf16 %v1039_v39  ;;  %v971_v50 = vld [vmem:[#allocation2 + $0x1ba8] sm:$0xff]  ;;  %v2948_v55 = vunpack.c.l.bf16 %v1037_v45 }
 0x3d7   :  { %5083 = vmatprep.subr.mxu1 %v2865_v51  ;;  %5013 = vmatpush1.msra.mxu0 %v2736_v52  ;;  %v1035_v51 = vld [vmem:[#allocation2 + $0x1da8] sm:$0xff]  ;;  %v2821_v52 = vunpack.c.h.bf16 %v973_v44  ;;  %v2816_v60 = vunpack.c.l.bf16 %v971_v50 }
 0x3d8   :  { %5084 = vmatpush1.msra.mxu1 %v2864_v53  ;;  %5014 = vmatprep.subr.mxu0 %v2733_v56  ;;  %v2949_v53 = vunpack.c.h.bf16 %v1037_v45  ;;  %v969_v56 = vld [vmem:[#allocation2 + $0x1b98] sm:$0xff]  ;;  %v2944_v61 = vunpack.c.l.bf16 %v1035_v51 }
 0x3d9   :  { %5085 = vmatprep.subr.mxu1 %v2861_v57  ;;  %5015 = vmatpush1.msra.mxu0 %v2732_v58  ;;  %v1033_v57 = vld [vmem:[#allocation2 + $0x1d98] sm:$0xff]  ;;  %v2817_v58 = vunpack.c.h.bf16 %v971_v50  ;;  %v2812_v2 = vunpack.c.l.bf16 %v969_v56 }
 0x3da   :  { %5086 = vmatpush1.msra.mxu1 %v2860_v59  ;;  %5016 = vmatprep.subr.mxu0 %v2729_v62  ;;  %v2945_v59 = vunpack.c.h.bf16 %v1035_v51  ;;  %v967_v62 = vld [vmem:[#allocation2 + $0x1b88] sm:$0xff]  ;;  %v2940_v3 = vunpack.c.l.bf16 %v1033_v57 }
 0x3db   :  { %5087 = vmatprep.subr.mxu1 %v2857_v63  ;;  %5017 = vmatpush1.msra.mxu0 %v2728_v0  ;;  %v1031_v63 = vld [vmem:[#allocation2 + $0x1d88] sm:$0xff]  ;;  %v2813_v0 = vunpack.c.h.bf16 %v969_v56  ;;  %v2808_v8 = vunpack.c.l.bf16 %v967_v62  ;;  %v5642_v56 = vld [vmem:[%s6067_s0 + $0xd8] sm:$0xff] }
 0x3dc   :  { %5088 = vmatpush1.msra.mxu1 %v2856_v1  ;;  %5018 = vmatprep.subr.mxu0 %v2725_v4  ;;  %v2941_v1 = vunpack.c.h.bf16 %v1033_v57  ;;  %v965_v4 = vld [vmem:[#allocation2 + $0x1b78] sm:$0xff]  ;;  %v2936_v9 = vunpack.c.l.bf16 %v1031_v63  ;;  %v5643_v57 = vld [vmem:[%s6067_s0 + $0xe8] sm:$0xff] }
 0x3dd   :  { %5089 = vmatprep.subr.mxu1 %v2853_v5  ;;  %5019 = vmatpush1.msra.mxu0 %v2724_v6  ;;  %v1029_v5 = vld [vmem:[#allocation2 + $0x1d78] sm:$0xff]  ;;  %v2809_v6 = vunpack.c.h.bf16 %v967_v62  ;;  %v2804_v14 = vunpack.c.l.bf16 %v965_v4 }
 0x3de   :  { %5090 = vmatpush1.msra.mxu1 %v2852_v7  ;;  %5020 = vmatprep.subr.mxu0 %v2721_v10  ;;  %v2937_v7 = vunpack.c.h.bf16 %v1031_v63  ;;  %v963_v10 = vld [vmem:[#allocation2 + $0x1b68] sm:$0xff]  ;;  %v2932_v15 = vunpack.c.l.bf16 %v1029_v5 }
 0x3df   :  { %5091 = vmatprep.subr.mxu1 %v2849_v11  ;;  %5021 = vmatpush1.msra.mxu0 %v2720_v12  ;;  %v1027_v11 = vld [vmem:[#allocation2 + $0x1d68] sm:$0xff]  ;;  %v2805_v12 = vunpack.c.h.bf16 %v965_v4  ;;  %v2800_v20 = vunpack.c.l.bf16 %v963_v10 }
 0x3e0   :  { %5092 = vmatpush1.msra.mxu1 %v2848_v13  ;;  %5022 = vmatprep.subr.mxu0 %v2717_v16  ;;  %v2933_v13 = vunpack.c.h.bf16 %v1029_v5  ;;  %v961_v16 = vld [vmem:[#allocation2 + $0x1b58] sm:$0xff]  ;;  %v2928_v21 = vunpack.c.l.bf16 %v1027_v11 }
 0x3e1   :  { %5093 = vmatprep.subr.mxu1 %v2845_v17  ;;  %5023 = vmatpush1.msra.mxu0 %v2716_v18  ;;  %v1025_v17 = vld [vmem:[#allocation2 + $0x1d58] sm:$0xff]  ;;  %v2801_v18 = vunpack.c.h.bf16 %v963_v10  ;;  %v2796_v26 = vunpack.c.l.bf16 %v961_v16 }
 0x3e2   :  { %5094 = vmatpush1.msra.mxu1 %v2844_v19  ;;  %5024 = vmatprep.subr.mxu0 %v2713_v22  ;;  %v2929_v19 = vunpack.c.h.bf16 %v1027_v11  ;;  %v959_v22 = vld [vmem:[#allocation2 + $0x1b48] sm:$0xff]  ;;  %v2924_v27 = vunpack.c.l.bf16 %v1025_v17  ;;  %v2970_v11 = vlaneseq }
 0x3e3   :  { %5095 = vmatprep.subr.mxu1 %v2841_v23  ;;  %5025 = vmatpush1.msra.mxu0 %v2712_v24  ;;  %v1023_v23 = vld [vmem:[#allocation2 + $0x1d48] sm:$0xff]  ;;  %v2797_v24 = vunpack.c.h.bf16 %v961_v16  ;;  %v2792_v32 = vunpack.c.l.bf16 %v959_v22 }
 0x3e4   :  { %5096 = vmatpush1.msra.mxu1 %v2840_v25  ;;  %5026 = vmatprep.subr.mxu0 %v2837_v28  ;;  %v2925_v25 = vunpack.c.h.bf16 %v1025_v17  ;;  %v957_v28 = vld [vmem:[#allocation2 + $0x1b38] sm:$0xff]  ;;  %v2920_v33 = vunpack.c.l.bf16 %v1023_v23 }
 0x3e5   :  { %5097 = vmatprep.subr.mxu1 %v2965_v29  ;;  %5027 = vmatpush2.msra.mxu0 %v2836_v30  ;;  %v1021_v29 = vld [vmem:[#allocation2 + $0x1d38] sm:$0xff]  ;;  %v2793_v30 = vunpack.c.h.bf16 %v959_v22  ;;  %v2788_v38 = vunpack.c.l.bf16 %v957_v28 }
 0x3e6   :  { %5098 = vmatpush2.msra.mxu1 %v2964_v31  ;;  %5028 = vmatprep.subr.mxu0 %v2833_v34  ;;  %v2921_v31 = vunpack.c.h.bf16 %v1023_v23  ;;  %v955_v34 = vld [vmem:[#allocation2 + $0x1b28] sm:$0xff]  ;;  %v2916_v39 = vunpack.c.l.bf16 %v1021_v29 }
 0x3e7   :  { %5099 = vmatprep.subr.mxu1 %v2961_v35  ;;  %5029 = vmatpush2.msra.mxu0 %v2832_v36  ;;  %v1019_v35 = vld [vmem:[#allocation2 + $0x1d28] sm:$0xff]  ;;  %v2789_v36 = vunpack.c.h.bf16 %v957_v28  ;;  %v2784_v44 = vunpack.c.l.bf16 %v955_v34 }
 0x3e8   :  { %5100 = vmatpush2.msra.mxu1 %v2960_v37  ;;  %5030 = vmatprep.subr.mxu0 %v2829_v40  ;;  %v2917_v37 = vunpack.c.h.bf16 %v1021_v29  ;;  %v953_v40 = vld [vmem:[#allocation2 + $0x1b18] sm:$0xff]  ;;  %v2912_v45 = vunpack.c.l.bf16 %v1019_v35 }
 0x3e9   :  { %5101 = vmatprep.subr.mxu1 %v2957_v41  ;;  %5031 = vmatpush2.msra.mxu0 %v2828_v42  ;;  %v1017_v41 = vld [vmem:[#allocation2 + $0x1d18] sm:$0xff]  ;;  %v2785_v42 = vunpack.c.h.bf16 %v955_v34  ;;  %v2780_v50 = vunpack.c.l.bf16 %v953_v40 }
 0x3ea   :  { %5102 = vmatpush2.msra.mxu1 %v2956_v43  ;;  %5032 = vmatprep.subr.mxu0 %v2825_v46  ;;  %v2913_v43 = vunpack.c.h.bf16 %v1019_v35  ;;  %v951_v46 = vld [vmem:[#allocation2 + $0x1b08] sm:$0xff]  ;;  %v2908_v51 = vunpack.c.l.bf16 %v1017_v41 }
 0x3eb   :  { %5103 = vmatprep.subr.mxu1 %v2953_v47  ;;  %5033 = vmatpush2.msra.mxu0 %v2824_v48  ;;  %v1015_v47 = vld [vmem:[#allocation2 + $0x1d08] sm:$0xff]  ;;  %v2781_v48 = vunpack.c.h.bf16 %v953_v40 }
 0x3ec   :  { %5104 = vmatpush2.msra.mxu1 %v2952_v49  ;;  %5034 = vmatprep.subr.mxu0 %v2821_v52  ;;  %v2909_v49 = vunpack.c.h.bf16 %v1017_v41  ;;  %v2777_v52 = vunpack.c.h.bf16 %v951_v46 }
 0x3ed   :  { %5105 = vmatprep.subr.mxu1 %v2949_v53  ;;  %5035 = vmatpush2.msra.mxu0 %v2820_v54  ;;  %v2905_v53 = vunpack.c.h.bf16 %v1015_v47  ;;  %v2776_v54 = vunpack.c.l.bf16 %v951_v46 }
 0x3ee   :  { %5106 = vmatpush2.msra.mxu1 %v2948_v55  ;;  %5036 = vmatprep.subr.mxu0 %v2817_v58  ;;  %v2904_v55 = vunpack.c.l.bf16 %v1015_v47  ;;  %v5644_v58 = vld [vmem:[%s6067_s0 + $0xd0] sm:$0xff] }
 0x3ef   :  { %5107 = vmatprep.subr.mxu1 %v2945_v59  ;;  %5037 = vmatpush2.msra.mxu0 %v2816_v60  ;;  %v5645_v59 = vld [vmem:[%s6067_s0 + $0xe0] sm:$0xff]  ;;  %v3072_v60 = vpop.f32.mrf.mxu0 }
 0x3f0   :  { %5108 = vmatpush2.msra.mxu1 %v2944_v61  ;;  %5038 = vmatprep.subr.mxu0 %v2813_v0  ;;  %v3143_v61 = vpop.f32.mrf.mxu1 }
 0x3f1   :  { %5109 = vmatprep.subr.mxu1 %v2941_v1  ;;  %5039 = vmatpush2.msra.mxu0 %v2812_v2  ;;  %v3074_v62 = vpop.f32.mrf.mxu0 }
 0x3f2   :  { %5110 = vmatpush2.msra.mxu1 %v2940_v3  ;;  %5040 = vmatprep.subr.mxu0 %v2809_v6  ;;  %v3145_v0 = vpop.f32.mrf.mxu1 }
 0x3f3   :  { %5111 = vmatprep.subr.mxu1 %v2937_v7  ;;  %5041 = vmatpush2.msra.mxu0 %v2808_v8  ;;  %v3214_v63 = vpop.f32.mrf.mxu0 }
 0x3f4   :  { %5112 = vmatpush2.msra.mxu1 %v2936_v9  ;;  %5042 = vmatprep.subr.mxu0 %v2805_v12  ;;  %v3285_v1 = vpop.f32.mrf.mxu1 }
 0x3f5   :  { %5113 = vmatprep.subr.mxu1 %v2933_v13  ;;  %5043 = vmatpush2.msra.mxu0 %v2804_v14  ;;  %v3216_v2 = vpop.f32.mrf.mxu0  ;;  %v5941_v14 = vshrl.u32 %v2970_v11, 7 }
 0x3f6   :  { %5114 = vmatpush2.msra.mxu1 %v2932_v15  ;;  %5044 = vmatprep.subr.mxu0 %v2801_v18  ;;  %v3287_v4 = vpop.f32.mrf.mxu1 }
 0x3f7   :  { %5115 = vmatprep.subr.mxu1 %v2929_v19  ;;  %5045 = vmatpush2.msra.mxu0 %v2800_v20  ;;  %v3356_v3 = vpop.f32.mrf.mxu0  ;;  %v2976_v18 = vsub.s32 4, %v5941_v14  ;;  %v5950_v19 = vld [vmem:[#allocation4] sm:$0xff] }
 0x3f8   :  { %5116 = vmatpush2.msra.mxu1 %v2928_v21  ;;  %5046 = vmatprep.subr.mxu0 %v2797_v24  ;;  %v5931_v5 = vpop.f32.mrf.mxu1  ;;  %v2972_v21 = vsub.s32 0, %v5941_v14 }
 0x3f9   :  { %5117 = vmatprep.subr.mxu1 %v2925_v25  ;;  %5047 = vmatpush2.msra.mxu0 %v2796_v26  ;;  %v3358_v6 = vpop.f32.mrf.mxu0  ;;  %v2977_v24 = vrot.slane %v5950_v19, %v2976_v18 }
 0x3fa   :  { %5118 = vmatpush2.msra.mxu1 %v2924_v27  ;;  %5048 = vmatprep.subr.mxu0 %v2793_v30  ;;  %v3429_v8 = vpop.f32.mrf.mxu1  ;;  %v2973_v26 = vrot.slane %v5950_v19, %v2972_v21 }
 0x3fb   :  { %5119 = vmatprep.subr.mxu1 %v2921_v31  ;;  %5049 = vmatpush2.msra.mxu0 %v2792_v32  ;;  %v5933_v7 = vpop.f32.mrf.mxu0  ;;  %v2997_v28 = vrot.slane %v2977_v24, %v2972_v21  ;;  %v5969_v31 = vld [vmem:[#allocation4 + $0x8] sm:$0xff] }
 0x3fc   :  { %5120 = vmatpush2.msra.mxu1 %v2920_v33  ;;  %5050 = vmatprep.subr.mxu0 %v2789_v36  ;;  %v5935_v9 = vpop.f32.mrf.mxu1  ;;  %v2993_v32 = vrot.slane %v2973_v26, %v2972_v21  ;;  %v2981_v35 = vrot.slane %v5969_v31, %v2972_v21 }
 0x3fd   :  { %5121 = vmatprep.subr.mxu1 %v2917_v37  ;;  %5051 = vmatpush2.msra.mxu0 %v2788_v38  ;;  %v3500_v10 = vpop.f32.mrf.mxu0  ;;  %v3075_v34 = vadd.f32 %v3074_v62, %v2997_v28  ;;  %v2985_v38 = vrot.slane %v5969_v31, %v2976_v18 }
 0x3fe   :  { %5122 = vmatpush2.msra.mxu1 %v2916_v39  ;;  %5052 = vmatprep.subr.mxu0 %v2785_v42  ;;  %v5939_v13 = vpop.f32.mrf.mxu1  ;;  %v3073_v37 = vadd.f32 %v3072_v60, %v2993_v32  ;;  %v3001_v42 = vrot.slane %v2981_v35, %v2972_v21 }
 0x3ff   :  { %5123 = vmatprep.subr.mxu1 %v2913_v43  ;;  %5053 = vmatpush2.msra.mxu0 %v2784_v44  ;;  %v5937_v12 = vpop.f32.mrf.mxu0  ;;  %v3146_v41 = vadd.f32 %v3145_v0, %v3075_v34  ;;  %v3005_v46 = vrot.slane %v2985_v38, %v2972_v21 }
 0x400   :  { %5124 = vmatpush2.msra.mxu1 %v2912_v45  ;;  %5054 = vmatprep.subr.mxu0 %v2781_v48  ;;  %v5943_v15 = vpop.f32.mrf.mxu1  ;;  %v3144_v44 = vadd.f32 %v3143_v61, %v3073_v37 }
 0x401   :  { %5125 = vmatprep.subr.mxu1 %v2909_v49  ;;  %5055 = vmatpush2.msra.mxu0 %v2780_v50  ;;  %v5945_v16 = vpop.f32.mrf.mxu0  ;;  %v3217_v45 = vadd.f32 %v3216_v2, %v3146_v41 }
 0x402   :  { %5126 = vmatpush2.msra.mxu1 %v2908_v51  ;;  %5056 = vmatprep.subr.mxu0 %v2777_v52  ;;  %v5952_v20 = vpop.f32.mrf.mxu1  ;;  %v3215_v48 = vadd.f32 %v3214_v63, %v3144_v44 }
 0x403   :  { %5127 = vmatprep.subr.mxu1 %v2905_v53  ;;  %5057 = vmatpush2.msra.mxu0 %v2776_v54  ;;  %v5947_v17 = vpop.f32.mrf.mxu0  ;;  %v3288_v52 = vadd.f32 %v3287_v4, %v3217_v45 }
 0x404   :  { %5058 = vmatprep.mubr.f32.mxu0 %v5642_v56  ;;  %5128 = vmatpush2.msra.mxu1 %v2904_v55  ;;  %v5955_v22 = vpop.f32.mrf.mxu1  ;;  %v3286_v56 = vadd.f32 %v3285_v1, %v3215_v48 }
 0x405   :  { %5129 = vmatprep.mubr.f32.mxu1 %v5643_v57  ;;  %5059 = vmatmul.mubr.f32.vlgmr.msra.gmra.mxu0 %v5644_v58  ;;  %v5957_v23 = vpop.f32.mrf.mxu0  ;;  %v3359_v57 = vadd.f32 %v3358_v6, %v3288_v52 }
 0x406   :  { %5130 = vmatmul.mubr.f32.vlgmr.msra.gmra.mxu1 %v5645_v59  ;;  %v5963_v27 = vpop.f32.mrf.mxu1  ;;  %v3357_v60 = vadd.f32 %v3356_v3, %v3286_v56 }
 0x407   :  { %v5960_v25 = vpop.f32.mrf.mxu0  ;;  %v3430_v61 = vadd.f32 %v3429_v8, %v3359_v57 }
 0x408   :  { %v5965_v29 = vpop.f32.mrf.mxu1  ;;  %v3428_v63 = vadd.f32 %v5931_v5, %v3357_v60 }
 0x409   :  { %v5967_v30 = vpop.f32.mrf.mxu0  ;;  %v3501_v24 = vadd.f32 %v3500_v10, %v3430_v61 }
 0x40a   :  { %v5974_v36 = vpop.f32.mrf.mxu1  ;;  %v3499_v28 = vadd.f32 %v5933_v7, %v3428_v63 }
 0x40b   :  { %v5971_v33 = vpop.f32.mrf.mxu0  ;;  %v3572_v34 = vadd.f32 %v5939_v13, %v3501_v24 }
 0x40c   :  { %v4137_v39 = vpop.f32.mrf.mxu1  ;;  %v3570_v8 = vadd.f32 %v5935_v9, %v3499_v28 }
 0x40d   :  { %v5977_v40 = vpop.f32.mrf.mxu0  ;;  %v4138_v49 = vadd.f32 %v4137_v39, %v3001_v42  ;;  %v3643_v38 = vadd.f32 %v5945_v16, %v3572_v34  ;;  %v5262_v34 = vld [vmem:[#allocation6 + $0x78] sm:$0xff] }
 0x40e   :  { %v4139_v47 = vpop.f32.mrf.mxu1  ;;  %v3641_v5 = vadd.f32 %v5937_v12, %v3570_v8  ;;  %v5342_v8 = vunpack.c.h.bf16 %v5262_v34 }
 0x40f   :  { %v4208_v43 = vpop.f32.mrf.mxu0  ;;  %v4140_v53 = vadd.f32 %v4139_v47, %v3005_v46  ;;  %v3714_v7 = vadd.f32 %v5952_v20, %v3643_v38 }
 0x410   :  { %v4279_v50 = vpop.f32.mrf.mxu1  ;;  %v4209_v54 = vadd.f32 %v4208_v43, %v4138_v49  ;;  %v3712_v13 = vadd.f32 %v5943_v15, %v3641_v5  ;;  %v5260_v5 = vld [vmem:[#allocation6 + $0x68] sm:$0xff]  ;;  %5457 = vmatprep.subr.mxu0 %v5342_v8 }
 0x411   :  { %v4210_v51 = vpop.f32.mrf.mxu0  ;;  %v3785_v47 = vadd.f32 %v5957_v23, %v3714_v7  ;;  %v5284_v8 = vld [vmem:[#allocation6 + $0x128] sm:$0xff] }
 0x412   :  { %v4211_v58 = vadd.f32 %v4210_v51, %v4140_v53  ;;  %v4281_v59 = vpop.f32.mrf.mxu1  ;;  %v4280_v62 = vadd.f32 %v4279_v50, %v4209_v54  ;;  %v3783_v16 = vadd.f32 %v5947_v17, %v3712_v13  ;;  %v5338_v13 = vunpack.c.h.bf16 %v5260_v5 }
 0x413   :  { %v4350_v55 = vpop.f32.mrf.mxu0  ;;  %v3856_v12 = vadd.f32 %v5963_v27, %v3785_v47 }
 0x414   :  { %v4421_v0 = vpop.f32.mrf.mxu1  ;;  %v4282_v2 = vadd.f32 %v4281_v59, %v4211_v58  ;;  %v4351_v18 = vadd.f32 %v4350_v55, %v4280_v62  ;;  %v3854_v20 = vadd.f32 %v5955_v22, %v3783_v16  ;;  %v5258_v16 = vld [vmem:[#allocation6 + $0x58] sm:$0xff] }
 0x415   :  { %v4352_v11 = vpop.f32.mrf.mxu0  ;;  %v3927_v55 = vadd.f32 %v5967_v30, %v3856_v12 }
 0x416   :  { %v4353_v26 = vadd.f32 %v4352_v11, %v4282_v2  ;;  %v4423_v4 = vpop.f32.mrf.mxu1  ;;  %v4422_v32 = vadd.f32 %v4421_v0, %v4351_v18  ;;  %v3925_v23 = vadd.f32 %v5960_v25, %v3854_v20  ;;  %v5334_v20 = vunpack.c.h.bf16 %v5258_v16 }
 0x417   :  { %v4492_v21 = vpop.f32.mrf.mxu0  ;;  %v3998_v17 = vadd.f32 %v5974_v36, %v3927_v55 }
 0x418   :  { %v4563_v1 = vpop.f32.mrf.mxu1  ;;  %v4424_v3 = vadd.f32 %v4423_v4, %v4353_v26  ;;  %v4493_v35 = vadd.f32 %v4492_v21, %v4422_v32  ;;  %v3996_v27 = vadd.f32 %v5965_v29, %v3925_v23  ;;  %v5256_v23 = vld [vmem:[#allocation6 + $0x48] sm:$0xff] }
 0x419   :  { %v4494_v6 = vpop.f32.mrf.mxu0  ;;  %v5996_v0 = vadd.f32 %v5977_v40, %v3998_v17 }
 0x41a   :  { %v4495_v39 = vadd.f32 %v4494_v6, %v4424_v3  ;;  %v4565_v41 = vpop.f32.mrf.mxu1  ;;  %v4564_v10 = vadd.f32 %v4563_v1, %v4493_v35  ;;  %v5999_v30 = vadd.f32 %v5971_v33, %v3996_v27  ;;  %v5294_v3 = vld [vmem:[#allocation6 + $0x178] sm:$0xff]  ;;  %v5261_v35 = vld [vmem:[#allocation6 + $0x70] sm:$0xff]  ;;  %v5287_v27 = vld [vmem:[#allocation6 + $0x140] sm:$0xff] }
 0x41b   :  { %v4634_v37 = vpop.f32.mrf.mxu0  ;;  %v5137_v18 = vmax.f32 %v5996_v0, 0.0  ;;  %v5405_v38 = vunpack.c.l.bf16 %v5294_v3 }
 0x41c   :  { %v4705_v42 = vpop.f32.mrf.mxu1  ;;  %v4566_v44 = vadd.f32 %v4565_v41, %v4495_v39  ;;  %v4635_v45 = vadd.f32 %v4634_v37, %v4564_v10  ;;  %v5136_v24 = vmax.f32 %v5999_v30, 0.0  ;;  %v5341_v37 = vunpack.c.l.bf16 %v5262_v34  ;;  %v5293_v41 = vld [vmem:[#allocation6 + $0x170] sm:$0xff]  ;;  %v5292_v10 = vld [vmem:[#allocation6 + $0x168] sm:$0xff] }
 0x41d   :  { %v4636_v43 = vpop.f32.mrf.mxu0  ;;  %v5406_v39 = vunpack.c.h.bf16 %v5294_v3  ;;  %v5403_v7 = vunpack.c.l.bf16 %v5293_v41  ;;  %v5402_v47 = vunpack.c.h.bf16 %v5292_v10 }
 0x41e   :  { %v4637_v48 = vadd.f32 %v4636_v43, %v4566_v44  ;;  %v4707_v9 = vpop.f32.mrf.mxu1  ;;  %v4706_v49 = vadd.f32 %v4705_v42, %v4635_v45  ;;  %v5140_v33 = vadd.f32 %v5137_v18, %v5136_v24  ;;  %v5339_v42 = vunpack.c.l.bf16 %v5261_v35  ;;  %v5259_v45 = vld [vmem:[#allocation6 + $0x60] sm:$0xff]  ;;  %5458 = vmatpush1.msra.mxu0 %v5341_v37  ;;  %v5252_v37 = vld [vmem:[#allocation6 + $0x28] sm:$0xff] }
 0x41f   :  { %v5340_v43 = vunpack.c.h.bf16 %v5261_v35  ;;  %v5404_v44 = vunpack.c.h.bf16 %v5293_v41  ;;  %5528 = vmatprep.subr.mxu1 %v5406_v39  ;;  %v5335_v12 = vunpack.c.l.bf16 %v5259_v45 }
 0x420   :  { %v4708_v52 = vadd.f32 %v4707_v9, %v4637_v48  ;;  %5529 = vmatpush1.msra.mxu1 %v5405_v38  ;;  %v5337_v48 = vunpack.c.l.bf16 %v5260_v5  ;;  %v5401_v9 = vunpack.c.l.bf16 %v5292_v10  ;;  %v5251_v10 = vld [vmem:[#allocation6 + $0x20] sm:$0xff] }
 0x421   :  { %5459 = vmatprep.subr.mxu0 %v5340_v43  ;;  %5530 = vmatprep.subr.mxu1 %v5404_v44  ;;  %v5322_v43 = vunpack.c.h.bf16 %v5252_v37  ;;  %v5321_v44 = vunpack.c.l.bf16 %v5252_v37 }
 0x422   :  { %5460 = vmatpush1.msra.mxu0 %v5339_v42  ;;  %5531 = vmatpush1.msra.mxu1 %v5403_v7  ;;  %v5283_v42 = vld [vmem:[#allocation6 + $0x120] sm:$0xff]  ;;  %v5386_v7 = vunpack.c.h.bf16 %v5284_v8 }
 0x423   :  { %5461 = vmatprep.subr.mxu0 %v5338_v13  ;;  %5532 = vmatprep.subr.mxu1 %v5402_v47  ;;  %v5282_v13 = vld [vmem:[#allocation6 + $0x118] sm:$0xff]  ;;  %v5320_v47 = vunpack.c.h.bf16 %v5251_v10 }
 0x424   :  { %5462 = vmatpush1.msra.mxu0 %v5337_v48  ;;  %5533 = vmatpush1.msra.mxu1 %v5401_v9  ;;  %v5384_v48 = vunpack.c.h.bf16 %v5283_v42  ;;  %v5319_v9 = vunpack.c.l.bf16 %v5251_v10 }
 0x441   :  { %v4776_v46 = vpop.f32.mrf.mxu0 }
 0x442   :  { %v4777_v53 = vadd.f32 %v4776_v46, %v4706_v49  ;;  %v5291_v46 = vld [vmem:[#allocation6 + $0x160] sm:$0xff]  ;;  %v5290_v49 = vld [vmem:[#allocation6 + $0x158] sm:$0xff] }
 0x443   :  { %v4847_v50 = vpop.f32.mrf.mxu1  ;;  %v4778_v51 = vpop.f32.mrf.mxu0  ;;  %v5398_v55 = vunpack.c.h.bf16 %v5290_v49 }
 0x444   :  { %v4779_v56 = vadd.f32 %v4778_v51, %v4708_v52  ;;  %v4848_v57 = vadd.f32 %v4847_v50, %v4777_v53  ;;  %v5336_v50 = vunpack.c.h.bf16 %v5259_v45  ;;  %v5400_v51 = vunpack.c.h.bf16 %v5291_v46  ;;  %v5257_v53 = vld [vmem:[#allocation6 + $0x50] sm:$0xff] }
 0x445   :  { %v4849_v15 = vpop.f32.mrf.mxu1  ;;  %v5399_v52 = vunpack.c.l.bf16 %v5291_v46  ;;  %v5331_v17 = vunpack.c.l.bf16 %v5257_v53  ;;  %v5385_v45 = vunpack.c.l.bf16 %v5284_v8  ;;  %v5250_v46 = vld [vmem:[#allocation6 + $0x18] sm:$0xff]  ;;  %v5275_v8 = vld [vmem:[#allocation6 + $0xe0] sm:$0xff] }
 0x446   :  { %v4850_v60 = vadd.f32 %v4849_v15, %v4779_v56  ;;  %v5333_v56 = vunpack.c.l.bf16 %v5258_v16  ;;  %v5397_v15 = vunpack.c.l.bf16 %v5290_v49  ;;  %5463 = vmatprep.subr.mxu0 %v5336_v50  ;;  %5534 = vmatprep.subr.mxu1 %v5400_v51  ;;  %v5383_v16 = vunpack.c.l.bf16 %v5283_v42  ;;  %v5249_v49 = vld [vmem:[#allocation6 + $0x10] sm:$0xff] }
 0x447   :  { %5464 = vmatpush1.msra.mxu0 %v5335_v12  ;;  %5535 = vmatpush1.msra.mxu1 %v5399_v52  ;;  %v5281_v50 = vld [vmem:[#allocation6 + $0x110] sm:$0xff]  ;;  %v5318_v51 = vunpack.c.h.bf16 %v5250_v46  ;;  %v5382_v12 = vunpack.c.h.bf16 %v5282_v13  ;;  %v5317_v52 = vunpack.c.l.bf16 %v5250_v46  ;;  %v5368_v42 = vunpack.c.h.bf16 %v5275_v8 }
 0x448   :  { %5465 = vmatprep.subr.mxu0 %v5334_v20  ;;  %5536 = vmatprep.subr.mxu1 %v5398_v55  ;;  %v5280_v20 = vld [vmem:[#allocation6 + $0x108] sm:$0xff]  ;;  %v5316_v55 = vunpack.c.h.bf16 %v5249_v49 }
 0x449   :  { %5466 = vmatpush1.msra.mxu0 %v5333_v56  ;;  %5537 = vmatpush1.msra.mxu1 %v5397_v15  ;;  %v5380_v56 = vunpack.c.h.bf16 %v5281_v50  ;;  %v5315_v15 = vunpack.c.l.bf16 %v5249_v49  ;;  %v5274_v49 = vld [vmem:[#allocation6 + $0xd8] sm:$0xff] }
 0x483   :  { %v4918_v54 = vpop.f32.mrf.mxu0 }
 0x484   :  { %v4919_v62 = vadd.f32 %v4918_v54, %v4848_v57  ;;  %v5289_v54 = vld [vmem:[#allocation6 + $0x150] sm:$0xff]  ;;  %v5288_v57 = vld [vmem:[#allocation6 + $0x148] sm:$0xff] }
 0x485   :  { %v4989_v58 = vpop.f32.mrf.mxu1  ;;  %v4920_v59 = vpop.f32.mrf.mxu0 }
 0x486   :  { %v4921_v11 = vadd.f32 %v4920_v59, %v4850_v60  ;;  %v4990_v61 = vadd.f32 %v4989_v58, %v4919_v62  ;;  %v5332_v58 = vunpack.c.h.bf16 %v5257_v53  ;;  %v5396_v59 = vunpack.c.h.bf16 %v5289_v54  ;;  %v5255_v62 = vld [vmem:[#allocation6 + $0x40] sm:$0xff] }
 0x487   :  { %v4991_v22 = vpop.f32.mrf.mxu1  ;;  %v5395_v60 = vunpack.c.l.bf16 %v5289_v54  ;;  %v5381_v53 = vunpack.c.l.bf16 %v5282_v13  ;;  %v5248_v54 = vld [vmem:[#allocation6 + $0x8] sm:$0xff] }
 0x488   :  { %v4992_v21 = vadd.f32 %v4991_v22, %v4921_v11  ;;  %v5330_v11 = vunpack.c.h.bf16 %v5256_v23  ;;  %v5394_v22 = vunpack.c.h.bf16 %v5288_v57  ;;  %5467 = vmatprep.subr.mxu0 %v5332_v58  ;;  %5538 = vmatprep.subr.mxu1 %v5396_v59  ;;  %v5279_v58 = vld [vmem:[#allocation6 + $0x100] sm:$0xff]  ;;  %v5314_v59 = vunpack.c.h.bf16 %v5248_v54 }
 0x489   :  { %5468 = vmatpush1.msra.mxu0 %v5331_v17  ;;  %5539 = vmatpush1.msra.mxu1 %v5395_v60  ;;  %v5378_v17 = vunpack.c.h.bf16 %v5280_v20  ;;  %v5313_v60 = vunpack.c.l.bf16 %v5248_v54 }
 0x48a   :  { %5469 = vmatprep.subr.mxu0 %v5330_v11  ;;  %5540 = vmatprep.subr.mxu1 %v5394_v22  ;;  %v5310_v11 = vld [vmem:[#allocation6 + $0x1f8] sm:$0xff] }
 0x4c5   :  { %v5060_v2 = vpop.f32.mrf.mxu0 }
 0x4c6   :  { %v5131_v25 = vpop.f32.mrf.mxu1  ;;  %v5061_v63 = vadd.f32 %v5060_v2, %v4990_v61  ;;  %v5329_v61 = vunpack.c.l.bf16 %v5256_v23  ;;  %v5393_v2 = vunpack.c.l.bf16 %v5288_v57  ;;  %v5379_v23 = vunpack.c.l.bf16 %v5281_v50  ;;  %v5247_v57 = vld [vmem:[#allocation6] sm:$0xff] }
 0x4c7   :  { %v5062_v36 = vpop.f32.mrf.mxu0  ;;  %v5312_v22 = vunpack.c.h.bf16 %v5247_v57 }
 0x4c8   :  { %v6003_v26 = vadd.f32 %v5131_v25, %v5061_v63  ;;  %v5063_v29 = vadd.f32 %v5062_v36, %v4992_v21  ;;  %v5133_v40 = vpop.f32.mrf.mxu1  ;;  %v5254_v25 = vld [vmem:[#allocation6 + $0x38] sm:$0xff]  ;;  %v5328_v63 = vunpack.c.h.bf16 %v5255_v62  ;;  %v5392_v36 = vunpack.c.h.bf16 %v5287_v27  ;;  %5470 = vmatpush1.msra.mxu0 %v5329_v61  ;;  %5541 = vmatpush1.msra.mxu1 %v5393_v2 }
 0x4c9   :  { %v5286_v21 = vld [vmem:[#allocation6 + $0x138] sm:$0xff]  ;;  %v5325_v3 = vunpack.c.l.bf16 %v5254_v25  ;;  %v5376_v61 = vunpack.c.h.bf16 %v5279_v58  ;;  %v5311_v2 = vunpack.c.l.bf16 %v5247_v57 }
 0x4ca   :  { %v5138_v4 = vmax.f32 %v6003_v26, 0.0  ;;  %v6010_v28 = vadd.f32 %v5133_v40, %v5063_v29  ;;  %v5327_v29 = vunpack.c.l.bf16 %v5255_v62  ;;  %v5391_v40 = vunpack.c.l.bf16 %v5287_v27  ;;  %5471 = vmatprep.subr.mxu0 %v5328_v63  ;;  %5542 = vmatprep.subr.mxu1 %v5392_v36  ;;  %v5278_v27 = vld [vmem:[#allocation6 + $0xf8] sm:$0xff]  ;;  %v5309_v63 = vld [vmem:[#allocation6 + $0x1f0] sm:$0xff] }
 0x4cb   :  { %v5390_v34 = vunpack.c.h.bf16 %v5286_v21  ;;  %v5389_v35 = vunpack.c.l.bf16 %v5286_v21  ;;  %v5377_v62 = vunpack.c.l.bf16 %v5280_v20  ;;  %v5277_v21 = vld [vmem:[#allocation6 + $0xf0] sm:$0xff]  ;;  %v5374_v36 = vunpack.c.h.bf16 %v5278_v27 }
 0x4cc   :  { %v5139_v32 = vmax.f32 %v6010_v28, 0.0  ;;  %v5141_v1 = vadd.f32 %v5140_v33, %v5138_v4  ;;  %v5253_v33 = vld [vmem:[#allocation6 + $0x30] sm:$0xff]  ;;  %5472 = vmatpush1.msra.mxu0 %v5327_v29  ;;  %5543 = vmatpush1.msra.mxu1 %v5391_v40  ;;  %v5438_v29 = vunpack.c.h.bf16 %v5310_v11  ;;  %v5373_v40 = vunpack.c.l.bf16 %v5278_v27  ;;  %v5306_v28 = vld [vmem:[#allocation6 + $0x1d8] sm:$0xff] }
 0x4cd   :  { %v5324_v38 = vunpack.c.h.bf16 %v5253_v33  ;;  %v5323_v41 = vunpack.c.l.bf16 %v5253_v33  ;;  %5544 = vmatprep.subr.mxu1 %v5390_v34  ;;  %v5437_v33 = vunpack.c.l.bf16 %v5310_v11  ;;  %v5372_v34 = vunpack.c.h.bf16 %v5277_v21  ;;  %v5270_v27 = vld [vmem:[#allocation6 + $0xb8] sm:$0xff] }
 0x4ce   :  { %v5142_v6 = vadd.f32 %v5141_v1, %v5139_v32  ;;  %v5285_v1 = vld [vmem:[#allocation6 + $0x130] sm:$0xff]  ;;  %5545 = vmatpush1.msra.mxu1 %v5389_v35  ;;  %v5371_v35 = vunpack.c.l.bf16 %v5277_v21  ;;  %v5435_v37 = vunpack.c.l.bf16 %v5309_v63  ;;  %v5430_v50 = vunpack.c.h.bf16 %v5306_v28 }
 0x4cf   :  { %v5388_v39 = vunpack.c.h.bf16 %v5285_v1  ;;  %v5387_v5 = vunpack.c.l.bf16 %v5285_v1  ;;  %v5276_v1 = vld [vmem:[#allocation6 + $0xe8] sm:$0xff]  ;;  %v5269_v21 = vld [vmem:[#allocation6 + $0xb0] sm:$0xff] }
 0x4d0   :  { %5143 = vadd.xlane.f32.xlu0 %v5142_v6  ;;  %v5326_v6 = vunpack.c.h.bf16 %v5254_v25  ;;  %v5375_v25 = vunpack.c.l.bf16 %v5279_v58 }
 0x4d1   :  { %5546 = vmatprep.subr.mxu1 %v5388_v39  ;;  %v5370_v39 = vunpack.c.h.bf16 %v5276_v1 }
 0x4d2   :  { %5473 = vmatprep.subr.mxu0 %v5326_v6  ;;  %5547 = vmatpush1.msra.mxu1 %v5387_v5  ;;  %v5308_v6 = vld [vmem:[#allocation6 + $0x1e8] sm:$0xff]  ;;  %v5369_v5 = vunpack.c.l.bf16 %v5276_v1 }
 0x4d3   :  { %5474 = vmatpush1.msra.mxu0 %v5325_v3  ;;  %5548 = vmatprep.subr.mxu1 %v5386_v7  ;;  %v5436_v3 = vunpack.c.h.bf16 %v5309_v63  ;;  %v5433_v10 = vunpack.c.l.bf16 %v5308_v6  ;;  %v5367_v7 = vunpack.c.l.bf16 %v5275_v8  ;;  %v5301_v63 = vld [vmem:[#allocation6 + $0x1b0] sm:$0xff]  ;;  %v5268_v1 = vld [vmem:[#allocation6 + $0xa8] sm:$0xff]  ;;  %v5267_v8 = vld [vmem:[#allocation6 + $0xa0] sm:$0xff] }
 0x4d4   :  { %5475 = vmatprep.subr.mxu0 %v5324_v38  ;;  %5549 = vmatpush1.msra.mxu1 %v5385_v45  ;;  %v5307_v38 = vld [vmem:[#allocation6 + $0x1e0] sm:$0xff] }
 0x4d5   :  { %5476 = vmatpush1.msra.mxu0 %v5323_v41  ;;  %5550 = vmatprep.subr.mxu1 %v5384_v48  ;;  %v5434_v41 = vunpack.c.h.bf16 %v5308_v6  ;;  %v5300_v6 = vld [vmem:[#allocation6 + $0x1a8] sm:$0xff] }
 0x4d6   :  { %5477 = vmatprep.subr.mxu0 %v5322_v43  ;;  %5551 = vmatpush1.msra.mxu1 %v5383_v16  ;;  %v5432_v43 = vunpack.c.h.bf16 %v5307_v38 }
 0x4d7   :  { %5478 = vmatpush1.msra.mxu0 %v5321_v44  ;;  %5552 = vmatprep.subr.mxu1 %v5382_v12  ;;  %v5431_v44 = vunpack.c.l.bf16 %v5307_v38  ;;  %v5429_v12 = vunpack.c.l.bf16 %v5306_v28  ;;  %v5299_v38 = vld [vmem:[#allocation6 + $0x1a0] sm:$0xff] }
 0x4d8   :  { %5479 = vmatprep.subr.mxu0 %v5320_v47  ;;  %5553 = vmatpush1.msra.mxu1 %v5381_v53  ;;  %v5305_v53 = vld [vmem:[#allocation6 + $0x1d0] sm:$0xff] }
 0x4d9   :  { %5480 = vmatpush1.msra.mxu0 %v5319_v9  ;;  %5554 = vmatprep.subr.mxu1 %v5380_v56  ;;  %v5428_v20 = vunpack.c.h.bf16 %v5305_v53  ;;  %v5427_v56 = vunpack.c.l.bf16 %v5305_v53 }
 0x4da   :  { %5481 = vmatprep.subr.mxu0 %v5318_v51  ;;  %5555 = vmatpush1.msra.mxu1 %v5379_v23  ;;  %v5365_v51 = vunpack.c.l.bf16 %v5274_v49  ;;  %v5304_v23 = vld [vmem:[#allocation6 + $0x1c8] sm:$0xff] }
 0x4db   :  { %5482 = vmatpush1.msra.mxu0 %v5317_v52  ;;  %5556 = vmatprep.subr.mxu1 %v5378_v17  ;;  %v5273_v52 = vld [vmem:[#allocation6 + $0xd0] sm:$0xff]  ;;  %v5426_v58 = vunpack.c.h.bf16 %v5304_v23  ;;  %v5425_v17 = vunpack.c.l.bf16 %v5304_v23 }
 0x4dc   :  { %5483 = vmatprep.subr.mxu0 %v5316_v55  ;;  %5557 = vmatpush1.msra.mxu1 %v5377_v62  ;;  %v5364_v54 = vunpack.c.h.bf16 %v5273_v52  ;;  %v5363_v55 = vunpack.c.l.bf16 %v5273_v52  ;;  %v5303_v62 = vld [vmem:[#allocation6 + $0x1c0] sm:$0xff] }
 0x4dd   :  { %5484 = vmatpush1.msra.mxu0 %v5315_v15  ;;  %5558 = vmatprep.subr.mxu1 %v5376_v61  ;;  %v5272_v15 = vld [vmem:[#allocation6 + $0xc8] sm:$0xff]  ;;  %v5423_v61 = vunpack.c.l.bf16 %v5303_v62  ;;  %v5295_v52 = vld [vmem:[#allocation6 + $0x180] sm:$0xff] }
 0x4de   :  { %5485 = vmatprep.subr.mxu0 %v5314_v59  ;;  %5559 = vmatpush1.msra.mxu1 %v5375_v25  ;;  %v5362_v57 = vunpack.c.h.bf16 %v5272_v15  ;;  %v5361_v59 = vunpack.c.l.bf16 %v5272_v15  ;;  %v5302_v25 = vld [vmem:[#allocation6 + $0x1b8] sm:$0xff]  ;;  %v5408_v15 = vunpack.c.h.bf16 %v5295_v52 }
 0x4df   :  { %5486 = vmatpush1.msra.mxu0 %v5313_v60  ;;  %5560 = vmatprep.subr.mxu1 %v5438_v29  ;;  %v5271_v60 = vld [vmem:[#allocation6 + $0xc0] sm:$0xff]  ;;  %v5358_v29 = vunpack.c.h.bf16 %v5270_v27 }
 0x4e0   :  { %5487 = vmatprep.subr.mxu0 %v5312_v22  ;;  %5561 = vmatpush2.msra.mxu1 %v5437_v33  ;;  %v5359_v11 = vunpack.c.l.bf16 %v5271_v60  ;;  %v5360_v22 = vunpack.c.h.bf16 %v5271_v60  ;;  %v5422_v33 = vunpack.c.h.bf16 %v5302_v25  ;;  %v5169_v60 = vsub.s32 1, %v5941_v14 }
 0x4e1   :  { %5488 = vmatpush1.msra.mxu0 %v5311_v2  ;;  %5562 = vmatprep.subr.mxu1 %v5436_v3  ;;  %v5424_v2 = vunpack.c.h.bf16 %v5303_v62  ;;  %v5420_v3 = vunpack.c.h.bf16 %v5301_v63  ;;  %v5173_v62 = vsub.s32 5, %v5941_v14 }
 0x4e2   :  { %5489 = vmatprep.subr.mxu0 %v5374_v36  ;;  %5563 = vmatpush2.msra.mxu1 %v5435_v37  ;;  %v5357_v36 = vunpack.c.l.bf16 %v5270_v27  ;;  %v5419_v37 = vunpack.c.l.bf16 %v5301_v63  ;;  %v5209_v27 = vsub.s32 2, %v5941_v14 }
 0x4e3   :  { %5490 = vmatpush2.msra.mxu0 %v5373_v40  ;;  %5564 = vmatprep.subr.mxu1 %v5434_v41  ;;  %v5421_v40 = vunpack.c.l.bf16 %v5302_v25  ;;  %v5418_v41 = vunpack.c.h.bf16 %v5300_v6  ;;  %v5178_v25 = vrot.slane %v5969_v31, %v5169_v60 }
 0x4e4   :  { %5491 = vmatprep.subr.mxu0 %v5372_v34  ;;  %5565 = vmatpush2.msra.mxu1 %v5433_v10  ;;  %v5356_v34 = vunpack.c.h.bf16 %v5269_v21  ;;  %v5417_v10 = vunpack.c.l.bf16 %v5300_v6 }
 0x4e5   :  { %5492 = vmatpush2.msra.mxu0 %v5371_v35  ;;  %5566 = vmatprep.subr.mxu1 %v5432_v43  ;;  %v5355_v35 = vunpack.c.l.bf16 %v5269_v21  ;;  %v5298_v43 = vld [vmem:[#allocation6 + $0x198] sm:$0xff]  ;;  %v5198_v6 = vrot.slane %v5178_v25, %v5169_v60 }
 0x4e6   :  { %5493 = vmatprep.subr.mxu0 %v5370_v39  ;;  %5567 = vmatpush2.msra.mxu1 %v5431_v44  ;;  %v5354_v39 = vunpack.c.h.bf16 %v5268_v1  ;;  %v5416_v44 = vunpack.c.h.bf16 %v5299_v38 }
 0x4e7   :  { %5494 = vmatpush2.msra.mxu0 %v5369_v5  ;;  %5568 = vmatprep.subr.mxu1 %v5430_v50  ;;  %v5353_v5 = vunpack.c.l.bf16 %v5268_v1 }
 0x4e8   :  { %5495 = vmatprep.subr.mxu0 %v5368_v42  ;;  %5569 = vmatpush2.msra.mxu1 %v5429_v12  ;;  %v5266_v42 = vld [vmem:[#allocation6 + $0x98] sm:$0xff]  ;;  %v5263_v12 = vld [vmem:[#allocation6 + $0x80] sm:$0xff] }
 0x4e9   :  { %5496 = vmatpush2.msra.mxu0 %v5367_v7  ;;  %5570 = vmatprep.subr.mxu1 %v5428_v20  ;;  %v5352_v7 = vunpack.c.h.bf16 %v5267_v8  ;;  %v5343_v23 = vunpack.c.l.bf16 %v5263_v12 }
 0x4ea   :  { %5571 = vmatpush2.msra.mxu1 %v5427_v56  ;;  %v5344_v56 = vunpack.c.h.bf16 %v5263_v12 }
 0x4eb   :  { %5572 = vmatprep.subr.mxu1 %v5426_v58 }
 0x4ec   :  { %5573 = vmatpush2.msra.mxu1 %v5425_v17 }
 0x4ed   :  { %5574 = vmatprep.subr.mxu1 %v5424_v2  ;;  %v5170_v2 = vrot.slane %v5950_v19, %v5169_v60 }
 0x4ee   :  { %5575 = vmatpush2.msra.mxu1 %v5423_v61  ;;  %v5182_v61 = vrot.slane %v5969_v31, %v5173_v62 }
 0x4ef   :  { %5576 = vmatprep.subr.mxu1 %v5422_v33  ;;  %v5190_v1 = vrot.slane %v5170_v2, %v5169_v60 }
 0x4f0   :  { %5577 = vmatpush2.msra.mxu1 %v5421_v40  ;;  %v5202_v33 = vrot.slane %v5182_v61, %v5169_v60 }
 0x4f1   :  { %5578 = vmatprep.subr.mxu1 %v5420_v3 }
 0x4f2   :  { %5579 = vmatpush2.msra.mxu1 %v5419_v37 }
 0x4f3   :  { %5580 = vmatprep.subr.mxu1 %v5418_v41 }
 0x4f4   :  { %5581 = vmatpush2.msra.mxu1 %v5417_v10 }
 0x4f5   :  { %5582 = vmatprep.subr.mxu1 %v5416_v44 }
 0x559   :  { %v5144_v45 = vpop.xlane.xlu0 %5143 }
 0x55a   :  { %v5146_v46 = vmul.f32 0.001953125, %v5144_v45  ;;  %v5351_v45 = vunpack.c.l.bf16 %v5267_v8 }
 0x55c   :  { %v6019_v13 = vsub.f32 %v5136_v24, %v5146_v46  ;;  %v6023_v47 = vsub.f32 %v5137_v18, %v5146_v46  ;;  %v6027_v48 = vsub.f32 %v5138_v4, %v5146_v46  ;;  %v6031_v9 = vsub.f32 %v5139_v32, %v5146_v46 }
 0x55d   :  { %v5366_v32 = vunpack.c.h.bf16 %v5274_v49  ;;  %v5415_v46 = vunpack.c.l.bf16 %v5299_v38  ;;  %v5296_v49 = vld [vmem:[#allocation6 + $0x188] sm:$0xff] }
 0x55e   :  { %v5151_v16 = vmul.f32 %v6019_v13, %v6019_v13  ;;  %v5152_v30 = vmul.f32 %v6023_v47, %v6023_v47  ;;  %v5153_v24 = vmul.f32 %v6027_v48, %v6027_v48  ;;  %v5154_v18 = vmul.f32 %v6031_v9, %v6031_v9 }
 0x55f   :  { %5497 = vmatprep.subr.mxu0 %v5366_v32  ;;  %5583 = vmatpush2.msra.mxu1 %v5415_v46 }
 0x560   :  { %v5155_v0 = vadd.f32 %v5152_v30, %v5151_v16  ;;  %5498 = vmatpush2.msra.mxu0 %v5365_v51  ;;  %v5265_v16 = vld [vmem:[#allocation6 + $0x90] sm:$0xff] }
 0x561   :  { %5499 = vmatprep.subr.mxu0 %v5364_v54  ;;  %v5297_v30 = vld [vmem:[#allocation6 + $0x190] sm:$0xff]  ;;  %v5348_v28 = vunpack.c.h.bf16 %v5265_v16  ;;  %v5347_v50 = vunpack.c.l.bf16 %v5265_v16  ;;  %v5410_v54 = vunpack.c.h.bf16 %v5296_v49 }
 0x562   :  { %v5156_v26 = vadd.f32 %v5155_v0, %v5153_v24  ;;  %5500 = vmatpush2.msra.mxu0 %v5363_v55  ;;  %v5350_v24 = vunpack.c.h.bf16 %v5266_v42  ;;  %v5414_v0 = vunpack.c.h.bf16 %v5298_v43  ;;  %v5412_v32 = vunpack.c.h.bf16 %v5297_v30 }
 0x563   :  { %5501 = vmatprep.subr.mxu0 %v5362_v57  ;;  %v5411_v51 = vunpack.c.l.bf16 %v5297_v30  ;;  %v5409_v55 = vunpack.c.l.bf16 %v5296_v49  ;;  %v5407_v57 = vunpack.c.l.bf16 %v5295_v52 }
 0x564   :  { %v5157_v4 = vadd.f32 %v5156_v26, %v5154_v18  ;;  %5502 = vmatpush2.msra.mxu0 %v5361_v59  ;;  %v5349_v18 = vunpack.c.l.bf16 %v5266_v42  ;;  %v5413_v26 = vunpack.c.l.bf16 %v5298_v43  ;;  %5584 = vmatprep.subr.mxu1 %v5414_v0 }
 0x565   :  { %5503 = vmatprep.subr.mxu0 %v5360_v22  ;;  %v5174_v22 = vrot.slane %v5950_v19, %v5173_v62 }
 0x566   :  { %5158 = vadd.xlane.f32.xlu0 %v5157_v4  ;;  %5504 = vmatpush2.msra.mxu0 %v5359_v11  ;;  %v5264_v4 = vld [vmem:[#allocation6 + $0x88] sm:$0xff]  ;;  %v5213_v11 = vsub.s32 6, %v5941_v14 }
 0x567   :  { %5505 = vmatprep.subr.mxu0 %v5358_v29  ;;  %v5346_v53 = vunpack.c.h.bf16 %v5264_v4  ;;  %5585 = vmatpush2.msra.mxu1 %v5413_v26  ;;  %v5345_v20 = vunpack.c.l.bf16 %v5264_v4  ;;  %v5218_v29 = vrot.slane %v5969_v31, %v5209_v27  ;;  %v5194_v40 = vrot.slane %v5174_v22, %v5169_v60 }
 0x568   :  { %5506 = vmatpush2.msra.mxu0 %v5357_v36  ;;  %5586 = vmatprep.subr.mxu1 %v5412_v32  ;;  %v5214_v21 = vrot.slane %v5950_v19, %v5213_v11  ;;  %v5222_v63 = vrot.slane %v5969_v31, %v5213_v11  ;;  %v5210_v36 = vrot.slane %v5950_v19, %v5209_v27 }
 0x569   :  { %5507 = vmatprep.subr.mxu0 %v5356_v34  ;;  %5587 = vmatpush2.msra.mxu1 %v5411_v51  ;;  %v5238_v8 = vrot.slane %v5218_v29, %v5209_v27 }
 0x56a   :  { %5508 = vmatpush2.msra.mxu0 %v5355_v35  ;;  %5588 = vmatprep.subr.mxu1 %v5410_v54  ;;  %v5234_v3 = vrot.slane %v5214_v21, %v5209_v27  ;;  %v5242_v35 = vrot.slane %v5222_v63, %v5209_v27  ;;  %v5230_v37 = vrot.slane %v5210_v36, %v5209_v27 }
 0x56b   :  { %5509 = vmatprep.subr.mxu0 %v5354_v39  ;;  %5589 = vmatpush2.msra.mxu1 %v5409_v55 }
 0x56c   :  { %5510 = vmatpush2.msra.mxu0 %v5353_v5  ;;  %5590 = vmatprep.subr.mxu1 %v5408_v15 }
 0x56d   :  { %5511 = vmatprep.subr.mxu0 %v5352_v7  ;;  %5591 = vmatpush2.msra.mxu1 %v5407_v57 }
 0x56e   :  { %5512 = vmatpush2.msra.mxu0 %v5351_v45 }
 0x56f   :  { %5513 = vmatprep.subr.mxu0 %v5350_v24 }
 0x570   :  { %5514 = vmatpush2.msra.mxu0 %v5349_v18 }
 0x571   :  { %5515 = vmatprep.subr.mxu0 %v5348_v28 }
 0x572   :  { %5516 = vmatpush2.msra.mxu0 %v5347_v50 }
 0x573   :  { %5517 = vmatprep.subr.mxu0 %v5346_v53 }
 0x574   :  { %5518 = vmatpush2.msra.mxu0 %v5345_v20 }
 0x575   :  { %5519 = vmatprep.subr.mxu0 %v5344_v56 }
 0x576   :  { %5520 = vmatpush2.msra.mxu0 %v5343_v23 }
 0x5ef   :  { %v5159_v58 = vpop.xlane.xlu0 %5158 }
 0x5f0   :  { %v5160_v59 = vmul.f32 0.001953125, %v5159_v58 }
 0x5f2   :  { %v5161_v17 = vadd.f32 1e-05, %v5160_v59 }
 0x5f4   :  { %5614 = vrsqrt.f32 %v5161_v17 }
 0x601   :  { %v5615_v34 = vpop.eup %5614 }
 0x602   :  { %v5164_v38 = vmul.f32 %v5615_v34, %v6023_v47  ;;  %v5166_v39 = vmul.f32 %v5615_v34, %v6031_v9  ;;  %v5163_v41 = vmul.f32 %v5615_v34, %v6019_v13  ;;  %v5165_v5 = vmul.f32 %v5615_v34, %v6027_v48 }
 0x603   :  { %v5441_v47 = vsub.s32 3, %v5941_v14  ;;  %v5445_v9 = vsub.s32 7, %v5941_v14 }
 0x604   :  { %v5204_v10 = vmul.f32 %v5194_v40, %v5164_v38  ;;  %v5206_v42 = vmul.f32 %v5202_v33, %v5166_v39  ;;  %v5203_v31 = vmul.f32 %v5190_v1, %v5163_v41  ;;  %v5205_v43 = vmul.f32 %v5198_v6, %v5165_v5 }
 0x605   :  { %v5442_v13 = vrot.slane %v5950_v19, %v5441_v47  ;;  %v5446_v48 = vrot.slane %v5950_v19, %v5445_v9 }
 0x606   :  { %v5244_v7 = vadd.f32 %v5234_v3, %v5204_v10  ;;  %v5246_v44 = vadd.f32 %v5242_v35, %v5206_v42  ;;  %v5243_v45 = vadd.f32 %v5230_v37, %v5203_v31  ;;  %v5245_v46 = vadd.f32 %v5238_v8, %v5205_v43 }
 0x607   :  { %v5452_v16 = vrot.slane %v5442_v13, %v5441_v47  ;;  %v5456_v30 = vrot.slane %v5446_v48, %v5441_v47 }
 0x608   :  { %5521 = vmatprep.mubr.f32.mxu0 %v5244_v7  ;;  %5592 = vmatprep.mubr.f32.mxu1 %v5246_v44 }
 0x609   :  { %5522 = vmatmul.mubr.f32.vlgmr.msra.gmra.mxu0 %v5243_v45  ;;  %5593 = vmatmul.mubr.f32.vlgmr.msra.gmra.mxu1 %v5245_v46 }
 0x6c9   :  { %v5523_v24 = vpop.f32.mrf.mxu0  ;;  %v5594_v0 = vpop.f32.mrf.mxu1 }
 0x6ca   :  { %v5524_v18 = vadd.f32 %v5523_v24, %v5452_v16 }
 0x6cb   :  { %v5525_v26 = vpop.f32.mrf.mxu0  ;;  %v5596_v28 = vpop.f32.mrf.mxu1 }
 0x6cc   :  { %v5595_v4 = vadd.f32 %v5594_v0, %v5524_v18  ;;  %v5526_v49 = vadd.f32 %v5525_v26, %v5456_v30 }
 0x6ce   :  { %5599 = vst [vmem:[%s6071_s4] sm:$0xff] %v5595_v4  ;;  %v5597_v32 = vadd.f32 %v5596_v28, %v5526_v49 }
 0x6d0   :  { %5600 = vst [vmem:[%s6071_s4 + $0x8] sm:$0xff] %v5597_v32 }
 0x6d1   :  { %5605 = vsyncpa [#allocation3], 1 }
 0x6d2   :  { %5606 = vsyncpa [#allocation5], 1 }

</bundles_post_ra>
